<compile_context>
chip_gen: v6e
topology: v6e:2x2x1
jax: 0.10.0
libtpu: 0.0.40
codegen_flags: <defaults>
</compile_context>

<pallas_src>
import functools
import math

import jax
import jax.numpy as jnp
from jax.experimental import pallas as pl
from jax.experimental.pallas import tpu as pltpu

BN_EPS = 1e-5


# ----------------------------- Pallas kernels -----------------------------

def _conv_bn_kernel(tap_ref, w_ref, gamma_ref, beta_ref, o_ref, acc_ref, *, relu):
    """Accumulate one (M, Cin) @ (Cin, tn) tap matmul into a VMEM f32 accumulator.
    At the last tap: BatchNorm over the M rows (batch statistics, affine folded to a
    single FMA) and optional ReLU, then write the output tile."""
    t = pl.program_id(1)

    @pl.when(t == 0)
    def _init():
        acc_ref[...] = jnp.zeros_like(acc_ref)

    acc_ref[...] += jnp.dot(tap_ref[0], w_ref[0],
                            preferred_element_type=jnp.float32)

    @pl.when(t == pl.num_programs(1) - 1)
    def _epilogue():
        y = acc_ref[...]
        mean = jnp.mean(y, axis=0, keepdims=True)
        var = jnp.mean((y - mean) ** 2, axis=0, keepdims=True)
        scale = gamma_ref[...] * jax.lax.rsqrt(var + BN_EPS)
        shift = beta_ref[...] - mean * scale
        y = y * scale + shift
        if relu:
            y = jnp.maximum(y, 0.0)
        o_ref[...] = y


def _eca_finalize_kernel(x_ref, res_ref, w_ref, o_ref):
    """One batch element per grid step.
    att = sigmoid(conv1d_k3(avgpool_HW(x)))  (ECA channel attention)
    out = relu(x * att + residual)
    The channel conv1d (kernel 3, zero pad) is expressed as a banded (C,C) matmul."""
    x = x_ref[0]                                       # (HW, C) f32
    res = res_ref[0]                                   # (HW, C) f32
    C = x.shape[1]
    avg = jnp.mean(x, axis=0, keepdims=True)           # (1, C)  adaptive avg pool
    r = jax.lax.broadcasted_iota(jnp.int32, (C, C), 0)
    c = jax.lax.broadcasted_iota(jnp.int32, (C, C), 1)
    # y[c] = w0*avg[c-1] + w1*avg[c] + w2*avg[c+1]   (zero padded at the ends)
    band = (jnp.where(r == c - 1, w_ref[0], 0.0)
            + jnp.where(r == c,     w_ref[1], 0.0)
            + jnp.where(r == c + 1, w_ref[2], 0.0))    # (C, C) f32
    y = jnp.dot(avg, band, preferred_element_type=jnp.float32)   # (1, C)
    att = 1.0 / (1.0 + jnp.exp(-y))                    # sigmoid
    o_ref[0] = jnp.maximum(x * att + res, 0.0)


# ----------------------------- Pallas wrappers -----------------------------

def _conv_bn_matmul(taps, w, gamma, beta, *, relu):
    """taps: (T, M, Cin) bf16, w: (T, Cin, Cout) bf16, gamma/beta: (1, Cout) f32.
    Grid = (Cout tiles [parallel], T taps [arbitrary, reduction])."""
    T, M, Cin = taps.shape
    Cout = w.shape[2]
    tn = 128 if (Cout > 128 and Cout % 128 == 0) else Cout   # keep lanes >= 128 when tiling
    n_tiles = Cout // tn
    return pl.pallas_call(
        functools.partial(_conv_bn_kernel, relu=relu),
        grid=(n_tiles, T),
        in_specs=[
            pl.BlockSpec((1, M, Cin), lambda n, t: (t, 0, 0)),
            pl.BlockSpec((1, Cin, tn), lambda n, t: (t, 0, n)),
            pl.BlockSpec((1, tn), lambda n, t: (0, n)),
            pl.BlockSpec((1, tn), lambda n, t: (0, n)),
        ],
        out_specs=pl.BlockSpec((M, tn), lambda n, t: (0, n)),
        out_shape=jax.ShapeDtypeStruct((M, Cout), jnp.float32),
        scratch_shapes=[pltpu.VMEM((M, tn), jnp.float32)],
        compiler_params=pltpu.CompilerParams(
            dimension_semantics=("parallel", "arbitrary")),
    )(taps, w, gamma, beta)


def conv3x3_bn(x, w9, gamma, beta, *, stride, relu):
    """x: (B,H,W,Cin) f32 NHWC.  w9: (9, Cin, Cout) bf16 in (dh, dw) tap order.
    3x3 conv (padding=1, no bias) -> BatchNorm (batch stats) -> optional ReLU."""
    B, H, W, Cin = x.shape
    Cout = w9.shape[2]
    Ho = (H + 2 - 3) // stride + 1
    Wo = (W + 2 - 3) // stride + 1
    xp = jnp.pad(x, ((0, 0), (1, 1), (1, 1), (0, 0)))
    taps = []
    for dh in range(3):
        for dw in range(3):
            taps.append(
                xp[:, dh:dh + stride * (Ho - 1) + 1:stride,
                      dw:dw + stride * (Wo - 1) + 1:stride, :]
                .reshape(B * Ho * Wo, Cin))
    taps = jnp.stack(taps, axis=0).astype(jnp.bfloat16)       # (9, M, Cin)
    out = _conv_bn_matmul(taps, w9, gamma, beta, relu=relu)
    return out.reshape(B, Ho, Wo, Cout)


def conv1x1_bn(x, w1, gamma, beta):
    """Projection-shortcut 1x1 conv (no bias) + BN; spatial stride is applied by the
    caller via subsampling.  Reuses the tap-accumulation kernel with a single tap."""
    B, H, W, Cin = x.shape
    Cout = w1.shape[2]
    taps = x.reshape(1, B * H * W, Cin).astype(jnp.bfloat16)  # (1, M, Cin)
    out = _conv_bn_matmul(taps, w1, gamma, beta, relu=False)
    return out.reshape(B, H, W, Cout)


def eca_finalize(h2, residual, eca_w):
    """Fused ECA channel attention + residual add + final ReLU, gridded over batch."""
    B, H, W, C = h2.shape
    HW = H * W
    out = pl.pallas_call(
        _eca_finalize_kernel,
        grid=(B,),
        in_specs=[
            pl.BlockSpec((1, HW, C), lambda b: (b, 0, 0)),
            pl.BlockSpec((1, HW, C), lambda b: (b, 0, 0)),
            pl.BlockSpec(memory_space=pltpu.MemorySpace.SMEM),   # (3,) conv1d weights
        ],
        out_specs=pl.BlockSpec((1, HW, C), lambda b: (b, 0, 0)),
        out_shape=jax.ShapeDtypeStruct((B, HW, C), jnp.float32),
        compiler_params=pltpu.CompilerParams(
            dimension_semantics=("parallel",)),
    )(h2.reshape(B, HW, C), residual.reshape(B, HW, C), eca_w)
    return out.reshape(B, H, W, C)


# ----------------------------- block forward -----------------------------

def eca_basic_block(x, p):
    """NHWC forward of ECABasicBlock."""
    stride = p['stride']
    h1 = conv3x3_bn(x, p['w1'], p['g1'], p['b1'], stride=stride, relu=True)
    h2 = conv3x3_bn(h1, p['w2'], p['g2'], p['b2'], stride=1, relu=False)
    if 'wd' in p:                        # projection shortcut: conv1x1(stride) + BN
        xs = x[:, ::stride, ::stride, :]
        res = conv1x1_bn(xs, p['wd'], p['gd'], p['bd'])
    else:                                # identity shortcut
        res = x
    return eca_finalize(h2, res, p['eca_w'])


def eca_basic_block_nchw(x_nchw, p):
    x = jnp.transpose(x_nchw, (0, 2, 3, 1)).astype(jnp.float32)   # NCHW -> NHWC
    y = eca_basic_block(x, p)
    return jnp.transpose(y, (0, 3, 1, 2))                          # NHWC -> NCHW


# ----------------------------- parameters -----------------------------

def _conv3x3_weight(key, cin, cout):
    std = math.sqrt(2.0 / (cout * 9))                 # kaiming normal, fan_out
    w = jax.random.normal(key, (cout, cin, 3, 3), jnp.float32) * std
    return jnp.transpose(w, (2, 3, 1, 0)).reshape(9, cin, cout).astype(jnp.bfloat16)


def _conv1x1_weight(key, cin, cout):
    std = math.sqrt(2.0 / cout)
    w = jax.random.normal(key, (cout, cin), jnp.float32) * std
    return jnp.transpose(w).reshape(1, cin, cout).astype(jnp.bfloat16)


def init_block_params(key, inplanes, planes, stride=1, k_size=3):
    assert k_size == 3                                 # module default
    k1, k2, k3, k4 = jax.random.split(key, 4)
    ones = lambda c: jnp.ones((1, c), jnp.float32)
    zeros = lambda c: jnp.zeros((1, c), jnp.float32)
    p = {
        'stride': stride,
        'w1': _conv3x3_weight(k1, inplanes, planes), 'g1': ones(planes), 'b1': zeros(planes),
        'w2': _conv3x3_weight(k2, planes, planes),   'g2': ones(planes), 'b2': zeros(planes),
        # nn.Conv1d(1, 1, 3, bias=False) default init: U(-1/sqrt(3), 1/sqrt(3))
        'eca_w': jax.random.uniform(k3, (3,), jnp.float32,
                                    minval=-1.0 / math.sqrt(3.0),
                                    maxval=1.0 / math.sqrt(3.0)),
    }
    if stride != 1 or inplanes != planes:
        p['wd'] = _conv1x1_weight(k4, inplanes, planes)
        p['gd'] = ones(planes)
        p['bd'] = zeros(planes)
    return p


if __name__ == "__main__":
    root = jax.random.PRNGKey(0)
    kA, kB, kx = jax.random.split(root, 3)
    # block A: identity shortcut (inplanes == planes, stride 1)
    blkA = init_block_params(kA, inplanes=32, planes=32, stride=1)
    # block B: projection shortcut (channel increase + stride 2, like a ResNet stage boundary)
    blkB = init_block_params(kB, inplanes=32, planes=64, stride=2)

    x = jax.random.normal(kx, (2, 32, 16, 16), jnp.float32)   # NCHW, PyTorch layout

    @jax.jit
    def forward(inp):
        y = eca_basic_block_nchw(inp, blkA)
        return eca_basic_block_nchw(y, blkB)

    out = jax.block_until_ready(forward(x))
    assert out.shape == (2, 64, 8, 8), out.shape
    assert bool(jnp.all(jnp.isfinite(out)))
    print("KERNEL_OK")
</pallas_src>

<mosaic_0001>
module attributes {stable_mosaic.version = 11 : i64} {
  func.func @_conv_bn_kernel(%arg0: i32, %arg1: i32, %arg2: memref<1x512x32xbf16, #tpu.memory_space<vmem>>, %arg3: memref<1x32x32xbf16, #tpu.memory_space<vmem>>, %arg4: memref<1x32xf32, #tpu.memory_space<vmem>>, %arg5: memref<1x32xf32, #tpu.memory_space<vmem>>, %arg6: memref<512x32xf32, #tpu.memory_space<vmem>>, %arg7: memref<512x32xf32, #tpu.memory_space<vmem>>) attributes {dimension_semantics = [#tpu.dimension_semantics<parallel>, #tpu.dimension_semantics<arbitrary>], iteration_bounds = array<i64: 1, 9>, scalar_prefetch = 0 : i64, scratch_operands = 1 : i64, tpu.core_type = #tpu.core_type<tc>, window_params = [{transform_indices = @transform_0, window_bounds = array<i64: 1, 512, 32>}, {transform_indices = @transform_1, window_bounds = array<i64: 1, 32, 32>}, {transform_indices = @transform_2, window_bounds = array<i64: 1, 32>}, {transform_indices = @transform_3, window_bounds = array<i64: 1, 32>}, {transform_indices = @transform_4, window_bounds = array<i64: 512, 32>}]} {
    %c0_i32 = arith.constant 0 : i32
    %0 = arith.cmpi eq, %arg1, %c0_i32 : i32
    %1 = arith.extui %0 : i1 to i32
    %c0_i32_0 = arith.constant 0 : i32
    %2 = arith.cmpi ne, %1, %c0_i32_0 : i32
    scf.if %2 {
      %cst_11 = arith.constant 0.000000e+00 : f32
      %14 = vector.broadcast %cst_11 : f32 to vector<512x32xf32>
      %c0_12 = arith.constant 0 : index
      %c0_13 = arith.constant 0 : index
      %15 = vector.load %arg7[%c0_12, %c0_13] : memref<512x32xf32, #tpu.memory_space<vmem>>, vector<512x32xf32>
      tpu.vector_store %arg7[%c0_12, %c0_13], %14 {strides = array<i32>} : memref<512x32xf32, #tpu.memory_space<vmem>>, vector<512x32xf32>,
    } else {
    }
    %c0 = arith.constant 0 : index
    %c0_1 = arith.constant 0 : index
    %3 = vector.load %arg7[%c0, %c0_1] : memref<512x32xf32, #tpu.memory_space<vmem>>, vector<512x32xf32>
    %c0_2 = arith.constant 0 : index
    %c0_3 = arith.constant 0 : index
    %c0_4 = arith.constant 0 : index
    %4 = vector.load %arg2[%c0_2, %c0_3, %c0_4] : memref<1x512x32xbf16, #tpu.memory_space<vmem>>, vector<1x512x32xbf16>
    %5 = vector.shape_cast %4 : vector<1x512x32xbf16> to vector<512x32xbf16>
    %c0_5 = arith.constant 0 : index
    %c0_6 = arith.constant 0 : index
    %c0_7 = arith.constant 0 : index
    %6 = vector.load %arg3[%c0_5, %c0_6, %c0_7] : memref<1x32x32xbf16, #tpu.memory_space<vmem>>, vector<1x32x32xbf16>
    %7 = vector.shape_cast %6 : vector<1x32x32xbf16> to vector<32x32xbf16>
    %cst = arith.constant dense<0.000000e+00> : vector<512x32xf32>
    %8 = tpu.matmul %5, %7, %cst {dimension_numbers = #tpu.dot_dimension_numbers<[1], [0], [0], [1], [0, 0, 1, 1], [], []>} : vector<512x32xbf16>, vector<32x32xbf16>, vector<512x32xf32> -> vector<512x32xf32>
    %9 = arith.addf %3, %8 : vector<512x32xf32>
    %c0_8 = arith.constant 0 : index
    %c0_9 = arith.constant 0 : index
    %10 = vector.load %arg7[%c0_8, %c0_9] : memref<512x32xf32, #tpu.memory_space<vmem>>, vector<512x32xf32>
    tpu.vector_store %arg7[%c0_8, %c0_9], %9 {strides = array<i32>} : memref<512x32xf32, #tpu.memory_space<vmem>>, vector<512x32xf32>,
    %c8_i32 = arith.constant 8 : i32
    %11 = arith.cmpi eq, %arg1, %c8_i32 : i32
    %12 = arith.extui %11 : i1 to i32
    %c0_i32_10 = arith.constant 0 : i32
    %13 = arith.cmpi ne, %12, %c0_i32_10 : i32
    scf.if %13 {
      %c0_11 = arith.constant 0 : index
      %c0_12 = arith.constant 0 : index
      %14 = vector.load %arg7[%c0_11, %c0_12] : memref<512x32xf32, #tpu.memory_space<vmem>>, vector<512x32xf32>
      %cst_13 = arith.constant dense<0.000000e+00> : vector<32xf32>
      %15 = vector.multi_reduction <add>, %14, %cst_13 [0] : vector<512x32xf32> to vector<32xf32>
      %16 = vector.shape_cast %15 : vector<32xf32> to vector<1x32xf32>
      %cst_14 = arith.constant 5.120000e+02 : f32
      %17 = vector.broadcast %cst_14 : f32 to vector<1x32xf32>
      %18 = arith.divf %16, %17 : vector<1x32xf32>
      %19 = vector.broadcast %18 : vector<1x32xf32> to vector<512x32xf32>
      %20 = arith.subf %14, %19 : vector<512x32xf32>
      %21 = arith.mulf %20, %20 : vector<512x32xf32>
      %cst_15 = arith.constant dense<0.000000e+00> : vector<32xf32>
      %22 = vector.multi_reduction <add>, %21, %cst_15 [0] : vector<512x32xf32> to vector<32xf32>
      %23 = vector.shape_cast %22 : vector<32xf32> to vector<1x32xf32>
      %cst_16 = arith.constant 5.120000e+02 : f32
      %24 = vector.broadcast %cst_16 : f32 to vector<1x32xf32>
      %25 = arith.divf %23, %24 : vector<1x32xf32>
      %c0_17 = arith.constant 0 : index
      %c0_18 = arith.constant 0 : index
      %26 = vector.load %arg4[%c0_17, %c0_18] : memref<1x32xf32, #tpu.memory_space<vmem>>, vector<1x32xf32>
      %cst_19 = arith.constant 9.99999974E-6 : f32
      %27 = vector.broadcast %cst_19 : f32 to vector<1x32xf32>
      %28 = arith.addf %25, %27 : vector<1x32xf32>
      %29 = math.rsqrt %28 : vector<1x32xf32>
      %30 = arith.mulf %26, %29 : vector<1x32xf32>
      %c0_20 = arith.constant 0 : index
      %c0_21 = arith.constant 0 : index
      %31 = vector.load %arg5[%c0_20, %c0_21] : memref<1x32xf32, #tpu.memory_space<vmem>>, vector<1x32xf32>
      %32 = arith.mulf %18, %30 : vector<1x32xf32>
      %33 = arith.subf %31, %32 : vector<1x32xf32>
      %34 = vector.broadcast %30 : vector<1x32xf32> to vector<512x32xf32>
      %35 = arith.mulf %14, %34 : vector<512x32xf32>
      %36 = vector.broadcast %33 : vector<1x32xf32> to vector<512x32xf32>
      %37 = arith.addf %35, %36 : vector<512x32xf32>
      %cst_22 = arith.constant 0.000000e+00 : f32
      %38 = vector.broadcast %cst_22 : f32 to vector<512x32xf32>
      %39 = arith.maximumf %37, %38 : vector<512x32xf32>
      %c0_23 = arith.constant 0 : index
      %c0_24 = arith.constant 0 : index
      %40 = vector.load %arg6[%c0_23, %c0_24] : memref<512x32xf32, #tpu.memory_space<vmem>>, vector<512x32xf32>
      tpu.vector_store %arg6[%c0_23, %c0_24], %39 {strides = array<i32>} : memref<512x32xf32, #tpu.memory_space<vmem>>, vector<512x32xf32>,
    } else {
    }
    return
  }
  func.func @transform_0(%arg0: i32, %arg1: i32) -> (i32, i32, i32) {
    %c0_i32 = arith.constant 0 : i32
    %c0_i32_0 = arith.constant 0 : i32
    %c0_i32_1 = arith.constant 0 : i32
    return %arg1, %c0_i32, %c0_i32_0 : i32, i32, i32
  }
  func.func @transform_1(%arg0: i32, %arg1: i32) -> (i32, i32, i32) {
    %c0_i32 = arith.constant 0 : i32
    %c0_i32_0 = arith.constant 0 : i32
    return %arg1, %c0_i32, %arg0 : i32, i32, i32
  }
  func.func @transform_2(%arg0: i32, %arg1: i32) -> (i32, i32) {
    %c0_i32 = arith.constant 0 : i32
    %c0_i32_0 = arith.constant 0 : i32
    return %c0_i32, %arg0 : i32, i32
  }
  func.func @transform_3(%arg0: i32, %arg1: i32) -> (i32, i32) {
    %c0_i32 = arith.constant 0 : i32
    %c0_i32_0 = arith.constant 0 : i32
    return %c0_i32, %arg0 : i32, i32
  }
  func.func @transform_4(%arg0: i32, %arg1: i32) -> (i32, i32) {
    %c0_i32 = arith.constant 0 : i32
    %c0_i32_0 = arith.constant 0 : i32
    return %c0_i32, %arg0 : i32, i32
  }
}

module attributes {stable_mosaic.version = 11 : i64} {
  func.func @_eca_finalize_kernel(%arg0: i32, %arg1: memref<1x256x32xf32, #tpu.memory_space<vmem>>, %arg2: memref<1x256x32xf32, #tpu.memory_space<vmem>>, %arg3: memref<3xf32, #tpu.memory_space<smem>>, %arg4: memref<1x256x32xf32, #tpu.memory_space<vmem>>) attributes {dimension_semantics = [#tpu.dimension_semantics<parallel>], iteration_bounds = array<i64: 2>, scalar_prefetch = 0 : i64, scratch_operands = 0 : i64, tpu.core_type = #tpu.core_type<tc>, window_params = [{transform_indices = @transform_0, window_bounds = array<i64: 1, 256, 32>}, {transform_indices = @transform_1, window_bounds = array<i64: 1, 256, 32>}, {transform_indices = @transform_2, window_bounds = array<i64: 3>}, {transform_indices = @transform_3, window_bounds = array<i64: 1, 256, 32>}]} {
    %c0 = arith.constant 0 : index
    %c0_0 = arith.constant 0 : index
    %c0_1 = arith.constant 0 : index
    %0 = vector.load %arg1[%c0, %c0_0, %c0_1] : memref<1x256x32xf32, #tpu.memory_space<vmem>>, vector<1x256x32xf32>
    %1 = vector.shape_cast %0 : vector<1x256x32xf32> to vector<256x32xf32>
    %c0_2 = arith.constant 0 : index
    %c0_3 = arith.constant 0 : index
    %c0_4 = arith.constant 0 : index
    %2 = vector.load %arg2[%c0_2, %c0_3, %c0_4] : memref<1x256x32xf32, #tpu.memory_space<vmem>>, vector<1x256x32xf32>
    %3 = vector.shape_cast %2 : vector<1x256x32xf32> to vector<256x32xf32>
    %cst = arith.constant dense<0.000000e+00> : vector<32xf32>
    %4 = vector.multi_reduction <add>, %1, %cst [0] : vector<256x32xf32> to vector<32xf32>
    %5 = vector.shape_cast %4 : vector<32xf32> to vector<1x32xf32>
    %cst_5 = arith.constant 2.560000e+02 : f32
    %6 = vector.broadcast %cst_5 : f32 to vector<1x32xf32>
    %7 = arith.divf %5, %6 : vector<1x32xf32>
    %8 = tpu.iota {dimensions = array<i32: 0>} : vector<32x32xi32>
    %9 = tpu.iota {dimensions = array<i32: 1>} : vector<32x32xi32>
    %c1_i32 = arith.constant 1 : i32
    %10 = vector.broadcast %c1_i32 : i32 to vector<32x32xi32>
    %11 = arith.subi %9, %10 : vector<32x32xi32>
    %12 = arith.cmpi eq, %8, %11 : vector<32x32xi32>
    %c0_6 = arith.constant 0 : index
    %13 = memref.load %arg3[%c0_6] : memref<3xf32, #tpu.memory_space<smem>>
    %cst_7 = arith.constant 0.000000e+00 : f32
    %14 = vector.broadcast %13 : f32 to vector<32x32xf32>
    %15 = vector.broadcast %cst_7 : f32 to vector<32x32xf32>
    %16 = arith.select %12, %14, %15 : vector<32x32xi1>, vector<32x32xf32>
    %17 = arith.cmpi eq, %8, %9 : vector<32x32xi32>
    %c1 = arith.constant 1 : index
    %18 = memref.load %arg3[%c1] : memref<3xf32, #tpu.memory_space<smem>>
    %cst_8 = arith.constant 0.000000e+00 : f32
    %19 = vector.broadcast %18 : f32 to vector<32x32xf32>
    %20 = vector.broadcast %cst_8 : f32 to vector<32x32xf32>
    %21 = arith.select %17, %19, %20 : vector<32x32xi1>, vector<32x32xf32>
    %22 = arith.addf %16, %21 : vector<32x32xf32>
    %c1_i32_9 = arith.constant 1 : i32
    %23 = vector.broadcast %c1_i32_9 : i32 to vector<32x32xi32>
    %24 = arith.addi %9, %23 : vector<32x32xi32>
    %25 = arith.cmpi eq, %8, %24 : vector<32x32xi32>
    %c2 = arith.constant 2 : index
    %26 = memref.load %arg3[%c2] : memref<3xf32, #tpu.memory_space<smem>>
    %cst_10 = arith.constant 0.000000e+00 : f32
    %27 = vector.broadcast %26 : f32 to vector<32x32xf32>
    %28 = vector.broadcast %cst_10 : f32 to vector<32x32xf32>
    %29 = arith.select %25, %27, %28 : vector<32x32xi1>, vector<32x32xf32>
    %30 = arith.addf %22, %29 : vector<32x32xf32>
    %cst_11 = arith.constant dense<0.000000e+00> : vector<1x32xf32>
    %31 = tpu.matmul %7, %30, %cst_11 {dimension_numbers = #tpu.dot_dimension_numbers<[1], [0], [0], [1], [0, 0, 1, 1], [], []>} : vector<1x32xf32>, vector<32x32xf32>, vector<1x32xf32> -> vector<1x32xf32>
    %cst_12 = arith.constant 0.000000e+00 : f32
    %32 = vector.broadcast %cst_12 : f32 to vector<1x32xf32>
    %33 = arith.subf %32, %31 : vector<1x32xf32>
    %34 = math.exp %33 : vector<1x32xf32>
    %cst_13 = arith.constant 1.000000e+00 : f32
    %35 = vector.broadcast %cst_13 : f32 to vector<1x32xf32>
    %36 = arith.addf %35, %34 : vector<1x32xf32>
    %cst_14 = arith.constant 1.000000e+00 : f32
    %37 = vector.broadcast %cst_14 : f32 to vector<1x32xf32>
    %38 = arith.divf %37, %36 : vector<1x32xf32>
    %39 = vector.broadcast %38 : vector<1x32xf32> to vector<256x32xf32>
    %40 = arith.mulf %1, %39 : vector<256x32xf32>
    %41 = arith.addf %40, %3 : vector<256x32xf32>
    %cst_15 = arith.constant 0.000000e+00 : f32
    %42 = vector.broadcast %cst_15 : f32 to vector<256x32xf32>
    %43 = arith.maximumf %41, %42 : vector<256x32xf32>
    %c0_16 = arith.constant 0 : index
    %c0_17 = arith.constant 0 : index
    %c0_18 = arith.constant 0 : index
    %44 = vector.load %arg4[%c0_16, %c0_17, %c0_18] : memref<1x256x32xf32, #tpu.memory_space<vmem>>, vector<1x256x32xf32>
    %45 = vector.shape_cast %44 : vector<1x256x32xf32> to vector<256x32xf32>
    %46 = vector.shape_cast %43 : vector<256x32xf32> to vector<1x256x32xf32>
    tpu.vector_store %arg4[%c0_16, %c0_17, %c0_18], %46 {strides = array<i32>} : memref<1x256x32xf32, #tpu.memory_space<vmem>>, vector<1x256x32xf32>,
    return
  }
  func.func @transform_0(%arg0: i32) -> (i32, i32, i32) {
    %c0_i32 = arith.constant 0 : i32
    %c0_i32_0 = arith.constant 0 : i32
    %c0_i32_1 = arith.constant 0 : i32
    return %arg0, %c0_i32, %c0_i32_0 : i32, i32, i32
  }
  func.func @transform_1(%arg0: i32) -> (i32, i32, i32) {
    %c0_i32 = arith.constant 0 : i32
    %c0_i32_0 = arith.constant 0 : i32
    %c0_i32_1 = arith.constant 0 : i32
    return %arg0, %c0_i32, %c0_i32_0 : i32, i32, i32
  }
  func.func @transform_2(%arg0: i32) -> i32 {
    %c0_i32 = arith.constant 0 : i32
    %c0_i32_0 = arith.constant 0 : i32
    return %c0_i32 : i32
  }
  func.func @transform_3(%arg0: i32) -> (i32, i32, i32) {
    %c0_i32 = arith.constant 0 : i32
    %c0_i32_0 = arith.constant 0 : i32
    %c0_i32_1 = arith.constant 0 : i32
    return %arg0, %c0_i32, %c0_i32_0 : i32, i32, i32
  }
}

module attributes {stable_mosaic.version = 11 : i64} {
  func.func @_conv_bn_kernel(%arg0: i32, %arg1: i32, %arg2: memref<1x512x32xbf16, #tpu.memory_space<vmem>>, %arg3: memref<1x32x32xbf16, #tpu.memory_space<vmem>>, %arg4: memref<1x32xf32, #tpu.memory_space<vmem>>, %arg5: memref<1x32xf32, #tpu.memory_space<vmem>>, %arg6: memref<512x32xf32, #tpu.memory_space<vmem>>, %arg7: memref<512x32xf32, #tpu.memory_space<vmem>>) attributes {dimension_semantics = [#tpu.dimension_semantics<parallel>, #tpu.dimension_semantics<arbitrary>], iteration_bounds = array<i64: 1, 9>, scalar_prefetch = 0 : i64, scratch_operands = 1 : i64, tpu.core_type = #tpu.core_type<tc>, window_params = [{transform_indices = @transform_0, window_bounds = array<i64: 1, 512, 32>}, {transform_indices = @transform_1, window_bounds = array<i64: 1, 32, 32>}, {transform_indices = @transform_2, window_bounds = array<i64: 1, 32>}, {transform_indices = @transform_3, window_bounds = array<i64: 1, 32>}, {transform_indices = @transform_4, window_bounds = array<i64: 512, 32>}]} {
    %c0_i32 = arith.constant 0 : i32
    %0 = arith.cmpi eq, %arg1, %c0_i32 : i32
    %1 = arith.extui %0 : i1 to i32
    %c0_i32_0 = arith.constant 0 : i32
    %2 = arith.cmpi ne, %1, %c0_i32_0 : i32
    scf.if %2 {
      %cst_11 = arith.constant 0.000000e+00 : f32
      %14 = vector.broadcast %cst_11 : f32 to vector<512x32xf32>
      %c0_12 = arith.constant 0 : index
      %c0_13 = arith.constant 0 : index
      %15 = vector.load %arg7[%c0_12, %c0_13] : memref<512x32xf32, #tpu.memory_space<vmem>>, vector<512x32xf32>
      tpu.vector_store %arg7[%c0_12, %c0_13], %14 {strides = array<i32>} : memref<512x32xf32, #tpu.memory_space<vmem>>, vector<512x32xf32>,
    } else {
    }
    %c0 = arith.constant 0 : index
    %c0_1 = arith.constant 0 : index
    %3 = vector.load %arg7[%c0, %c0_1] : memref<512x32xf32, #tpu.memory_space<vmem>>, vector<512x32xf32>
    %c0_2 = arith.constant 0 : index
    %c0_3 = arith.constant 0 : index
    %c0_4 = arith.constant 0 : index
    %4 = vector.load %arg2[%c0_2, %c0_3, %c0_4] : memref<1x512x32xbf16, #tpu.memory_space<vmem>>, vector<1x512x32xbf16>
    %5 = vector.shape_cast %4 : vector<1x512x32xbf16> to vector<512x32xbf16>
    %c0_5 = arith.constant 0 : index
    %c0_6 = arith.constant 0 : index
    %c0_7 = arith.constant 0 : index
    %6 = vector.load %arg3[%c0_5, %c0_6, %c0_7] : memref<1x32x32xbf16, #tpu.memory_space<vmem>>, vector<1x32x32xbf16>
    %7 = vector.shape_cast %6 : vector<1x32x32xbf16> to vector<32x32xbf16>
    %cst = arith.constant dense<0.000000e+00> : vector<512x32xf32>
    %8 = tpu.matmul %5, %7, %cst {dimension_numbers = #tpu.dot_dimension_numbers<[1], [0], [0], [1], [0, 0, 1, 1], [], []>} : vector<512x32xbf16>, vector<32x32xbf16>, vector<512x32xf32> -> vector<512x32xf32>
    %9 = arith.addf %3, %8 : vector<512x32xf32>
    %c0_8 = arith.constant 0 : index
    %c0_9 = arith.constant 0 : index
    %10 = vector.load %arg7[%c0_8, %c0_9] : memref<512x32xf32, #tpu.memory_space<vmem>>, vector<512x32xf32>
    tpu.vector_store %arg7[%c0_8, %c0_9], %9 {strides = array<i32>} : memref<512x32xf32, #tpu.memory_space<vmem>>, vector<512x32xf32>,
    %c8_i32 = arith.constant 8 : i32
    %11 = arith.cmpi eq, %arg1, %c8_i32 : i32
    %12 = arith.extui %11 : i1 to i32
    %c0_i32_10 = arith.constant 0 : i32
    %13 = arith.cmpi ne, %12, %c0_i32_10 : i32
    scf.if %13 {
      %c0_11 = arith.constant 0 : index
      %c0_12 = arith.constant 0 : index
      %14 = vector.load %arg7[%c0_11, %c0_12] : memref<512x32xf32, #tpu.memory_space<vmem>>, vector<512x32xf32>
      %cst_13 = arith.constant dense<0.000000e+00> : vector<32xf32>
      %15 = vector.multi_reduction <add>, %14, %cst_13 [0] : vector<512x32xf32> to vector<32xf32>
      %16 = vector.shape_cast %15 : vector<32xf32> to vector<1x32xf32>
      %cst_14 = arith.constant 5.120000e+02 : f32
      %17 = vector.broadcast %cst_14 : f32 to vector<1x32xf32>
      %18 = arith.divf %16, %17 : vector<1x32xf32>
      %19 = vector.broadcast %18 : vector<1x32xf32> to vector<512x32xf32>
      %20 = arith.subf %14, %19 : vector<512x32xf32>
      %21 = arith.mulf %20, %20 : vector<512x32xf32>
      %cst_15 = arith.constant dense<0.000000e+00> : vector<32xf32>
      %22 = vector.multi_reduction <add>, %21, %cst_15 [0] : vector<512x32xf32> to vector<32xf32>
      %23 = vector.shape_cast %22 : vector<32xf32> to vector<1x32xf32>
      %cst_16 = arith.constant 5.120000e+02 : f32
      %24 = vector.broadcast %cst_16 : f32 to vector<1x32xf32>
      %25 = arith.divf %23, %24 : vector<1x32xf32>
      %c0_17 = arith.constant 0 : index
      %c0_18 = arith.constant 0 : index
      %26 = vector.load %arg4[%c0_17, %c0_18] : memref<1x32xf32, #tpu.memory_space<vmem>>, vector<1x32xf32>
      %cst_19 = arith.constant 9.99999974E-6 : f32
      %27 = vector.broadcast %cst_19 : f32 to vector<1x32xf32>
      %28 = arith.addf %25, %27 : vector<1x32xf32>
      %29 = math.rsqrt %28 : vector<1x32xf32>
      %30 = arith.mulf %26, %29 : vector<1x32xf32>
      %c0_20 = arith.constant 0 : index
      %c0_21 = arith.constant 0 : index
      %31 = vector.load %arg5[%c0_20, %c0_21] : memref<1x32xf32, #tpu.memory_space<vmem>>, vector<1x32xf32>
      %32 = arith.mulf %18, %30 : vector<1x32xf32>
      %33 = arith.subf %31, %32 : vector<1x32xf32>
      %34 = vector.broadcast %30 : vector<1x32xf32> to vector<512x32xf32>
      %35 = arith.mulf %14, %34 : vector<512x32xf32>
      %36 = vector.broadcast %33 : vector<1x32xf32> to vector<512x32xf32>
      %37 = arith.addf %35, %36 : vector<512x32xf32>
      %c0_22 = arith.constant 0 : index
      %c0_23 = arith.constant 0 : index
      %38 = vector.load %arg6[%c0_22, %c0_23] : memref<512x32xf32, #tpu.memory_space<vmem>>, vector<512x32xf32>
      tpu.vector_store %arg6[%c0_22, %c0_23], %37 {strides = array<i32>} : memref<512x32xf32, #tpu.memory_space<vmem>>, vector<512x32xf32>,
    } else {
    }
    return
  }
  func.func @transform_0(%arg0: i32, %arg1: i32) -> (i32, i32, i32) {
    %c0_i32 = arith.constant 0 : i32
    %c0_i32_0 = arith.constant 0 : i32
    %c0_i32_1 = arith.constant 0 : i32
    return %arg1, %c0_i32, %c0_i32_0 : i32, i32, i32
  }
  func.func @transform_1(%arg0: i32, %arg1: i32) -> (i32, i32, i32) {
    %c0_i32 = arith.constant 0 : i32
    %c0_i32_0 = arith.constant 0 : i32
    return %arg1, %c0_i32, %arg0 : i32, i32, i32
  }
  func.func @transform_2(%arg0: i32, %arg1: i32) -> (i32, i32) {
    %c0_i32 = arith.constant 0 : i32
    %c0_i32_0 = arith.constant 0 : i32
    return %c0_i32, %arg0 : i32, i32
  }
  func.func @transform_3(%arg0: i32, %arg1: i32) -> (i32, i32) {
    %c0_i32 = arith.constant 0 : i32
    %c0_i32_0 = arith.constant 0 : i32
    return %c0_i32, %arg0 : i32, i32
  }
  func.func @transform_4(%arg0: i32, %arg1: i32) -> (i32, i32) {
    %c0_i32 = arith.constant 0 : i32
    %c0_i32_0 = arith.constant 0 : i32
    return %c0_i32, %arg0 : i32, i32
  }
}

module attributes {stable_mosaic.version = 11 : i64} {
  func.func @_conv_bn_kernel(%arg0: i32, %arg1: i32, %arg2: memref<1x128x32xbf16, #tpu.memory_space<vmem>>, %arg3: memref<1x32x64xbf16, #tpu.memory_space<vmem>>, %arg4: memref<1x64xf32, #tpu.memory_space<vmem>>, %arg5: memref<1x64xf32, #tpu.memory_space<vmem>>, %arg6: memref<128x64xf32, #tpu.memory_space<vmem>>, %arg7: memref<128x64xf32, #tpu.memory_space<vmem>>) attributes {dimension_semantics = [#tpu.dimension_semantics<parallel>, #tpu.dimension_semantics<arbitrary>], iteration_bounds = array<i64: 1, 9>, scalar_prefetch = 0 : i64, scratch_operands = 1 : i64, tpu.core_type = #tpu.core_type<tc>, window_params = [{transform_indices = @transform_0, window_bounds = array<i64: 1, 128, 32>}, {transform_indices = @transform_1, window_bounds = array<i64: 1, 32, 64>}, {transform_indices = @transform_2, window_bounds = array<i64: 1, 64>}, {transform_indices = @transform_3, window_bounds = array<i64: 1, 64>}, {transform_indices = @transform_4, window_bounds = array<i64: 128, 64>}]} {
    %c0_i32 = arith.constant 0 : i32
    %0 = arith.cmpi eq, %arg1, %c0_i32 : i32
    %1 = arith.extui %0 : i1 to i32
    %c0_i32_0 = arith.constant 0 : i32
    %2 = arith.cmpi ne, %1, %c0_i32_0 : i32
    scf.if %2 {
      %cst_11 = arith.constant 0.000000e+00 : f32
      %14 = vector.broadcast %cst_11 : f32 to vector<128x64xf32>
      %c0_12 = arith.constant 0 : index
      %c0_13 = arith.constant 0 : index
      %15 = vector.load %arg7[%c0_12, %c0_13] : memref<128x64xf32, #tpu.memory_space<vmem>>, vector<128x64xf32>
      tpu.vector_store %arg7[%c0_12, %c0_13], %14 {strides = array<i32>} : memref<128x64xf32, #tpu.memory_space<vmem>>, vector<128x64xf32>,
    } else {
    }
    %c0 = arith.constant 0 : index
    %c0_1 = arith.constant 0 : index
    %3 = vector.load %arg7[%c0, %c0_1] : memref<128x64xf32, #tpu.memory_space<vmem>>, vector<128x64xf32>
    %c0_2 = arith.constant 0 : index
    %c0_3 = arith.constant 0 : index
    %c0_4 = arith.constant 0 : index
    %4 = vector.load %arg2[%c0_2, %c0_3, %c0_4] : memref<1x128x32xbf16, #tpu.memory_space<vmem>>, vector<1x128x32xbf16>
    %5 = vector.shape_cast %4 : vector<1x128x32xbf16> to vector<128x32xbf16>
    %c0_5 = arith.constant 0 : index
    %c0_6 = arith.constant 0 : index
    %c0_7 = arith.constant 0 : index
    %6 = vector.load %arg3[%c0_5, %c0_6, %c0_7] : memref<1x32x64xbf16, #tpu.memory_space<vmem>>, vector<1x32x64xbf16>
    %7 = vector.shape_cast %6 : vector<1x32x64xbf16> to vector<32x64xbf16>
    %cst = arith.constant dense<0.000000e+00> : vector<128x64xf32>
    %8 = tpu.matmul %5, %7, %cst {dimension_numbers = #tpu.dot_dimension_numbers<[1], [0], [0], [1], [0, 0, 1, 1], [], []>} : vector<128x32xbf16>, vector<32x64xbf16>, vector<128x64xf32> -> vector<128x64xf32>
    %9 = arith.addf %3, %8 : vector<128x64xf32>
    %c0_8 = arith.constant 0 : index
    %c0_9 = arith.constant 0 : index
    %10 = vector.load %arg7[%c0_8, %c0_9] : memref<128x64xf32, #tpu.memory_space<vmem>>, vector<128x64xf32>
    tpu.vector_store %arg7[%c0_8, %c0_9], %9 {strides = array<i32>} : memref<128x64xf32, #tpu.memory_space<vmem>>, vector<128x64xf32>,
    %c8_i32 = arith.constant 8 : i32
    %11 = arith.cmpi eq, %arg1, %c8_i32 : i32
    %12 = arith.extui %11 : i1 to i32
    %c0_i32_10 = arith.constant 0 : i32
    %13 = arith.cmpi ne, %12, %c0_i32_10 : i32
    scf.if %13 {
      %c0_11 = arith.constant 0 : index
      %c0_12 = arith.constant 0 : index
      %14 = vector.load %arg7[%c0_11, %c0_12] : memref<128x64xf32, #tpu.memory_space<vmem>>, vector<128x64xf32>
      %cst_13 = arith.constant dense<0.000000e+00> : vector<64xf32>
      %15 = vector.multi_reduction <add>, %14, %cst_13 [0] : vector<128x64xf32> to vector<64xf32>
      %16 = vector.shape_cast %15 : vector<64xf32> to vector<1x64xf32>
      %cst_14 = arith.constant 1.280000e+02 : f32
      %17 = vector.broadcast %cst_14 : f32 to vector<1x64xf32>
      %18 = arith.divf %16, %17 : vector<1x64xf32>
      %19 = vector.broadcast %18 : vector<1x64xf32> to vector<128x64xf32>
      %20 = arith.subf %14, %19 : vector<128x64xf32>
      %21 = arith.mulf %20, %20 : vector<128x64xf32>
      %cst_15 = arith.constant dense<0.000000e+00> : vector<64xf32>
      %22 = vector.multi_reduction <add>, %21, %cst_15 [0] : vector<128x64xf32> to vector<64xf32>
      %23 = vector.shape_cast %22 : vector<64xf32> to vector<1x64xf32>
      %cst_16 = arith.constant 1.280000e+02 : f32
      %24 = vector.broadcast %cst_16 : f32 to vector<1x64xf32>
      %25 = arith.divf %23, %24 : vector<1x64xf32>
      %c0_17 = arith.constant 0 : index
      %c0_18 = arith.constant 0 : index
      %26 = vector.load %arg4[%c0_17, %c0_18] : memref<1x64xf32, #tpu.memory_space<vmem>>, vector<1x64xf32>
      %cst_19 = arith.constant 9.99999974E-6 : f32
      %27 = vector.broadcast %cst_19 : f32 to vector<1x64xf32>
      %28 = arith.addf %25, %27 : vector<1x64xf32>
      %29 = math.rsqrt %28 : vector<1x64xf32>
      %30 = arith.mulf %26, %29 : vector<1x64xf32>
      %c0_20 = arith.constant 0 : index
      %c0_21 = arith.constant 0 : index
      %31 = vector.load %arg5[%c0_20, %c0_21] : memref<1x64xf32, #tpu.memory_space<vmem>>, vector<1x64xf32>
      %32 = arith.mulf %18, %30 : vector<1x64xf32>
      %33 = arith.subf %31, %32 : vector<1x64xf32>
      %34 = vector.broadcast %30 : vector<1x64xf32> to vector<128x64xf32>
      %35 = arith.mulf %14, %34 : vector<128x64xf32>
      %36 = vector.broadcast %33 : vector<1x64xf32> to vector<128x64xf32>
      %37 = arith.addf %35, %36 : vector<128x64xf32>
      %cst_22 = arith.constant 0.000000e+00 : f32
      %38 = vector.broadcast %cst_22 : f32 to vector<128x64xf32>
      %39 = arith.maximumf %37, %38 : vector<128x64xf32>
      %c0_23 = arith.constant 0 : index
      %c0_24 = arith.constant 0 : index
      %40 = vector.load %arg6[%c0_23, %c0_24] : memref<128x64xf32, #tpu.memory_space<vmem>>, vector<128x64xf32>
      tpu.vector_store %arg6[%c0_23, %c0_24], %39 {strides = array<i32>} : memref<128x64xf32, #tpu.memory_space<vmem>>, vector<128x64xf32>,
    } else {
    }
    return
  }
  func.func @transform_0(%arg0: i32, %arg1: i32) -> (i32, i32, i32) {
    %c0_i32 = arith.constant 0 : i32
    %c0_i32_0 = arith.constant 0 : i32
    %c0_i32_1 = arith.constant 0 : i32
    return %arg1, %c0_i32, %c0_i32_0 : i32, i32, i32
  }
  func.func @transform_1(%arg0: i32, %arg1: i32) -> (i32, i32, i32) {
    %c0_i32 = arith.constant 0 : i32
    %c0_i32_0 = arith.constant 0 : i32
    return %arg1, %c0_i32, %arg0 : i32, i32, i32
  }
  func.func @transform_2(%arg0: i32, %arg1: i32) -> (i32, i32) {
    %c0_i32 = arith.constant 0 : i32
    %c0_i32_0 = arith.constant 0 : i32
    return %c0_i32, %arg0 : i32, i32
  }
  func.func @transform_3(%arg0: i32, %arg1: i32) -> (i32, i32) {
    %c0_i32 = arith.constant 0 : i32
    %c0_i32_0 = arith.constant 0 : i32
    return %c0_i32, %arg0 : i32, i32
  }
  func.func @transform_4(%arg0: i32, %arg1: i32) -> (i32, i32) {
    %c0_i32 = arith.constant 0 : i32
    %c0_i32_0 = arith.constant 0 : i32
    return %c0_i32, %arg0 : i32, i32
  }
}

module attributes {stable_mosaic.version = 11 : i64} {
  func.func @_conv_bn_kernel(%arg0: i32, %arg1: i32, %arg2: memref<1x128x64xbf16, #tpu.memory_space<vmem>>, %arg3: memref<1x64x64xbf16, #tpu.memory_space<vmem>>, %arg4: memref<1x64xf32, #tpu.memory_space<vmem>>, %arg5: memref<1x64xf32, #tpu.memory_space<vmem>>, %arg6: memref<128x64xf32, #tpu.memory_space<vmem>>, %arg7: memref<128x64xf32, #tpu.memory_space<vmem>>) attributes {dimension_semantics = [#tpu.dimension_semantics<parallel>, #tpu.dimension_semantics<arbitrary>], iteration_bounds = array<i64: 1, 9>, scalar_prefetch = 0 : i64, scratch_operands = 1 : i64, tpu.core_type = #tpu.core_type<tc>, window_params = [{transform_indices = @transform_0, window_bounds = array<i64: 1, 128, 64>}, {transform_indices = @transform_1, window_bounds = array<i64: 1, 64, 64>}, {transform_indices = @transform_2, window_bounds = array<i64: 1, 64>}, {transform_indices = @transform_3, window_bounds = array<i64: 1, 64>}, {transform_indices = @transform_4, window_bounds = array<i64: 128, 64>}]} {
    %c0_i32 = arith.constant 0 : i32
    %0 = arith.cmpi eq, %arg1, %c0_i32 : i32
    %1 = arith.extui %0 : i1 to i32
    %c0_i32_0 = arith.constant 0 : i32
    %2 = arith.cmpi ne, %1, %c0_i32_0 : i32
    scf.if %2 {
      %cst_11 = arith.constant 0.000000e+00 : f32
      %14 = vector.broadcast %cst_11 : f32 to vector<128x64xf32>
      %c0_12 = arith.constant 0 : index
      %c0_13 = arith.constant 0 : index
      %15 = vector.load %arg7[%c0_12, %c0_13] : memref<128x64xf32, #tpu.memory_space<vmem>>, vector<128x64xf32>
      tpu.vector_store %arg7[%c0_12, %c0_13], %14 {strides = array<i32>} : memref<128x64xf32, #tpu.memory_space<vmem>>, vector<128x64xf32>,
    } else {
    }
    %c0 = arith.constant 0 : index
    %c0_1 = arith.constant 0 : index
    %3 = vector.load %arg7[%c0, %c0_1] : memref<128x64xf32, #tpu.memory_space<vmem>>, vector<128x64xf32>
    %c0_2 = arith.constant 0 : index
    %c0_3 = arith.constant 0 : index
    %c0_4 = arith.constant 0 : index
    %4 = vector.load %arg2[%c0_2, %c0_3, %c0_4] : memref<1x128x64xbf16, #tpu.memory_space<vmem>>, vector<1x128x64xbf16>
    %5 = vector.shape_cast %4 : vector<1x128x64xbf16> to vector<128x64xbf16>
    %c0_5 = arith.constant 0 : index
    %c0_6 = arith.constant 0 : index
    %c0_7 = arith.constant 0 : index
    %6 = vector.load %arg3[%c0_5, %c0_6, %c0_7] : memref<1x64x64xbf16, #tpu.memory_space<vmem>>, vector<1x64x64xbf16>
    %7 = vector.shape_cast %6 : vector<1x64x64xbf16> to vector<64x64xbf16>
    %cst = arith.constant dense<0.000000e+00> : vector<128x64xf32>
    %8 = tpu.matmul %5, %7, %cst {dimension_numbers = #tpu.dot_dimension_numbers<[1], [0], [0], [1], [0, 0, 1, 1], [], []>} : vector<128x64xbf16>, vector<64x64xbf16>, vector<128x64xf32> -> vector<128x64xf32>
    %9 = arith.addf %3, %8 : vector<128x64xf32>
    %c0_8 = arith.constant 0 : index
    %c0_9 = arith.constant 0 : index
    %10 = vector.load %arg7[%c0_8, %c0_9] : memref<128x64xf32, #tpu.memory_space<vmem>>, vector<128x64xf32>
    tpu.vector_store %arg7[%c0_8, %c0_9], %9 {strides = array<i32>} : memref<128x64xf32, #tpu.memory_space<vmem>>, vector<128x64xf32>,
    %c8_i32 = arith.constant 8 : i32
    %11 = arith.cmpi eq, %arg1, %c8_i32 : i32
    %12 = arith.extui %11 : i1 to i32
    %c0_i32_10 = arith.constant 0 : i32
    %13 = arith.cmpi ne, %12, %c0_i32_10 : i32
    scf.if %13 {
      %c0_11 = arith.constant 0 : index
      %c0_12 = arith.constant 0 : index
      %14 = vector.load %arg7[%c0_11, %c0_12] : memref<128x64xf32, #tpu.memory_space<vmem>>, vector<128x64xf32>
      %cst_13 = arith.constant dense<0.000000e+00> : vector<64xf32>
      %15 = vector.multi_reduction <add>, %14, %cst_13 [0] : vector<128x64xf32> to vector<64xf32>
      %16 = vector.shape_cast %15 : vector<64xf32> to vector<1x64xf32>
      %cst_14 = arith.constant 1.280000e+02 : f32
      %17 = vector.broadcast %cst_14 : f32 to vector<1x64xf32>
      %18 = arith.divf %16, %17 : vector<1x64xf32>
      %19 = vector.broadcast %18 : vector<1x64xf32> to vector<128x64xf32>
      %20 = arith.subf %14, %19 : vector<128x64xf32>
      %21 = arith.mulf %20, %20 : vector<128x64xf32>
      %cst_15 = arith.constant dense<0.000000e+00> : vector<64xf32>
      %22 = vector.multi_reduction <add>, %21, %cst_15 [0] : vector<128x64xf32> to vector<64xf32>
      %23 = vector.shape_cast %22 : vector<64xf32> to vector<1x64xf32>
      %cst_16 = arith.constant 1.280000e+02 : f32
      %24 = vector.broadcast %cst_16 : f32 to vector<1x64xf32>
      %25 = arith.divf %23, %24 : vector<1x64xf32>
      %c0_17 = arith.constant 0 : index
      %c0_18 = arith.constant 0 : index
      %26 = vector.load %arg4[%c0_17, %c0_18] : memref<1x64xf32, #tpu.memory_space<vmem>>, vector<1x64xf32>
      %cst_19 = arith.constant 9.99999974E-6 : f32
      %27 = vector.broadcast %cst_19 : f32 to vector<1x64xf32>
      %28 = arith.addf %25, %27 : vector<1x64xf32>
      %29 = math.rsqrt %28 : vector<1x64xf32>
      %30 = arith.mulf %26, %29 : vector<1x64xf32>
      %c0_20 = arith.constant 0 : index
      %c0_21 = arith.constant 0 : index
      %31 = vector.load %arg5[%c0_20, %c0_21] : memref<1x64xf32, #tpu.memory_space<vmem>>, vector<1x64xf32>
      %32 = arith.mulf %18, %30 : vector<1x64xf32>
      %33 = arith.subf %31, %32 : vector<1x64xf32>
      %34 = vector.broadcast %30 : vector<1x64xf32> to vector<128x64xf32>
      %35 = arith.mulf %14, %34 : vector<128x64xf32>
      %36 = vector.broadcast %33 : vector<1x64xf32> to vector<128x64xf32>
      %37 = arith.addf %35, %36 : vector<128x64xf32>
      %c0_22 = arith.constant 0 : index
      %c0_23 = arith.constant 0 : index
      %38 = vector.load %arg6[%c0_22, %c0_23] : memref<128x64xf32, #tpu.memory_space<vmem>>, vector<128x64xf32>
      tpu.vector_store %arg6[%c0_22, %c0_23], %37 {strides = array<i32>} : memref<128x64xf32, #tpu.memory_space<vmem>>, vector<128x64xf32>,
    } else {
    }
    return
  }
  func.func @transform_0(%arg0: i32, %arg1: i32) -> (i32, i32, i32) {
    %c0_i32 = arith.constant 0 : i32
    %c0_i32_0 = arith.constant 0 : i32
    %c0_i32_1 = arith.constant 0 : i32
    return %arg1, %c0_i32, %c0_i32_0 : i32, i32, i32
  }
  func.func @transform_1(%arg0: i32, %arg1: i32) -> (i32, i32, i32) {
    %c0_i32 = arith.constant 0 : i32
    %c0_i32_0 = arith.constant 0 : i32
    return %arg1, %c0_i32, %arg0 : i32, i32, i32
  }
  func.func @transform_2(%arg0: i32, %arg1: i32) -> (i32, i32) {
    %c0_i32 = arith.constant 0 : i32
    %c0_i32_0 = arith.constant 0 : i32
    return %c0_i32, %arg0 : i32, i32
  }
  func.func @transform_3(%arg0: i32, %arg1: i32) -> (i32, i32) {
    %c0_i32 = arith.constant 0 : i32
    %c0_i32_0 = arith.constant 0 : i32
    return %c0_i32, %arg0 : i32, i32
  }
  func.func @transform_4(%arg0: i32, %arg1: i32) -> (i32, i32) {
    %c0_i32 = arith.constant 0 : i32
    %c0_i32_0 = arith.constant 0 : i32
    return %c0_i32, %arg0 : i32, i32
  }
}

module attributes {stable_mosaic.version = 11 : i64} {
  func.func @_conv_bn_kernel(%arg0: i32, %arg1: i32, %arg2: memref<1x128x32xbf16, #tpu.memory_space<vmem>>, %arg3: memref<1x32x64xbf16, #tpu.memory_space<vmem>>, %arg4: memref<1x64xf32, #tpu.memory_space<vmem>>, %arg5: memref<1x64xf32, #tpu.memory_space<vmem>>, %arg6: memref<128x64xf32, #tpu.memory_space<vmem>>, %arg7: memref<128x64xf32, #tpu.memory_space<vmem>>) attributes {dimension_semantics = [#tpu.dimension_semantics<parallel>, #tpu.dimension_semantics<arbitrary>], iteration_bounds = array<i64: 1, 1>, scalar_prefetch = 0 : i64, scratch_operands = 1 : i64, tpu.core_type = #tpu.core_type<tc>, window_params = [{transform_indices = @transform_0, window_bounds = array<i64: 1, 128, 32>}, {transform_indices = @transform_1, window_bounds = array<i64: 1, 32, 64>}, {transform_indices = @transform_2, window_bounds = array<i64: 1, 64>}, {transform_indices = @transform_3, window_bounds = array<i64: 1, 64>}, {transform_indices = @transform_4, window_bounds = array<i64: 128, 64>}]} {
    %c0_i32 = arith.constant 0 : i32
    %0 = arith.cmpi eq, %arg1, %c0_i32 : i32
    %1 = arith.extui %0 : i1 to i32
    %c0_i32_0 = arith.constant 0 : i32
    %2 = arith.cmpi ne, %1, %c0_i32_0 : i32
    scf.if %2 {
      %cst_12 = arith.constant 0.000000e+00 : f32
      %14 = vector.broadcast %cst_12 : f32 to vector<128x64xf32>
      %c0_13 = arith.constant 0 : index
      %c0_14 = arith.constant 0 : index
      %15 = vector.load %arg7[%c0_13, %c0_14] : memref<128x64xf32, #tpu.memory_space<vmem>>, vector<128x64xf32>
      tpu.vector_store %arg7[%c0_13, %c0_14], %14 {strides = array<i32>} : memref<128x64xf32, #tpu.memory_space<vmem>>, vector<128x64xf32>,
    } else {
    }
    %c0 = arith.constant 0 : index
    %c0_1 = arith.constant 0 : index
    %3 = vector.load %arg7[%c0, %c0_1] : memref<128x64xf32, #tpu.memory_space<vmem>>, vector<128x64xf32>
    %c0_2 = arith.constant 0 : index
    %c0_3 = arith.constant 0 : index
    %c0_4 = arith.constant 0 : index
    %4 = vector.load %arg2[%c0_2, %c0_3, %c0_4] : memref<1x128x32xbf16, #tpu.memory_space<vmem>>, vector<1x128x32xbf16>
    %5 = vector.shape_cast %4 : vector<1x128x32xbf16> to vector<128x32xbf16>
    %c0_5 = arith.constant 0 : index
    %c0_6 = arith.constant 0 : index
    %c0_7 = arith.constant 0 : index
    %6 = vector.load %arg3[%c0_5, %c0_6, %c0_7] : memref<1x32x64xbf16, #tpu.memory_space<vmem>>, vector<1x32x64xbf16>
    %7 = vector.shape_cast %6 : vector<1x32x64xbf16> to vector<32x64xbf16>
    %cst = arith.constant dense<0.000000e+00> : vector<128x64xf32>
    %8 = tpu.matmul %5, %7, %cst {dimension_numbers = #tpu.dot_dimension_numbers<[1], [0], [0], [1], [0, 0, 1, 1], [], []>} : vector<128x32xbf16>, vector<32x64xbf16>, vector<128x64xf32> -> vector<128x64xf32>
    %9 = arith.addf %3, %8 : vector<128x64xf32>
    %c0_8 = arith.constant 0 : index
    %c0_9 = arith.constant 0 : index
    %10 = vector.load %arg7[%c0_8, %c0_9] : memref<128x64xf32, #tpu.memory_space<vmem>>, vector<128x64xf32>
    tpu.vector_store %arg7[%c0_8, %c0_9], %9 {strides = array<i32>} : memref<128x64xf32, #tpu.memory_space<vmem>>, vector<128x64xf32>,
    %c0_i32_10 = arith.constant 0 : i32
    %11 = arith.cmpi eq, %arg1, %c0_i32_10 : i32
    %12 = arith.extui %11 : i1 to i32
    %c0_i32_11 = arith.constant 0 : i32
    %13 = arith.cmpi ne, %12, %c0_i32_11 : i32
    scf.if %13 {
      %c0_12 = arith.constant 0 : index
      %c0_13 = arith.constant 0 : index
      %14 = vector.load %arg7[%c0_12, %c0_13] : memref<128x64xf32, #tpu.memory_space<vmem>>, vector<128x64xf32>
      %cst_14 = arith.constant dense<0.000000e+00> : vector<64xf32>
      %15 = vector.multi_reduction <add>, %14, %cst_14 [0] : vector<128x64xf32> to vector<64xf32>
      %16 = vector.shape_cast %15 : vector<64xf32> to vector<1x64xf32>
      %cst_15 = arith.constant 1.280000e+02 : f32
      %17 = vector.broadcast %cst_15 : f32 to vector<1x64xf32>
      %18 = arith.divf %16, %17 : vector<1x64xf32>
      %19 = vector.broadcast %18 : vector<1x64xf32> to vector<128x64xf32>
      %20 = arith.subf %14, %19 : vector<128x64xf32>
      %21 = arith.mulf %20, %20 : vector<128x64xf32>
      %cst_16 = arith.constant dense<0.000000e+00> : vector<64xf32>
      %22 = vector.multi_reduction <add>, %21, %cst_16 [0] : vector<128x64xf32> to vector<64xf32>
      %23 = vector.shape_cast %22 : vector<64xf32> to vector<1x64xf32>
      %cst_17 = arith.constant 1.280000e+02 : f32
      %24 = vector.broadcast %cst_17 : f32 to vector<1x64xf32>
      %25 = arith.divf %23, %24 : vector<1x64xf32>
      %c0_18 = arith.constant 0 : index
      %c0_19 = arith.constant 0 : index
      %26 = vector.load %arg4[%c0_18, %c0_19] : memref<1x64xf32, #tpu.memory_space<vmem>>, vector<1x64xf32>
      %cst_20 = arith.constant 9.99999974E-6 : f32
      %27 = vector.broadcast %cst_20 : f32 to vector<1x64xf32>
      %28 = arith.addf %25, %27 : vector<1x64xf32>
      %29 = math.rsqrt %28 : vector<1x64xf32>
      %30 = arith.mulf %26, %29 : vector<1x64xf32>
      %c0_21 = arith.constant 0 : index
      %c0_22 = arith.constant 0 : index
      %31 = vector.load %arg5[%c0_21, %c0_22] : memref<1x64xf32, #tpu.memory_space<vmem>>, vector<1x64xf32>
      %32 = arith.mulf %18, %30 : vector<1x64xf32>
      %33 = arith.subf %31, %32 : vector<1x64xf32>
      %34 = vector.broadcast %30 : vector<1x64xf32> to vector<128x64xf32>
      %35 = arith.mulf %14, %34 : vector<128x64xf32>
      %36 = vector.broadcast %33 : vector<1x64xf32> to vector<128x64xf32>
      %37 = arith.addf %35, %36 : vector<128x64xf32>
      %c0_23 = arith.constant 0 : index
      %c0_24 = arith.constant 0 : index
      %38 = vector.load %arg6[%c0_23, %c0_24] : memref<128x64xf32, #tpu.memory_space<vmem>>, vector<128x64xf32>
      tpu.vector_store %arg6[%c0_23, %c0_24], %37 {strides = array<i32>} : memref<128x64xf32, #tpu.memory_space<vmem>>, vector<128x64xf32>,
    } else {
    }
    return
  }
  func.func @transform_0(%arg0: i32, %arg1: i32) -> (i32, i32, i32) {
    %c0_i32 = arith.constant 0 : i32
    %c0_i32_0 = arith.constant 0 : i32
    %c0_i32_1 = arith.constant 0 : i32
    return %arg1, %c0_i32, %c0_i32_0 : i32, i32, i32
  }
  func.func @transform_1(%arg0: i32, %arg1: i32) -> (i32, i32, i32) {
    %c0_i32 = arith.constant 0 : i32
    %c0_i32_0 = arith.constant 0 : i32
    return %arg1, %c0_i32, %arg0 : i32, i32, i32
  }
  func.func @transform_2(%arg0: i32, %arg1: i32) -> (i32, i32) {
    %c0_i32 = arith.constant 0 : i32
    %c0_i32_0 = arith.constant 0 : i32
    return %c0_i32, %arg0 : i32, i32
  }
  func.func @transform_3(%arg0: i32, %arg1: i32) -> (i32, i32) {
    %c0_i32 = arith.constant 0 : i32
    %c0_i32_0 = arith.constant 0 : i32
    return %c0_i32, %arg0 : i32, i32
  }
  func.func @transform_4(%arg0: i32, %arg1: i32) -> (i32, i32) {
    %c0_i32 = arith.constant 0 : i32
    %c0_i32_0 = arith.constant 0 : i32
    return %c0_i32, %arg0 : i32, i32
  }
}

module attributes {stable_mosaic.version = 11 : i64} {
  func.func @_eca_finalize_kernel(%arg0: i32, %arg1: memref<1x64x64xf32, #tpu.memory_space<vmem>>, %arg2: memref<1x64x64xf32, #tpu.memory_space<vmem>>, %arg3: memref<3xf32, #tpu.memory_space<smem>>, %arg4: memref<1x64x64xf32, #tpu.memory_space<vmem>>) attributes {dimension_semantics = [#tpu.dimension_semantics<parallel>], iteration_bounds = array<i64: 2>, scalar_prefetch = 0 : i64, scratch_operands = 0 : i64, tpu.core_type = #tpu.core_type<tc>, window_params = [{transform_indices = @transform_0, window_bounds = array<i64: 1, 64, 64>}, {transform_indices = @transform_1, window_bounds = array<i64: 1, 64, 64>}, {transform_indices = @transform_2, window_bounds = array<i64: 3>}, {transform_indices = @transform_3, window_bounds = array<i64: 1, 64, 64>}]} {
    %c0 = arith.constant 0 : index
    %c0_0 = arith.constant 0 : index
    %c0_1 = arith.constant 0 : index
    %0 = vector.load %arg1[%c0, %c0_0, %c0_1] : memref<1x64x64xf32, #tpu.memory_space<vmem>>, vector<1x64x64xf32>
    %1 = vector.shape_cast %0 : vector<1x64x64xf32> to vector<64x64xf32>
    %c0_2 = arith.constant 0 : index
    %c0_3 = arith.constant 0 : index
    %c0_4 = arith.constant 0 : index
    %2 = vector.load %arg2[%c0_2, %c0_3, %c0_4] : memref<1x64x64xf32, #tpu.memory_space<vmem>>, vector<1x64x64xf32>
    %3 = vector.shape_cast %2 : vector<1x64x64xf32> to vector<64x64xf32>
    %cst = arith.constant dense<0.000000e+00> : vector<64xf32>
    %4 = vector.multi_reduction <add>, %1, %cst [0] : vector<64x64xf32> to vector<64xf32>
    %5 = vector.shape_cast %4 : vector<64xf32> to vector<1x64xf32>
    %cst_5 = arith.constant 6.400000e+01 : f32
    %6 = vector.broadcast %cst_5 : f32 to vector<1x64xf32>
    %7 = arith.divf %5, %6 : vector<1x64xf32>
    %8 = tpu.iota {dimensions = array<i32: 0>} : vector<64x64xi32>
    %9 = tpu.iota {dimensions = array<i32: 1>} : vector<64x64xi32>
    %c1_i32 = arith.constant 1 : i32
    %10 = vector.broadcast %c1_i32 : i32 to vector<64x64xi32>
    %11 = arith.subi %9, %10 : vector<64x64xi32>
    %12 = arith.cmpi eq, %8, %11 : vector<64x64xi32>
    %c0_6 = arith.constant 0 : index
    %13 = memref.load %arg3[%c0_6] : memref<3xf32, #tpu.memory_space<smem>>
    %cst_7 = arith.constant 0.000000e+00 : f32
    %14 = vector.broadcast %13 : f32 to vector<64x64xf32>
    %15 = vector.broadcast %cst_7 : f32 to vector<64x64xf32>
    %16 = arith.select %12, %14, %15 : vector<64x64xi1>, vector<64x64xf32>
    %17 = arith.cmpi eq, %8, %9 : vector<64x64xi32>
    %c1 = arith.constant 1 : index
    %18 = memref.load %arg3[%c1] : memref<3xf32, #tpu.memory_space<smem>>
    %cst_8 = arith.constant 0.000000e+00 : f32
    %19 = vector.broadcast %18 : f32 to vector<64x64xf32>
    %20 = vector.broadcast %cst_8 : f32 to vector<64x64xf32>
    %21 = arith.select %17, %19, %20 : vector<64x64xi1>, vector<64x64xf32>
    %22 = arith.addf %16, %21 : vector<64x64xf32>
    %c1_i32_9 = arith.constant 1 : i32
    %23 = vector.broadcast %c1_i32_9 : i32 to vector<64x64xi32>
    %24 = arith.addi %9, %23 : vector<64x64xi32>
    %25 = arith.cmpi eq, %8, %24 : vector<64x64xi32>
    %c2 = arith.constant 2 : index
    %26 = memref.load %arg3[%c2] : memref<3xf32, #tpu.memory_space<smem>>
    %cst_10 = arith.constant 0.000000e+00 : f32
    %27 = vector.broadcast %26 : f32 to vector<64x64xf32>
    %28 = vector.broadcast %cst_10 : f32 to vector<64x64xf32>
    %29 = arith.select %25, %27, %28 : vector<64x64xi1>, vector<64x64xf32>
    %30 = arith.addf %22, %29 : vector<64x64xf32>
    %cst_11 = arith.constant dense<0.000000e+00> : vector<1x64xf32>
    %31 = tpu.matmul %7, %30, %cst_11 {dimension_numbers = #tpu.dot_dimension_numbers<[1], [0], [0], [1], [0, 0, 1, 1], [], []>} : vector<1x64xf32>, vector<64x64xf32>, vector<1x64xf32> -> vector<1x64xf32>
    %cst_12 = arith.constant 0.000000e+00 : f32
    %32 = vector.broadcast %cst_12 : f32 to vector<1x64xf32>
    %33 = arith.subf %32, %31 : vector<1x64xf32>
    %34 = math.exp %33 : vector<1x64xf32>
    %cst_13 = arith.constant 1.000000e+00 : f32
    %35 = vector.broadcast %cst_13 : f32 to vector<1x64xf32>
    %36 = arith.addf %35, %34 : vector<1x64xf32>
    %cst_14 = arith.constant 1.000000e+00 : f32
    %37 = vector.broadcast %cst_14 : f32 to vector<1x64xf32>
    %38 = arith.divf %37, %36 : vector<1x64xf32>
    %39 = vector.broadcast %38 : vector<1x64xf32> to vector<64x64xf32>
    %40 = arith.mulf %1, %39 : vector<64x64xf32>
    %41 = arith.addf %40, %3 : vector<64x64xf32>
    %cst_15 = arith.constant 0.000000e+00 : f32
    %42 = vector.broadcast %cst_15 : f32 to vector<64x64xf32>
    %43 = arith.maximumf %41, %42 : vector<64x64xf32>
    %c0_16 = arith.constant 0 : index
    %c0_17 = arith.constant 0 : index
    %c0_18 = arith.constant 0 : index
    %44 = vector.load %arg4[%c0_16, %c0_17, %c0_18] : memref<1x64x64xf32, #tpu.memory_space<vmem>>, vector<1x64x64xf32>
    %45 = vector.shape_cast %44 : vector<1x64x64xf32> to vector<64x64xf32>
    %46 = vector.shape_cast %43 : vector<64x64xf32> to vector<1x64x64xf32>
    tpu.vector_store %arg4[%c0_16, %c0_17, %c0_18], %46 {strides = array<i32>} : memref<1x64x64xf32, #tpu.memory_space<vmem>>, vector<1x64x64xf32>,
    return
  }
  func.func @transform_0(%arg0: i32) -> (i32, i32, i32) {
    %c0_i32 = arith.constant 0 : i32
    %c0_i32_0 = arith.constant 0 : i32
    %c0_i32_1 = arith.constant 0 : i32
    return %arg0, %c0_i32, %c0_i32_0 : i32, i32, i32
  }
  func.func @transform_1(%arg0: i32) -> (i32, i32, i32) {
    %c0_i32 = arith.constant 0 : i32
    %c0_i32_0 = arith.constant 0 : i32
    %c0_i32_1 = arith.constant 0 : i32
    return %arg0, %c0_i32, %c0_i32_0 : i32, i32, i32
  }
  func.func @transform_2(%arg0: i32) -> i32 {
    %c0_i32 = arith.constant 0 : i32
    %c0_i32_0 = arith.constant 0 : i32
    return %c0_i32 : i32
  }
  func.func @transform_3(%arg0: i32) -> (i32, i32, i32) {
    %c0_i32 = arith.constant 0 : i32
    %c0_i32_0 = arith.constant 0 : i32
    %c0_i32_1 = arith.constant 0 : i32
    return %arg0, %c0_i32, %c0_i32_0 : i32, i32, i32
  }
}

</mosaic_0001>

<bundles_post_ra>
// kernel: forward.9
= control target key start
LH: loop header
LB: loop body
LE: loop exit
PB: predicated region body
PF: predicated region fallthrough
CT: control target
= control target key end

     0   :  { %8 = vsyncpa [#allocation3], 0  ;;  %s791_s12 = smov 0   ;;  %s1185_s0 = inlined_call_operand.vmem [shape: f32[2,256,32], index: 0, kind: input, shape index: {}]   ;;  %s1186_s1 = inlined_call_operand.vmem [shape: f32[2,256,32], index: 1, kind: input, shape index: {}]   ;;  %s1187_s2 = inlined_call_operand.vmem [shape: f32[3], index: 2, kind: input, shape index: {}]   ;;  %s1188_s3 = inlined_call_operand.vmem [shape: f32[2,256,32], index: 3, kind: output, shape index: {}]  }
   0x1 LB: > { %s797_s13 = sadd.s32 4294967295, %s766_s12   ;;  %p680_p0 = scmp.ge.s32.totalorder %s766_s12, 1  ;;  %s766_s12 = sphi %s791_s12, %s14_s12  }
   0x2   : > { %p118_p1 = scmp.lt.s32.totalorder %s766_s12, 3  ;;  %s131_s16 = sshll.u32 %s1187_s2, 4  ;;  %s132_s16 = int_to_ptr.vmem [resolvable:$true] %s131_s16 }
   0x3   : > { %p724_p3 = scmp.eq.s32.totalorder %s797_s13, 0  ;;  %s741_s18 = scalar_lea.vmem %s132_s16, 16 }
   0x4   : > { %p804_p2 = pnand %p680_p0, %p118_p1  ;;  %p742_p6 = scmp.ne.s32.totalorder %s132_s16, %s741_s18 }
   0x5   : > { %p749_p10 = scmp.lt.s32.totalorder %s132_s16, %s132_s16  ;;  %p750_p11 = scmp.lt.s32.totalorder %s741_s18, %s741_s18 }
   0x6   : > { %p720_p4 = pneg %p804_p2 }
   0x7   : > { %p751_p12 = por %p750_p11, %p749_p10 }
   0x8   : > { %p721_p5 = pnand %p724_p3, %p720_p4 }
   0xa   : > { %p743_p7 = pneg %p721_p5 }
   0xc   : > { %p744_p8 = pnand %p743_p7, %p742_p6 }
   0xe   : > { %p745_p9 = pneg %p744_p8 }
  0x10   : > { %p752_p13 = pnand %p751_p12, %p745_p9 }
  0x12   : > { %755 = shalt.err (!%p752_p13)
}
  0x13   : > { %s768_s19 = smov [#allocation2]   ;;  %160 = sbr.rel (%p804_p2) target bundleno = 380 (0x17c), region = 32 }
  0x14   : > { %723 = dma.vmem_to_smem (!%p721_p5), %s132_s16, 16, %s768_s19, [#allocation3]  }
  0x18   : > { %761 = dma.done.wait (%p724_p3), [#allocation3], 16  }
  0x19   : > { %763 = vsyncadd (%p724_p3), [#allocation3], 4294967280 }
  0x1a   : > { %166 = sfence }
  0x1b   : > { %v341_v0 = vlaneseq  ;;  %s353_s20 = sld [smem:[#allocation2]]  ;;  %p190_p0 = scmp.lt.s32.totalorder %s797_s13, 1  ;;  %v769_v1 = vmov 0.0   ;;  %vm770_vm0 = vmmov 0   ;;  %vm269_vm2 = vcmask 261120  }
  0x1c   : > { %705 = vmatprep.subr.mxu0 %v769_v1  ;;  %s692_s21 = sld [smem:[#allocation2 + $0x1]]  ;;  %713 = vmatprep.mubr.msk.f32.mxu0 %vm770_vm0, %v769_v1 }
  0x1d   : > { %v822_v2 = vshrl.u32 %v341_v0, 7  ;;  %v347_v3 = vand.u32 127, %v341_v0  ;;  %s693_s22 = sld [smem:[#allocation2 + $0x2]]  ;;  %s1191_s13 = smov (!%p190_p0, %s797_s13), 1 }
  0x1e   : > { %s829_s23 = sshll.u32 %s1191_s13, 8 }
  0x1f   : > { %v345_v4 = vadd.s32 24, %v822_v2  ;;  %v691_v5 = vadd.s32 4294967295, %v347_v3  ;;  %v373_v6 = vadd.s32 1, %v347_v3  ;;  %v344_v7 = vadd.s32 16, %v822_v2  ;;  %s835_s26 = scalar_lea.vmem %s1185_s0, %s829_s23  ;;  %s1010_s29 = scalar_lea.vmem %s1186_s1, %s829_s23 }
  0x20   : > { %v343_v8 = vadd.s32 8, %v822_v2  ;;  %vm359_vm1 = vcmp.eq.s32.totalorder %v822_v2, %v347_v3  ;;  %v838_v20 = vld [vmem:[%s835_s26] sm:$0xff]  ;;  %v841_v21 = vld [vmem:[%s835_s26 + $0x8] sm:$0xff]  ;;  %v847_v29 = vld [vmem:[%s835_s26 + $0x10] sm:$0xff]  ;;  %s1096_s5 = scalar_lea.vmem %s1188_s3, %s829_s23 }
  0x21   : > { %vm352_vm3 = vcmp.eq.s32.totalorder %v345_v4, %v691_v5  ;;  %v354_v9 = vstv %s353_s20  ;;  %vm362_vm4 = vcmp.eq.s32.totalorder %v345_v4, %v347_v3  ;;  %vm377_vm5 = vcmp.eq.s32.totalorder %v345_v4, %v373_v6  ;;  %v850_v30 = vld [vmem:[%s835_s26 + $0x18] sm:$0xff]  ;;  %v859_v37 = vld [vmem:[%s835_s26 + $0x20] sm:$0xff]  ;;  %v867_v42 = vld [vmem:[%s835_s26 + $0x28] sm:$0xff] }
  0x22   : > { %v358_v10 = vsel %vm352_vm3, %v354_v9, 0.0  ;;  %v364_v11 = vstv %s692_s21  ;;  %vm351_vm6 = vcmp.eq.s32.totalorder %v344_v7, %v691_v5  ;;  %vm361_vm7 = vcmp.eq.s32.totalorder %v344_v7, %v347_v3  ;;  %v873_v45 = vld [vmem:[%s835_s26 + $0x30] sm:$0xff]  ;;  %v878_v48 = vld [vmem:[%s835_s26 + $0x38] sm:$0xff]  ;;  %v883_v51 = vld [vmem:[%s835_s26 + $0x40] sm:$0xff] }
  0x23   : > { %v368_v12 = vsel %vm362_vm4, %v364_v11, 0.0  ;;  %v379_v13 = vstv %s693_s22  ;;  %v357_v14 = vsel %vm351_vm6, %v354_v9, 0.0  ;;  %v367_v15 = vsel %vm361_vm7, %v364_v11, 0.0  ;;  %v888_v54 = vld [vmem:[%s835_s26 + $0x48] sm:$0xff]  ;;  %v893_v57 = vld [vmem:[%s835_s26 + $0x50] sm:$0xff]  ;;  %v898_v60 = vld [vmem:[%s835_s26 + $0x58] sm:$0xff] }
  0x24   : > { %v372_v16 = vadd.f32 %v368_v12, %v358_v10  ;;  %v383_v17 = vsel %vm377_vm5, %v379_v13, 0.0  ;;  %v371_v18 = vadd.f32 %v367_v15, %v357_v14  ;;  %vm376_vm8 = vcmp.eq.s32.totalorder %v344_v7, %v373_v6  ;;  %v903_v63 = vld [vmem:[%s835_s26 + $0x60] sm:$0xff]  ;;  %v928_v15 = vld [vmem:[%s835_s26 + $0x88] sm:$0xff] }
  0x25   : > { %v382_v19 = vsel %vm376_vm8, %v379_v13, 0.0  ;;  %vm350_vm9 = vcmp.eq.s32.totalorder %v343_v8, %v691_v5  ;;  %vm360_vm10 = vcmp.eq.s32.totalorder %v343_v8, %v347_v3  ;;  %vm375_vm11 = vcmp.eq.s32.totalorder %v343_v8, %v373_v6  ;;  %v908_v3 = vld [vmem:[%s835_s26 + $0x68] sm:$0xff]  ;;  %v923_v12 = vld [vmem:[%s835_s26 + $0x80] sm:$0xff] }
  0x26   : > { %v387_v22 = vadd.f32 %v383_v17, %v372_v16  ;;  %v386_v23 = vadd.f32 %v382_v19, %v371_v18  ;;  %v356_v24 = vsel %vm350_vm9, %v354_v9, 0.0  ;;  %v366_v25 = vsel %vm360_vm10, %v364_v11, 0.0  ;;  %v933_v18 = vld [vmem:[%s835_s26 + $0x90] sm:$0xff] }
  0x27   : > { %v370_v26 = vadd.f32 %v366_v25, %v356_v24  ;;  %v381_v27 = vsel %vm375_vm11, %v379_v13, 0.0  ;;  %vm349_vm12 = vcmp.eq.s32.totalorder %v822_v2, %v691_v5  ;;  %v365_v28 = vsel %vm359_vm1, %v364_v11, 0.0 }
  0x28   : > { %706 = vmatpush3.msra.mxu0 %v387_v22  ;;  %v355_v31 = vsel %vm349_vm12, %v354_v9, 0.0  ;;  %vm374_vm13 = vcmp.eq.s32.totalorder %v822_v2, %v373_v6  ;;  %v270_v32 = vsel %vm269_vm2, %v838_v20, 0.0  ;;  %v271_v33 = vsel %vm269_vm2, %v841_v21, 0.0  ;;  %v913_v6 = vld [vmem:[%s835_s26 + $0x70] sm:$0xff]  ;;  %v918_v9 = vld [vmem:[%s835_s26 + $0x78] sm:$0xff] }
  0x29   : > { %707 = vmatprep.subr.mxu0 %v769_v1  ;;  %v385_v34 = vadd.f32 %v381_v27, %v370_v26  ;;  %v369_v35 = vadd.f32 %v365_v28, %v355_v31  ;;  %v380_v36 = vsel %vm374_vm13, %v379_v13, 0.0  ;;  %v272_v38 = vadd.f32 %v271_v33, %v270_v32  ;;  %v943_v26 = vld [vmem:[%s835_s26 + $0xa0] sm:$0xff]  ;;  %v948_v31 = vld [vmem:[%s835_s26 + $0xa8] sm:$0xff] }
  0x2a   : > { %708 = vmatpush3.msra.mxu0 %v386_v23  ;;  %v273_v39 = vsel %vm269_vm2, %v847_v29, 0.0  ;;  %v275_v40 = vsel %vm269_vm2, %v850_v30, 0.0  ;;  %v277_v44 = vsel %vm269_vm2, %v859_v37, 0.0  ;;  %v279_v47 = vsel %vm269_vm2, %v867_v42, 0.0  ;;  %v938_v23 = vld [vmem:[%s835_s26 + $0x98] sm:$0xff] }
  0x2b   : > { %709 = vmatprep.subr.mxu0 %v769_v1  ;;  %v384_v41 = vadd.f32 %v380_v36, %v369_v35  ;;  %v274_v43 = vadd.f32 %v273_v39, %v272_v38  ;;  %v281_v50 = vsel %vm269_vm2, %v873_v45, 0.0  ;;  %v283_v53 = vsel %vm269_vm2, %v878_v48, 0.0  ;;  %v958_v38 = vld [vmem:[%s835_s26 + $0xb8] sm:$0xff] }
  0x2c   : > { %710 = vmatpush3.msra.mxu0 %v385_v34  ;;  %v285_v56 = vsel %vm269_vm2, %v883_v51, 0.0  ;;  %v287_v59 = vsel %vm269_vm2, %v888_v54, 0.0  ;;  %v289_v62 = vsel %vm269_vm2, %v893_v57, 0.0  ;;  %v293_v5 = vsel %vm269_vm2, %v903_v63, 0.0  ;;  %v953_v34 = vld [vmem:[%s835_s26 + $0xb0] sm:$0xff] }
  0x2d   : > { %711 = vmatprep.subr.mxu0 %v769_v1  ;;  %v276_v46 = vadd.f32 %v275_v40, %v274_v43  ;;  %v291_v1 = vsel %vm269_vm2, %v898_v60, 0.0  ;;  %v295_v8 = vsel %vm269_vm2, %v908_v3, 0.0  ;;  %v297_v11 = vsel %vm269_vm2, %v913_v6, 0.0 }
  0x2e   : > { %712 = vmatpush3.msra.mxu0 %v384_v41  ;;  %v299_v14 = vsel %vm269_vm2, %v918_v9, 0.0  ;;  %v301_v17 = vsel %vm269_vm2, %v923_v12, 0.0  ;;  %v303_v22 = vsel %vm269_vm2, %v928_v15, 0.0  ;;  %v305_v25 = vsel %vm269_vm2, %v933_v18, 0.0  ;;  %v963_v41 = vld [vmem:[%s835_s26 + $0xc0] sm:$0xff] }
  0x2f   : > { %v278_v49 = vadd.f32 %v277_v44, %v276_v46  ;;  %v307_v28 = vsel %vm269_vm2, %v938_v23, 0.0  ;;  %v309_v33 = vsel %vm269_vm2, %v943_v26, 0.0  ;;  %v311_v36 = vsel %vm269_vm2, %v948_v31, 0.0  ;;  %v968_v46 = vld [vmem:[%s835_s26 + $0xc8] sm:$0xff] }
  0x30   : > { %v313_v40 = vsel %vm269_vm2, %v953_v34, 0.0  ;;  %v315_v44 = vsel %vm269_vm2, %v958_v38, 0.0 }
  0x31   : > { %v280_v52 = vadd.f32 %v279_v47, %v278_v49  ;;  %v317_v49 = vsel %vm269_vm2, %v963_v41, 0.0 }
  0x33   : > { %v282_v55 = vadd.f32 %v281_v50, %v280_v52  ;;  %v973_v50 = vld [vmem:[%s835_s26 + $0xd0] sm:$0xff] }
  0x35   : > { %v284_v58 = vadd.f32 %v283_v53, %v282_v55  ;;  %v319_v53 = vsel %vm269_vm2, %v968_v46, 0.0  ;;  %v978_v55 = vld [vmem:[%s835_s26 + $0xd8] sm:$0xff] }
  0x37   : > { %v286_v61 = vadd.f32 %v285_v56, %v284_v58  ;;  %v321_v58 = vsel %vm269_vm2, %v973_v50, 0.0 }
  0x39   : > { %v288_v0 = vadd.f32 %v287_v59, %v286_v61  ;;  %v983_v59 = vld [vmem:[%s835_s26 + $0xe0] sm:$0xff] }
  0x3b   : > { %v290_v4 = vadd.f32 %v289_v62, %v288_v0  ;;  %v323_v62 = vsel %vm269_vm2, %v978_v55, 0.0  ;;  %v988_v0 = vld [vmem:[%s835_s26 + $0xe8] sm:$0xff] }
  0x3d   : > { %v292_v7 = vadd.f32 %v291_v1, %v290_v4  ;;  %v325_v4 = vsel %vm269_vm2, %v983_v59, 0.0 }
  0x3f   : > { %v294_v10 = vadd.f32 %v293_v5, %v292_v7  ;;  %v993_v5 = vld [vmem:[%s835_s26 + $0xf0] sm:$0xff] }
  0x41   : > { %v296_v13 = vadd.f32 %v295_v8, %v294_v10  ;;  %v327_v8 = vsel %vm269_vm2, %v988_v0, 0.0  ;;  %v998_v10 = vld [vmem:[%s835_s26 + $0xf8] sm:$0xff] }
  0x43   : > { %v298_v16 = vadd.f32 %v297_v11, %v296_v13  ;;  %v329_v13 = vsel %vm269_vm2, %v993_v5, 0.0 }
  0x45   : > { %v300_v19 = vadd.f32 %v299_v14, %v298_v16  ;;  %v331_v16 = vsel %vm269_vm2, %v998_v10, 0.0 }
  0x47   : > { %v302_v24 = vadd.f32 %v301_v17, %v300_v19 }
  0x49   : > { %v304_v27 = vadd.f32 %v303_v22, %v302_v24 }
  0x4b   : > { %v306_v32 = vadd.f32 %v305_v25, %v304_v27 }
  0x4d   : > { %v308_v35 = vadd.f32 %v307_v28, %v306_v32 }
  0x4f   : > { %v310_v39 = vadd.f32 %v309_v33, %v308_v35 }
  0x51   : > { %v312_v43 = vadd.f32 %v311_v36, %v310_v39 }
  0x53   : > { %v314_v47 = vadd.f32 %v313_v40, %v312_v43 }
  0x55   : > { %v316_v52 = vadd.f32 %v315_v44, %v314_v47  ;;  %v469_v47 = vsub.s32 0, %v822_v2 }
  0x57   : > { %v318_v56 = vadd.f32 %v317_v49, %v316_v52 }
  0x59   : > { %v320_v61 = vadd.f32 %v319_v53, %v318_v56 }
  0x5b   : > { %v322_v1 = vadd.f32 %v321_v58, %v320_v61 }
  0x5d   : > { %v324_v7 = vadd.f32 %v323_v62, %v322_v1 }
  0x5f   : > { %v326_v11 = vadd.f32 %v325_v4, %v324_v7  ;;  %v237_v7 = vld [vmem:[%s1010_s29] sm:$0xff] }
  0x61   : > { %v328_v14 = vadd.f32 %v327_v8, %v326_v11  ;;  %v240_v8 = vld [vmem:[%s1010_s29 + $0x18] sm:$0xff] }
  0x63   : > { %v330_v17 = vadd.f32 %v329_v13, %v328_v14  ;;  %v244_v13 = vld [vmem:[%s1010_s29 + $0x38] sm:$0xff] }
  0x65   : > { %v332_v19 = vadd.f32 %v331_v16, %v330_v17 }
  0x67   : > { %v333_v22 = vrot.slane %v332_v19, 4 }
  0x69   : > { %v334_v24 = vadd.f32 %v333_v22, %v332_v19 }
  0x6b   : > { %v335_v25 = vrot.slane %v334_v24, 2 }
  0x6d   : > { %v336_v27 = vadd.f32 %v335_v25, %v334_v24  ;;  %v250_v25 = vld [vmem:[%s1010_s29 + $0x68] sm:$0xff] }
  0x6f   : > { %v337_v28 = vrot.slane %v336_v27, 1 }
  0x71   : > { %v338_v32 = vadd.f32 %v337_v28, %v336_v27 }
  0x73   : > { %v340_v33 = vmul.f32 0.00390625, %v338_v32  ;;  %v253_v32 = vld [vmem:[%s1010_s29 + $0x80] sm:$0xff] }
  0x75   : > { %714 = vmatmul.mubr.msk.f32.vlgmr.msra.gmra.mxu0 %vm269_vm2, %v340_v33 }
 0x135   : > { %v457_v35 = vpop.f32.mrf.mxu0 }
 0x136   : > { %v461_v36 = vsub.f32 0.0, %v457_v35 }
 0x137   : > { %v715_v39 = vpop.f32.mrf.mxu0 }
 0x138   : > { %v462_v40 = vmul.f32 1.442695, %v461_v36  ;;  %v256_v36 = vld [vmem:[%s1010_s29 + $0x98] sm:$0xff] }
 0x13a   : > { %737 = vpow2.f32 %v462_v40 }
 0x147   : > { %v738_v43 = vpop.eup %737 }
 0x148   : > { %v464_v44 = vadd.f32 1.0, %v738_v43 }
 0x14a   : > { %739 = vrcp.f32 %v464_v44  ;;  %v257_v44 = vld [vmem:[%s1010_s29 + $0xa0] sm:$0xff] }
 0x157   : > { %v740_v49 = vpop.eup %739 }
 0x158   : > { %v470_v52 = vrot.slane %v740_v49, %v469_v47 }
 0x15a   : > { %v471_v53 = vmul.f32 %v470_v52, %v838_v20  ;;  %v472_v56 = vmul.f32 %v470_v52, %v841_v21  ;;  %v473_v58 = vmul.f32 %v470_v52, %v847_v29  ;;  %v474_v61 = vmul.f32 %v470_v52, %v850_v30 }
 0x15b   : > { %v475_v2 = vmul.f32 %v470_v52, %v859_v37  ;;  %v476_v62 = vmul.f32 %v470_v52, %v867_v42  ;;  %v477_v1 = vmul.f32 %v470_v52, %v873_v45  ;;  %v478_v4 = vmul.f32 %v470_v52, %v878_v48  ;;  %v238_v37 = vld [vmem:[%s1010_s29 + $0x8] sm:$0xff]  ;;  %v239_v42 = vld [vmem:[%s1010_s29 + $0x10] sm:$0xff] }
 0x15c   : > { %v479_v20 = vmul.f32 %v470_v52, %v883_v51  ;;  %v480_v21 = vmul.f32 %v470_v52, %v888_v54  ;;  %v481_v29 = vmul.f32 %v470_v52, %v893_v57  ;;  %v482_v30 = vmul.f32 %v470_v52, %v898_v60  ;;  %v241_v54 = vld [vmem:[%s1010_s29 + $0x20] sm:$0xff]  ;;  %v242_v57 = vld [vmem:[%s1010_s29 + $0x28] sm:$0xff]  ;;  %v243_v60 = vld [vmem:[%s1010_s29 + $0x30] sm:$0xff] }
 0x15d   : > { %v483_v45 = vmul.f32 %v470_v52, %v903_v63  ;;  %v484_v48 = vmul.f32 %v470_v52, %v908_v3  ;;  %v485_v11 = vmul.f32 %v470_v52, %v913_v6  ;;  %v486_v51 = vmul.f32 %v470_v52, %v918_v9  ;;  %v245_v3 = vld [vmem:[%s1010_s29 + $0x40] sm:$0xff]  ;;  %v246_v6 = vld [vmem:[%s1010_s29 + $0x48] sm:$0xff]  ;;  %v247_v9 = vld [vmem:[%s1010_s29 + $0x50] sm:$0xff] }
 0x15e   : > { %v487_v14 = vmul.f32 %v470_v52, %v923_v12  ;;  %v488_v16 = vmul.f32 %v470_v52, %v928_v15  ;;  %v489_v17 = vmul.f32 %v470_v52, %v933_v18  ;;  %v490_v63 = vmul.f32 %v470_v52, %v938_v23  ;;  %v248_v15 = vld [vmem:[%s1010_s29 + $0x58] sm:$0xff]  ;;  %v249_v18 = vld [vmem:[%s1010_s29 + $0x60] sm:$0xff] }
 0x15f   : > { %v491_v19 = vmul.f32 %v470_v52, %v943_v26  ;;  %v492_v22 = vmul.f32 %v470_v52, %v948_v31  ;;  %v493_v24 = vmul.f32 %v470_v52, %v953_v34  ;;  %v494_v12 = vmul.f32 %v470_v52, %v958_v38  ;;  %v251_v31 = vld [vmem:[%s1010_s29 + $0x70] sm:$0xff]  ;;  %v252_v34 = vld [vmem:[%s1010_s29 + $0x78] sm:$0xff] }
 0x160   : > { %v495_v23 = vmul.f32 %v470_v52, %v963_v41  ;;  %v496_v27 = vmul.f32 %v470_v52, %v968_v46  ;;  %v497_v28 = vmul.f32 %v470_v52, %v973_v50  ;;  %v498_v26 = vmul.f32 %v470_v52, %v978_v55  ;;  %v254_v46 = vld [vmem:[%s1010_s29 + $0x88] sm:$0xff]  ;;  %v255_v50 = vld [vmem:[%s1010_s29 + $0x90] sm:$0xff] }
 0x161   : > { %v499_v38 = vmul.f32 %v470_v52, %v983_v59  ;;  %v500_v33 = vmul.f32 %v470_v52, %v988_v0  ;;  %v501_v35 = vmul.f32 %v470_v52, %v993_v5  ;;  %v502_v41 = vmul.f32 %v470_v52, %v998_v10  ;;  %v258_v59 = vld [vmem:[%s1010_s29 + $0xa8] sm:$0xff]  ;;  %v259_v0 = vld [vmem:[%s1010_s29 + $0xb0] sm:$0xff]  ;;  %v260_v52 = vld [vmem:[%s1010_s29 + $0xb8] sm:$0xff] }
 0x162   : > { %v503_v55 = vadd.f32 %v471_v53, %v237_v7  ;;  %v504_v39 = vadd.f32 %v472_v56, %v238_v37  ;;  %v505_v40 = vadd.f32 %v473_v58, %v239_v42  ;;  %v506_v43 = vadd.f32 %v474_v61, %v240_v8  ;;  %v261_v7 = vld [vmem:[%s1010_s29 + $0xc0] sm:$0xff]  ;;  %v262_v53 = vld [vmem:[%s1010_s29 + $0xc8] sm:$0xff]  ;;  %v263_v61 = vld [vmem:[%s1010_s29 + $0xd0] sm:$0xff] }
 0x163   : > { %v507_v47 = vadd.f32 %v475_v2, %v241_v54  ;;  %v508_v5 = vadd.f32 %v476_v62, %v242_v57  ;;  %v509_v49 = vadd.f32 %v477_v1, %v243_v60  ;;  %v510_v10 = vadd.f32 %v478_v4, %v244_v13  ;;  %v264_v8 = vld [vmem:[%s1010_s29 + $0xd8] sm:$0xff]  ;;  %v265_v2 = vld [vmem:[%s1010_s29 + $0xe0] sm:$0xff]  ;;  %v266_v60 = vld [vmem:[%s1010_s29 + $0xe8] sm:$0xff] }
 0x164   : > { %v511_v37 = vadd.f32 %v479_v20, %v245_v3  ;;  %v512_v56 = vadd.f32 %v480_v21, %v246_v6  ;;  %v513_v58 = vadd.f32 %v481_v29, %v247_v9  ;;  %v514_v42 = vadd.f32 %v482_v30, %v248_v15  ;;  %v267_v4 = vld [vmem:[%s1010_s29 + $0xf0] sm:$0xff]  ;;  %v268_v13 = vld [vmem:[%s1010_s29 + $0xf8] sm:$0xff] }
 0x165   : > { %v515_v54 = vadd.f32 %v483_v45, %v249_v18  ;;  %v516_v57 = vadd.f32 %v484_v48, %v250_v25  ;;  %v517_v62 = vadd.f32 %v485_v11, %v251_v31  ;;  %v518_v1 = vadd.f32 %v486_v51, %v252_v34 }
 0x166   : > { %v519_v3 = vadd.f32 %v487_v14, %v253_v32  ;;  %v520_v20 = vadd.f32 %v488_v16, %v254_v46  ;;  %v521_v6 = vadd.f32 %v489_v17, %v255_v50  ;;  %v522_v21 = vadd.f32 %v490_v63, %v256_v36 }
 0x167   : > { %v1076_v9 = vadd.f32 %v491_v19, %v257_v44  ;;  %v1078_v29 = vadd.f32 %v492_v22, %v258_v59  ;;  %v1080_v30 = vadd.f32 %v493_v24, %v259_v0  ;;  %v1082_v15 = vadd.f32 %v494_v12, %v260_v52 }
 0x168   : > { %v1084_v45 = vadd.f32 %v495_v23, %v261_v7  ;;  %v1086_v48 = vadd.f32 %v496_v27, %v262_v53  ;;  %v1088_v11 = vadd.f32 %v497_v28, %v263_v61  ;;  %v1090_v51 = vadd.f32 %v498_v26, %v264_v8 }
 0x169   : > { %v1098_v14 = vadd.f32 %v499_v38, %v265_v2  ;;  %v1100_v16 = vadd.f32 %v500_v33, %v266_v60  ;;  %v1102_v17 = vadd.f32 %v501_v35, %v267_v4  ;;  %v1104_v63 = vadd.f32 %v502_v41, %v268_v13 }
 0x16a   : > { %v535_v19 = vmax.f32 %v503_v55, 0.0  ;;  %v536_v22 = vmax.f32 %v504_v39, 0.0  ;;  %v537_v24 = vmax.f32 %v505_v40, 0.0  ;;  %v538_v12 = vmax.f32 %v506_v43, 0.0 }
 0x16b   : > { %v539_v18 = vmax.f32 %v507_v47, 0.0  ;;  %v540_v25 = vmax.f32 %v508_v5, 0.0  ;;  %v541_v23 = vmax.f32 %v509_v49, 0.0  ;;  %v542_v27 = vmax.f32 %v510_v10, 0.0 }
 0x16c   : > { %v543_v28 = vmax.f32 %v511_v37, 0.0  ;;  %v544_v26 = vmax.f32 %v512_v56, 0.0  ;;  %v545_v31 = vmax.f32 %v513_v58, 0.0  ;;  %v546_v34 = vmax.f32 %v514_v42, 0.0  ;;  %567 = vst.msk [vmem:[%s1096_s5] sm:$0xff] %vm269_vm2, %v535_v19  ;;  %568 = vst.msk [vmem:[%s1096_s5 + $0x8] sm:$0xff] %vm269_vm2, %v536_v22 }
 0x16d   : > { %569 = vst.msk [vmem:[%s1096_s5 + $0x10] sm:$0xff] %vm269_vm2, %v537_v24  ;;  %570 = vst.msk [vmem:[%s1096_s5 + $0x18] sm:$0xff] %vm269_vm2, %v538_v12  ;;  %v547_v32 = vmax.f32 %v515_v54, 0.0  ;;  %v548_v38 = vmax.f32 %v516_v57, 0.0  ;;  %v549_v33 = vmax.f32 %v517_v62, 0.0  ;;  %v550_v35 = vmax.f32 %v518_v1, 0.0 }
 0x16e   : > { %571 = vst.msk [vmem:[%s1096_s5 + $0x20] sm:$0xff] %vm269_vm2, %v539_v18  ;;  %572 = vst.msk [vmem:[%s1096_s5 + $0x28] sm:$0xff] %vm269_vm2, %v540_v25  ;;  %v551_v41 = vmax.f32 %v519_v3, 0.0  ;;  %v552_v46 = vmax.f32 %v520_v20, 0.0  ;;  %v553_v50 = vmax.f32 %v521_v6, 0.0  ;;  %v554_v36 = vmax.f32 %v522_v21, 0.0 }
 0x16f   : > { %573 = vst.msk [vmem:[%s1096_s5 + $0x30] sm:$0xff] %vm269_vm2, %v541_v23  ;;  %574 = vst.msk [vmem:[%s1096_s5 + $0x38] sm:$0xff] %vm269_vm2, %v542_v27  ;;  %v555_v55 = vmax.f32 %v1076_v9, 0.0  ;;  %v556_v39 = vmax.f32 %v1078_v29, 0.0  ;;  %v557_v40 = vmax.f32 %v1080_v30, 0.0  ;;  %v558_v43 = vmax.f32 %v1082_v15, 0.0 }
 0x170   : > { %575 = vst.msk [vmem:[%s1096_s5 + $0x40] sm:$0xff] %vm269_vm2, %v543_v28  ;;  %576 = vst.msk [vmem:[%s1096_s5 + $0x48] sm:$0xff] %vm269_vm2, %v544_v26  ;;  %v559_v44 = vmax.f32 %v1084_v45, 0.0  ;;  %v560_v59 = vmax.f32 %v1086_v48, 0.0  ;;  %v561_v0 = vmax.f32 %v1088_v11, 0.0  ;;  %v562_v47 = vmax.f32 %v1090_v51, 0.0 }
 0x171   : > { %577 = vst.msk [vmem:[%s1096_s5 + $0x50] sm:$0xff] %vm269_vm2, %v545_v31  ;;  %578 = vst.msk [vmem:[%s1096_s5 + $0x58] sm:$0xff] %vm269_vm2, %v546_v34  ;;  %v563_v5 = vmax.f32 %v1098_v14, 0.0  ;;  %v564_v49 = vmax.f32 %v1100_v16, 0.0  ;;  %v565_v10 = vmax.f32 %v1102_v17, 0.0  ;;  %v566_v52 = vmax.f32 %v1104_v63, 0.0 }
 0x172   : > { %579 = vst.msk [vmem:[%s1096_s5 + $0x60] sm:$0xff] %vm269_vm2, %v547_v32  ;;  %580 = vst.msk [vmem:[%s1096_s5 + $0x68] sm:$0xff] %vm269_vm2, %v548_v38 }
 0x173   : > { %581 = vst.msk [vmem:[%s1096_s5 + $0x70] sm:$0xff] %vm269_vm2, %v549_v33  ;;  %582 = vst.msk [vmem:[%s1096_s5 + $0x78] sm:$0xff] %vm269_vm2, %v550_v35 }
 0x174   : > { %583 = vst.msk [vmem:[%s1096_s5 + $0x80] sm:$0xff] %vm269_vm2, %v551_v41  ;;  %584 = vst.msk [vmem:[%s1096_s5 + $0x88] sm:$0xff] %vm269_vm2, %v552_v46 }
 0x175   : > { %585 = vst.msk [vmem:[%s1096_s5 + $0x90] sm:$0xff] %vm269_vm2, %v553_v50  ;;  %586 = vst.msk [vmem:[%s1096_s5 + $0x98] sm:$0xff] %vm269_vm2, %v554_v36 }
 0x176   : > { %587 = vst.msk [vmem:[%s1096_s5 + $0xa0] sm:$0xff] %vm269_vm2, %v555_v55  ;;  %588 = vst.msk [vmem:[%s1096_s5 + $0xa8] sm:$0xff] %vm269_vm2, %v556_v39 }
 0x177   : > { %589 = vst.msk [vmem:[%s1096_s5 + $0xb0] sm:$0xff] %vm269_vm2, %v557_v40  ;;  %590 = vst.msk [vmem:[%s1096_s5 + $0xb8] sm:$0xff] %vm269_vm2, %v558_v43 }
 0x178   : > { %591 = vst.msk [vmem:[%s1096_s5 + $0xc0] sm:$0xff] %vm269_vm2, %v559_v44  ;;  %592 = vst.msk [vmem:[%s1096_s5 + $0xc8] sm:$0xff] %vm269_vm2, %v560_v59 }
 0x179   : > { %593 = vst.msk [vmem:[%s1096_s5 + $0xd0] sm:$0xff] %vm269_vm2, %v561_v0  ;;  %594 = vst.msk [vmem:[%s1096_s5 + $0xd8] sm:$0xff] %vm269_vm2, %v562_v47 }
 0x17a   : > { %595 = vst.msk [vmem:[%s1096_s5 + $0xe0] sm:$0xff] %vm269_vm2, %v563_v5  ;;  %596 = vst.msk [vmem:[%s1096_s5 + $0xe8] sm:$0xff] %vm269_vm2, %v564_v49 }
 0x17b   : > { %597 = vst.msk [vmem:[%s1096_s5 + $0xf0] sm:$0xff] %vm269_vm2, %v565_v10  ;;  %598 = vst.msk [vmem:[%s1096_s5 + $0xf8] sm:$0xff] %vm269_vm2, %v566_v52 }
 0x17c PF: > { %s14_s12 = sadd.s32 1, %s766_s12  }
 0x17d   : > { %p11_p1 = scmp.ge.s32.totalorder %s14_s12, 4  }
 0x17f   :  { %13 = sbr.rel (!%p11_p1) target bundleno = 1 (0x1), region = 70 }
 0x184   :  { %620 = vsyncpa [#allocation3], 1 }
 0x185   :  { %622 = vsyncpa [#allocation3 + $0x1], 1 }

// kernel: forward.7
= control target key start
LH: loop header
LB: loop body
LE: loop exit
PB: predicated region body
PF: predicated region fallthrough
CT: control target
= control target key end

     0   :  { %s2314_s15 = smov 0   ;;  %s2316_s16 = smov 0   ;;  %s3506_s0 = inlined_call_operand.vmem [shape: bf16[9,512,32], index: 0, kind: input, shape index: {}]   ;;  %s3507_s1 = inlined_call_operand.vmem [shape: bf16[9,32,32], index: 1, kind: input, shape index: {}]   ;;  %s3508_s2 = inlined_call_operand.vmem [shape: f32[1,32], index: 2, kind: input, shape index: {}]   ;;  %s3509_s3 = inlined_call_operand.vmem [shape: f32[1,32], index: 3, kind: input, shape index: {}]   ;;  %s3510_s4 = inlined_call_operand.vmem [shape: f32[512,32], index: 4, kind: output, shape index: {}]  }
   0x1   :  { %s2318_s17 = smov 0  }
   0x2 LB: > { %s23_s18 = sadd.s32 1, %s2282_s16  ;;  %p2001_p0 = scmp.ge.s32.totalorder %s2286_s17, 1  ;;  %s2286_s17 = sphi %s2318_s17, %s14_s17   ;;  %s2282_s16 = sphi %s2316_s16, %s3575_s16   ;;  %s2278_s15 = sphi %s2314_s15, %s3574_s15  }
   0x3   : > { %p24_p1 = scmp.ge.s32.totalorder %s23_s18, 9  ;;  %p205_p2 = scmp.lt.s32.totalorder %s2286_s17, 10 }
   0x5   : > { %s3577_s18 = smov (%p24_p1, %s23_s18), 0  ;;  %p206_p3 = pnand %p2001_p0, %p205_p2 }
   0x6   : > { %p244_p4 = scmp.lt.s32.totalorder (!%p206_p3), %s2278_s15, 8  ;;  %p2006_p5 = scmp.ne.s32.totalorder (!%p206_p3), %s2278_s15, 0 }
   0x7   : > { %209 = sbr.rel (%p206_p3) target bundleno = 679 (0x2a7), region = 36 }
   0xc   : > { %s245_s19 = scalar_select %p244_p4, %s2278_s15, 8 }
   0xd   : > { %271 = sbr.rel (%p2006_p5) target bundleno = 51 (0x33), region = 40 }
   0xe   : > { %s2077_s20 = sshll.u32 %s245_s19, 8  ;;  %s2078_s21 = sshll.u32 %s245_s19, 4 }
   0xf   : > { %s2339_s24 = scalar_lea.vmem %s3506_s0, %s2077_s20  ;;  %s2344_s27 = scalar_lea.vmem %s3507_s1, %s2078_s21 }
  0x12   : > { %vm272_vm0 = vcmask 261120   ;;  %v2288_v0 = vmov 0.0  }
  0x13   : > { %273 = vst.msk [vmem:[#allocation2] sm:$0xff] %vm272_vm0, %v2288_v0  ;;  %274 = vst.msk [vmem:[#allocation2 + $0x8] sm:$0xff] %vm272_vm0, %v2288_v0 }
  0x14   : > { %275 = vst.msk [vmem:[#allocation2 + $0x10] sm:$0xff] %vm272_vm0, %v2288_v0  ;;  %276 = vst.msk [vmem:[#allocation2 + $0x18] sm:$0xff] %vm272_vm0, %v2288_v0 }
  0x15   : > { %277 = vst.msk [vmem:[#allocation2 + $0x20] sm:$0xff] %vm272_vm0, %v2288_v0  ;;  %278 = vst.msk [vmem:[#allocation2 + $0x28] sm:$0xff] %vm272_vm0, %v2288_v0 }
  0x16   : > { %279 = vst.msk [vmem:[#allocation2 + $0x30] sm:$0xff] %vm272_vm0, %v2288_v0  ;;  %280 = vst.msk [vmem:[#allocation2 + $0x38] sm:$0xff] %vm272_vm0, %v2288_v0 }
  0x17   : > { %281 = vst.msk [vmem:[#allocation2 + $0x40] sm:$0xff] %vm272_vm0, %v2288_v0  ;;  %282 = vst.msk [vmem:[#allocation2 + $0x48] sm:$0xff] %vm272_vm0, %v2288_v0 }
  0x18   : > { %283 = vst.msk [vmem:[#allocation2 + $0x50] sm:$0xff] %vm272_vm0, %v2288_v0  ;;  %284 = vst.msk [vmem:[#allocation2 + $0x58] sm:$0xff] %vm272_vm0, %v2288_v0 }
  0x19   : > { %285 = vst.msk [vmem:[#allocation2 + $0x60] sm:$0xff] %vm272_vm0, %v2288_v0  ;;  %286 = vst.msk [vmem:[#allocation2 + $0x68] sm:$0xff] %vm272_vm0, %v2288_v0 }
  0x1a   : > { %287 = vst.msk [vmem:[#allocation2 + $0x70] sm:$0xff] %vm272_vm0, %v2288_v0  ;;  %288 = vst.msk [vmem:[#allocation2 + $0x78] sm:$0xff] %vm272_vm0, %v2288_v0 }
  0x1b   : > { %289 = vst.msk [vmem:[#allocation2 + $0x80] sm:$0xff] %vm272_vm0, %v2288_v0  ;;  %290 = vst.msk [vmem:[#allocation2 + $0x88] sm:$0xff] %vm272_vm0, %v2288_v0 }
  0x1c   : > { %291 = vst.msk [vmem:[#allocation2 + $0x90] sm:$0xff] %vm272_vm0, %v2288_v0  ;;  %292 = vst.msk [vmem:[#allocation2 + $0x98] sm:$0xff] %vm272_vm0, %v2288_v0 }
  0x1d   : > { %293 = vst.msk [vmem:[#allocation2 + $0xa0] sm:$0xff] %vm272_vm0, %v2288_v0  ;;  %294 = vst.msk [vmem:[#allocation2 + $0xa8] sm:$0xff] %vm272_vm0, %v2288_v0 }
  0x1e   : > { %295 = vst.msk [vmem:[#allocation2 + $0xb0] sm:$0xff] %vm272_vm0, %v2288_v0  ;;  %296 = vst.msk [vmem:[#allocation2 + $0xb8] sm:$0xff] %vm272_vm0, %v2288_v0 }
  0x1f   : > { %297 = vst.msk [vmem:[#allocation2 + $0xc0] sm:$0xff] %vm272_vm0, %v2288_v0  ;;  %298 = vst.msk [vmem:[#allocation2 + $0xc8] sm:$0xff] %vm272_vm0, %v2288_v0 }
  0x20   : > { %299 = vst.msk [vmem:[#allocation2 + $0xd0] sm:$0xff] %vm272_vm0, %v2288_v0  ;;  %300 = vst.msk [vmem:[#allocation2 + $0xd8] sm:$0xff] %vm272_vm0, %v2288_v0 }
  0x21   : > { %301 = vst.msk [vmem:[#allocation2 + $0xe0] sm:$0xff] %vm272_vm0, %v2288_v0  ;;  %302 = vst.msk [vmem:[#allocation2 + $0xe8] sm:$0xff] %vm272_vm0, %v2288_v0 }
  0x22   : > { %303 = vst.msk [vmem:[#allocation2 + $0xf0] sm:$0xff] %vm272_vm0, %v2288_v0  ;;  %304 = vst.msk [vmem:[#allocation2 + $0xf8] sm:$0xff] %vm272_vm0, %v2288_v0 }
  0x23   : > { %305 = vst.msk [vmem:[#allocation2 + $0x100] sm:$0xff] %vm272_vm0, %v2288_v0  ;;  %306 = vst.msk [vmem:[#allocation2 + $0x108] sm:$0xff] %vm272_vm0, %v2288_v0 }
  0x24   : > { %307 = vst.msk [vmem:[#allocation2 + $0x110] sm:$0xff] %vm272_vm0, %v2288_v0  ;;  %308 = vst.msk [vmem:[#allocation2 + $0x118] sm:$0xff] %vm272_vm0, %v2288_v0 }
  0x25   : > { %309 = vst.msk [vmem:[#allocation2 + $0x120] sm:$0xff] %vm272_vm0, %v2288_v0  ;;  %310 = vst.msk [vmem:[#allocation2 + $0x128] sm:$0xff] %vm272_vm0, %v2288_v0 }
  0x26   : > { %311 = vst.msk [vmem:[#allocation2 + $0x130] sm:$0xff] %vm272_vm0, %v2288_v0  ;;  %312 = vst.msk [vmem:[#allocation2 + $0x138] sm:$0xff] %vm272_vm0, %v2288_v0 }
  0x27   : > { %313 = vst.msk [vmem:[#allocation2 + $0x140] sm:$0xff] %vm272_vm0, %v2288_v0  ;;  %314 = vst.msk [vmem:[#allocation2 + $0x148] sm:$0xff] %vm272_vm0, %v2288_v0 }
  0x28   : > { %315 = vst.msk [vmem:[#allocation2 + $0x150] sm:$0xff] %vm272_vm0, %v2288_v0  ;;  %316 = vst.msk [vmem:[#allocation2 + $0x158] sm:$0xff] %vm272_vm0, %v2288_v0 }
  0x29   : > { %317 = vst.msk [vmem:[#allocation2 + $0x160] sm:$0xff] %vm272_vm0, %v2288_v0  ;;  %318 = vst.msk [vmem:[#allocation2 + $0x168] sm:$0xff] %vm272_vm0, %v2288_v0 }
  0x2a   : > { %319 = vst.msk [vmem:[#allocation2 + $0x170] sm:$0xff] %vm272_vm0, %v2288_v0  ;;  %320 = vst.msk [vmem:[#allocation2 + $0x178] sm:$0xff] %vm272_vm0, %v2288_v0 }
  0x2b   : > { %321 = vst.msk [vmem:[#allocation2 + $0x180] sm:$0xff] %vm272_vm0, %v2288_v0  ;;  %322 = vst.msk [vmem:[#allocation2 + $0x188] sm:$0xff] %vm272_vm0, %v2288_v0 }
  0x2c   : > { %323 = vst.msk [vmem:[#allocation2 + $0x190] sm:$0xff] %vm272_vm0, %v2288_v0  ;;  %324 = vst.msk [vmem:[#allocation2 + $0x198] sm:$0xff] %vm272_vm0, %v2288_v0 }
  0x2d   : > { %325 = vst.msk [vmem:[#allocation2 + $0x1a0] sm:$0xff] %vm272_vm0, %v2288_v0  ;;  %326 = vst.msk [vmem:[#allocation2 + $0x1a8] sm:$0xff] %vm272_vm0, %v2288_v0 }
  0x2e   : > { %327 = vst.msk [vmem:[#allocation2 + $0x1b0] sm:$0xff] %vm272_vm0, %v2288_v0  ;;  %328 = vst.msk [vmem:[#allocation2 + $0x1b8] sm:$0xff] %vm272_vm0, %v2288_v0 }
  0x2f   : > { %329 = vst.msk [vmem:[#allocation2 + $0x1c0] sm:$0xff] %vm272_vm0, %v2288_v0  ;;  %330 = vst.msk [vmem:[#allocation2 + $0x1c8] sm:$0xff] %vm272_vm0, %v2288_v0 }
  0x30   : > { %331 = vst.msk [vmem:[#allocation2 + $0x1d0] sm:$0xff] %vm272_vm0, %v2288_v0  ;;  %332 = vst.msk [vmem:[#allocation2 + $0x1d8] sm:$0xff] %vm272_vm0, %v2288_v0 }
  0x31   : > { %333 = vst.msk [vmem:[#allocation2 + $0x1e0] sm:$0xff] %vm272_vm0, %v2288_v0  ;;  %334 = vst.msk [vmem:[#allocation2 + $0x1e8] sm:$0xff] %vm272_vm0, %v2288_v0 }
  0x32   : > { %335 = vst.msk [vmem:[#allocation2 + $0x1f0] sm:$0xff] %vm272_vm0, %v2288_v0  ;;  %336 = vst.msk [vmem:[#allocation2 + $0x1f8] sm:$0xff] %vm272_vm0, %v2288_v0 }
  0x33 PF: > { %v2210_v1 = vld [vmem:[%s2344_s27 + $0x8] sm:$0xff]   ;;  %v2211_v2 = vld [vmem:[%s2344_s27] sm:$0xff]   ;;  %vm641_vm1 = vcmask 261120   ;;  %v2216_v7 = vld [vmem:[%s2339_s24 + $0x10] sm:$0xff]   ;;  %p2073_p6 = scmp.ne.s32.totalorder %s2278_s15, 8 }
  0x34   : > { %2113 = vmatprep.subr.bf16.mxu0 %v2210_v1  ;;  %2181 = vmatprep.subr.bf16.mxu1 %v2210_v1  ;;  %v2212_v3 = vld [vmem:[%s2339_s24] sm:$0xff]   ;;  %v2214_v5 = vld [vmem:[%s2339_s24 + $0x8] sm:$0xff]   ;;  %v2217_v8 = vld [vmem:[%s2339_s24 + $0x90] sm:$0xff]  }
  0x35   : > { %2114 = vmatpush3.bf16.msra.mxu0 %v2210_v1  ;;  %2183 = vmatpush3.bf16.msra.mxu1 %v2210_v1  ;;  %v2213_v4 = vld [vmem:[%s2339_s24 + $0x80] sm:$0xff]   ;;  %v2215_v6 = vld [vmem:[%s2339_s24 + $0x88] sm:$0xff]   ;;  %v2218_v9 = vld [vmem:[%s2339_s24 + $0x18] sm:$0xff]  }
  0x36   : > { %2115 = vmatprep.subr.bf16.mxu0 %v2211_v2  ;;  %2182 = vmatprep.subr.bf16.mxu1 %v2211_v2  ;;  %v2219_v10 = vld [vmem:[%s2339_s24 + $0x98] sm:$0xff]   ;;  %v2220_v11 = vld [vmem:[%s2339_s24 + $0x20] sm:$0xff]   ;;  %v2222_v13 = vld [vmem:[%s2339_s24 + $0x28] sm:$0xff]  }
  0x37   : > { %2117 = vmatprep.mubr.msk.bf16.mxu0 %vm641_vm1, %v2212_v3  ;;  %2149 = vmatprep.mubr.msk.bf16.mxu1 %vm641_vm1, %v2213_v4  ;;  %v2221_v12 = vld [vmem:[%s2339_s24 + $0xa0] sm:$0xff]   ;;  %v2223_v14 = vld [vmem:[%s2339_s24 + $0xa8] sm:$0xff]   ;;  %v2224_v15 = vld [vmem:[%s2339_s24 + $0x30] sm:$0xff]  }
  0x38   : > { %v2225_v16 = vld [vmem:[%s2339_s24 + $0xb0] sm:$0xff]   ;;  %v2226_v17 = vld [vmem:[%s2339_s24 + $0x38] sm:$0xff]   ;;  %v2228_v19 = vld [vmem:[%s2339_s24 + $0x40] sm:$0xff]  }
  0x39   : > { %2116 = vmatpush3.bf16.msra.mxu0 %v2211_v2  ;;  %2184 = vmatpush3.bf16.msra.mxu1 %v2211_v2  ;;  %v2227_v18 = vld [vmem:[%s2339_s24 + $0xb8] sm:$0xff]   ;;  %v2229_v20 = vld [vmem:[%s2339_s24 + $0xc0] sm:$0xff]   ;;  %v2230_v21 = vld [vmem:[%s2339_s24 + $0x48] sm:$0xff]  }
  0x3a   : > { %v2231_v22 = vld [vmem:[%s2339_s24 + $0xc8] sm:$0xff]   ;;  %v2232_v23 = vld [vmem:[%s2339_s24 + $0x50] sm:$0xff]   ;;  %v2234_v25 = vld [vmem:[%s2339_s24 + $0x58] sm:$0xff]  }
  0x3b   : > { %v2233_v24 = vld [vmem:[%s2339_s24 + $0xd0] sm:$0xff]   ;;  %v2235_v26 = vld [vmem:[%s2339_s24 + $0xd8] sm:$0xff]   ;;  %v2236_v27 = vld [vmem:[%s2339_s24 + $0x60] sm:$0xff]  }
  0x3c   : > { %2118 = vmatmul.mubr.msk.bf16.vlgmr.msra.gmra.mxu0 %vm641_vm1, %v2214_v5  ;;  %2150 = vmatmul.mubr.msk.bf16.vlgmr.msra.gmra.mxu1 %vm641_vm1, %v2215_v6  ;;  %v2237_v28 = vld [vmem:[%s2339_s24 + $0xe0] sm:$0xff]   ;;  %v2238_v29 = vld [vmem:[%s2339_s24 + $0x68] sm:$0xff]   ;;  %v2240_v31 = vld [vmem:[%s2339_s24 + $0x70] sm:$0xff]  }
  0x3d   : > { %2121 = vmatprep.mubr.msk.bf16.mxu0 %vm641_vm1, %v2216_v7  ;;  %2153 = vmatprep.mubr.msk.bf16.mxu1 %vm641_vm1, %v2217_v8  ;;  %v2239_v30 = vld [vmem:[%s2339_s24 + $0xe8] sm:$0xff]   ;;  %v2241_v32 = vld [vmem:[%s2339_s24 + $0xf0] sm:$0xff]   ;;  %v2242_v33 = vld [vmem:[%s2339_s24 + $0x78] sm:$0xff]  }
  0x3e   : > { %v2243_v34 = vld [vmem:[%s2339_s24 + $0xf8] sm:$0xff]   ;;  %v339_v35 = vld [vmem:[#allocation2 + $0x10] sm:$0xff]  ;;  %v337_v39 = vld [vmem:[#allocation2] sm:$0xff] }
  0x3f   : > { %v371_v36 = vld [vmem:[#allocation2 + $0x110] sm:$0xff]  ;;  %v369_v40 = vld [vmem:[#allocation2 + $0x100] sm:$0xff]  ;;  %v340_v45 = vld [vmem:[#allocation2 + $0x18] sm:$0xff] }
  0x40   : > { %v372_v46 = vld [vmem:[#allocation2 + $0x118] sm:$0xff]  ;;  %v338_v51 = vld [vmem:[#allocation2 + $0x8] sm:$0xff]  ;;  %v343_v57 = vld [vmem:[#allocation2 + $0x30] sm:$0xff] }
  0x41   : > { %v370_v52 = vld [vmem:[#allocation2 + $0x108] sm:$0xff]  ;;  %v375_v58 = vld [vmem:[#allocation2 + $0x130] sm:$0xff]  ;;  %v341_v63 = vld [vmem:[#allocation2 + $0x20] sm:$0xff] }
  0x42   : > { %v373_v0 = vld [vmem:[#allocation2 + $0x120] sm:$0xff]  ;;  %v344_v5 = vld [vmem:[#allocation2 + $0x38] sm:$0xff] }
  0x43   : > { %v376_v6 = vld [vmem:[#allocation2 + $0x138] sm:$0xff] }
  0x44   : > { %2122 = vmatmul.mubr.msk.bf16.gmra.mxu0 %vm641_vm1, %v2218_v9  ;;  %2154 = vmatmul.mubr.msk.bf16.gmra.mxu1 %vm641_vm1, %v2219_v10 }
  0x45   : > { %2125 = vmatprep.mubr.msk.bf16.mxu0 %vm641_vm1, %v2220_v11  ;;  %2157 = vmatprep.mubr.msk.bf16.mxu1 %vm641_vm1, %v2221_v12  ;;  %v342_v11 = vld [vmem:[#allocation2 + $0x28] sm:$0xff] }
  0x46   : > { %v374_v12 = vld [vmem:[#allocation2 + $0x128] sm:$0xff] }
  0x4c   : > { %2126 = vmatmul.mubr.msk.bf16.gmra.mxu0 %vm641_vm1, %v2222_v13  ;;  %2158 = vmatmul.mubr.msk.bf16.gmra.mxu1 %vm641_vm1, %v2223_v14 }
  0x4d   : > { %2129 = vmatprep.mubr.msk.bf16.mxu0 %vm641_vm1, %v2224_v15  ;;  %2161 = vmatprep.mubr.msk.bf16.mxu1 %vm641_vm1, %v2225_v16 }
  0x54   : > { %2130 = vmatmul.mubr.msk.bf16.gmra.mxu0 %vm641_vm1, %v2226_v17  ;;  %2162 = vmatmul.mubr.msk.bf16.gmra.mxu1 %vm641_vm1, %v2227_v18  ;;  %v347_v17 = vld [vmem:[#allocation2 + $0x50] sm:$0xff] }
  0x55   : > { %2133 = vmatprep.mubr.msk.bf16.mxu0 %vm641_vm1, %v2228_v19  ;;  %2165 = vmatprep.mubr.msk.bf16.mxu1 %vm641_vm1, %v2229_v20  ;;  %v379_v18 = vld [vmem:[#allocation2 + $0x150] sm:$0xff] }
  0x5c   : > { %2134 = vmatmul.mubr.msk.bf16.gmra.mxu0 %vm641_vm1, %v2230_v21  ;;  %2166 = vmatmul.mubr.msk.bf16.gmra.mxu1 %vm641_vm1, %v2231_v22 }
  0x5d   : > { %2137 = vmatprep.mubr.msk.bf16.mxu0 %vm641_vm1, %v2232_v23  ;;  %2169 = vmatprep.mubr.msk.bf16.mxu1 %vm641_vm1, %v2233_v24  ;;  %v345_v23 = vld [vmem:[#allocation2 + $0x40] sm:$0xff] }
  0x5e   : > { %v377_v24 = vld [vmem:[#allocation2 + $0x140] sm:$0xff] }
  0x64   : > { %2138 = vmatmul.mubr.msk.bf16.gmra.mxu0 %vm641_vm1, %v2234_v25  ;;  %2170 = vmatmul.mubr.msk.bf16.gmra.mxu1 %vm641_vm1, %v2235_v26 }
  0x65   : > { %2141 = vmatprep.mubr.msk.bf16.mxu0 %vm641_vm1, %v2236_v27  ;;  %2173 = vmatprep.mubr.msk.bf16.mxu1 %vm641_vm1, %v2237_v28 }
  0x6c   : > { %2142 = vmatmul.mubr.msk.bf16.gmra.mxu0 %vm641_vm1, %v2238_v29  ;;  %2174 = vmatmul.mubr.msk.bf16.gmra.mxu1 %vm641_vm1, %v2239_v30  ;;  %v348_v29 = vld [vmem:[#allocation2 + $0x58] sm:$0xff] }
  0x6d   : > { %2145 = vmatprep.mubr.msk.bf16.mxu0 %vm641_vm1, %v2240_v31  ;;  %2177 = vmatprep.mubr.msk.bf16.mxu1 %vm641_vm1, %v2241_v32  ;;  %v380_v30 = vld [vmem:[#allocation2 + $0x158] sm:$0xff] }
  0x74   : > { %2146 = vmatmul.mubr.msk.bf16.gmra.mxu0 %vm641_vm1, %v2242_v33  ;;  %2178 = vmatmul.mubr.msk.bf16.gmra.mxu1 %vm641_vm1, %v2243_v34 }
  0xfc   : > { %v2119_v37 = vpop.f32.mrf.mxu0  ;;  %v2151_v38 = vpop.f32.mrf.mxu1 }
  0xfd   : > { %v1029_v41 = vadd.f32 %v2119_v37, %v339_v35  ;;  %v1061_v42 = vadd.f32 %v2151_v38, %v371_v36  ;;  %v346_v35 = vld [vmem:[#allocation2 + $0x48] sm:$0xff] }
  0xfe   : > { %v772_v43 = vpop.f32.mrf.mxu0  ;;  %v900_v44 = vpop.f32.mrf.mxu1  ;;  %v378_v36 = vld [vmem:[#allocation2 + $0x148] sm:$0xff] }
  0xff   : > { %1093 = vst.msk [vmem:[#allocation2 + $0x10] sm:$0xff] %vm641_vm1, %v1029_v41  ;;  %1125 = vst.msk [vmem:[#allocation2 + $0x110] sm:$0xff] %vm641_vm1, %v1061_v42  ;;  %v1027_v47 = vadd.f32 %v772_v43, %v337_v39  ;;  %v1059_v48 = vadd.f32 %v900_v44, %v369_v40  ;;  %v351_v41 = vld [vmem:[#allocation2 + $0x70] sm:$0xff] }
 0x100   : > { %v2120_v49 = vpop.f32.mrf.mxu0  ;;  %v2152_v50 = vpop.f32.mrf.mxu1  ;;  %v383_v42 = vld [vmem:[#allocation2 + $0x170] sm:$0xff] }
 0x101   : > { %1091 = vst.msk [vmem:[#allocation2] sm:$0xff] %vm641_vm1, %v1027_v47  ;;  %1123 = vst.msk [vmem:[#allocation2 + $0x100] sm:$0xff] %vm641_vm1, %v1059_v48  ;;  %v1030_v53 = vadd.f32 %v2120_v49, %v340_v45  ;;  %v1062_v54 = vadd.f32 %v2152_v50, %v372_v46  ;;  %v349_v47 = vld [vmem:[#allocation2 + $0x60] sm:$0xff] }
 0x102   : > { %v775_v55 = vpop.f32.mrf.mxu0  ;;  %v903_v56 = vpop.f32.mrf.mxu1  ;;  %v381_v48 = vld [vmem:[#allocation2 + $0x160] sm:$0xff] }
 0x103   : > { %1094 = vst.msk [vmem:[#allocation2 + $0x18] sm:$0xff] %vm641_vm1, %v1030_v53  ;;  %1126 = vst.msk [vmem:[#allocation2 + $0x118] sm:$0xff] %vm641_vm1, %v1062_v54  ;;  %v1028_v59 = vadd.f32 %v775_v55, %v338_v51  ;;  %v1060_v60 = vadd.f32 %v903_v56, %v370_v52  ;;  %v352_v53 = vld [vmem:[#allocation2 + $0x78] sm:$0xff] }
 0x104   : > { %v2123_v61 = vpop.f32.mrf.mxu0  ;;  %v2155_v62 = vpop.f32.mrf.mxu1  ;;  %v384_v54 = vld [vmem:[#allocation2 + $0x178] sm:$0xff] }
 0x105   : > { %1092 = vst.msk [vmem:[#allocation2 + $0x8] sm:$0xff] %vm641_vm1, %v1028_v59  ;;  %1124 = vst.msk [vmem:[#allocation2 + $0x108] sm:$0xff] %vm641_vm1, %v1060_v60  ;;  %v1033_v1 = vadd.f32 %v2123_v61, %v343_v57  ;;  %v1065_v2 = vadd.f32 %v2155_v62, %v375_v58  ;;  %v350_v59 = vld [vmem:[#allocation2 + $0x68] sm:$0xff] }
 0x106   : > { %v788_v3 = vpop.f32.mrf.mxu0  ;;  %v916_v4 = vpop.f32.mrf.mxu1  ;;  %v382_v60 = vld [vmem:[#allocation2 + $0x168] sm:$0xff] }
 0x107   : > { %1097 = vst.msk [vmem:[#allocation2 + $0x30] sm:$0xff] %vm641_vm1, %v1033_v1  ;;  %1129 = vst.msk [vmem:[#allocation2 + $0x130] sm:$0xff] %vm641_vm1, %v1065_v2  ;;  %v1031_v7 = vadd.f32 %v788_v3, %v341_v63  ;;  %v1063_v8 = vadd.f32 %v916_v4, %v373_v0  ;;  %v355_v1 = vld [vmem:[#allocation2 + $0x90] sm:$0xff] }
 0x108   : > { %v2124_v9 = vpop.f32.mrf.mxu0  ;;  %v2156_v10 = vpop.f32.mrf.mxu1  ;;  %v387_v2 = vld [vmem:[#allocation2 + $0x190] sm:$0xff] }
 0x109   : > { %1095 = vst.msk [vmem:[#allocation2 + $0x20] sm:$0xff] %vm641_vm1, %v1031_v7  ;;  %1127 = vst.msk [vmem:[#allocation2 + $0x120] sm:$0xff] %vm641_vm1, %v1063_v8  ;;  %v1034_v13 = vadd.f32 %v2124_v9, %v344_v5  ;;  %v1066_v14 = vadd.f32 %v2156_v10, %v376_v6  ;;  %v353_v7 = vld [vmem:[#allocation2 + $0x80] sm:$0xff] }
 0x10a   : > { %v791_v15 = vpop.f32.mrf.mxu0  ;;  %v919_v16 = vpop.f32.mrf.mxu1  ;;  %v385_v8 = vld [vmem:[#allocation2 + $0x180] sm:$0xff] }
 0x10b   : > { %1098 = vst.msk [vmem:[#allocation2 + $0x38] sm:$0xff] %vm641_vm1, %v1034_v13  ;;  %1130 = vst.msk [vmem:[#allocation2 + $0x138] sm:$0xff] %vm641_vm1, %v1066_v14  ;;  %v1032_v19 = vadd.f32 %v791_v15, %v342_v11  ;;  %v1064_v20 = vadd.f32 %v919_v16, %v374_v12  ;;  %v356_v13 = vld [vmem:[#allocation2 + $0x98] sm:$0xff] }
 0x10c   : > { %v2127_v21 = vpop.f32.mrf.mxu0  ;;  %v2159_v22 = vpop.f32.mrf.mxu1  ;;  %v388_v14 = vld [vmem:[#allocation2 + $0x198] sm:$0xff] }
 0x10d   : > { %1096 = vst.msk [vmem:[#allocation2 + $0x28] sm:$0xff] %vm641_vm1, %v1032_v19  ;;  %1128 = vst.msk [vmem:[#allocation2 + $0x128] sm:$0xff] %vm641_vm1, %v1064_v20  ;;  %v1037_v25 = vadd.f32 %v2127_v21, %v347_v17  ;;  %v1069_v26 = vadd.f32 %v2159_v22, %v379_v18  ;;  %v354_v19 = vld [vmem:[#allocation2 + $0x88] sm:$0xff] }
 0x10e   : > { %v804_v27 = vpop.f32.mrf.mxu0  ;;  %v932_v28 = vpop.f32.mrf.mxu1  ;;  %v386_v20 = vld [vmem:[#allocation2 + $0x188] sm:$0xff] }
 0x10f   : > { %1101 = vst.msk [vmem:[#allocation2 + $0x50] sm:$0xff] %vm641_vm1, %v1037_v25  ;;  %1133 = vst.msk [vmem:[#allocation2 + $0x150] sm:$0xff] %vm641_vm1, %v1069_v26  ;;  %v1035_v31 = vadd.f32 %v804_v27, %v345_v23  ;;  %v1067_v32 = vadd.f32 %v932_v28, %v377_v24  ;;  %v359_v25 = vld [vmem:[#allocation2 + $0xb0] sm:$0xff] }
 0x110   : > { %v2128_v33 = vpop.f32.mrf.mxu0  ;;  %v2160_v34 = vpop.f32.mrf.mxu1  ;;  %v391_v26 = vld [vmem:[#allocation2 + $0x1b0] sm:$0xff] }
 0x111   : > { %1099 = vst.msk [vmem:[#allocation2 + $0x40] sm:$0xff] %vm641_vm1, %v1035_v31  ;;  %1131 = vst.msk [vmem:[#allocation2 + $0x140] sm:$0xff] %vm641_vm1, %v1067_v32  ;;  %v1038_v37 = vadd.f32 %v2128_v33, %v348_v29  ;;  %v1070_v38 = vadd.f32 %v2160_v34, %v380_v30  ;;  %v357_v31 = vld [vmem:[#allocation2 + $0xa0] sm:$0xff] }
 0x112   : > { %v807_v39 = vpop.f32.mrf.mxu0  ;;  %v935_v40 = vpop.f32.mrf.mxu1  ;;  %v389_v32 = vld [vmem:[#allocation2 + $0x1a0] sm:$0xff] }
 0x113   : > { %1102 = vst.msk [vmem:[#allocation2 + $0x58] sm:$0xff] %vm641_vm1, %v1038_v37  ;;  %1134 = vst.msk [vmem:[#allocation2 + $0x158] sm:$0xff] %vm641_vm1, %v1070_v38  ;;  %v1036_v43 = vadd.f32 %v807_v39, %v346_v35  ;;  %v1068_v44 = vadd.f32 %v935_v40, %v378_v36  ;;  %v360_v37 = vld [vmem:[#allocation2 + $0xb8] sm:$0xff] }
 0x114   : > { %v2131_v45 = vpop.f32.mrf.mxu0  ;;  %v2163_v46 = vpop.f32.mrf.mxu1  ;;  %v392_v38 = vld [vmem:[#allocation2 + $0x1b8] sm:$0xff] }
 0x115   : > { %1100 = vst.msk [vmem:[#allocation2 + $0x48] sm:$0xff] %vm641_vm1, %v1036_v43  ;;  %1132 = vst.msk [vmem:[#allocation2 + $0x148] sm:$0xff] %vm641_vm1, %v1068_v44  ;;  %v1041_v49 = vadd.f32 %v2131_v45, %v351_v41  ;;  %v1073_v50 = vadd.f32 %v2163_v46, %v383_v42  ;;  %v358_v43 = vld [vmem:[#allocation2 + $0xa8] sm:$0xff] }
 0x116   : > { %v820_v51 = vpop.f32.mrf.mxu0  ;;  %v948_v52 = vpop.f32.mrf.mxu1  ;;  %v390_v44 = vld [vmem:[#allocation2 + $0x1a8] sm:$0xff] }
 0x117   : > { %1105 = vst.msk [vmem:[#allocation2 + $0x70] sm:$0xff] %vm641_vm1, %v1041_v49  ;;  %1137 = vst.msk [vmem:[#allocation2 + $0x170] sm:$0xff] %vm641_vm1, %v1073_v50  ;;  %v1039_v55 = vadd.f32 %v820_v51, %v349_v47  ;;  %v1071_v56 = vadd.f32 %v948_v52, %v381_v48  ;;  %v363_v49 = vld [vmem:[#allocation2 + $0xd0] sm:$0xff] }
 0x118   : > { %v2132_v57 = vpop.f32.mrf.mxu0  ;;  %v2164_v58 = vpop.f32.mrf.mxu1  ;;  %v395_v50 = vld [vmem:[#allocation2 + $0x1d0] sm:$0xff] }
 0x119   : > { %1103 = vst.msk [vmem:[#allocation2 + $0x60] sm:$0xff] %vm641_vm1, %v1039_v55  ;;  %1135 = vst.msk [vmem:[#allocation2 + $0x160] sm:$0xff] %vm641_vm1, %v1071_v56  ;;  %v1042_v61 = vadd.f32 %v2132_v57, %v352_v53  ;;  %v1074_v62 = vadd.f32 %v2164_v58, %v384_v54  ;;  %v361_v55 = vld [vmem:[#allocation2 + $0xc0] sm:$0xff] }
 0x11a   : > { %v823_v63 = vpop.f32.mrf.mxu0  ;;  %v951_v0 = vpop.f32.mrf.mxu1  ;;  %v393_v56 = vld [vmem:[#allocation2 + $0x1c0] sm:$0xff] }
 0x11b   : > { %1106 = vst.msk [vmem:[#allocation2 + $0x78] sm:$0xff] %vm641_vm1, %v1042_v61  ;;  %1138 = vst.msk [vmem:[#allocation2 + $0x178] sm:$0xff] %vm641_vm1, %v1074_v62  ;;  %v1040_v3 = vadd.f32 %v823_v63, %v350_v59  ;;  %v1072_v4 = vadd.f32 %v951_v0, %v382_v60  ;;  %v364_v61 = vld [vmem:[#allocation2 + $0xd8] sm:$0xff] }
 0x11c   : > { %v2135_v5 = vpop.f32.mrf.mxu0  ;;  %v2167_v6 = vpop.f32.mrf.mxu1  ;;  %v396_v62 = vld [vmem:[#allocation2 + $0x1d8] sm:$0xff] }
 0x11d   : > { %1104 = vst.msk [vmem:[#allocation2 + $0x68] sm:$0xff] %vm641_vm1, %v1040_v3  ;;  %1136 = vst.msk [vmem:[#allocation2 + $0x168] sm:$0xff] %vm641_vm1, %v1072_v4  ;;  %v1045_v9 = vadd.f32 %v2135_v5, %v355_v1  ;;  %v1077_v10 = vadd.f32 %v2167_v6, %v387_v2  ;;  %v362_v3 = vld [vmem:[#allocation2 + $0xc8] sm:$0xff] }
 0x11e   : > { %v836_v11 = vpop.f32.mrf.mxu0  ;;  %v964_v12 = vpop.f32.mrf.mxu1  ;;  %v394_v4 = vld [vmem:[#allocation2 + $0x1c8] sm:$0xff] }
 0x11f   : > { %1109 = vst.msk [vmem:[#allocation2 + $0x90] sm:$0xff] %vm641_vm1, %v1045_v9  ;;  %1141 = vst.msk [vmem:[#allocation2 + $0x190] sm:$0xff] %vm641_vm1, %v1077_v10  ;;  %v1043_v15 = vadd.f32 %v836_v11, %v353_v7  ;;  %v1075_v16 = vadd.f32 %v964_v12, %v385_v8  ;;  %v367_v9 = vld [vmem:[#allocation2 + $0xf0] sm:$0xff] }
 0x120   : > { %v2136_v17 = vpop.f32.mrf.mxu0  ;;  %v2168_v18 = vpop.f32.mrf.mxu1  ;;  %v399_v10 = vld [vmem:[#allocation2 + $0x1f0] sm:$0xff] }
 0x121   : > { %1107 = vst.msk [vmem:[#allocation2 + $0x80] sm:$0xff] %vm641_vm1, %v1043_v15  ;;  %1139 = vst.msk [vmem:[#allocation2 + $0x180] sm:$0xff] %vm641_vm1, %v1075_v16  ;;  %v1046_v21 = vadd.f32 %v2136_v17, %v356_v13  ;;  %v1078_v22 = vadd.f32 %v2168_v18, %v388_v14  ;;  %v365_v15 = vld [vmem:[#allocation2 + $0xe0] sm:$0xff] }
 0x122   : > { %v839_v23 = vpop.f32.mrf.mxu0  ;;  %v967_v24 = vpop.f32.mrf.mxu1  ;;  %v397_v16 = vld [vmem:[#allocation2 + $0x1e0] sm:$0xff] }
 0x123   : > { %1110 = vst.msk [vmem:[#allocation2 + $0x98] sm:$0xff] %vm641_vm1, %v1046_v21  ;;  %1142 = vst.msk [vmem:[#allocation2 + $0x198] sm:$0xff] %vm641_vm1, %v1078_v22  ;;  %v1044_v27 = vadd.f32 %v839_v23, %v354_v19  ;;  %v1076_v28 = vadd.f32 %v967_v24, %v386_v20  ;;  %v368_v21 = vld [vmem:[#allocation2 + $0xf8] sm:$0xff] }
 0x124   : > { %v2139_v29 = vpop.f32.mrf.mxu0  ;;  %v2171_v30 = vpop.f32.mrf.mxu1  ;;  %v400_v22 = vld [vmem:[#allocation2 + $0x1f8] sm:$0xff] }
 0x125   : > { %1108 = vst.msk [vmem:[#allocation2 + $0x88] sm:$0xff] %vm641_vm1, %v1044_v27  ;;  %1140 = vst.msk [vmem:[#allocation2 + $0x188] sm:$0xff] %vm641_vm1, %v1076_v28  ;;  %v1049_v33 = vadd.f32 %v2139_v29, %v359_v25  ;;  %v1081_v34 = vadd.f32 %v2171_v30, %v391_v26  ;;  %v366_v27 = vld [vmem:[#allocation2 + $0xe8] sm:$0xff] }
 0x126   : > { %v852_v35 = vpop.f32.mrf.mxu0  ;;  %v980_v36 = vpop.f32.mrf.mxu1  ;;  %v398_v28 = vld [vmem:[#allocation2 + $0x1e8] sm:$0xff] }
 0x127   : > { %1113 = vst.msk [vmem:[#allocation2 + $0xb0] sm:$0xff] %vm641_vm1, %v1049_v33  ;;  %1145 = vst.msk [vmem:[#allocation2 + $0x1b0] sm:$0xff] %vm641_vm1, %v1081_v34  ;;  %v1047_v39 = vadd.f32 %v852_v35, %v357_v31  ;;  %v1079_v40 = vadd.f32 %v980_v36, %v389_v32 }
 0x128   : > { %v2140_v41 = vpop.f32.mrf.mxu0  ;;  %v2172_v42 = vpop.f32.mrf.mxu1 }
 0x129   : > { %1111 = vst.msk [vmem:[#allocation2 + $0xa0] sm:$0xff] %vm641_vm1, %v1047_v39  ;;  %1143 = vst.msk [vmem:[#allocation2 + $0x1a0] sm:$0xff] %vm641_vm1, %v1079_v40  ;;  %v1050_v45 = vadd.f32 %v2140_v41, %v360_v37  ;;  %v1082_v46 = vadd.f32 %v2172_v42, %v392_v38 }
 0x12a   : > { %v855_v47 = vpop.f32.mrf.mxu0  ;;  %v983_v48 = vpop.f32.mrf.mxu1 }
 0x12b   : > { %1114 = vst.msk [vmem:[#allocation2 + $0xb8] sm:$0xff] %vm641_vm1, %v1050_v45  ;;  %1146 = vst.msk [vmem:[#allocation2 + $0x1b8] sm:$0xff] %vm641_vm1, %v1082_v46  ;;  %v1048_v51 = vadd.f32 %v855_v47, %v358_v43  ;;  %v1080_v52 = vadd.f32 %v983_v48, %v390_v44 }
 0x12c   : > { %v2143_v53 = vpop.f32.mrf.mxu0  ;;  %v2175_v54 = vpop.f32.mrf.mxu1 }
 0x12d   : > { %1112 = vst.msk [vmem:[#allocation2 + $0xa8] sm:$0xff] %vm641_vm1, %v1048_v51  ;;  %1144 = vst.msk [vmem:[#allocation2 + $0x1a8] sm:$0xff] %vm641_vm1, %v1080_v52  ;;  %v1053_v57 = vadd.f32 %v2143_v53, %v363_v49  ;;  %v1085_v58 = vadd.f32 %v2175_v54, %v395_v50 }
 0x12e   : > { %v868_v59 = vpop.f32.mrf.mxu0  ;;  %v996_v60 = vpop.f32.mrf.mxu1 }
 0x12f   : > { %1117 = vst.msk [vmem:[#allocation2 + $0xd0] sm:$0xff] %vm641_vm1, %v1053_v57  ;;  %1149 = vst.msk [vmem:[#allocation2 + $0x1d0] sm:$0xff] %vm641_vm1, %v1085_v58  ;;  %v1051_v63 = vadd.f32 %v868_v59, %v361_v55  ;;  %v1083_v0 = vadd.f32 %v996_v60, %v393_v56 }
 0x130   : > { %v2144_v1 = vpop.f32.mrf.mxu0  ;;  %v2176_v2 = vpop.f32.mrf.mxu1 }
 0x131   : > { %1115 = vst.msk [vmem:[#allocation2 + $0xc0] sm:$0xff] %vm641_vm1, %v1051_v63  ;;  %1147 = vst.msk [vmem:[#allocation2 + $0x1c0] sm:$0xff] %vm641_vm1, %v1083_v0  ;;  %v1054_v5 = vadd.f32 %v2144_v1, %v364_v61  ;;  %v1086_v6 = vadd.f32 %v2176_v2, %v396_v62 }
 0x132   : > { %v871_v7 = vpop.f32.mrf.mxu0  ;;  %v999_v8 = vpop.f32.mrf.mxu1 }
 0x133   : > { %1118 = vst.msk [vmem:[#allocation2 + $0xd8] sm:$0xff] %vm641_vm1, %v1054_v5  ;;  %1150 = vst.msk [vmem:[#allocation2 + $0x1d8] sm:$0xff] %vm641_vm1, %v1086_v6  ;;  %v1052_v11 = vadd.f32 %v871_v7, %v362_v3  ;;  %v1084_v12 = vadd.f32 %v999_v8, %v394_v4 }
 0x134   : > { %v2147_v13 = vpop.f32.mrf.mxu0  ;;  %v2179_v14 = vpop.f32.mrf.mxu1 }
 0x135   : > { %1116 = vst.msk [vmem:[#allocation2 + $0xc8] sm:$0xff] %vm641_vm1, %v1052_v11  ;;  %1148 = vst.msk [vmem:[#allocation2 + $0x1c8] sm:$0xff] %vm641_vm1, %v1084_v12  ;;  %v1057_v17 = vadd.f32 %v2147_v13, %v367_v9  ;;  %v1089_v18 = vadd.f32 %v2179_v14, %v399_v10 }
 0x136   : > { %v884_v19 = vpop.f32.mrf.mxu0  ;;  %v1012_v20 = vpop.f32.mrf.mxu1 }
 0x137   : > { %1121 = vst.msk [vmem:[#allocation2 + $0xf0] sm:$0xff] %vm641_vm1, %v1057_v17  ;;  %1153 = vst.msk [vmem:[#allocation2 + $0x1f0] sm:$0xff] %vm641_vm1, %v1089_v18  ;;  %v1055_v23 = vadd.f32 %v884_v19, %v365_v15  ;;  %v1087_v24 = vadd.f32 %v1012_v20, %v397_v16 }
 0x138   : > { %v2148_v25 = vpop.f32.mrf.mxu0  ;;  %v2180_v26 = vpop.f32.mrf.mxu1 }
 0x139   : > { %1119 = vst.msk [vmem:[#allocation2 + $0xe0] sm:$0xff] %vm641_vm1, %v1055_v23  ;;  %1151 = vst.msk [vmem:[#allocation2 + $0x1e0] sm:$0xff] %vm641_vm1, %v1087_v24  ;;  %v1058_v29 = vadd.f32 %v2148_v25, %v368_v21  ;;  %v1090_v30 = vadd.f32 %v2180_v26, %v400_v22  ;;  %1158 = sbr.rel (%p2073_p6) target bundleno = 679 (0x2a7), region = 44 }
 0x13a   : > { %v887_v31 = vpop.f32.mrf.mxu0  ;;  %v1015_v32 = vpop.f32.mrf.mxu1 }
 0x13b   : > { %1122 = vst.msk [vmem:[#allocation2 + $0xf8] sm:$0xff] %vm641_vm1, %v1058_v29  ;;  %1154 = vst.msk [vmem:[#allocation2 + $0x1f8] sm:$0xff] %vm641_vm1, %v1090_v30  ;;  %v1056_v33 = vadd.f32 %v887_v31, %v366_v27  ;;  %v1088_v34 = vadd.f32 %v1015_v32, %v398_v28 }
 0x13d   : > { %1120 = vst.msk [vmem:[#allocation2 + $0xe8] sm:$0xff] %vm641_vm1, %v1056_v33  ;;  %1152 = vst.msk [vmem:[#allocation2 + $0x1e8] sm:$0xff] %vm641_vm1, %v1088_v34 }
 0x13e   : > { %v2606_v35 = vld [vmem:[#allocation2] sm:$0xff]  ;;  %v2608_v36 = vld [vmem:[#allocation2 + $0x8] sm:$0xff]  ;;  %v2610_v37 = vld [vmem:[#allocation2 + $0x10] sm:$0xff] }
 0x13f   : > { %3532 = vst [vmem:[#allocation3_spill] sm:$0xff] %v2608_v36  ;;  %3533 = vst [vmem:[#allocation4_spill] sm:$0xff] %v2610_v37  ;;  %v2612_v38 = vld [vmem:[#allocation2 + $0x18] sm:$0xff]  ;;  %v1223_v39 = vsel %vm641_vm1, %v2606_v35, 0.0  ;;  %v1224_v40 = vsel %vm641_vm1, %v2608_v36, 0.0  ;;  %v1226_v41 = vsel %vm641_vm1, %v2610_v37, 0.0 }
 0x140   : > { %3534 = vst [vmem:[#allocation5_spill] sm:$0xff] %v2612_v38  ;;  %v2620_v42 = vld [vmem:[#allocation2 + $0x20] sm:$0xff]  ;;  %v1225_v43 = vadd.f32 %v1224_v40, %v1223_v39  ;;  %v1228_v44 = vsel %vm641_vm1, %v2612_v38, 0.0  ;;  %v2624_v45 = vld [vmem:[#allocation2 + $0x28] sm:$0xff]  ;;  %v2628_v48 = vld [vmem:[#allocation2 + $0x30] sm:$0xff] }
 0x141   : > { %3535 = vst [vmem:[#allocation6_spill] sm:$0xff] %v2620_v42  ;;  %3536 = vst [vmem:[#allocation7_spill] sm:$0xff] %v2624_v45  ;;  %v1230_v47 = vsel %vm641_vm1, %v2620_v42, 0.0  ;;  %v1232_v50 = vsel %vm641_vm1, %v2624_v45, 0.0  ;;  %v2632_v51 = vld [vmem:[#allocation2 + $0x38] sm:$0xff]  ;;  %v1234_v53 = vsel %vm641_vm1, %v2628_v48, 0.0 }
 0x142   : > { %v1227_v46 = vadd.f32 %v1226_v41, %v1225_v43  ;;  %3537 = vst [vmem:[#allocation8_spill] sm:$0xff] %v2628_v48  ;;  %v2636_v54 = vld [vmem:[#allocation2 + $0x40] sm:$0xff]  ;;  %v1236_v56 = vsel %vm641_vm1, %v2632_v51, 0.0  ;;  %v2640_v57 = vld [vmem:[#allocation2 + $0x48] sm:$0xff]  ;;  %v2644_v60 = vld [vmem:[#allocation2 + $0x50] sm:$0xff] }
 0x143   : > { %v1238_v59 = vsel %vm641_vm1, %v2636_v54, 0.0  ;;  %v1240_v62 = vsel %vm641_vm1, %v2640_v57, 0.0  ;;  %v2648_v63 = vld [vmem:[#allocation2 + $0x58] sm:$0xff]  ;;  %v1242_v1 = vsel %vm641_vm1, %v2644_v60, 0.0  ;;  %v2652_v2 = vld [vmem:[#allocation2 + $0x60] sm:$0xff]  ;;  %v2656_v5 = vld [vmem:[#allocation2 + $0x68] sm:$0xff] }
 0x144   : > { %v1229_v49 = vadd.f32 %v1228_v44, %v1227_v46  ;;  %v1244_v4 = vsel %vm641_vm1, %v2648_v63, 0.0  ;;  %v1246_v7 = vsel %vm641_vm1, %v2652_v2, 0.0  ;;  %v2660_v8 = vld [vmem:[#allocation2 + $0x70] sm:$0xff]  ;;  %v1248_v10 = vsel %vm641_vm1, %v2656_v5, 0.0  ;;  %v2664_v11 = vld [vmem:[#allocation2 + $0x78] sm:$0xff]  ;;  %v2668_v14 = vld [vmem:[#allocation2 + $0x80] sm:$0xff] }
 0x145   : > { %v1250_v13 = vsel %vm641_vm1, %v2660_v8, 0.0  ;;  %v1252_v16 = vsel %vm641_vm1, %v2664_v11, 0.0  ;;  %v2672_v17 = vld [vmem:[#allocation2 + $0x88] sm:$0xff]  ;;  %v1254_v19 = vsel %vm641_vm1, %v2668_v14, 0.0  ;;  %v2676_v20 = vld [vmem:[#allocation2 + $0x90] sm:$0xff]  ;;  %v2680_v23 = vld [vmem:[#allocation2 + $0x98] sm:$0xff] }
 0x146   : > { %v1231_v52 = vadd.f32 %v1230_v47, %v1229_v49  ;;  %v1256_v22 = vsel %vm641_vm1, %v2672_v17, 0.0  ;;  %v1258_v25 = vsel %vm641_vm1, %v2676_v20, 0.0  ;;  %v2684_v26 = vld [vmem:[#allocation2 + $0xa0] sm:$0xff]  ;;  %v1260_v28 = vsel %vm641_vm1, %v2680_v23, 0.0  ;;  %v2688_v29 = vld [vmem:[#allocation2 + $0xa8] sm:$0xff]  ;;  %v2692_v32 = vld [vmem:[#allocation2 + $0xb0] sm:$0xff] }
 0x147   : > { %v1262_v31 = vsel %vm641_vm1, %v2684_v26, 0.0  ;;  %v1264_v34 = vsel %vm641_vm1, %v2688_v29, 0.0  ;;  %v2696_v39 = vld [vmem:[#allocation2 + $0xb8] sm:$0xff]  ;;  %v1266_v41 = vsel %vm641_vm1, %v2692_v32, 0.0  ;;  %v2700_v43 = vld [vmem:[#allocation2 + $0xc0] sm:$0xff]  ;;  %v2704_v47 = vld [vmem:[#allocation2 + $0xc8] sm:$0xff] }
 0x148   : > { %v1233_v55 = vadd.f32 %v1232_v50, %v1231_v52  ;;  %v1268_v46 = vsel %vm641_vm1, %v2696_v39, 0.0  ;;  %v1270_v50 = vsel %vm641_vm1, %v2700_v43, 0.0  ;;  %v2708_v52 = vld [vmem:[#allocation2 + $0xd0] sm:$0xff] }
 0x14a   : > { %v1235_v58 = vadd.f32 %v1234_v53, %v1233_v55  ;;  %v1272_v55 = vsel %vm641_vm1, %v2704_v47, 0.0 }
 0x14c   : > { %v1237_v61 = vadd.f32 %v1236_v56, %v1235_v58  ;;  %v2712_v56 = vld [vmem:[#allocation2 + $0xd8] sm:$0xff] }
 0x14e   : > { %v1239_v0 = vadd.f32 %v1238_v59, %v1237_v61  ;;  %v1274_v59 = vsel %vm641_vm1, %v2708_v52, 0.0  ;;  %v2716_v61 = vld [vmem:[#allocation2 + $0xe0] sm:$0xff] }
 0x150   : > { %v1241_v3 = vadd.f32 %v1240_v62, %v1239_v0  ;;  %v1276_v0 = vsel %vm641_vm1, %v2712_v56, 0.0 }
 0x152   : > { %v1243_v6 = vadd.f32 %v1242_v1, %v1241_v3  ;;  %v2720_v1 = vld [vmem:[#allocation2 + $0xe8] sm:$0xff] }
 0x154   : > { %v1245_v9 = vadd.f32 %v1244_v4, %v1243_v6  ;;  %v1278_v4 = vsel %vm641_vm1, %v2716_v61, 0.0  ;;  %v2724_v6 = vld [vmem:[#allocation2 + $0xf0] sm:$0xff] }
 0x156   : > { %v1247_v12 = vadd.f32 %v1246_v7, %v1245_v9  ;;  %v1280_v9 = vsel %vm641_vm1, %v2720_v1, 0.0 }
 0x158   : > { %v1249_v15 = vadd.f32 %v1248_v10, %v1247_v12  ;;  %v2728_v10 = vld [vmem:[#allocation2 + $0xf8] sm:$0xff] }
 0x15a   : > { %v1251_v18 = vadd.f32 %v1250_v13, %v1249_v15  ;;  %v1282_v13 = vsel %vm641_vm1, %v2724_v6, 0.0  ;;  %v2732_v15 = vld [vmem:[#allocation2 + $0x100] sm:$0xff] }
 0x15c   : > { %v1253_v21 = vadd.f32 %v1252_v16, %v1251_v18  ;;  %v1284_v18 = vsel %vm641_vm1, %v2728_v10, 0.0 }
 0x15e   : > { %v1255_v24 = vadd.f32 %v1254_v19, %v1253_v21  ;;  %v2736_v19 = vld [vmem:[#allocation2 + $0x108] sm:$0xff] }
 0x160   : > { %v1257_v27 = vadd.f32 %v1256_v22, %v1255_v24  ;;  %v1286_v22 = vsel %vm641_vm1, %v2732_v15, 0.0  ;;  %v2740_v24 = vld [vmem:[#allocation2 + $0x110] sm:$0xff] }
 0x162   : > { %v1259_v30 = vadd.f32 %v1258_v25, %v1257_v27  ;;  %v1288_v27 = vsel %vm641_vm1, %v2736_v19, 0.0 }
 0x164   : > { %v1261_v33 = vadd.f32 %v1260_v28, %v1259_v30  ;;  %v2744_v28 = vld [vmem:[#allocation2 + $0x118] sm:$0xff] }
 0x166   : > { %v1263_v40 = vadd.f32 %v1262_v31, %v1261_v33  ;;  %v1290_v31 = vsel %vm641_vm1, %v2740_v24, 0.0  ;;  %v2748_v33 = vld [vmem:[#allocation2 + $0x120] sm:$0xff] }
 0x168   : > { %v1265_v44 = vadd.f32 %v1264_v34, %v1263_v40  ;;  %v1292_v40 = vsel %vm641_vm1, %v2744_v28, 0.0 }
 0x16a   : > { %v1267_v49 = vadd.f32 %v1266_v41, %v1265_v44  ;;  %v2752_v41 = vld [vmem:[#allocation2 + $0x128] sm:$0xff] }
 0x16c   : > { %v1269_v53 = vadd.f32 %v1268_v46, %v1267_v49  ;;  %v1294_v46 = vsel %vm641_vm1, %v2748_v33, 0.0  ;;  %v2756_v49 = vld [vmem:[#allocation2 + $0x130] sm:$0xff] }
 0x16e   : > { %v1271_v58 = vadd.f32 %v1270_v50, %v1269_v53  ;;  %v1296_v53 = vsel %vm641_vm1, %v2752_v41, 0.0 }
 0x170   : > { %v1273_v62 = vadd.f32 %v1272_v55, %v1271_v58  ;;  %v2760_v55 = vld [vmem:[#allocation2 + $0x138] sm:$0xff] }
 0x172   : > { %v1275_v3 = vadd.f32 %v1274_v59, %v1273_v62  ;;  %v1298_v59 = vsel %vm641_vm1, %v2756_v49, 0.0  ;;  %v2764_v62 = vld [vmem:[#allocation2 + $0x140] sm:$0xff] }
 0x174   : > { %v1277_v7 = vadd.f32 %v1276_v0, %v1275_v3  ;;  %v1300_v3 = vsel %vm641_vm1, %v2760_v55, 0.0 }
 0x176   : > { %v1279_v12 = vadd.f32 %v1278_v4, %v1277_v7  ;;  %v2768_v4 = vld [vmem:[#allocation2 + $0x148] sm:$0xff] }
 0x178   : > { %v1281_v16 = vadd.f32 %v1280_v9, %v1279_v12  ;;  %v1302_v9 = vsel %vm641_vm1, %v2764_v62, 0.0  ;;  %v2772_v12 = vld [vmem:[#allocation2 + $0x150] sm:$0xff] }
 0x17a   : > { %v1283_v21 = vadd.f32 %v1282_v13, %v1281_v16  ;;  %v1304_v16 = vsel %vm641_vm1, %v2768_v4, 0.0 }
 0x17c   : > { %v1285_v25 = vadd.f32 %v1284_v18, %v1283_v21  ;;  %v2776_v18 = vld [vmem:[#allocation2 + $0x158] sm:$0xff] }
 0x17e   : > { %v1287_v30 = vadd.f32 %v1286_v22, %v1285_v25  ;;  %v1306_v22 = vsel %vm641_vm1, %v2772_v12, 0.0  ;;  %v2780_v25 = vld [vmem:[#allocation2 + $0x160] sm:$0xff] }
 0x180   : > { %v1289_v34 = vadd.f32 %v1288_v27, %v1287_v30  ;;  %v1308_v30 = vsel %vm641_vm1, %v2776_v18, 0.0 }
 0x182   : > { %v1291_v44 = vadd.f32 %v1290_v31, %v1289_v34  ;;  %v2784_v31 = vld [vmem:[#allocation2 + $0x168] sm:$0xff] }
 0x184   : > { %v1293_v50 = vadd.f32 %v1292_v40, %v1291_v44  ;;  %v1310_v40 = vsel %vm641_vm1, %v2780_v25, 0.0  ;;  %v2788_v44 = vld [vmem:[#allocation2 + $0x170] sm:$0xff] }
 0x186   : > { %v1295_v58 = vadd.f32 %v1294_v46, %v1293_v50  ;;  %v1312_v50 = vsel %vm641_vm1, %v2784_v31, 0.0 }
 0x188   : > { %v1297_v0 = vadd.f32 %v1296_v53, %v1295_v58  ;;  %v2792_v53 = vld [vmem:[#allocation2 + $0x178] sm:$0xff] }
 0x189   : > { %3538 = vst [vmem:[#allocation9_spill] sm:$0xff] %v2792_v53 }
 0x18a   : > { %v1299_v7 = vadd.f32 %v1298_v59, %v1297_v0  ;;  %v1314_v59 = vsel %vm641_vm1, %v2788_v44, 0.0  ;;  %v2796_v0 = vld [vmem:[#allocation2 + $0x180] sm:$0xff] }
 0x18b   : > { %3539 = vst [vmem:[#allocation10_spill] sm:$0xff] %v2796_v0 }
 0x18c   : > { %v1301_v13 = vadd.f32 %v1300_v3, %v1299_v7  ;;  %v1316_v7 = vsel %vm641_vm1, %v2792_v53, 0.0 }
 0x18e   : > { %v1303_v21 = vadd.f32 %v1302_v9, %v1301_v13  ;;  %v2800_v9 = vld [vmem:[#allocation2 + $0x188] sm:$0xff] }
 0x18f   : > { %3540 = vst [vmem:[#allocation11_spill] sm:$0xff] %v2800_v9 }
 0x190   : > { %v1305_v27 = vadd.f32 %v1304_v16, %v1303_v21  ;;  %v1318_v16 = vsel %vm641_vm1, %v2796_v0, 0.0  ;;  %v2804_v21 = vld [vmem:[#allocation2 + $0x190] sm:$0xff] }
 0x191   : > { %3541 = vst [vmem:[#allocation12_spill] sm:$0xff] %v2804_v21 }
 0x192   : > { %v1307_v34 = vadd.f32 %v1306_v22, %v1305_v27  ;;  %v1320_v27 = vsel %vm641_vm1, %v2800_v9, 0.0 }
 0x194   : > { %v1309_v46 = vadd.f32 %v1308_v30, %v1307_v34  ;;  %v2808_v30 = vld [vmem:[#allocation2 + $0x198] sm:$0xff] }
 0x195   : > { %3542 = vst [vmem:[#allocation13_spill] sm:$0xff] %v2808_v30 }
 0x196   : > { %v1311_v58 = vadd.f32 %v1310_v40, %v1309_v46  ;;  %v1322_v40 = vsel %vm641_vm1, %v2804_v21, 0.0  ;;  %v2812_v46 = vld [vmem:[#allocation2 + $0x1a0] sm:$0xff] }
 0x197   : > { %3543 = vst [vmem:[#allocation14_spill] sm:$0xff] %v2812_v46 }
 0x198   : > { %v1313_v3 = vadd.f32 %v1312_v50, %v1311_v58  ;;  %v1324_v58 = vsel %vm641_vm1, %v2808_v30, 0.0 }
 0x19a   : > { %v1315_v13 = vadd.f32 %v1314_v59, %v1313_v3  ;;  %v2816_v59 = vld [vmem:[#allocation2 + $0x1a8] sm:$0xff] }
 0x19b   : > { %3544 = vst [vmem:[#allocation15_spill] sm:$0xff] %v2816_v59 }
 0x19c   : > { %v1317_v22 = vadd.f32 %v1316_v7, %v1315_v13  ;;  %v1326_v7 = vsel %vm641_vm1, %v2812_v46, 0.0  ;;  %v2820_v13 = vld [vmem:[#allocation2 + $0x1b0] sm:$0xff] }
 0x19d   : > { %3545 = vst [vmem:[#allocation16_spill] sm:$0xff] %v2820_v13 }
 0x19e   : > { %v1319_v34 = vadd.f32 %v1318_v16, %v1317_v22  ;;  %v1328_v16 = vsel %vm641_vm1, %v2816_v59, 0.0  ;;  %v2824_v22 = vld [vmem:[#allocation2 + $0x1b8] sm:$0xff] }
 0x19f   : > { %3546 = vst [vmem:[#allocation17_spill] sm:$0xff] %v2824_v22 }
 0x1a0   : > { %v1321_v50 = vadd.f32 %v1320_v27, %v1319_v34  ;;  %v1330_v27 = vsel %vm641_vm1, %v2820_v13, 0.0  ;;  %v2828_v34 = vld [vmem:[#allocation2 + $0x1c0] sm:$0xff] }
 0x1a1   : > { %3547 = vst [vmem:[#allocation18_spill] sm:$0xff] %v2828_v34 }
 0x1a2   : > { %v1323_v3 = vadd.f32 %v1322_v40, %v1321_v50  ;;  %v1332_v40 = vsel %vm641_vm1, %v2824_v22, 0.0  ;;  %v2832_v50 = vld [vmem:[#allocation2 + $0x1c8] sm:$0xff] }
 0x1a3   : > { %3548 = vst [vmem:[#allocation19_spill] sm:$0xff] %v2832_v50 }
 0x1a4   : > { %v1325_v9 = vadd.f32 %v1324_v58, %v1323_v3  ;;  %v1334_v58 = vsel %vm641_vm1, %v2828_v34, 0.0  ;;  %v2836_v3 = vld [vmem:[#allocation2 + $0x1d0] sm:$0xff] }
 0x1a5   : > { %3549 = vst [vmem:[#allocation20_spill] sm:$0xff] %v2836_v3 }
 0x1a6   : > { %v1327_v21 = vadd.f32 %v1326_v7, %v1325_v9  ;;  %v1336_v9 = vsel %vm641_vm1, %v2832_v50, 0.0  ;;  %v2840_v7 = vld [vmem:[#allocation2 + $0x1d8] sm:$0xff] }
 0x1a7   : > { %3550 = vst [vmem:[#allocation21_spill] sm:$0xff] %v2840_v7  ;;  %v1340_v22 = vsel %vm641_vm1, %v2840_v7, 0.0 }
 0x1a8   : > { %v1329_v30 = vadd.f32 %v1328_v16, %v1327_v21  ;;  %v1338_v21 = vsel %vm641_vm1, %v2836_v3, 0.0 }
 0x1aa   : > { %v1331_v46 = vadd.f32 %v1330_v27, %v1329_v30  ;;  %v2846_v30 = vld [vmem:[#allocation2 + $0x1e0] sm:$0xff] }
 0x1ab   : > { %3551 = vst [vmem:[#allocation22_spill] sm:$0xff] %v2846_v30 }
 0x1ac   : > { %v1333_v59 = vadd.f32 %v1332_v40, %v1331_v46  ;;  %v1342_v46 = vsel %vm641_vm1, %v2846_v30, 0.0  ;;  %v2850_v40 = vld [vmem:[#allocation2 + $0x1e8] sm:$0xff] }
 0x1ad   : > { %3552 = vst [vmem:[#allocation23_spill] sm:$0xff] %v2850_v40 }
 0x1ae   : > { %v1335_v13 = vadd.f32 %v1334_v58, %v1333_v59  ;;  %v1344_v59 = vsel %vm641_vm1, %v2850_v40, 0.0  ;;  %v2854_v58 = vld [vmem:[#allocation2 + $0x1f0] sm:$0xff] }
 0x1b0   : > { %v1337_v16 = vadd.f32 %v1336_v9, %v1335_v13  ;;  %v1346_v13 = vsel %vm641_vm1, %v2854_v58, 0.0  ;;  %v2858_v9 = vld [vmem:[#allocation2 + $0x1f8] sm:$0xff] }
 0x1b2   : > { %v1339_v27 = vadd.f32 %v1338_v21, %v1337_v16 }
 0x1b4   : > { %v1341_v34 = vadd.f32 %v1340_v22, %v1339_v27  ;;  %v1348_v22 = vsel %vm641_vm1, %v2858_v9, 0.0 }
 0x1b6   : > { %v1343_v50 = vadd.f32 %v1342_v46, %v1341_v34 }
 0x1b8   : > { %v1345_v3 = vadd.f32 %v1344_v59, %v1343_v50 }
 0x1ba   : > { %v1347_v7 = vadd.f32 %v1346_v13, %v1345_v3 }
 0x1bc   : > { %v1349_v21 = vadd.f32 %v1348_v22, %v1347_v7 }
 0x1be   : > { %v1350_v16 = vrot.slane %v1349_v21, 4 }
 0x1c0   : > { %v1351_v27 = vadd.f32 %v1350_v16, %v1349_v21 }
 0x1c2   : > { %v1352_v30 = vrot.slane %v1351_v27, 2 }
 0x1c4   : > { %v1353_v34 = vadd.f32 %v1352_v30, %v1351_v27 }
 0x1c6   : > { %v1354_v46 = vrot.slane %v1353_v34, 1 }
 0x1c8   : > { %v1355_v0 = vadd.f32 %v1354_v46, %v1353_v34 }
 0x1ca   : > { %v2862_v40 = vmul.f32 0.001953125, %v1355_v0 }
 0x1cc   : > { %v1358_v50 = vsub.f32 %v2606_v35, %v2862_v40  ;;  %v1359_v59 = vsub.f32 %v2608_v36, %v2862_v40  ;;  %v1360_v3 = vsub.f32 %v2610_v37, %v2862_v40  ;;  %v1361_v7 = vsub.f32 %v2612_v38, %v2862_v40 }
 0x1cd   : > { %v1362_v13 = vsub.f32 %v2620_v42, %v2862_v40  ;;  %v1363_v0 = vsub.f32 %v2624_v45, %v2862_v40  ;;  %v1364_v27 = vsub.f32 %v2628_v48, %v2862_v40 }
 0x1ce   : > { %v1422_v30 = vmul.f32 %v1358_v50, %v1358_v50  ;;  %v1423_v22 = vmul.f32 %v1359_v59, %v1359_v59  ;;  %v1424_v21 = vmul.f32 %v1360_v3, %v1360_v3  ;;  %v1425_v16 = vmul.f32 %v1361_v7, %v1361_v7 }
 0x1cf   : > { %v1426_v34 = vmul.f32 %v1362_v13, %v1362_v13  ;;  %v1365_v50 = vsub.f32 %v2632_v51, %v2862_v40  ;;  %v1427_v59 = vmul.f32 %v1363_v0, %v1363_v0  ;;  %v1366_v7 = vsub.f32 %v2636_v54, %v2862_v40 }
 0x1d0   : > { %v1486_v46 = vsel %vm641_vm1, %v1422_v30, 0.0  ;;  %v1487_v37 = vsel %vm641_vm1, %v1423_v22, 0.0  ;;  %v1489_v38 = vsel %vm641_vm1, %v1424_v21, 0.0  ;;  %v1491_v3 = vsel %vm641_vm1, %v1425_v16, 0.0 }
 0x1d1   : > { %v1488_v36 = vadd.f32 %v1487_v37, %v1486_v46  ;;  %v1428_v45 = vmul.f32 %v1364_v27, %v1364_v27  ;;  %v1493_v13 = vsel %vm641_vm1, %v1426_v34, 0.0  ;;  %v1367_v30 = vsub.f32 %v2640_v57, %v2862_v40 }
 0x1d2   : > { %v1429_v22 = vmul.f32 %v1365_v50, %v1365_v50  ;;  %v1495_v37 = vsel %vm641_vm1, %v1427_v59, 0.0  ;;  %v1368_v0 = vsub.f32 %v2644_v60, %v2862_v40  ;;  %v1430_v46 = vmul.f32 %v1366_v7, %v1366_v7 }
 0x1d3   : > { %v1490_v42 = vadd.f32 %v1489_v38, %v1488_v36  ;;  %v1497_v36 = vsel %vm641_vm1, %v1428_v45, 0.0  ;;  %v1369_v16 = vsub.f32 %v2648_v63, %v2862_v40  ;;  %v1431_v27 = vmul.f32 %v1367_v30, %v1367_v30 }
 0x1d4   : > { %v1370_v50 = vsub.f32 %v2652_v2, %v2862_v40  ;;  %v1371_v7 = vsub.f32 %v2656_v5, %v2862_v40  ;;  %v1372_v30 = vsub.f32 %v2660_v8, %v2862_v40 }
 0x1d5   : > { %v1492_v48 = vadd.f32 %v1491_v3, %v1490_v42  ;;  %v1499_v42 = vsel %vm641_vm1, %v1429_v22, 0.0  ;;  %v1432_v3 = vmul.f32 %v1368_v0, %v1368_v0  ;;  %v1503_v45 = vsel %vm641_vm1, %v1431_v27, 0.0 }
 0x1d6   : > { %v1373_v0 = vsub.f32 %v2664_v11, %v2862_v40 }
 0x1d7   : > { %v1494_v21 = vadd.f32 %v1493_v13, %v1492_v48  ;;  %v1501_v48 = vsel %vm641_vm1, %v1430_v46, 0.0  ;;  %v1433_v13 = vmul.f32 %v1369_v16, %v1369_v16  ;;  %v1505_v22 = vsel %vm641_vm1, %v1432_v3, 0.0 }
 0x1d8   : > { %v1374_v16 = vsub.f32 %v2668_v14, %v2862_v40 }
 0x1d9   : > { %v1496_v38 = vadd.f32 %v1495_v37, %v1494_v21  ;;  %v1434_v21 = vmul.f32 %v1370_v50, %v1370_v50  ;;  %v1507_v46 = vsel %vm641_vm1, %v1433_v13, 0.0  ;;  %v1375_v50 = vsub.f32 %v2672_v17, %v2862_v40 }
 0x1db   : > { %v1498_v34 = vadd.f32 %v1497_v36, %v1496_v38  ;;  %v1435_v38 = vmul.f32 %v1371_v7, %v1371_v7  ;;  %v1509_v27 = vsel %vm641_vm1, %v1434_v21, 0.0  ;;  %v1376_v7 = vsub.f32 %v2676_v20, %v2862_v40 }
 0x1dd   : > { %v1500_v59 = vadd.f32 %v1499_v42, %v1498_v34  ;;  %v1436_v34 = vmul.f32 %v1372_v30, %v1372_v30  ;;  %v1511_v3 = vsel %vm641_vm1, %v1435_v38, 0.0  ;;  %v1377_v30 = vsub.f32 %v2680_v23, %v2862_v40 }
 0x1df   : > { %v1502_v37 = vadd.f32 %v1501_v48, %v1500_v59  ;;  %v1437_v59 = vmul.f32 %v1373_v0, %v1373_v0  ;;  %v1513_v13 = vsel %vm641_vm1, %v1436_v34, 0.0  ;;  %v1378_v0 = vsub.f32 %v2684_v26, %v2862_v40 }
 0x1e1   : > { %v1504_v36 = vadd.f32 %v1503_v45, %v1502_v37  ;;  %v1438_v37 = vmul.f32 %v1374_v16, %v1374_v16  ;;  %v1515_v21 = vsel %vm641_vm1, %v1437_v59, 0.0  ;;  %v1379_v16 = vsub.f32 %v2688_v29, %v2862_v40 }
 0x1e3   : > { %v1506_v42 = vadd.f32 %v1505_v22, %v1504_v36  ;;  %v1439_v36 = vmul.f32 %v1375_v50, %v1375_v50  ;;  %v1517_v38 = vsel %vm641_vm1, %v1438_v37, 0.0  ;;  %v1380_v50 = vsub.f32 %v2692_v32, %v2862_v40 }
 0x1e5   : > { %v1508_v48 = vadd.f32 %v1507_v46, %v1506_v42  ;;  %v1440_v42 = vmul.f32 %v1376_v7, %v1376_v7  ;;  %v1519_v34 = vsel %vm641_vm1, %v1439_v36, 0.0  ;;  %v1381_v7 = vsub.f32 %v2696_v39, %v2862_v40 }
 0x1e7   : > { %v1510_v45 = vadd.f32 %v1509_v27, %v1508_v48  ;;  %v1441_v48 = vmul.f32 %v1377_v30, %v1377_v30  ;;  %v1521_v59 = vsel %vm641_vm1, %v1440_v42, 0.0  ;;  %v1382_v30 = vsub.f32 %v2700_v43, %v2862_v40 }
 0x1e9   : > { %v1512_v22 = vadd.f32 %v1511_v3, %v1510_v45  ;;  %v1442_v45 = vmul.f32 %v1378_v0, %v1378_v0  ;;  %v1523_v37 = vsel %vm641_vm1, %v1441_v48, 0.0  ;;  %v1383_v0 = vsub.f32 %v2704_v47, %v2862_v40 }
 0x1eb   : > { %v1514_v46 = vadd.f32 %v1513_v13, %v1512_v22  ;;  %v1443_v22 = vmul.f32 %v1379_v16, %v1379_v16  ;;  %v1525_v36 = vsel %vm641_vm1, %v1442_v45, 0.0  ;;  %v1384_v16 = vsub.f32 %v2708_v52, %v2862_v40 }
 0x1ed   : > { %v1516_v27 = vadd.f32 %v1515_v21, %v1514_v46  ;;  %v1444_v46 = vmul.f32 %v1380_v50, %v1380_v50  ;;  %v1527_v42 = vsel %vm641_vm1, %v1443_v22, 0.0  ;;  %v1385_v50 = vsub.f32 %v2712_v56, %v2862_v40 }
 0x1ef   : > { %v1518_v3 = vadd.f32 %v1517_v38, %v1516_v27  ;;  %v1445_v27 = vmul.f32 %v1381_v7, %v1381_v7  ;;  %v1529_v48 = vsel %vm641_vm1, %v1444_v46, 0.0  ;;  %v1386_v7 = vsub.f32 %v2716_v61, %v2862_v40 }
 0x1f1   : > { %v1520_v13 = vadd.f32 %v1519_v34, %v1518_v3  ;;  %v1446_v3 = vmul.f32 %v1382_v30, %v1382_v30  ;;  %v1531_v45 = vsel %vm641_vm1, %v1445_v27, 0.0  ;;  %v1387_v30 = vsub.f32 %v2720_v1, %v2862_v40 }
 0x1f3   : > { %v1522_v21 = vadd.f32 %v1521_v59, %v1520_v13  ;;  %v1447_v13 = vmul.f32 %v1383_v0, %v1383_v0  ;;  %v1533_v22 = vsel %vm641_vm1, %v1446_v3, 0.0  ;;  %v1388_v0 = vsub.f32 %v2724_v6, %v2862_v40 }
 0x1f5   : > { %v1524_v38 = vadd.f32 %v1523_v37, %v1522_v21  ;;  %v1448_v21 = vmul.f32 %v1384_v16, %v1384_v16  ;;  %v1535_v46 = vsel %vm641_vm1, %v1447_v13, 0.0  ;;  %v1389_v16 = vsub.f32 %v2728_v10, %v2862_v40 }
 0x1f7   : > { %v1526_v34 = vadd.f32 %v1525_v36, %v1524_v38  ;;  %v1449_v38 = vmul.f32 %v1385_v50, %v1385_v50  ;;  %v1537_v27 = vsel %vm641_vm1, %v1448_v21, 0.0  ;;  %v1390_v50 = vsub.f32 %v2732_v15, %v2862_v40 }
 0x1f9   : > { %v1528_v59 = vadd.f32 %v1527_v42, %v1526_v34  ;;  %v1450_v34 = vmul.f32 %v1386_v7, %v1386_v7  ;;  %v1539_v3 = vsel %vm641_vm1, %v1449_v38, 0.0  ;;  %v1391_v7 = vsub.f32 %v2736_v19, %v2862_v40 }
 0x1fb   : > { %v1530_v37 = vadd.f32 %v1529_v48, %v1528_v59  ;;  %v1451_v59 = vmul.f32 %v1387_v30, %v1387_v30  ;;  %v1541_v13 = vsel %vm641_vm1, %v1450_v34, 0.0  ;;  %v1392_v30 = vsub.f32 %v2740_v24, %v2862_v40 }
 0x1fd   : > { %v1532_v36 = vadd.f32 %v1531_v45, %v1530_v37  ;;  %v1452_v37 = vmul.f32 %v1388_v0, %v1388_v0  ;;  %v1543_v21 = vsel %vm641_vm1, %v1451_v59, 0.0  ;;  %v1393_v0 = vsub.f32 %v2744_v28, %v2862_v40 }
 0x1ff   : > { %v1534_v42 = vadd.f32 %v1533_v22, %v1532_v36  ;;  %v1453_v36 = vmul.f32 %v1389_v16, %v1389_v16  ;;  %v1545_v38 = vsel %vm641_vm1, %v1452_v37, 0.0  ;;  %v1394_v16 = vsub.f32 %v2748_v33, %v2862_v40 }
 0x201   : > { %v1536_v48 = vadd.f32 %v1535_v46, %v1534_v42  ;;  %v1454_v42 = vmul.f32 %v1390_v50, %v1390_v50  ;;  %v1547_v34 = vsel %vm641_vm1, %v1453_v36, 0.0  ;;  %v1395_v50 = vsub.f32 %v2752_v41, %v2862_v40 }
 0x203   : > { %v1538_v45 = vadd.f32 %v1537_v27, %v1536_v48  ;;  %v1455_v48 = vmul.f32 %v1391_v7, %v1391_v7  ;;  %v1549_v59 = vsel %vm641_vm1, %v1454_v42, 0.0  ;;  %v1396_v7 = vsub.f32 %v2756_v49, %v2862_v40 }
 0x205   : > { %v1540_v22 = vadd.f32 %v1539_v3, %v1538_v45  ;;  %v1456_v45 = vmul.f32 %v1392_v30, %v1392_v30  ;;  %v1551_v37 = vsel %vm641_vm1, %v1455_v48, 0.0  ;;  %v1397_v30 = vsub.f32 %v2760_v55, %v2862_v40 }
 0x207   : > { %v1542_v46 = vadd.f32 %v1541_v13, %v1540_v22  ;;  %v1457_v22 = vmul.f32 %v1393_v0, %v1393_v0  ;;  %v1553_v36 = vsel %vm641_vm1, %v1456_v45, 0.0  ;;  %v1398_v0 = vsub.f32 %v2764_v62, %v2862_v40 }
 0x208   : > { %v1401_v62 = vsub.f32 %v2776_v18, %v2862_v40 }
 0x209   : > { %v1544_v27 = vadd.f32 %v1543_v21, %v1542_v46  ;;  %v1458_v46 = vmul.f32 %v1394_v16, %v1394_v16  ;;  %v1555_v42 = vsel %vm641_vm1, %v1457_v22, 0.0  ;;  %v1399_v16 = vsub.f32 %v2768_v4, %v2862_v40 }
 0x20b   : > { %v1546_v3 = vadd.f32 %v1545_v38, %v1544_v27  ;;  %v1459_v27 = vmul.f32 %v1395_v50, %v1395_v50  ;;  %v1557_v48 = vsel %vm641_vm1, %v1458_v46, 0.0  ;;  %v1400_v50 = vsub.f32 %v2772_v12, %v2862_v40 }
 0x20d   : > { %v1548_v13 = vadd.f32 %v1547_v34, %v1546_v3  ;;  %v1460_v3 = vmul.f32 %v1396_v7, %v1396_v7  ;;  %v1559_v45 = vsel %vm641_vm1, %v1459_v27, 0.0  ;;  %v1463_v7 = vmul.f32 %v1399_v16, %v1399_v16 }
 0x20e   : > { %v1404_v16 = vsub.f32 %v2788_v44, %v2862_v40  ;;  %v3554_v44 = vld [vmem:[#allocation11_spill] sm:$0xff] }
 0x20f   : > { %v1550_v21 = vadd.f32 %v1549_v59, %v1548_v13  ;;  %v1461_v13 = vmul.f32 %v1397_v30, %v1397_v30  ;;  %v1561_v22 = vsel %vm641_vm1, %v1460_v3, 0.0  ;;  %v1402_v30 = vsub.f32 %v2780_v25, %v2862_v40 }
 0x210   : > { %v1567_v3 = vsel %vm641_vm1, %v1463_v7, 0.0 }
 0x211   : > { %v1552_v38 = vadd.f32 %v1551_v37, %v1550_v21  ;;  %v1462_v21 = vmul.f32 %v1398_v0, %v1398_v0  ;;  %v1563_v46 = vsel %vm641_vm1, %v1461_v13, 0.0  ;;  %v1403_v0 = vsub.f32 %v2784_v31, %v2862_v40 }
 0x213   : > { %v1554_v34 = vadd.f32 %v1553_v36, %v1552_v38  ;;  %v1565_v27 = vsel %vm641_vm1, %v1462_v21, 0.0 }
 0x215   : > { %v1556_v59 = vadd.f32 %v1555_v42, %v1554_v34  ;;  %v1464_v42 = vmul.f32 %v1400_v50, %v1400_v50  ;;  %v1405_v50 = vsub.f32 %v2792_v53, %v2862_v40 }
 0x217   : > { %v1558_v37 = vadd.f32 %v1557_v48, %v1556_v59  ;;  %v1465_v48 = vmul.f32 %v1401_v62, %v1401_v62  ;;  %v1569_v13 = vsel %vm641_vm1, %v1464_v42, 0.0 }
 0x219   : > { %v1560_v36 = vadd.f32 %v1559_v45, %v1558_v37  ;;  %v1466_v45 = vmul.f32 %v1402_v30, %v1402_v30  ;;  %v1571_v21 = vsel %vm641_vm1, %v1465_v48, 0.0  ;;  %v1407_v30 = vsub.f32 %v3554_v44, %v2862_v40 }
 0x21b   : > { %v1562_v38 = vadd.f32 %v1561_v22, %v1560_v36  ;;  %v1467_v22 = vmul.f32 %v1403_v0, %v1403_v0  ;;  %v1573_v7 = vsel %vm641_vm1, %v1466_v45, 0.0 }
 0x21d   : > { %v1564_v34 = vadd.f32 %v1563_v46, %v1562_v38  ;;  %v3553_v46 = vld [vmem:[#allocation10_spill] sm:$0xff]  ;;  %v1468_v38 = vmul.f32 %v1404_v16, %v1404_v16  ;;  %v1575_v42 = vsel %vm641_vm1, %v1467_v22, 0.0 }
 0x21e   : > { %v1406_v62 = vsub.f32 %v3553_v46, %v2862_v40  ;;  %v1471_v46 = vmul.f32 %v1407_v30, %v1407_v30 }
 0x21f   : > { %v1566_v59 = vadd.f32 %v1565_v27, %v1564_v34  ;;  %v1469_v34 = vmul.f32 %v1405_v50, %v1405_v50  ;;  %v1577_v48 = vsel %vm641_vm1, %v1468_v38, 0.0 }
 0x220   : > { %v1470_v53 = vmul.f32 %v1406_v62, %v1406_v62  ;;  %v1583_v38 = vsel %vm641_vm1, %v1471_v46, 0.0 }
 0x221   : > { %v1568_v37 = vadd.f32 %v1567_v3, %v1566_v59  ;;  %v3555_v59 = vld [vmem:[#allocation12_spill] sm:$0xff]  ;;  %v1579_v45 = vsel %vm641_vm1, %v1469_v34, 0.0 }
 0x222   : > { %v1408_v0 = vsub.f32 %v3555_v59, %v2862_v40  ;;  %v1581_v22 = vsel %vm641_vm1, %v1470_v53, 0.0 }
 0x223   : > { %v1570_v36 = vadd.f32 %v1569_v13, %v1568_v37  ;;  %v3556_v37 = vld [vmem:[#allocation13_spill] sm:$0xff] }
 0x224   : > { %v1409_v16 = vsub.f32 %v3556_v37, %v2862_v40  ;;  %v1472_v44 = vmul.f32 %v1408_v0, %v1408_v0 }
 0x225   : > { %v1572_v27 = vadd.f32 %v1571_v21, %v1570_v36  ;;  %v3557_v36 = vld [vmem:[#allocation14_spill] sm:$0xff] }
 0x226   : > { %v1410_v50 = vsub.f32 %v3557_v36, %v2862_v40  ;;  %v1473_v59 = vmul.f32 %v1409_v16, %v1409_v16  ;;  %v1585_v34 = vsel %vm641_vm1, %v1472_v44, 0.0 }
 0x227   : > { %v1574_v3 = vadd.f32 %v1573_v7, %v1572_v27  ;;  %v3558_v27 = vld [vmem:[#allocation15_spill] sm:$0xff] }
 0x228   : > { %v1411_v62 = vsub.f32 %v3558_v27, %v2862_v40  ;;  %v1474_v37 = vmul.f32 %v1410_v50, %v1410_v50  ;;  %v1587_v53 = vsel %vm641_vm1, %v1473_v59, 0.0 }
 0x229   : > { %v1576_v13 = vadd.f32 %v1575_v42, %v1574_v3  ;;  %v3559_v3 = vld [vmem:[#allocation16_spill] sm:$0xff] }
 0x22a   : > { %v1412_v30 = vsub.f32 %v3559_v3, %v2862_v40  ;;  %v1475_v36 = vmul.f32 %v1411_v62, %v1411_v62  ;;  %v1589_v46 = vsel %vm641_vm1, %v1474_v37, 0.0 }
 0x22b   : > { %v1578_v21 = vadd.f32 %v1577_v48, %v1576_v13  ;;  %v3560_v13 = vld [vmem:[#allocation17_spill] sm:$0xff] }
 0x22c   : > { %v1413_v0 = vsub.f32 %v3560_v13, %v2862_v40  ;;  %v1476_v27 = vmul.f32 %v1412_v30, %v1412_v30  ;;  %v1591_v44 = vsel %vm641_vm1, %v1475_v36, 0.0 }
 0x22d   : > { %v1580_v7 = vadd.f32 %v1579_v45, %v1578_v21  ;;  %v3561_v21 = vld [vmem:[#allocation18_spill] sm:$0xff] }
 0x22e   : > { %v1414_v16 = vsub.f32 %v3561_v21, %v2862_v40  ;;  %v1477_v3 = vmul.f32 %v1413_v0, %v1413_v0  ;;  %v1593_v59 = vsel %vm641_vm1, %v1476_v27, 0.0 }
 0x22f   : > { %v1582_v42 = vadd.f32 %v1581_v22, %v1580_v7  ;;  %v3562_v7 = vld [vmem:[#allocation19_spill] sm:$0xff] }
 0x230   : > { %v1415_v50 = vsub.f32 %v3562_v7, %v2862_v40  ;;  %v1478_v13 = vmul.f32 %v1414_v16, %v1414_v16  ;;  %v1595_v37 = vsel %vm641_vm1, %v1477_v3, 0.0 }
 0x231   : > { %v1584_v48 = vadd.f32 %v1583_v38, %v1582_v42  ;;  %v3563_v42 = vld [vmem:[#allocation20_spill] sm:$0xff] }
 0x232   : > { %v1416_v62 = vsub.f32 %v3563_v42, %v2862_v40  ;;  %v1479_v21 = vmul.f32 %v1415_v50, %v1415_v50  ;;  %v1597_v36 = vsel %vm641_vm1, %v1478_v13, 0.0  ;;  %v1420_v50 = vsub.f32 %v2854_v58, %v2862_v40 }
 0x233   : > { %v1586_v45 = vadd.f32 %v1585_v34, %v1584_v48  ;;  %v3564_v48 = vld [vmem:[#allocation21_spill] sm:$0xff] }
 0x234   : > { %v1417_v30 = vsub.f32 %v3564_v48, %v2862_v40  ;;  %v1480_v7 = vmul.f32 %v1416_v62, %v1416_v62  ;;  %v1599_v27 = vsel %vm641_vm1, %v1479_v21, 0.0  ;;  %v1421_v62 = vsub.f32 %v2858_v9, %v2862_v40 }
 0x235   : > { %v1588_v22 = vadd.f32 %v1587_v53, %v1586_v45  ;;  %v3565_v45 = vld [vmem:[#allocation22_spill] sm:$0xff] }
 0x236   : > { %v1418_v0 = vsub.f32 %v3565_v45, %v2862_v40  ;;  %v1481_v42 = vmul.f32 %v1417_v30, %v1417_v30  ;;  %v1601_v3 = vsel %vm641_vm1, %v1480_v7, 0.0  ;;  %v1485_v21 = vmul.f32 %v1421_v62, %v1421_v62 }
 0x237   : > { %v1590_v38 = vadd.f32 %v1589_v46, %v1588_v22  ;;  %v3566_v22 = vld [vmem:[#allocation23_spill] sm:$0xff] }
 0x238   : > { %v1419_v16 = vsub.f32 %v3566_v22, %v2862_v40  ;;  %v1603_v13 = vsel %vm641_vm1, %v1481_v42, 0.0  ;;  %v1611_v7 = vsel %vm641_vm1, %v1485_v21, 0.0 }
 0x239   : > { %v1592_v34 = vadd.f32 %v1591_v44, %v1590_v38  ;;  %v1482_v38 = vmul.f32 %v1418_v0, %v1418_v0 }
 0x23b   : > { %v1594_v53 = vadd.f32 %v1593_v59, %v1592_v34  ;;  %v1483_v34 = vmul.f32 %v1419_v16, %v1419_v16  ;;  %v1605_v30 = vsel %vm641_vm1, %v1482_v38, 0.0 }
 0x23d   : > { %v1596_v46 = vadd.f32 %v1595_v37, %v1594_v53  ;;  %v1484_v37 = vmul.f32 %v1420_v50, %v1420_v50  ;;  %v1607_v45 = vsel %vm641_vm1, %v1483_v34, 0.0  ;;  %v1620_v34 = vld [vmem:[%s3508_s2] sm:$0x1] }
 0x23f   : > { %v1598_v44 = vadd.f32 %v1597_v36, %v1596_v46  ;;  %v1609_v58 = vsel %vm641_vm1, %v1484_v37, 0.0 }
 0x241   : > { %v1600_v59 = vadd.f32 %v1599_v27, %v1598_v44 }
 0x243   : > { %v1602_v48 = vadd.f32 %v1601_v3, %v1600_v59  ;;  %v1628_v59 = vlaneseq }
 0x245   : > { %v1604_v53 = vadd.f32 %v1603_v13, %v1602_v48  ;;  %v1629_v62 = vshrl.u32 %v1628_v59, 7 }
 0x247   : > { %v1606_v36 = vadd.f32 %v1605_v30, %v1604_v53  ;;  %v1630_v13 = vsub.s32 0, %v1629_v62  ;;  %v1624_v30 = vld [vmem:[%s3509_s3] sm:$0x1] }
 0x249   : > { %v1608_v0 = vadd.f32 %v1607_v45, %v1606_v36 }
 0x24b   : > { %v1610_v46 = vadd.f32 %v1609_v58, %v1608_v0  ;;  %v3567_v58 = vld [vmem:[#allocation3_spill] sm:$0xff] }
 0x24d   : > { %v1612_v22 = vadd.f32 %v1611_v7, %v1610_v46  ;;  %v3568_v7 = vld [vmem:[#allocation4_spill] sm:$0xff] }
 0x24f   : > { %v1613_v9 = vrot.slane %v1612_v22, 4 }
 0x251   : > { %v1614_v16 = vadd.f32 %v1613_v9, %v1612_v22  ;;  %v3569_v22 = vld [vmem:[#allocation5_spill] sm:$0xff] }
 0x253   : > { %v1615_v27 = vrot.slane %v1614_v16, 2 }
 0x255   : > { %v1616_v42 = vadd.f32 %v1615_v27, %v1614_v16  ;;  %v3570_v16 = vld [vmem:[#allocation6_spill] sm:$0xff] }
 0x257   : > { %v1617_v44 = vrot.slane %v1616_v42, 1 }
 0x259   : > { %v1618_v50 = vadd.f32 %v1617_v44, %v1616_v42  ;;  %v3571_v42 = vld [vmem:[#allocation7_spill] sm:$0xff]  ;;  %v3572_v44 = vld [vmem:[#allocation8_spill] sm:$0xff] }
 0x25b   : > { %v1619_v3 = vmul.f32 0.001953125, %v1618_v50 }
 0x25d   : > { %v1621_v38 = vadd.f32 1e-05, %v1619_v3 }
 0x25f   : > { %2244 = vrsqrt.f32 %v1621_v38 }
 0x26c   : > { %v2245_v48 = vpop.eup %2244 }
 0x26d   : > { %v1623_v37 = vmul.f32 %v2245_v48, %v1620_v34 }
 0x26f   : > { %v1625_v53 = vmul.f32 %v1623_v37, %v2862_v40  ;;  %v3063_v21 = vrot.slane %v1623_v37, %v1630_v13 }
 0x271   : > { %v1626_v45 = vsub.f32 %v1624_v30, %v1625_v53  ;;  %v1633_v36 = vmul.f32 %v3063_v21, %v2606_v35  ;;  %v1634_v0 = vmul.f32 %v3063_v21, %v3567_v58  ;;  %v1635_v46 = vmul.f32 %v3063_v21, %v3568_v7 }
 0x272   : > { %v1636_v9 = vmul.f32 %v3063_v21, %v3569_v22  ;;  %v1637_v27 = vmul.f32 %v3063_v21, %v3570_v16  ;;  %v1638_v40 = vmul.f32 %v3063_v21, %v3571_v42  ;;  %v1639_v50 = vmul.f32 %v3063_v21, %v3572_v44 }
 0x273   : > { %v3079_v3 = vrot.slane %v1626_v45, %v1630_v13  ;;  %v1640_v35 = vmul.f32 %v3063_v21, %v2632_v51  ;;  %v1641_v38 = vmul.f32 %v3063_v21, %v2636_v54  ;;  %v1642_v59 = vmul.f32 %v3063_v21, %v2640_v57 }
 0x274   : > { %v1643_v62 = vmul.f32 %v3063_v21, %v2644_v60  ;;  %v1644_v34 = vmul.f32 %v3063_v21, %v2648_v63  ;;  %v1645_v48 = vmul.f32 %v3063_v21, %v2652_v2  ;;  %v1646_v13 = vmul.f32 %v3063_v21, %v2656_v5 }
 0x275   : > { %v1703_v51 = vadd.f32 %v3079_v3, %v1633_v36  ;;  %v1704_v37 = vadd.f32 %v3079_v3, %v1634_v0  ;;  %v1705_v54 = vadd.f32 %v3079_v3, %v1635_v46  ;;  %v1706_v57 = vadd.f32 %v3079_v3, %v1636_v9 }
 0x276   : > { %v1707_v30 = vadd.f32 %v3079_v3, %v1637_v27  ;;  %v1708_v60 = vadd.f32 %v3079_v3, %v1638_v40  ;;  %v1709_v63 = vadd.f32 %v3079_v3, %v1639_v50  ;;  %v1710_v53 = vadd.f32 %v3079_v3, %v1640_v35 }
 0x277   : > { %v1767_v2 = vmax.f32 %v1703_v51, 0.0  ;;  %v1768_v45 = vmax.f32 %v1704_v37, 0.0  ;;  %v1769_v58 = vmax.f32 %v1705_v54, 0.0  ;;  %v1770_v5 = vmax.f32 %v1706_v57, 0.0 }
 0x278   : > { %v1771_v7 = vmax.f32 %v1707_v30, 0.0  ;;  %v1772_v36 = vmax.f32 %v1708_v60, 0.0  ;;  %v1773_v22 = vmax.f32 %v1709_v63, 0.0  ;;  %v1774_v0 = vmax.f32 %v1710_v53, 0.0 }
 0x279   : > { %1831 = vst.msk [vmem:[%s3510_s4] sm:$0xff] %vm641_vm1, %v1767_v2  ;;  %1832 = vst.msk [vmem:[%s3510_s4 + $0x8] sm:$0xff] %vm641_vm1, %v1768_v45  ;;  %v1711_v46 = vadd.f32 %v3079_v3, %v1641_v38  ;;  %v1712_v9 = vadd.f32 %v3079_v3, %v1642_v59  ;;  %v1713_v16 = vadd.f32 %v3079_v3, %v1643_v62 }
 0x27a   : > { %1833 = vst.msk [vmem:[%s3510_s4 + $0x10] sm:$0xff] %vm641_vm1, %v1769_v58  ;;  %1834 = vst.msk [vmem:[%s3510_s4 + $0x18] sm:$0xff] %vm641_vm1, %v1770_v5  ;;  %v1714_v27 = vadd.f32 %v3079_v3, %v1644_v34  ;;  %v1715_v42 = vadd.f32 %v3079_v3, %v1645_v48  ;;  %v1716_v40 = vadd.f32 %v3079_v3, %v1646_v13 }
 0x27b   : > { %1835 = vst.msk [vmem:[%s3510_s4 + $0x20] sm:$0xff] %vm641_vm1, %v1771_v7  ;;  %1836 = vst.msk [vmem:[%s3510_s4 + $0x28] sm:$0xff] %vm641_vm1, %v1772_v36  ;;  %v1647_v44 = vmul.f32 %v3063_v21, %v2660_v8  ;;  %v1648_v50 = vmul.f32 %v3063_v21, %v2664_v11  ;;  %v1775_v35 = vmax.f32 %v1711_v46, 0.0  ;;  %v1776_v38 = vmax.f32 %v1712_v9, 0.0 }
 0x27c   : > { %1837 = vst.msk [vmem:[%s3510_s4 + $0x30] sm:$0xff] %vm641_vm1, %v1773_v22  ;;  %1838 = vst.msk [vmem:[%s3510_s4 + $0x38] sm:$0xff] %vm641_vm1, %v1774_v0  ;;  %v1777_v59 = vmax.f32 %v1713_v16, 0.0  ;;  %v1778_v62 = vmax.f32 %v1714_v27, 0.0  ;;  %v1779_v34 = vmax.f32 %v1715_v42, 0.0  ;;  %v1780_v51 = vmax.f32 %v1716_v40, 0.0 }
 0x27d   : > { %v1717_v37 = vadd.f32 %v3079_v3, %v1647_v44  ;;  %v1718_v54 = vadd.f32 %v3079_v3, %v1648_v50  ;;  %1839 = vst.msk [vmem:[%s3510_s4 + $0x40] sm:$0xff] %vm641_vm1, %v1775_v35  ;;  %1840 = vst.msk [vmem:[%s3510_s4 + $0x48] sm:$0xff] %vm641_vm1, %v1776_v38  ;;  %v1649_v8 = vmul.f32 %v3063_v21, %v2668_v14 }
 0x27e   : > { %1841 = vst.msk [vmem:[%s3510_s4 + $0x50] sm:$0xff] %vm641_vm1, %v1777_v59  ;;  %1842 = vst.msk [vmem:[%s3510_s4 + $0x58] sm:$0xff] %vm641_vm1, %v1778_v62  ;;  %v1650_v11 = vmul.f32 %v3063_v21, %v2672_v17  ;;  %v1651_v48 = vmul.f32 %v3063_v21, %v2676_v20  ;;  %v1652_v13 = vmul.f32 %v3063_v21, %v2680_v23 }
 0x27f   : > { %1843 = vst.msk [vmem:[%s3510_s4 + $0x60] sm:$0xff] %vm641_vm1, %v1779_v34  ;;  %1844 = vst.msk [vmem:[%s3510_s4 + $0x68] sm:$0xff] %vm641_vm1, %v1780_v51  ;;  %v1781_v14 = vmax.f32 %v1717_v37, 0.0  ;;  %v1782_v57 = vmax.f32 %v1718_v54, 0.0  ;;  %v1653_v17 = vmul.f32 %v3063_v21, %v2684_v26  ;;  %v1654_v20 = vmul.f32 %v3063_v21, %v2688_v29 }
 0x280   : > { %v1719_v23 = vadd.f32 %v3079_v3, %v1649_v8  ;;  %v1720_v30 = vadd.f32 %v3079_v3, %v1650_v11  ;;  %v1721_v60 = vadd.f32 %v3079_v3, %v1651_v48  ;;  %v1722_v63 = vadd.f32 %v3079_v3, %v1652_v13 }
 0x281   : > { %1845 = vst.msk [vmem:[%s3510_s4 + $0x70] sm:$0xff] %vm641_vm1, %v1781_v14  ;;  %1846 = vst.msk [vmem:[%s3510_s4 + $0x78] sm:$0xff] %vm641_vm1, %v1782_v57  ;;  %v1723_v26 = vadd.f32 %v3079_v3, %v1653_v17  ;;  %v1724_v29 = vadd.f32 %v3079_v3, %v1654_v20  ;;  %v1655_v53 = vmul.f32 %v3063_v21, %v2692_v32 }
 0x282   : > { %v1656_v2 = vmul.f32 %v3063_v21, %v2696_v39  ;;  %v1783_v45 = vmax.f32 %v1719_v23, 0.0  ;;  %v1784_v58 = vmax.f32 %v1720_v30, 0.0  ;;  %v1785_v5 = vmax.f32 %v1721_v60, 0.0 }
 0x283   : > { %v1786_v7 = vmax.f32 %v1722_v63, 0.0  ;;  %v1787_v36 = vmax.f32 %v1723_v26, 0.0  ;;  %v1788_v22 = vmax.f32 %v1724_v29, 0.0  ;;  %v1725_v0 = vadd.f32 %v3079_v3, %v1655_v53 }
 0x284   : > { %v1726_v46 = vadd.f32 %v3079_v3, %v1656_v2  ;;  %1847 = vst.msk [vmem:[%s3510_s4 + $0x80] sm:$0xff] %vm641_vm1, %v1783_v45  ;;  %1848 = vst.msk [vmem:[%s3510_s4 + $0x88] sm:$0xff] %vm641_vm1, %v1784_v58  ;;  %v1657_v32 = vmul.f32 %v3063_v21, %v2700_v43  ;;  %v1658_v39 = vmul.f32 %v3063_v21, %v2704_v47 }
 0x285   : > { %1849 = vst.msk [vmem:[%s3510_s4 + $0x90] sm:$0xff] %vm641_vm1, %v1785_v5  ;;  %1850 = vst.msk [vmem:[%s3510_s4 + $0x98] sm:$0xff] %vm641_vm1, %v1786_v7  ;;  %v1659_v9 = vmul.f32 %v3063_v21, %v2708_v52  ;;  %v1660_v16 = vmul.f32 %v3063_v21, %v2712_v56  ;;  %v1789_v43 = vmax.f32 %v1725_v0, 0.0  ;;  %v1661_v47 = vmul.f32 %v3063_v21, %v2716_v61 }
 0x286   : > { %1851 = vst.msk [vmem:[%s3510_s4 + $0xa0] sm:$0xff] %vm641_vm1, %v1787_v36  ;;  %1852 = vst.msk [vmem:[%s3510_s4 + $0xa8] sm:$0xff] %vm641_vm1, %v1788_v22  ;;  %v1790_v27 = vmax.f32 %v1726_v46, 0.0  ;;  %v1662_v52 = vmul.f32 %v3063_v21, %v2720_v1  ;;  %v1727_v56 = vadd.f32 %v3079_v3, %v1657_v32  ;;  %v1728_v42 = vadd.f32 %v3079_v3, %v1658_v39  ;;  %v2247_v39 = vld [vmem:[#allocation2 + $0x170] sm:$0xff] }
 0x287   : > { %v1729_v40 = vadd.f32 %v3079_v3, %v1659_v9  ;;  %v1730_v44 = vadd.f32 %v3079_v3, %v1660_v16  ;;  %1853 = vst.msk [vmem:[%s3510_s4 + $0xb0] sm:$0xff] %vm641_vm1, %v1789_v43  ;;  %v1731_v61 = vadd.f32 %v3079_v3, %v1661_v47  ;;  %v1663_v50 = vmul.f32 %v3063_v21, %v2724_v6  ;;  %v3573_v16 = vld [vmem:[#allocation9_spill] sm:$0xff] }
 0x288   : > { %1854 = vst.msk [vmem:[%s3510_s4 + $0xb8] sm:$0xff] %vm641_vm1, %v1790_v27  ;;  %v1732_v1 = vadd.f32 %v3079_v3, %v1662_v52  ;;  %v1664_v35 = vmul.f32 %v3063_v21, %v2728_v10  ;;  %v1791_v38 = vmax.f32 %v1727_v56, 0.0  ;;  %v1792_v59 = vmax.f32 %v1728_v42, 0.0 }
 0x289   : > { %v1793_v62 = vmax.f32 %v1729_v40, 0.0  ;;  %v1794_v34 = vmax.f32 %v1730_v44, 0.0  ;;  %v1795_v51 = vmax.f32 %v1731_v61, 0.0  ;;  %v1733_v54 = vadd.f32 %v3079_v3, %v1663_v50 }
 0x28a   : > { %v1796_v37 = vmax.f32 %v1732_v1, 0.0  ;;  %v1734_v8 = vadd.f32 %v3079_v3, %v1664_v35  ;;  %1855 = vst.msk [vmem:[%s3510_s4 + $0xc0] sm:$0xff] %vm641_vm1, %v1791_v38  ;;  %1856 = vst.msk [vmem:[%s3510_s4 + $0xc8] sm:$0xff] %vm641_vm1, %v1792_v59  ;;  %v1665_v6 = vmul.f32 %v3063_v21, %v2732_v15  ;;  %v1666_v10 = vmul.f32 %v3063_v21, %v2736_v19  ;;  %v2248_v1 = vld [vmem:[#allocation2 + $0x180] sm:$0xff]  ;;  %v2249_v35 = vld [vmem:[#allocation2 + $0x188] sm:$0xff] }
 0x28b   : > { %1857 = vst.msk [vmem:[%s3510_s4 + $0xd0] sm:$0xff] %vm641_vm1, %v1793_v62  ;;  %1858 = vst.msk [vmem:[%s3510_s4 + $0xd8] sm:$0xff] %vm641_vm1, %v1794_v34  ;;  %v1667_v11 = vmul.f32 %v3063_v21, %v2740_v24  ;;  %v1668_v48 = vmul.f32 %v3063_v21, %v2744_v28  ;;  %v1797_v15 = vmax.f32 %v1733_v54, 0.0  ;;  %v1669_v19 = vmul.f32 %v3063_v21, %v2748_v33  ;;  %v2250_v59 = vld [vmem:[#allocation2 + $0x190] sm:$0xff]  ;;  %v2251_v34 = vld [vmem:[#allocation2 + $0x198] sm:$0xff] }
 0x28c   : > { %1859 = vst.msk [vmem:[%s3510_s4 + $0xe0] sm:$0xff] %vm641_vm1, %v1795_v51  ;;  %1860 = vst.msk [vmem:[%s3510_s4 + $0xe8] sm:$0xff] %vm641_vm1, %v1796_v37  ;;  %v1798_v13 = vmax.f32 %v1734_v8, 0.0  ;;  %v1670_v24 = vmul.f32 %v3063_v21, %v2752_v41  ;;  %v1735_v28 = vadd.f32 %v3079_v3, %v1665_v6  ;;  %v1736_v14 = vadd.f32 %v3079_v3, %v1666_v10  ;;  %v2252_v8 = vld [vmem:[#allocation2 + $0x1a0] sm:$0xff]  ;;  %v2253_v10 = vld [vmem:[#allocation2 + $0x1a8] sm:$0xff] }
 0x28d   : > { %v1737_v57 = vadd.f32 %v3079_v3, %v1667_v11  ;;  %v1738_v17 = vadd.f32 %v3079_v3, %v1668_v48  ;;  %1861 = vst.msk [vmem:[%s3510_s4 + $0xf0] sm:$0xff] %vm641_vm1, %v1797_v15  ;;  %v1739_v33 = vadd.f32 %v3079_v3, %v1669_v19  ;;  %v1671_v20 = vmul.f32 %v3063_v21, %v2756_v49  ;;  %v2246_v49 = vld [vmem:[#allocation2 + $0x140] sm:$0xff] }
 0x28e   : > { %1862 = vst.msk [vmem:[%s3510_s4 + $0xf8] sm:$0xff] %vm641_vm1, %v1798_v13  ;;  %v1740_v41 = vadd.f32 %v3079_v3, %v1670_v24  ;;  %v1672_v23 = vmul.f32 %v3063_v21, %v2760_v55  ;;  %v1799_v30 = vmax.f32 %v1735_v28, 0.0  ;;  %v1800_v60 = vmax.f32 %v1736_v14, 0.0  ;;  %v2254_v14 = vld [vmem:[#allocation2 + $0x1b0] sm:$0xff] }
 0x28f   : > { %v1801_v63 = vmax.f32 %v1737_v57, 0.0  ;;  %v1802_v26 = vmax.f32 %v1738_v17, 0.0  ;;  %v1803_v29 = vmax.f32 %v1739_v33, 0.0  ;;  %v1741_v2 = vadd.f32 %v3079_v3, %v1671_v20  ;;  %v2255_v17 = vld [vmem:[#allocation2 + $0x1b8] sm:$0xff] }
 0x290   : > { %v1804_v53 = vmax.f32 %v1740_v41, 0.0  ;;  %v1742_v45 = vadd.f32 %v3079_v3, %v1672_v23  ;;  %1863 = vst.msk [vmem:[%s3510_s4 + $0x100] sm:$0xff] %vm641_vm1, %v1799_v30  ;;  %1864 = vst.msk [vmem:[%s3510_s4 + $0x108] sm:$0xff] %vm641_vm1, %v1800_v60  ;;  %v1673_v55 = vmul.f32 %v2246_v49, %v3063_v21  ;;  %v1674_v58 = vmul.f32 %v3063_v21, %v2768_v4 }
 0x291   : > { %1865 = vst.msk [vmem:[%s3510_s4 + $0x110] sm:$0xff] %vm641_vm1, %v1801_v63  ;;  %1866 = vst.msk [vmem:[%s3510_s4 + $0x118] sm:$0xff] %vm641_vm1, %v1802_v26  ;;  %v1675_v5 = vmul.f32 %v3063_v21, %v2772_v12  ;;  %v1676_v7 = vmul.f32 %v3063_v21, %v2776_v18  ;;  %v1805_v36 = vmax.f32 %v1741_v2, 0.0  ;;  %v1677_v4 = vmul.f32 %v3063_v21, %v2780_v25 }
 0x292   : > { %1867 = vst.msk [vmem:[%s3510_s4 + $0x120] sm:$0xff] %vm641_vm1, %v1803_v29  ;;  %1868 = vst.msk [vmem:[%s3510_s4 + $0x128] sm:$0xff] %vm641_vm1, %v1804_v53  ;;  %v1806_v22 = vmax.f32 %v1742_v45, 0.0  ;;  %v1678_v12 = vmul.f32 %v3063_v21, %v2784_v31  ;;  %v1743_v18 = vadd.f32 %v3079_v3, %v1673_v55  ;;  %v1744_v0 = vadd.f32 %v3079_v3, %v1674_v58  ;;  %v2256_v53 = vld [vmem:[#allocation2 + $0x1c0] sm:$0xff]  ;;  %v2257_v45 = vld [vmem:[#allocation2 + $0x1c8] sm:$0xff] }
 0x293   : > { %v1745_v46 = vadd.f32 %v3079_v3, %v1675_v5  ;;  %v1746_v32 = vadd.f32 %v3079_v3, %v1676_v7  ;;  %1869 = vst.msk [vmem:[%s3510_s4 + $0x130] sm:$0xff] %vm641_vm1, %v1805_v36  ;;  %v1747_v25 = vadd.f32 %v3079_v3, %v1677_v4  ;;  %v1679_v9 = vmul.f32 %v2247_v39, %v3063_v21  ;;  %v2258_v55 = vld [vmem:[#allocation2 + $0x1d0] sm:$0xff]  ;;  %v2259_v5 = vld [vmem:[#allocation2 + $0x1d8] sm:$0xff]  ;;  %v2260_v4 = vld [vmem:[#allocation2 + $0x1e0] sm:$0xff] }
 0x294   : > { %1870 = vst.msk [vmem:[%s3510_s4 + $0x138] sm:$0xff] %vm641_vm1, %v1806_v22  ;;  %v1748_v31 = vadd.f32 %v3079_v3, %v1678_v12  ;;  %v1680_v43 = vmul.f32 %v3063_v21, %v3573_v16  ;;  %v1807_v27 = vmax.f32 %v1743_v18, 0.0  ;;  %v1808_v47 = vmax.f32 %v1744_v0, 0.0  ;;  %v2261_v18 = vld [vmem:[#allocation2 + $0x1e8] sm:$0xff]  ;;  %v2262_v16 = vld [vmem:[#allocation2 + $0x1f0] sm:$0xff] }
 0x295   : > { %v1809_v52 = vmax.f32 %v1745_v46, 0.0  ;;  %v1810_v56 = vmax.f32 %v1746_v32, 0.0  ;;  %v1811_v42 = vmax.f32 %v1747_v25, 0.0  ;;  %v1749_v44 = vadd.f32 %v3079_v3, %v1679_v9 }
 0x296   : > { %v1812_v40 = vmax.f32 %v1748_v31, 0.0  ;;  %v1750_v61 = vadd.f32 %v3079_v3, %v1680_v43  ;;  %1871 = vst.msk [vmem:[%s3510_s4 + $0x140] sm:$0xff] %vm641_vm1, %v1807_v27  ;;  %1872 = vst.msk [vmem:[%s3510_s4 + $0x148] sm:$0xff] %vm641_vm1, %v1808_v47  ;;  %v1681_v50 = vmul.f32 %v2248_v1, %v3063_v21  ;;  %v1682_v38 = vmul.f32 %v2249_v35, %v3063_v21  ;;  %v2263_v27 = vld [vmem:[#allocation2 + $0x1f8] sm:$0xff] }
 0x297   : > { %1873 = vst.msk [vmem:[%s3510_s4 + $0x150] sm:$0xff] %vm641_vm1, %v1809_v52  ;;  %1874 = vst.msk [vmem:[%s3510_s4 + $0x158] sm:$0xff] %vm641_vm1, %v1810_v56  ;;  %v1683_v62 = vmul.f32 %v2250_v59, %v3063_v21  ;;  %v1684_v51 = vmul.f32 %v2251_v34, %v3063_v21  ;;  %v1813_v37 = vmax.f32 %v1749_v44, 0.0  ;;  %v1685_v6 = vmul.f32 %v2252_v8, %v3063_v21 }
 0x298   : > { %1875 = vst.msk [vmem:[%s3510_s4 + $0x160] sm:$0xff] %vm641_vm1, %v1811_v42  ;;  %1876 = vst.msk [vmem:[%s3510_s4 + $0x168] sm:$0xff] %vm641_vm1, %v1812_v40  ;;  %v1814_v54 = vmax.f32 %v1750_v61, 0.0  ;;  %v1686_v11 = vmul.f32 %v2253_v10, %v3063_v21  ;;  %v1751_v48 = vadd.f32 %v3079_v3, %v1681_v50  ;;  %v1752_v15 = vadd.f32 %v3079_v3, %v1682_v38 }
 0x299   : > { %v1753_v13 = vadd.f32 %v3079_v3, %v1683_v62  ;;  %v1754_v19 = vadd.f32 %v3079_v3, %v1684_v51  ;;  %1877 = vst.msk [vmem:[%s3510_s4 + $0x170] sm:$0xff] %vm641_vm1, %v1813_v37  ;;  %v1755_v24 = vadd.f32 %v3079_v3, %v1685_v6  ;;  %v1687_v57 = vmul.f32 %v2254_v14, %v3063_v21 }
 0x29a   : > { %1878 = vst.msk [vmem:[%s3510_s4 + $0x178] sm:$0xff] %vm641_vm1, %v1814_v54  ;;  %v1756_v28 = vadd.f32 %v3079_v3, %v1686_v11  ;;  %v1688_v33 = vmul.f32 %v2255_v17, %v3063_v21  ;;  %v1815_v41 = vmax.f32 %v1751_v48, 0.0  ;;  %v1816_v20 = vmax.f32 %v1752_v15, 0.0 }
 0x29b   : > { %v1817_v23 = vmax.f32 %v1753_v13, 0.0  ;;  %v1818_v30 = vmax.f32 %v1754_v19, 0.0  ;;  %v1819_v60 = vmax.f32 %v1755_v24, 0.0  ;;  %v1757_v26 = vadd.f32 %v3079_v3, %v1687_v57 }
 0x29c   : > { %v1820_v63 = vmax.f32 %v1756_v28, 0.0  ;;  %v1758_v29 = vadd.f32 %v3079_v3, %v1688_v33  ;;  %1879 = vst.msk [vmem:[%s3510_s4 + $0x180] sm:$0xff] %vm641_vm1, %v1815_v41  ;;  %1880 = vst.msk [vmem:[%s3510_s4 + $0x188] sm:$0xff] %vm641_vm1, %v1816_v20  ;;  %v1689_v2 = vmul.f32 %v2256_v53, %v3063_v21  ;;  %v1690_v49 = vmul.f32 %v2257_v45, %v3063_v21 }
 0x29d   : > { %1881 = vst.msk [vmem:[%s3510_s4 + $0x190] sm:$0xff] %vm641_vm1, %v1817_v23  ;;  %1882 = vst.msk [vmem:[%s3510_s4 + $0x198] sm:$0xff] %vm641_vm1, %v1818_v30  ;;  %v1691_v58 = vmul.f32 %v2258_v55, %v3063_v21  ;;  %v1692_v7 = vmul.f32 %v2259_v5, %v3063_v21  ;;  %v1821_v36 = vmax.f32 %v1757_v26, 0.0  ;;  %v1693_v12 = vmul.f32 %v2260_v4, %v3063_v21 }
 0x29e   : > { %1883 = vst.msk [vmem:[%s3510_s4 + $0x1a0] sm:$0xff] %vm641_vm1, %v1819_v60  ;;  %1884 = vst.msk [vmem:[%s3510_s4 + $0x1a8] sm:$0xff] %vm641_vm1, %v1820_v63  ;;  %v1822_v22 = vmax.f32 %v1758_v29, 0.0  ;;  %v1694_v0 = vmul.f32 %v2261_v18, %v3063_v21  ;;  %v1759_v46 = vadd.f32 %v3079_v3, %v1689_v2  ;;  %v1760_v32 = vadd.f32 %v3079_v3, %v1690_v49 }
 0x29f   : > { %v1761_v25 = vadd.f32 %v3079_v3, %v1691_v58  ;;  %v1762_v31 = vadd.f32 %v3079_v3, %v1692_v7  ;;  %1885 = vst.msk [vmem:[%s3510_s4 + $0x1b0] sm:$0xff] %vm641_vm1, %v1821_v36  ;;  %v1763_v39 = vadd.f32 %v3079_v3, %v1693_v12  ;;  %v1695_v43 = vmul.f32 %v2262_v16, %v3063_v21 }
 0x2a0   : > { %1886 = vst.msk [vmem:[%s3510_s4 + $0x1b8] sm:$0xff] %vm641_vm1, %v1822_v22  ;;  %v1764_v9 = vadd.f32 %v3079_v3, %v1694_v0  ;;  %v1696_v47 = vmul.f32 %v2263_v27, %v3063_v21  ;;  %v1823_v52 = vmax.f32 %v1759_v46, 0.0  ;;  %v1824_v56 = vmax.f32 %v1760_v32, 0.0 }
 0x2a1   : > { %v1825_v42 = vmax.f32 %v1761_v25, 0.0  ;;  %v1826_v40 = vmax.f32 %v1762_v31, 0.0  ;;  %v1827_v44 = vmax.f32 %v1763_v39, 0.0  ;;  %v1765_v1 = vadd.f32 %v3079_v3, %v1695_v43 }
 0x2a2   : > { %v1828_v61 = vmax.f32 %v1764_v9, 0.0  ;;  %v1766_v50 = vadd.f32 %v3079_v3, %v1696_v47  ;;  %1887 = vst.msk [vmem:[%s3510_s4 + $0x1c0] sm:$0xff] %vm641_vm1, %v1823_v52  ;;  %1888 = vst.msk [vmem:[%s3510_s4 + $0x1c8] sm:$0xff] %vm641_vm1, %v1824_v56 }
 0x2a3   : > { %1889 = vst.msk [vmem:[%s3510_s4 + $0x1d0] sm:$0xff] %vm641_vm1, %v1825_v42  ;;  %1890 = vst.msk [vmem:[%s3510_s4 + $0x1d8] sm:$0xff] %vm641_vm1, %v1826_v40  ;;  %v1829_v21 = vmax.f32 %v1765_v1, 0.0 }
 0x2a4   : > { %1891 = vst.msk [vmem:[%s3510_s4 + $0x1e0] sm:$0xff] %vm641_vm1, %v1827_v44  ;;  %1892 = vst.msk [vmem:[%s3510_s4 + $0x1e8] sm:$0xff] %vm641_vm1, %v1828_v61  ;;  %v1830_v3 = vmax.f32 %v1766_v50, 0.0 }
 0x2a5   : > { %1893 = vst.msk [vmem:[%s3510_s4 + $0x1f0] sm:$0xff] %vm641_vm1, %v1829_v21 }
 0x2a6   : > { %1894 = vst.msk [vmem:[%s3510_s4 + $0x1f8] sm:$0xff] %vm641_vm1, %v1830_v3 }
 0x2a7 PF: > { %s14_s17 = sadd.s32 1, %s2286_s17   ;;  %s3574_s15 = smov %s2282_s16 }
 0x2a8   : > { %p11_p7 = scmp.ge.s32.totalorder %s14_s17, 11   ;;  %s3575_s16 = smov %s3577_s18 }
 0x2aa   :  { %13 = sbr.rel (!%p11_p7) target bundleno = 2 (0x2), region = 83 }

// kernel: forward.8
= control target key start
LH: loop header
LB: loop body
LE: loop exit
PB: predicated region body
PF: predicated region fallthrough
CT: control target
= control target key end

     0   :  { %s2232_s15 = smov 0   ;;  %s2234_s16 = smov 0   ;;  %s3442_s0 = inlined_call_operand.vmem [shape: bf16[9,512,32], index: 0, kind: input, shape index: {}]   ;;  %s3443_s1 = inlined_call_operand.vmem [shape: bf16[9,32,32], index: 1, kind: input, shape index: {}]   ;;  %s3444_s2 = inlined_call_operand.vmem [shape: f32[1,32], index: 2, kind: input, shape index: {}]   ;;  %s3445_s3 = inlined_call_operand.vmem [shape: f32[1,32], index: 3, kind: input, shape index: {}]   ;;  %s3446_s4 = inlined_call_operand.vmem [shape: f32[512,32], index: 4, kind: output, shape index: {}]  }
   0x1   :  { %s2236_s17 = smov 0  }
   0x2 LB: > { %s23_s18 = sadd.s32 1, %s2200_s16  ;;  %p1937_p0 = scmp.ge.s32.totalorder %s2204_s17, 1  ;;  %s2204_s17 = sphi %s2236_s17, %s14_s17   ;;  %s2200_s16 = sphi %s2234_s16, %s3550_s16   ;;  %s2196_s15 = sphi %s2232_s15, %s3549_s15  }
   0x3   : > { %p24_p1 = scmp.ge.s32.totalorder %s23_s18, 9  ;;  %p205_p2 = scmp.lt.s32.totalorder %s2204_s17, 10 }
   0x5   : > { %s3552_s18 = smov (%p24_p1, %s23_s18), 0  ;;  %p206_p3 = pnand %p1937_p0, %p205_p2 }
   0x6   : > { %p244_p4 = scmp.lt.s32.totalorder (!%p206_p3), %s2196_s15, 8  ;;  %p1942_p5 = scmp.ne.s32.totalorder (!%p206_p3), %s2196_s15, 0 }
   0x7   : > { %209 = sbr.rel (%p206_p3) target bundleno = 668 (0x29c), region = 36 }
   0xc   : > { %s245_s19 = scalar_select %p244_p4, %s2196_s15, 8 }
   0xd   : > { %271 = sbr.rel (%p1942_p5) target bundleno = 51 (0x33), region = 40 }
   0xe   : > { %s2013_s20 = sshll.u32 %s245_s19, 8  ;;  %s2014_s21 = sshll.u32 %s245_s19, 4 }
   0xf   : > { %s2257_s24 = scalar_lea.vmem %s3442_s0, %s2013_s20  ;;  %s2262_s27 = scalar_lea.vmem %s3443_s1, %s2014_s21 }
  0x12   : > { %vm272_vm0 = vcmask 261120   ;;  %v2206_v0 = vmov 0.0  }
  0x13   : > { %273 = vst.msk [vmem:[#allocation2] sm:$0xff] %vm272_vm0, %v2206_v0  ;;  %274 = vst.msk [vmem:[#allocation2 + $0x8] sm:$0xff] %vm272_vm0, %v2206_v0 }
  0x14   : > { %275 = vst.msk [vmem:[#allocation2 + $0x10] sm:$0xff] %vm272_vm0, %v2206_v0  ;;  %276 = vst.msk [vmem:[#allocation2 + $0x18] sm:$0xff] %vm272_vm0, %v2206_v0 }
  0x15   : > { %277 = vst.msk [vmem:[#allocation2 + $0x20] sm:$0xff] %vm272_vm0, %v2206_v0  ;;  %278 = vst.msk [vmem:[#allocation2 + $0x28] sm:$0xff] %vm272_vm0, %v2206_v0 }
  0x16   : > { %279 = vst.msk [vmem:[#allocation2 + $0x30] sm:$0xff] %vm272_vm0, %v2206_v0  ;;  %280 = vst.msk [vmem:[#allocation2 + $0x38] sm:$0xff] %vm272_vm0, %v2206_v0 }
  0x17   : > { %281 = vst.msk [vmem:[#allocation2 + $0x40] sm:$0xff] %vm272_vm0, %v2206_v0  ;;  %282 = vst.msk [vmem:[#allocation2 + $0x48] sm:$0xff] %vm272_vm0, %v2206_v0 }
  0x18   : > { %283 = vst.msk [vmem:[#allocation2 + $0x50] sm:$0xff] %vm272_vm0, %v2206_v0  ;;  %284 = vst.msk [vmem:[#allocation2 + $0x58] sm:$0xff] %vm272_vm0, %v2206_v0 }
  0x19   : > { %285 = vst.msk [vmem:[#allocation2 + $0x60] sm:$0xff] %vm272_vm0, %v2206_v0  ;;  %286 = vst.msk [vmem:[#allocation2 + $0x68] sm:$0xff] %vm272_vm0, %v2206_v0 }
  0x1a   : > { %287 = vst.msk [vmem:[#allocation2 + $0x70] sm:$0xff] %vm272_vm0, %v2206_v0  ;;  %288 = vst.msk [vmem:[#allocation2 + $0x78] sm:$0xff] %vm272_vm0, %v2206_v0 }
  0x1b   : > { %289 = vst.msk [vmem:[#allocation2 + $0x80] sm:$0xff] %vm272_vm0, %v2206_v0  ;;  %290 = vst.msk [vmem:[#allocation2 + $0x88] sm:$0xff] %vm272_vm0, %v2206_v0 }
  0x1c   : > { %291 = vst.msk [vmem:[#allocation2 + $0x90] sm:$0xff] %vm272_vm0, %v2206_v0  ;;  %292 = vst.msk [vmem:[#allocation2 + $0x98] sm:$0xff] %vm272_vm0, %v2206_v0 }
  0x1d   : > { %293 = vst.msk [vmem:[#allocation2 + $0xa0] sm:$0xff] %vm272_vm0, %v2206_v0  ;;  %294 = vst.msk [vmem:[#allocation2 + $0xa8] sm:$0xff] %vm272_vm0, %v2206_v0 }
  0x1e   : > { %295 = vst.msk [vmem:[#allocation2 + $0xb0] sm:$0xff] %vm272_vm0, %v2206_v0  ;;  %296 = vst.msk [vmem:[#allocation2 + $0xb8] sm:$0xff] %vm272_vm0, %v2206_v0 }
  0x1f   : > { %297 = vst.msk [vmem:[#allocation2 + $0xc0] sm:$0xff] %vm272_vm0, %v2206_v0  ;;  %298 = vst.msk [vmem:[#allocation2 + $0xc8] sm:$0xff] %vm272_vm0, %v2206_v0 }
  0x20   : > { %299 = vst.msk [vmem:[#allocation2 + $0xd0] sm:$0xff] %vm272_vm0, %v2206_v0  ;;  %300 = vst.msk [vmem:[#allocation2 + $0xd8] sm:$0xff] %vm272_vm0, %v2206_v0 }
  0x21   : > { %301 = vst.msk [vmem:[#allocation2 + $0xe0] sm:$0xff] %vm272_vm0, %v2206_v0  ;;  %302 = vst.msk [vmem:[#allocation2 + $0xe8] sm:$0xff] %vm272_vm0, %v2206_v0 }
  0x22   : > { %303 = vst.msk [vmem:[#allocation2 + $0xf0] sm:$0xff] %vm272_vm0, %v2206_v0  ;;  %304 = vst.msk [vmem:[#allocation2 + $0xf8] sm:$0xff] %vm272_vm0, %v2206_v0 }
  0x23   : > { %305 = vst.msk [vmem:[#allocation2 + $0x100] sm:$0xff] %vm272_vm0, %v2206_v0  ;;  %306 = vst.msk [vmem:[#allocation2 + $0x108] sm:$0xff] %vm272_vm0, %v2206_v0 }
  0x24   : > { %307 = vst.msk [vmem:[#allocation2 + $0x110] sm:$0xff] %vm272_vm0, %v2206_v0  ;;  %308 = vst.msk [vmem:[#allocation2 + $0x118] sm:$0xff] %vm272_vm0, %v2206_v0 }
  0x25   : > { %309 = vst.msk [vmem:[#allocation2 + $0x120] sm:$0xff] %vm272_vm0, %v2206_v0  ;;  %310 = vst.msk [vmem:[#allocation2 + $0x128] sm:$0xff] %vm272_vm0, %v2206_v0 }
  0x26   : > { %311 = vst.msk [vmem:[#allocation2 + $0x130] sm:$0xff] %vm272_vm0, %v2206_v0  ;;  %312 = vst.msk [vmem:[#allocation2 + $0x138] sm:$0xff] %vm272_vm0, %v2206_v0 }
  0x27   : > { %313 = vst.msk [vmem:[#allocation2 + $0x140] sm:$0xff] %vm272_vm0, %v2206_v0  ;;  %314 = vst.msk [vmem:[#allocation2 + $0x148] sm:$0xff] %vm272_vm0, %v2206_v0 }
  0x28   : > { %315 = vst.msk [vmem:[#allocation2 + $0x150] sm:$0xff] %vm272_vm0, %v2206_v0  ;;  %316 = vst.msk [vmem:[#allocation2 + $0x158] sm:$0xff] %vm272_vm0, %v2206_v0 }
  0x29   : > { %317 = vst.msk [vmem:[#allocation2 + $0x160] sm:$0xff] %vm272_vm0, %v2206_v0  ;;  %318 = vst.msk [vmem:[#allocation2 + $0x168] sm:$0xff] %vm272_vm0, %v2206_v0 }
  0x2a   : > { %319 = vst.msk [vmem:[#allocation2 + $0x170] sm:$0xff] %vm272_vm0, %v2206_v0  ;;  %320 = vst.msk [vmem:[#allocation2 + $0x178] sm:$0xff] %vm272_vm0, %v2206_v0 }
  0x2b   : > { %321 = vst.msk [vmem:[#allocation2 + $0x180] sm:$0xff] %vm272_vm0, %v2206_v0  ;;  %322 = vst.msk [vmem:[#allocation2 + $0x188] sm:$0xff] %vm272_vm0, %v2206_v0 }
  0x2c   : > { %323 = vst.msk [vmem:[#allocation2 + $0x190] sm:$0xff] %vm272_vm0, %v2206_v0  ;;  %324 = vst.msk [vmem:[#allocation2 + $0x198] sm:$0xff] %vm272_vm0, %v2206_v0 }
  0x2d   : > { %325 = vst.msk [vmem:[#allocation2 + $0x1a0] sm:$0xff] %vm272_vm0, %v2206_v0  ;;  %326 = vst.msk [vmem:[#allocation2 + $0x1a8] sm:$0xff] %vm272_vm0, %v2206_v0 }
  0x2e   : > { %327 = vst.msk [vmem:[#allocation2 + $0x1b0] sm:$0xff] %vm272_vm0, %v2206_v0  ;;  %328 = vst.msk [vmem:[#allocation2 + $0x1b8] sm:$0xff] %vm272_vm0, %v2206_v0 }
  0x2f   : > { %329 = vst.msk [vmem:[#allocation2 + $0x1c0] sm:$0xff] %vm272_vm0, %v2206_v0  ;;  %330 = vst.msk [vmem:[#allocation2 + $0x1c8] sm:$0xff] %vm272_vm0, %v2206_v0 }
  0x30   : > { %331 = vst.msk [vmem:[#allocation2 + $0x1d0] sm:$0xff] %vm272_vm0, %v2206_v0  ;;  %332 = vst.msk [vmem:[#allocation2 + $0x1d8] sm:$0xff] %vm272_vm0, %v2206_v0 }
  0x31   : > { %333 = vst.msk [vmem:[#allocation2 + $0x1e0] sm:$0xff] %vm272_vm0, %v2206_v0  ;;  %334 = vst.msk [vmem:[#allocation2 + $0x1e8] sm:$0xff] %vm272_vm0, %v2206_v0 }
  0x32   : > { %335 = vst.msk [vmem:[#allocation2 + $0x1f0] sm:$0xff] %vm272_vm0, %v2206_v0  ;;  %336 = vst.msk [vmem:[#allocation2 + $0x1f8] sm:$0xff] %vm272_vm0, %v2206_v0 }
  0x33 PF: > { %v2146_v1 = vld [vmem:[%s2262_s27 + $0x8] sm:$0xff]   ;;  %v2147_v2 = vld [vmem:[%s2262_s27] sm:$0xff]   ;;  %vm641_vm1 = vcmask 261120   ;;  %v2152_v7 = vld [vmem:[%s2257_s24 + $0x10] sm:$0xff]   ;;  %p2009_p6 = scmp.ne.s32.totalorder %s2196_s15, 8 }
  0x34   : > { %2049 = vmatprep.subr.bf16.mxu0 %v2146_v1  ;;  %2117 = vmatprep.subr.bf16.mxu1 %v2146_v1  ;;  %v2148_v3 = vld [vmem:[%s2257_s24] sm:$0xff]   ;;  %v2150_v5 = vld [vmem:[%s2257_s24 + $0x8] sm:$0xff]   ;;  %v2153_v8 = vld [vmem:[%s2257_s24 + $0x90] sm:$0xff]  }
  0x35   : > { %2050 = vmatpush3.bf16.msra.mxu0 %v2146_v1  ;;  %2119 = vmatpush3.bf16.msra.mxu1 %v2146_v1  ;;  %v2149_v4 = vld [vmem:[%s2257_s24 + $0x80] sm:$0xff]   ;;  %v2151_v6 = vld [vmem:[%s2257_s24 + $0x88] sm:$0xff]   ;;  %v2154_v9 = vld [vmem:[%s2257_s24 + $0x18] sm:$0xff]  }
  0x36   : > { %2051 = vmatprep.subr.bf16.mxu0 %v2147_v2  ;;  %2118 = vmatprep.subr.bf16.mxu1 %v2147_v2  ;;  %v2155_v10 = vld [vmem:[%s2257_s24 + $0x98] sm:$0xff]   ;;  %v2156_v11 = vld [vmem:[%s2257_s24 + $0x20] sm:$0xff]   ;;  %v2158_v13 = vld [vmem:[%s2257_s24 + $0x28] sm:$0xff]  }
  0x37   : > { %2053 = vmatprep.mubr.msk.bf16.mxu0 %vm641_vm1, %v2148_v3  ;;  %2085 = vmatprep.mubr.msk.bf16.mxu1 %vm641_vm1, %v2149_v4  ;;  %v2157_v12 = vld [vmem:[%s2257_s24 + $0xa0] sm:$0xff]   ;;  %v2159_v14 = vld [vmem:[%s2257_s24 + $0xa8] sm:$0xff]   ;;  %v2160_v15 = vld [vmem:[%s2257_s24 + $0x30] sm:$0xff]  }
  0x38   : > { %v2161_v16 = vld [vmem:[%s2257_s24 + $0xb0] sm:$0xff]   ;;  %v2162_v17 = vld [vmem:[%s2257_s24 + $0x38] sm:$0xff]   ;;  %v2164_v19 = vld [vmem:[%s2257_s24 + $0x40] sm:$0xff]  }
  0x39   : > { %2052 = vmatpush3.bf16.msra.mxu0 %v2147_v2  ;;  %2120 = vmatpush3.bf16.msra.mxu1 %v2147_v2  ;;  %v2163_v18 = vld [vmem:[%s2257_s24 + $0xb8] sm:$0xff]   ;;  %v2165_v20 = vld [vmem:[%s2257_s24 + $0xc0] sm:$0xff]   ;;  %v2166_v21 = vld [vmem:[%s2257_s24 + $0x48] sm:$0xff]  }
  0x3a   : > { %v2167_v22 = vld [vmem:[%s2257_s24 + $0xc8] sm:$0xff]   ;;  %v2168_v23 = vld [vmem:[%s2257_s24 + $0x50] sm:$0xff]   ;;  %v2170_v25 = vld [vmem:[%s2257_s24 + $0x58] sm:$0xff]  }
  0x3b   : > { %v2169_v24 = vld [vmem:[%s2257_s24 + $0xd0] sm:$0xff]   ;;  %v2171_v26 = vld [vmem:[%s2257_s24 + $0xd8] sm:$0xff]   ;;  %v2172_v27 = vld [vmem:[%s2257_s24 + $0x60] sm:$0xff]  }
  0x3c   : > { %2054 = vmatmul.mubr.msk.bf16.vlgmr.msra.gmra.mxu0 %vm641_vm1, %v2150_v5  ;;  %2086 = vmatmul.mubr.msk.bf16.vlgmr.msra.gmra.mxu1 %vm641_vm1, %v2151_v6  ;;  %v2173_v28 = vld [vmem:[%s2257_s24 + $0xe0] sm:$0xff]   ;;  %v2174_v29 = vld [vmem:[%s2257_s24 + $0x68] sm:$0xff]   ;;  %v2176_v31 = vld [vmem:[%s2257_s24 + $0x70] sm:$0xff]  }
  0x3d   : > { %2057 = vmatprep.mubr.msk.bf16.mxu0 %vm641_vm1, %v2152_v7  ;;  %2089 = vmatprep.mubr.msk.bf16.mxu1 %vm641_vm1, %v2153_v8  ;;  %v2175_v30 = vld [vmem:[%s2257_s24 + $0xe8] sm:$0xff]   ;;  %v2177_v32 = vld [vmem:[%s2257_s24 + $0xf0] sm:$0xff]   ;;  %v2178_v33 = vld [vmem:[%s2257_s24 + $0x78] sm:$0xff]  }
  0x3e   : > { %v2179_v34 = vld [vmem:[%s2257_s24 + $0xf8] sm:$0xff]   ;;  %v339_v35 = vld [vmem:[#allocation2 + $0x10] sm:$0xff]  ;;  %v337_v39 = vld [vmem:[#allocation2] sm:$0xff] }
  0x3f   : > { %v371_v36 = vld [vmem:[#allocation2 + $0x110] sm:$0xff]  ;;  %v369_v40 = vld [vmem:[#allocation2 + $0x100] sm:$0xff]  ;;  %v340_v45 = vld [vmem:[#allocation2 + $0x18] sm:$0xff] }
  0x40   : > { %v372_v46 = vld [vmem:[#allocation2 + $0x118] sm:$0xff]  ;;  %v338_v51 = vld [vmem:[#allocation2 + $0x8] sm:$0xff]  ;;  %v343_v57 = vld [vmem:[#allocation2 + $0x30] sm:$0xff] }
  0x41   : > { %v370_v52 = vld [vmem:[#allocation2 + $0x108] sm:$0xff]  ;;  %v375_v58 = vld [vmem:[#allocation2 + $0x130] sm:$0xff]  ;;  %v341_v63 = vld [vmem:[#allocation2 + $0x20] sm:$0xff] }
  0x42   : > { %v373_v0 = vld [vmem:[#allocation2 + $0x120] sm:$0xff]  ;;  %v344_v5 = vld [vmem:[#allocation2 + $0x38] sm:$0xff] }
  0x43   : > { %v376_v6 = vld [vmem:[#allocation2 + $0x138] sm:$0xff] }
  0x44   : > { %2058 = vmatmul.mubr.msk.bf16.gmra.mxu0 %vm641_vm1, %v2154_v9  ;;  %2090 = vmatmul.mubr.msk.bf16.gmra.mxu1 %vm641_vm1, %v2155_v10 }
  0x45   : > { %2061 = vmatprep.mubr.msk.bf16.mxu0 %vm641_vm1, %v2156_v11  ;;  %2093 = vmatprep.mubr.msk.bf16.mxu1 %vm641_vm1, %v2157_v12  ;;  %v342_v11 = vld [vmem:[#allocation2 + $0x28] sm:$0xff] }
  0x46   : > { %v374_v12 = vld [vmem:[#allocation2 + $0x128] sm:$0xff] }
  0x4c   : > { %2062 = vmatmul.mubr.msk.bf16.gmra.mxu0 %vm641_vm1, %v2158_v13  ;;  %2094 = vmatmul.mubr.msk.bf16.gmra.mxu1 %vm641_vm1, %v2159_v14 }
  0x4d   : > { %2065 = vmatprep.mubr.msk.bf16.mxu0 %vm641_vm1, %v2160_v15  ;;  %2097 = vmatprep.mubr.msk.bf16.mxu1 %vm641_vm1, %v2161_v16 }
  0x54   : > { %2066 = vmatmul.mubr.msk.bf16.gmra.mxu0 %vm641_vm1, %v2162_v17  ;;  %2098 = vmatmul.mubr.msk.bf16.gmra.mxu1 %vm641_vm1, %v2163_v18  ;;  %v347_v17 = vld [vmem:[#allocation2 + $0x50] sm:$0xff] }
  0x55   : > { %2069 = vmatprep.mubr.msk.bf16.mxu0 %vm641_vm1, %v2164_v19  ;;  %2101 = vmatprep.mubr.msk.bf16.mxu1 %vm641_vm1, %v2165_v20  ;;  %v379_v18 = vld [vmem:[#allocation2 + $0x150] sm:$0xff] }
  0x5c   : > { %2070 = vmatmul.mubr.msk.bf16.gmra.mxu0 %vm641_vm1, %v2166_v21  ;;  %2102 = vmatmul.mubr.msk.bf16.gmra.mxu1 %vm641_vm1, %v2167_v22 }
  0x5d   : > { %2073 = vmatprep.mubr.msk.bf16.mxu0 %vm641_vm1, %v2168_v23  ;;  %2105 = vmatprep.mubr.msk.bf16.mxu1 %vm641_vm1, %v2169_v24  ;;  %v345_v23 = vld [vmem:[#allocation2 + $0x40] sm:$0xff] }
  0x5e   : > { %v377_v24 = vld [vmem:[#allocation2 + $0x140] sm:$0xff] }
  0x64   : > { %2074 = vmatmul.mubr.msk.bf16.gmra.mxu0 %vm641_vm1, %v2170_v25  ;;  %2106 = vmatmul.mubr.msk.bf16.gmra.mxu1 %vm641_vm1, %v2171_v26 }
  0x65   : > { %2077 = vmatprep.mubr.msk.bf16.mxu0 %vm641_vm1, %v2172_v27  ;;  %2109 = vmatprep.mubr.msk.bf16.mxu1 %vm641_vm1, %v2173_v28 }
  0x6c   : > { %2078 = vmatmul.mubr.msk.bf16.gmra.mxu0 %vm641_vm1, %v2174_v29  ;;  %2110 = vmatmul.mubr.msk.bf16.gmra.mxu1 %vm641_vm1, %v2175_v30  ;;  %v348_v29 = vld [vmem:[#allocation2 + $0x58] sm:$0xff] }
  0x6d   : > { %2081 = vmatprep.mubr.msk.bf16.mxu0 %vm641_vm1, %v2176_v31  ;;  %2113 = vmatprep.mubr.msk.bf16.mxu1 %vm641_vm1, %v2177_v32  ;;  %v380_v30 = vld [vmem:[#allocation2 + $0x158] sm:$0xff] }
  0x74   : > { %2082 = vmatmul.mubr.msk.bf16.gmra.mxu0 %vm641_vm1, %v2178_v33  ;;  %2114 = vmatmul.mubr.msk.bf16.gmra.mxu1 %vm641_vm1, %v2179_v34 }
  0xfc   : > { %v2055_v37 = vpop.f32.mrf.mxu0  ;;  %v2087_v38 = vpop.f32.mrf.mxu1 }
  0xfd   : > { %v1029_v41 = vadd.f32 %v2055_v37, %v339_v35  ;;  %v1061_v42 = vadd.f32 %v2087_v38, %v371_v36  ;;  %v346_v35 = vld [vmem:[#allocation2 + $0x48] sm:$0xff] }
  0xfe   : > { %v772_v43 = vpop.f32.mrf.mxu0  ;;  %v900_v44 = vpop.f32.mrf.mxu1  ;;  %v378_v36 = vld [vmem:[#allocation2 + $0x148] sm:$0xff] }
  0xff   : > { %1093 = vst.msk [vmem:[#allocation2 + $0x10] sm:$0xff] %vm641_vm1, %v1029_v41  ;;  %1125 = vst.msk [vmem:[#allocation2 + $0x110] sm:$0xff] %vm641_vm1, %v1061_v42  ;;  %v1027_v47 = vadd.f32 %v772_v43, %v337_v39  ;;  %v1059_v48 = vadd.f32 %v900_v44, %v369_v40  ;;  %v351_v41 = vld [vmem:[#allocation2 + $0x70] sm:$0xff] }
 0x100   : > { %v2056_v49 = vpop.f32.mrf.mxu0  ;;  %v2088_v50 = vpop.f32.mrf.mxu1  ;;  %v383_v42 = vld [vmem:[#allocation2 + $0x170] sm:$0xff] }
 0x101   : > { %1091 = vst.msk [vmem:[#allocation2] sm:$0xff] %vm641_vm1, %v1027_v47  ;;  %1123 = vst.msk [vmem:[#allocation2 + $0x100] sm:$0xff] %vm641_vm1, %v1059_v48  ;;  %v1030_v53 = vadd.f32 %v2056_v49, %v340_v45  ;;  %v1062_v54 = vadd.f32 %v2088_v50, %v372_v46  ;;  %v349_v47 = vld [vmem:[#allocation2 + $0x60] sm:$0xff] }
 0x102   : > { %v775_v55 = vpop.f32.mrf.mxu0  ;;  %v903_v56 = vpop.f32.mrf.mxu1  ;;  %v381_v48 = vld [vmem:[#allocation2 + $0x160] sm:$0xff] }
 0x103   : > { %1094 = vst.msk [vmem:[#allocation2 + $0x18] sm:$0xff] %vm641_vm1, %v1030_v53  ;;  %1126 = vst.msk [vmem:[#allocation2 + $0x118] sm:$0xff] %vm641_vm1, %v1062_v54  ;;  %v1028_v59 = vadd.f32 %v775_v55, %v338_v51  ;;  %v1060_v60 = vadd.f32 %v903_v56, %v370_v52  ;;  %v352_v53 = vld [vmem:[#allocation2 + $0x78] sm:$0xff] }
 0x104   : > { %v2059_v61 = vpop.f32.mrf.mxu0  ;;  %v2091_v62 = vpop.f32.mrf.mxu1  ;;  %v384_v54 = vld [vmem:[#allocation2 + $0x178] sm:$0xff] }
 0x105   : > { %1092 = vst.msk [vmem:[#allocation2 + $0x8] sm:$0xff] %vm641_vm1, %v1028_v59  ;;  %1124 = vst.msk [vmem:[#allocation2 + $0x108] sm:$0xff] %vm641_vm1, %v1060_v60  ;;  %v1033_v1 = vadd.f32 %v2059_v61, %v343_v57  ;;  %v1065_v2 = vadd.f32 %v2091_v62, %v375_v58  ;;  %v350_v59 = vld [vmem:[#allocation2 + $0x68] sm:$0xff] }
 0x106   : > { %v788_v3 = vpop.f32.mrf.mxu0  ;;  %v916_v4 = vpop.f32.mrf.mxu1  ;;  %v382_v60 = vld [vmem:[#allocation2 + $0x168] sm:$0xff] }
 0x107   : > { %1097 = vst.msk [vmem:[#allocation2 + $0x30] sm:$0xff] %vm641_vm1, %v1033_v1  ;;  %1129 = vst.msk [vmem:[#allocation2 + $0x130] sm:$0xff] %vm641_vm1, %v1065_v2  ;;  %v1031_v7 = vadd.f32 %v788_v3, %v341_v63  ;;  %v1063_v8 = vadd.f32 %v916_v4, %v373_v0  ;;  %v355_v1 = vld [vmem:[#allocation2 + $0x90] sm:$0xff] }
 0x108   : > { %v2060_v9 = vpop.f32.mrf.mxu0  ;;  %v2092_v10 = vpop.f32.mrf.mxu1  ;;  %v387_v2 = vld [vmem:[#allocation2 + $0x190] sm:$0xff] }
 0x109   : > { %1095 = vst.msk [vmem:[#allocation2 + $0x20] sm:$0xff] %vm641_vm1, %v1031_v7  ;;  %1127 = vst.msk [vmem:[#allocation2 + $0x120] sm:$0xff] %vm641_vm1, %v1063_v8  ;;  %v1034_v13 = vadd.f32 %v2060_v9, %v344_v5  ;;  %v1066_v14 = vadd.f32 %v2092_v10, %v376_v6  ;;  %v353_v7 = vld [vmem:[#allocation2 + $0x80] sm:$0xff] }
 0x10a   : > { %v791_v15 = vpop.f32.mrf.mxu0  ;;  %v919_v16 = vpop.f32.mrf.mxu1  ;;  %v385_v8 = vld [vmem:[#allocation2 + $0x180] sm:$0xff] }
 0x10b   : > { %1098 = vst.msk [vmem:[#allocation2 + $0x38] sm:$0xff] %vm641_vm1, %v1034_v13  ;;  %1130 = vst.msk [vmem:[#allocation2 + $0x138] sm:$0xff] %vm641_vm1, %v1066_v14  ;;  %v1032_v19 = vadd.f32 %v791_v15, %v342_v11  ;;  %v1064_v20 = vadd.f32 %v919_v16, %v374_v12  ;;  %v356_v13 = vld [vmem:[#allocation2 + $0x98] sm:$0xff] }
 0x10c   : > { %v2063_v21 = vpop.f32.mrf.mxu0  ;;  %v2095_v22 = vpop.f32.mrf.mxu1  ;;  %v388_v14 = vld [vmem:[#allocation2 + $0x198] sm:$0xff] }
 0x10d   : > { %1096 = vst.msk [vmem:[#allocation2 + $0x28] sm:$0xff] %vm641_vm1, %v1032_v19  ;;  %1128 = vst.msk [vmem:[#allocation2 + $0x128] sm:$0xff] %vm641_vm1, %v1064_v20  ;;  %v1037_v25 = vadd.f32 %v2063_v21, %v347_v17  ;;  %v1069_v26 = vadd.f32 %v2095_v22, %v379_v18  ;;  %v354_v19 = vld [vmem:[#allocation2 + $0x88] sm:$0xff] }
 0x10e   : > { %v804_v27 = vpop.f32.mrf.mxu0  ;;  %v932_v28 = vpop.f32.mrf.mxu1  ;;  %v386_v20 = vld [vmem:[#allocation2 + $0x188] sm:$0xff] }
 0x10f   : > { %1101 = vst.msk [vmem:[#allocation2 + $0x50] sm:$0xff] %vm641_vm1, %v1037_v25  ;;  %1133 = vst.msk [vmem:[#allocation2 + $0x150] sm:$0xff] %vm641_vm1, %v1069_v26  ;;  %v1035_v31 = vadd.f32 %v804_v27, %v345_v23  ;;  %v1067_v32 = vadd.f32 %v932_v28, %v377_v24  ;;  %v359_v25 = vld [vmem:[#allocation2 + $0xb0] sm:$0xff] }
 0x110   : > { %v2064_v33 = vpop.f32.mrf.mxu0  ;;  %v2096_v34 = vpop.f32.mrf.mxu1  ;;  %v391_v26 = vld [vmem:[#allocation2 + $0x1b0] sm:$0xff] }
 0x111   : > { %1099 = vst.msk [vmem:[#allocation2 + $0x40] sm:$0xff] %vm641_vm1, %v1035_v31  ;;  %1131 = vst.msk [vmem:[#allocation2 + $0x140] sm:$0xff] %vm641_vm1, %v1067_v32  ;;  %v1038_v37 = vadd.f32 %v2064_v33, %v348_v29  ;;  %v1070_v38 = vadd.f32 %v2096_v34, %v380_v30  ;;  %v357_v31 = vld [vmem:[#allocation2 + $0xa0] sm:$0xff] }
 0x112   : > { %v807_v39 = vpop.f32.mrf.mxu0  ;;  %v935_v40 = vpop.f32.mrf.mxu1  ;;  %v389_v32 = vld [vmem:[#allocation2 + $0x1a0] sm:$0xff] }
 0x113   : > { %1102 = vst.msk [vmem:[#allocation2 + $0x58] sm:$0xff] %vm641_vm1, %v1038_v37  ;;  %1134 = vst.msk [vmem:[#allocation2 + $0x158] sm:$0xff] %vm641_vm1, %v1070_v38  ;;  %v1036_v43 = vadd.f32 %v807_v39, %v346_v35  ;;  %v1068_v44 = vadd.f32 %v935_v40, %v378_v36  ;;  %v360_v37 = vld [vmem:[#allocation2 + $0xb8] sm:$0xff] }
 0x114   : > { %v2067_v45 = vpop.f32.mrf.mxu0  ;;  %v2099_v46 = vpop.f32.mrf.mxu1  ;;  %v392_v38 = vld [vmem:[#allocation2 + $0x1b8] sm:$0xff] }
 0x115   : > { %1100 = vst.msk [vmem:[#allocation2 + $0x48] sm:$0xff] %vm641_vm1, %v1036_v43  ;;  %1132 = vst.msk [vmem:[#allocation2 + $0x148] sm:$0xff] %vm641_vm1, %v1068_v44  ;;  %v1041_v49 = vadd.f32 %v2067_v45, %v351_v41  ;;  %v1073_v50 = vadd.f32 %v2099_v46, %v383_v42  ;;  %v358_v43 = vld [vmem:[#allocation2 + $0xa8] sm:$0xff] }
 0x116   : > { %v820_v51 = vpop.f32.mrf.mxu0  ;;  %v948_v52 = vpop.f32.mrf.mxu1  ;;  %v390_v44 = vld [vmem:[#allocation2 + $0x1a8] sm:$0xff] }
 0x117   : > { %1105 = vst.msk [vmem:[#allocation2 + $0x70] sm:$0xff] %vm641_vm1, %v1041_v49  ;;  %1137 = vst.msk [vmem:[#allocation2 + $0x170] sm:$0xff] %vm641_vm1, %v1073_v50  ;;  %v1039_v55 = vadd.f32 %v820_v51, %v349_v47  ;;  %v1071_v56 = vadd.f32 %v948_v52, %v381_v48  ;;  %v363_v49 = vld [vmem:[#allocation2 + $0xd0] sm:$0xff] }
 0x118   : > { %v2068_v57 = vpop.f32.mrf.mxu0  ;;  %v2100_v58 = vpop.f32.mrf.mxu1  ;;  %v395_v50 = vld [vmem:[#allocation2 + $0x1d0] sm:$0xff] }
 0x119   : > { %1103 = vst.msk [vmem:[#allocation2 + $0x60] sm:$0xff] %vm641_vm1, %v1039_v55  ;;  %1135 = vst.msk [vmem:[#allocation2 + $0x160] sm:$0xff] %vm641_vm1, %v1071_v56  ;;  %v1042_v61 = vadd.f32 %v2068_v57, %v352_v53  ;;  %v1074_v62 = vadd.f32 %v2100_v58, %v384_v54  ;;  %v361_v55 = vld [vmem:[#allocation2 + $0xc0] sm:$0xff] }
 0x11a   : > { %v823_v63 = vpop.f32.mrf.mxu0  ;;  %v951_v0 = vpop.f32.mrf.mxu1  ;;  %v393_v56 = vld [vmem:[#allocation2 + $0x1c0] sm:$0xff] }
 0x11b   : > { %1106 = vst.msk [vmem:[#allocation2 + $0x78] sm:$0xff] %vm641_vm1, %v1042_v61  ;;  %1138 = vst.msk [vmem:[#allocation2 + $0x178] sm:$0xff] %vm641_vm1, %v1074_v62  ;;  %v1040_v3 = vadd.f32 %v823_v63, %v350_v59  ;;  %v1072_v4 = vadd.f32 %v951_v0, %v382_v60  ;;  %v364_v61 = vld [vmem:[#allocation2 + $0xd8] sm:$0xff] }
 0x11c   : > { %v2071_v5 = vpop.f32.mrf.mxu0  ;;  %v2103_v6 = vpop.f32.mrf.mxu1  ;;  %v396_v62 = vld [vmem:[#allocation2 + $0x1d8] sm:$0xff] }
 0x11d   : > { %1104 = vst.msk [vmem:[#allocation2 + $0x68] sm:$0xff] %vm641_vm1, %v1040_v3  ;;  %1136 = vst.msk [vmem:[#allocation2 + $0x168] sm:$0xff] %vm641_vm1, %v1072_v4  ;;  %v1045_v9 = vadd.f32 %v2071_v5, %v355_v1  ;;  %v1077_v10 = vadd.f32 %v2103_v6, %v387_v2  ;;  %v362_v3 = vld [vmem:[#allocation2 + $0xc8] sm:$0xff] }
 0x11e   : > { %v836_v11 = vpop.f32.mrf.mxu0  ;;  %v964_v12 = vpop.f32.mrf.mxu1  ;;  %v394_v4 = vld [vmem:[#allocation2 + $0x1c8] sm:$0xff] }
 0x11f   : > { %1109 = vst.msk [vmem:[#allocation2 + $0x90] sm:$0xff] %vm641_vm1, %v1045_v9  ;;  %1141 = vst.msk [vmem:[#allocation2 + $0x190] sm:$0xff] %vm641_vm1, %v1077_v10  ;;  %v1043_v15 = vadd.f32 %v836_v11, %v353_v7  ;;  %v1075_v16 = vadd.f32 %v964_v12, %v385_v8  ;;  %v367_v9 = vld [vmem:[#allocation2 + $0xf0] sm:$0xff] }
 0x120   : > { %v2072_v17 = vpop.f32.mrf.mxu0  ;;  %v2104_v18 = vpop.f32.mrf.mxu1  ;;  %v399_v10 = vld [vmem:[#allocation2 + $0x1f0] sm:$0xff] }
 0x121   : > { %1107 = vst.msk [vmem:[#allocation2 + $0x80] sm:$0xff] %vm641_vm1, %v1043_v15  ;;  %1139 = vst.msk [vmem:[#allocation2 + $0x180] sm:$0xff] %vm641_vm1, %v1075_v16  ;;  %v1046_v21 = vadd.f32 %v2072_v17, %v356_v13  ;;  %v1078_v22 = vadd.f32 %v2104_v18, %v388_v14  ;;  %v365_v15 = vld [vmem:[#allocation2 + $0xe0] sm:$0xff] }
 0x122   : > { %v839_v23 = vpop.f32.mrf.mxu0  ;;  %v967_v24 = vpop.f32.mrf.mxu1  ;;  %v397_v16 = vld [vmem:[#allocation2 + $0x1e0] sm:$0xff] }
 0x123   : > { %1110 = vst.msk [vmem:[#allocation2 + $0x98] sm:$0xff] %vm641_vm1, %v1046_v21  ;;  %1142 = vst.msk [vmem:[#allocation2 + $0x198] sm:$0xff] %vm641_vm1, %v1078_v22  ;;  %v1044_v27 = vadd.f32 %v839_v23, %v354_v19  ;;  %v1076_v28 = vadd.f32 %v967_v24, %v386_v20  ;;  %v368_v21 = vld [vmem:[#allocation2 + $0xf8] sm:$0xff] }
 0x124   : > { %v2075_v29 = vpop.f32.mrf.mxu0  ;;  %v2107_v30 = vpop.f32.mrf.mxu1  ;;  %v400_v22 = vld [vmem:[#allocation2 + $0x1f8] sm:$0xff] }
 0x125   : > { %1108 = vst.msk [vmem:[#allocation2 + $0x88] sm:$0xff] %vm641_vm1, %v1044_v27  ;;  %1140 = vst.msk [vmem:[#allocation2 + $0x188] sm:$0xff] %vm641_vm1, %v1076_v28  ;;  %v1049_v33 = vadd.f32 %v2075_v29, %v359_v25  ;;  %v1081_v34 = vadd.f32 %v2107_v30, %v391_v26  ;;  %v366_v27 = vld [vmem:[#allocation2 + $0xe8] sm:$0xff] }
 0x126   : > { %v852_v35 = vpop.f32.mrf.mxu0  ;;  %v980_v36 = vpop.f32.mrf.mxu1  ;;  %v398_v28 = vld [vmem:[#allocation2 + $0x1e8] sm:$0xff] }
 0x127   : > { %1113 = vst.msk [vmem:[#allocation2 + $0xb0] sm:$0xff] %vm641_vm1, %v1049_v33  ;;  %1145 = vst.msk [vmem:[#allocation2 + $0x1b0] sm:$0xff] %vm641_vm1, %v1081_v34  ;;  %v1047_v39 = vadd.f32 %v852_v35, %v357_v31  ;;  %v1079_v40 = vadd.f32 %v980_v36, %v389_v32 }
 0x128   : > { %v2076_v41 = vpop.f32.mrf.mxu0  ;;  %v2108_v42 = vpop.f32.mrf.mxu1 }
 0x129   : > { %1111 = vst.msk [vmem:[#allocation2 + $0xa0] sm:$0xff] %vm641_vm1, %v1047_v39  ;;  %1143 = vst.msk [vmem:[#allocation2 + $0x1a0] sm:$0xff] %vm641_vm1, %v1079_v40  ;;  %v1050_v45 = vadd.f32 %v2076_v41, %v360_v37  ;;  %v1082_v46 = vadd.f32 %v2108_v42, %v392_v38 }
 0x12a   : > { %v855_v47 = vpop.f32.mrf.mxu0  ;;  %v983_v48 = vpop.f32.mrf.mxu1 }
 0x12b   : > { %1114 = vst.msk [vmem:[#allocation2 + $0xb8] sm:$0xff] %vm641_vm1, %v1050_v45  ;;  %1146 = vst.msk [vmem:[#allocation2 + $0x1b8] sm:$0xff] %vm641_vm1, %v1082_v46  ;;  %v1048_v51 = vadd.f32 %v855_v47, %v358_v43  ;;  %v1080_v52 = vadd.f32 %v983_v48, %v390_v44 }
 0x12c   : > { %v2079_v53 = vpop.f32.mrf.mxu0  ;;  %v2111_v54 = vpop.f32.mrf.mxu1 }
 0x12d   : > { %1112 = vst.msk [vmem:[#allocation2 + $0xa8] sm:$0xff] %vm641_vm1, %v1048_v51  ;;  %1144 = vst.msk [vmem:[#allocation2 + $0x1a8] sm:$0xff] %vm641_vm1, %v1080_v52  ;;  %v1053_v57 = vadd.f32 %v2079_v53, %v363_v49  ;;  %v1085_v58 = vadd.f32 %v2111_v54, %v395_v50 }
 0x12e   : > { %v868_v59 = vpop.f32.mrf.mxu0  ;;  %v996_v60 = vpop.f32.mrf.mxu1 }
 0x12f   : > { %1117 = vst.msk [vmem:[#allocation2 + $0xd0] sm:$0xff] %vm641_vm1, %v1053_v57  ;;  %1149 = vst.msk [vmem:[#allocation2 + $0x1d0] sm:$0xff] %vm641_vm1, %v1085_v58  ;;  %v1051_v63 = vadd.f32 %v868_v59, %v361_v55  ;;  %v1083_v0 = vadd.f32 %v996_v60, %v393_v56 }
 0x130   : > { %v2080_v1 = vpop.f32.mrf.mxu0  ;;  %v2112_v2 = vpop.f32.mrf.mxu1 }
 0x131   : > { %1115 = vst.msk [vmem:[#allocation2 + $0xc0] sm:$0xff] %vm641_vm1, %v1051_v63  ;;  %1147 = vst.msk [vmem:[#allocation2 + $0x1c0] sm:$0xff] %vm641_vm1, %v1083_v0  ;;  %v1054_v5 = vadd.f32 %v2080_v1, %v364_v61  ;;  %v1086_v6 = vadd.f32 %v2112_v2, %v396_v62 }
 0x132   : > { %v871_v7 = vpop.f32.mrf.mxu0  ;;  %v999_v8 = vpop.f32.mrf.mxu1 }
 0x133   : > { %1118 = vst.msk [vmem:[#allocation2 + $0xd8] sm:$0xff] %vm641_vm1, %v1054_v5  ;;  %1150 = vst.msk [vmem:[#allocation2 + $0x1d8] sm:$0xff] %vm641_vm1, %v1086_v6  ;;  %v1052_v11 = vadd.f32 %v871_v7, %v362_v3  ;;  %v1084_v12 = vadd.f32 %v999_v8, %v394_v4 }
 0x134   : > { %v2083_v13 = vpop.f32.mrf.mxu0  ;;  %v2115_v14 = vpop.f32.mrf.mxu1 }
 0x135   : > { %1116 = vst.msk [vmem:[#allocation2 + $0xc8] sm:$0xff] %vm641_vm1, %v1052_v11  ;;  %1148 = vst.msk [vmem:[#allocation2 + $0x1c8] sm:$0xff] %vm641_vm1, %v1084_v12  ;;  %v1057_v17 = vadd.f32 %v2083_v13, %v367_v9  ;;  %v1089_v18 = vadd.f32 %v2115_v14, %v399_v10 }
 0x136   : > { %v884_v19 = vpop.f32.mrf.mxu0  ;;  %v1012_v20 = vpop.f32.mrf.mxu1 }
 0x137   : > { %1121 = vst.msk [vmem:[#allocation2 + $0xf0] sm:$0xff] %vm641_vm1, %v1057_v17  ;;  %1153 = vst.msk [vmem:[#allocation2 + $0x1f0] sm:$0xff] %vm641_vm1, %v1089_v18  ;;  %v1055_v23 = vadd.f32 %v884_v19, %v365_v15  ;;  %v1087_v24 = vadd.f32 %v1012_v20, %v397_v16 }
 0x138   : > { %v2084_v25 = vpop.f32.mrf.mxu0  ;;  %v2116_v26 = vpop.f32.mrf.mxu1 }
 0x139   : > { %1119 = vst.msk [vmem:[#allocation2 + $0xe0] sm:$0xff] %vm641_vm1, %v1055_v23  ;;  %1151 = vst.msk [vmem:[#allocation2 + $0x1e0] sm:$0xff] %vm641_vm1, %v1087_v24  ;;  %v1058_v29 = vadd.f32 %v2084_v25, %v368_v21  ;;  %v1090_v30 = vadd.f32 %v2116_v26, %v400_v22  ;;  %1158 = sbr.rel (%p2009_p6) target bundleno = 668 (0x29c), region = 44 }
 0x13a   : > { %v887_v31 = vpop.f32.mrf.mxu0  ;;  %v1015_v32 = vpop.f32.mrf.mxu1 }
 0x13b   : > { %1122 = vst.msk [vmem:[#allocation2 + $0xf8] sm:$0xff] %vm641_vm1, %v1058_v29  ;;  %1154 = vst.msk [vmem:[#allocation2 + $0x1f8] sm:$0xff] %vm641_vm1, %v1090_v30  ;;  %v1056_v33 = vadd.f32 %v887_v31, %v366_v27  ;;  %v1088_v34 = vadd.f32 %v1015_v32, %v398_v28 }
 0x13d   : > { %1120 = vst.msk [vmem:[#allocation2 + $0xe8] sm:$0xff] %vm641_vm1, %v1056_v33  ;;  %1152 = vst.msk [vmem:[#allocation2 + $0x1e8] sm:$0xff] %vm641_vm1, %v1088_v34 }
 0x13e   : > { %v2524_v35 = vld [vmem:[#allocation2] sm:$0xff]  ;;  %v2526_v36 = vld [vmem:[#allocation2 + $0x8] sm:$0xff]  ;;  %v2528_v37 = vld [vmem:[#allocation2 + $0x10] sm:$0xff] }
 0x13f   : > { %3486 = vst [vmem:[#allocation3_spill] sm:$0xff] %v2526_v36  ;;  %3487 = vst [vmem:[#allocation4_spill] sm:$0xff] %v2528_v37  ;;  %v2530_v38 = vld [vmem:[#allocation2 + $0x18] sm:$0xff]  ;;  %v1223_v39 = vsel %vm641_vm1, %v2524_v35, 0.0  ;;  %v1224_v40 = vsel %vm641_vm1, %v2526_v36, 0.0  ;;  %v1226_v41 = vsel %vm641_vm1, %v2528_v37, 0.0 }
 0x140   : > { %3488 = vst [vmem:[#allocation5_spill] sm:$0xff] %v2530_v38  ;;  %v2538_v42 = vld [vmem:[#allocation2 + $0x20] sm:$0xff]  ;;  %v1225_v43 = vadd.f32 %v1224_v40, %v1223_v39  ;;  %v1228_v44 = vsel %vm641_vm1, %v2530_v38, 0.0  ;;  %v2542_v45 = vld [vmem:[#allocation2 + $0x28] sm:$0xff]  ;;  %v2546_v48 = vld [vmem:[#allocation2 + $0x30] sm:$0xff] }
 0x141   : > { %3489 = vst [vmem:[#allocation6_spill] sm:$0xff] %v2538_v42  ;;  %3490 = vst [vmem:[#allocation7_spill] sm:$0xff] %v2542_v45  ;;  %v1230_v47 = vsel %vm641_vm1, %v2538_v42, 0.0  ;;  %v1232_v50 = vsel %vm641_vm1, %v2542_v45, 0.0  ;;  %v2550_v51 = vld [vmem:[#allocation2 + $0x38] sm:$0xff]  ;;  %v1234_v53 = vsel %vm641_vm1, %v2546_v48, 0.0 }
 0x142   : > { %v1227_v46 = vadd.f32 %v1226_v41, %v1225_v43  ;;  %3491 = vst [vmem:[#allocation8_spill] sm:$0xff] %v2546_v48  ;;  %v2554_v54 = vld [vmem:[#allocation2 + $0x40] sm:$0xff]  ;;  %v1236_v56 = vsel %vm641_vm1, %v2550_v51, 0.0  ;;  %v2558_v57 = vld [vmem:[#allocation2 + $0x48] sm:$0xff]  ;;  %v2562_v60 = vld [vmem:[#allocation2 + $0x50] sm:$0xff] }
 0x143   : > { %v1238_v59 = vsel %vm641_vm1, %v2554_v54, 0.0  ;;  %v1240_v62 = vsel %vm641_vm1, %v2558_v57, 0.0  ;;  %v2566_v63 = vld [vmem:[#allocation2 + $0x58] sm:$0xff]  ;;  %v1242_v1 = vsel %vm641_vm1, %v2562_v60, 0.0  ;;  %v2570_v2 = vld [vmem:[#allocation2 + $0x60] sm:$0xff]  ;;  %v2574_v5 = vld [vmem:[#allocation2 + $0x68] sm:$0xff] }
 0x144   : > { %v1229_v49 = vadd.f32 %v1228_v44, %v1227_v46  ;;  %v1244_v4 = vsel %vm641_vm1, %v2566_v63, 0.0  ;;  %v1246_v7 = vsel %vm641_vm1, %v2570_v2, 0.0  ;;  %v2578_v8 = vld [vmem:[#allocation2 + $0x70] sm:$0xff]  ;;  %v1248_v10 = vsel %vm641_vm1, %v2574_v5, 0.0  ;;  %v2582_v11 = vld [vmem:[#allocation2 + $0x78] sm:$0xff]  ;;  %v2586_v14 = vld [vmem:[#allocation2 + $0x80] sm:$0xff] }
 0x145   : > { %v1250_v13 = vsel %vm641_vm1, %v2578_v8, 0.0  ;;  %v1252_v16 = vsel %vm641_vm1, %v2582_v11, 0.0  ;;  %v2590_v17 = vld [vmem:[#allocation2 + $0x88] sm:$0xff]  ;;  %v1254_v19 = vsel %vm641_vm1, %v2586_v14, 0.0  ;;  %v2594_v20 = vld [vmem:[#allocation2 + $0x90] sm:$0xff]  ;;  %v2598_v23 = vld [vmem:[#allocation2 + $0x98] sm:$0xff] }
 0x146   : > { %v1231_v52 = vadd.f32 %v1230_v47, %v1229_v49  ;;  %v1256_v22 = vsel %vm641_vm1, %v2590_v17, 0.0  ;;  %v1258_v25 = vsel %vm641_vm1, %v2594_v20, 0.0  ;;  %v2602_v26 = vld [vmem:[#allocation2 + $0xa0] sm:$0xff]  ;;  %v1260_v28 = vsel %vm641_vm1, %v2598_v23, 0.0  ;;  %v2606_v29 = vld [vmem:[#allocation2 + $0xa8] sm:$0xff]  ;;  %v2610_v32 = vld [vmem:[#allocation2 + $0xb0] sm:$0xff] }
 0x147   : > { %v1262_v31 = vsel %vm641_vm1, %v2602_v26, 0.0  ;;  %v1264_v34 = vsel %vm641_vm1, %v2606_v29, 0.0  ;;  %v2614_v39 = vld [vmem:[#allocation2 + $0xb8] sm:$0xff]  ;;  %v1266_v41 = vsel %vm641_vm1, %v2610_v32, 0.0  ;;  %v2618_v43 = vld [vmem:[#allocation2 + $0xc0] sm:$0xff]  ;;  %v2622_v47 = vld [vmem:[#allocation2 + $0xc8] sm:$0xff] }
 0x148   : > { %v1233_v55 = vadd.f32 %v1232_v50, %v1231_v52  ;;  %v1268_v46 = vsel %vm641_vm1, %v2614_v39, 0.0  ;;  %v1270_v50 = vsel %vm641_vm1, %v2618_v43, 0.0  ;;  %v2626_v52 = vld [vmem:[#allocation2 + $0xd0] sm:$0xff] }
 0x14a   : > { %v1235_v58 = vadd.f32 %v1234_v53, %v1233_v55  ;;  %v1272_v55 = vsel %vm641_vm1, %v2622_v47, 0.0 }
 0x14c   : > { %v1237_v61 = vadd.f32 %v1236_v56, %v1235_v58  ;;  %v2630_v56 = vld [vmem:[#allocation2 + $0xd8] sm:$0xff] }
 0x14e   : > { %v1239_v0 = vadd.f32 %v1238_v59, %v1237_v61  ;;  %v1274_v59 = vsel %vm641_vm1, %v2626_v52, 0.0  ;;  %v2634_v61 = vld [vmem:[#allocation2 + $0xe0] sm:$0xff] }
 0x150   : > { %v1241_v3 = vadd.f32 %v1240_v62, %v1239_v0  ;;  %v1276_v0 = vsel %vm641_vm1, %v2630_v56, 0.0 }
 0x152   : > { %v1243_v6 = vadd.f32 %v1242_v1, %v1241_v3  ;;  %v2638_v1 = vld [vmem:[#allocation2 + $0xe8] sm:$0xff] }
 0x154   : > { %v1245_v9 = vadd.f32 %v1244_v4, %v1243_v6  ;;  %v1278_v4 = vsel %vm641_vm1, %v2634_v61, 0.0  ;;  %v2642_v6 = vld [vmem:[#allocation2 + $0xf0] sm:$0xff] }
 0x156   : > { %v1247_v12 = vadd.f32 %v1246_v7, %v1245_v9  ;;  %v1280_v9 = vsel %vm641_vm1, %v2638_v1, 0.0 }
 0x158   : > { %v1249_v15 = vadd.f32 %v1248_v10, %v1247_v12  ;;  %v2646_v10 = vld [vmem:[#allocation2 + $0xf8] sm:$0xff] }
 0x15a   : > { %v1251_v18 = vadd.f32 %v1250_v13, %v1249_v15  ;;  %v1282_v13 = vsel %vm641_vm1, %v2642_v6, 0.0  ;;  %v2650_v15 = vld [vmem:[#allocation2 + $0x100] sm:$0xff] }
 0x15c   : > { %v1253_v21 = vadd.f32 %v1252_v16, %v1251_v18  ;;  %v1284_v18 = vsel %vm641_vm1, %v2646_v10, 0.0 }
 0x15e   : > { %v1255_v24 = vadd.f32 %v1254_v19, %v1253_v21  ;;  %v2654_v19 = vld [vmem:[#allocation2 + $0x108] sm:$0xff] }
 0x160   : > { %v1257_v27 = vadd.f32 %v1256_v22, %v1255_v24  ;;  %v1286_v22 = vsel %vm641_vm1, %v2650_v15, 0.0  ;;  %v2658_v24 = vld [vmem:[#allocation2 + $0x110] sm:$0xff] }
 0x162   : > { %v1259_v30 = vadd.f32 %v1258_v25, %v1257_v27  ;;  %v1288_v27 = vsel %vm641_vm1, %v2654_v19, 0.0 }
 0x164   : > { %v1261_v33 = vadd.f32 %v1260_v28, %v1259_v30  ;;  %v2662_v28 = vld [vmem:[#allocation2 + $0x118] sm:$0xff] }
 0x166   : > { %v1263_v40 = vadd.f32 %v1262_v31, %v1261_v33  ;;  %v1290_v31 = vsel %vm641_vm1, %v2658_v24, 0.0  ;;  %v2666_v33 = vld [vmem:[#allocation2 + $0x120] sm:$0xff] }
 0x168   : > { %v1265_v44 = vadd.f32 %v1264_v34, %v1263_v40  ;;  %v1292_v40 = vsel %vm641_vm1, %v2662_v28, 0.0 }
 0x16a   : > { %v1267_v49 = vadd.f32 %v1266_v41, %v1265_v44  ;;  %v2670_v41 = vld [vmem:[#allocation2 + $0x128] sm:$0xff] }
 0x16c   : > { %v1269_v53 = vadd.f32 %v1268_v46, %v1267_v49  ;;  %v1294_v46 = vsel %vm641_vm1, %v2666_v33, 0.0  ;;  %v2674_v49 = vld [vmem:[#allocation2 + $0x130] sm:$0xff] }
 0x16e   : > { %v1271_v58 = vadd.f32 %v1270_v50, %v1269_v53  ;;  %v1296_v53 = vsel %vm641_vm1, %v2670_v41, 0.0 }
 0x170   : > { %v1273_v62 = vadd.f32 %v1272_v55, %v1271_v58  ;;  %v2678_v55 = vld [vmem:[#allocation2 + $0x138] sm:$0xff] }
 0x172   : > { %v1275_v3 = vadd.f32 %v1274_v59, %v1273_v62  ;;  %v1298_v59 = vsel %vm641_vm1, %v2674_v49, 0.0  ;;  %v2682_v62 = vld [vmem:[#allocation2 + $0x140] sm:$0xff] }
 0x174   : > { %v1277_v7 = vadd.f32 %v1276_v0, %v1275_v3  ;;  %v1300_v3 = vsel %vm641_vm1, %v2678_v55, 0.0 }
 0x176   : > { %v1279_v12 = vadd.f32 %v1278_v4, %v1277_v7  ;;  %v2686_v4 = vld [vmem:[#allocation2 + $0x148] sm:$0xff] }
 0x178   : > { %v1281_v16 = vadd.f32 %v1280_v9, %v1279_v12  ;;  %v1302_v9 = vsel %vm641_vm1, %v2682_v62, 0.0  ;;  %v2690_v12 = vld [vmem:[#allocation2 + $0x150] sm:$0xff] }
 0x17a   : > { %v1283_v21 = vadd.f32 %v1282_v13, %v1281_v16  ;;  %v1304_v16 = vsel %vm641_vm1, %v2686_v4, 0.0 }
 0x17c   : > { %v1285_v25 = vadd.f32 %v1284_v18, %v1283_v21  ;;  %v2694_v18 = vld [vmem:[#allocation2 + $0x158] sm:$0xff] }
 0x17e   : > { %v1287_v30 = vadd.f32 %v1286_v22, %v1285_v25  ;;  %v1306_v22 = vsel %vm641_vm1, %v2690_v12, 0.0  ;;  %v2698_v25 = vld [vmem:[#allocation2 + $0x160] sm:$0xff] }
 0x180   : > { %v1289_v34 = vadd.f32 %v1288_v27, %v1287_v30  ;;  %v1308_v30 = vsel %vm641_vm1, %v2694_v18, 0.0 }
 0x182   : > { %v1291_v44 = vadd.f32 %v1290_v31, %v1289_v34  ;;  %v2702_v31 = vld [vmem:[#allocation2 + $0x168] sm:$0xff] }
 0x183   : > { %3492 = vst [vmem:[#allocation9_spill] sm:$0xff] %v2702_v31 }
 0x184   : > { %v1293_v50 = vadd.f32 %v1292_v40, %v1291_v44  ;;  %v1310_v40 = vsel %vm641_vm1, %v2698_v25, 0.0  ;;  %v2706_v44 = vld [vmem:[#allocation2 + $0x170] sm:$0xff] }
 0x185   : > { %3493 = vst [vmem:[#allocation10_spill] sm:$0xff] %v2706_v44 }
 0x186   : > { %v1295_v58 = vadd.f32 %v1294_v46, %v1293_v50  ;;  %v1312_v50 = vsel %vm641_vm1, %v2702_v31, 0.0 }
 0x188   : > { %v1297_v0 = vadd.f32 %v1296_v53, %v1295_v58  ;;  %v2710_v53 = vld [vmem:[#allocation2 + $0x178] sm:$0xff] }
 0x189   : > { %3494 = vst [vmem:[#allocation11_spill] sm:$0xff] %v2710_v53 }
 0x18a   : > { %v1299_v7 = vadd.f32 %v1298_v59, %v1297_v0  ;;  %v1314_v59 = vsel %vm641_vm1, %v2706_v44, 0.0  ;;  %v2714_v0 = vld [vmem:[#allocation2 + $0x180] sm:$0xff] }
 0x18b   : > { %3495 = vst [vmem:[#allocation12_spill] sm:$0xff] %v2714_v0 }
 0x18c   : > { %v1301_v13 = vadd.f32 %v1300_v3, %v1299_v7  ;;  %v1316_v7 = vsel %vm641_vm1, %v2710_v53, 0.0 }
 0x18e   : > { %v1303_v21 = vadd.f32 %v1302_v9, %v1301_v13  ;;  %v2718_v9 = vld [vmem:[#allocation2 + $0x188] sm:$0xff] }
 0x18f   : > { %3496 = vst [vmem:[#allocation13_spill] sm:$0xff] %v2718_v9 }
 0x190   : > { %v1305_v27 = vadd.f32 %v1304_v16, %v1303_v21  ;;  %v1318_v16 = vsel %vm641_vm1, %v2714_v0, 0.0  ;;  %v2722_v21 = vld [vmem:[#allocation2 + $0x190] sm:$0xff] }
 0x191   : > { %3497 = vst [vmem:[#allocation14_spill] sm:$0xff] %v2722_v21 }
 0x192   : > { %v1307_v34 = vadd.f32 %v1306_v22, %v1305_v27  ;;  %v1320_v27 = vsel %vm641_vm1, %v2718_v9, 0.0 }
 0x194   : > { %v1309_v46 = vadd.f32 %v1308_v30, %v1307_v34  ;;  %v2726_v30 = vld [vmem:[#allocation2 + $0x198] sm:$0xff] }
 0x195   : > { %3498 = vst [vmem:[#allocation15_spill] sm:$0xff] %v2726_v30 }
 0x196   : > { %v1311_v58 = vadd.f32 %v1310_v40, %v1309_v46  ;;  %v1322_v40 = vsel %vm641_vm1, %v2722_v21, 0.0  ;;  %v2730_v46 = vld [vmem:[#allocation2 + $0x1a0] sm:$0xff] }
 0x197   : > { %3499 = vst [vmem:[#allocation16_spill] sm:$0xff] %v2730_v46 }
 0x198   : > { %v1313_v3 = vadd.f32 %v1312_v50, %v1311_v58  ;;  %v1324_v58 = vsel %vm641_vm1, %v2726_v30, 0.0 }
 0x19a   : > { %v1315_v13 = vadd.f32 %v1314_v59, %v1313_v3  ;;  %v2734_v59 = vld [vmem:[#allocation2 + $0x1a8] sm:$0xff] }
 0x19b   : > { %3500 = vst [vmem:[#allocation17_spill] sm:$0xff] %v2734_v59 }
 0x19c   : > { %v1317_v22 = vadd.f32 %v1316_v7, %v1315_v13  ;;  %v1326_v7 = vsel %vm641_vm1, %v2730_v46, 0.0  ;;  %v2738_v13 = vld [vmem:[#allocation2 + $0x1b0] sm:$0xff] }
 0x19d   : > { %3501 = vst [vmem:[#allocation18_spill] sm:$0xff] %v2738_v13 }
 0x19e   : > { %v1319_v34 = vadd.f32 %v1318_v16, %v1317_v22  ;;  %v1328_v16 = vsel %vm641_vm1, %v2734_v59, 0.0  ;;  %v2742_v22 = vld [vmem:[#allocation2 + $0x1b8] sm:$0xff] }
 0x19f   : > { %3502 = vst [vmem:[#allocation19_spill] sm:$0xff] %v2742_v22 }
 0x1a0   : > { %v1321_v50 = vadd.f32 %v1320_v27, %v1319_v34  ;;  %v1330_v27 = vsel %vm641_vm1, %v2738_v13, 0.0  ;;  %v2746_v34 = vld [vmem:[#allocation2 + $0x1c0] sm:$0xff] }
 0x1a1   : > { %3503 = vst [vmem:[#allocation20_spill] sm:$0xff] %v2746_v34 }
 0x1a2   : > { %v1323_v3 = vadd.f32 %v1322_v40, %v1321_v50  ;;  %v1332_v40 = vsel %vm641_vm1, %v2742_v22, 0.0  ;;  %v2750_v50 = vld [vmem:[#allocation2 + $0x1c8] sm:$0xff] }
 0x1a3   : > { %3504 = vst [vmem:[#allocation21_spill] sm:$0xff] %v2750_v50 }
 0x1a4   : > { %v1325_v9 = vadd.f32 %v1324_v58, %v1323_v3  ;;  %v1334_v58 = vsel %vm641_vm1, %v2746_v34, 0.0  ;;  %v2754_v3 = vld [vmem:[#allocation2 + $0x1d0] sm:$0xff] }
 0x1a5   : > { %3505 = vst [vmem:[#allocation22_spill] sm:$0xff] %v2754_v3 }
 0x1a6   : > { %v1327_v21 = vadd.f32 %v1326_v7, %v1325_v9  ;;  %v1336_v9 = vsel %vm641_vm1, %v2750_v50, 0.0  ;;  %v2758_v7 = vld [vmem:[#allocation2 + $0x1d8] sm:$0xff] }
 0x1a7   : > { %3506 = vst [vmem:[#allocation23_spill] sm:$0xff] %v2758_v7  ;;  %v1340_v22 = vsel %vm641_vm1, %v2758_v7, 0.0 }
 0x1a8   : > { %v1329_v30 = vadd.f32 %v1328_v16, %v1327_v21  ;;  %v1338_v21 = vsel %vm641_vm1, %v2754_v3, 0.0 }
 0x1aa   : > { %v1331_v46 = vadd.f32 %v1330_v27, %v1329_v30  ;;  %v2764_v30 = vld [vmem:[#allocation2 + $0x1e0] sm:$0xff] }
 0x1ab   : > { %3507 = vst [vmem:[#allocation24_spill] sm:$0xff] %v2764_v30 }
 0x1ac   : > { %v1333_v59 = vadd.f32 %v1332_v40, %v1331_v46  ;;  %v1342_v46 = vsel %vm641_vm1, %v2764_v30, 0.0  ;;  %v2768_v40 = vld [vmem:[#allocation2 + $0x1e8] sm:$0xff] }
 0x1ad   : > { %3508 = vst [vmem:[#allocation25_spill] sm:$0xff] %v2768_v40 }
 0x1ae   : > { %v1335_v13 = vadd.f32 %v1334_v58, %v1333_v59  ;;  %v1344_v59 = vsel %vm641_vm1, %v2768_v40, 0.0  ;;  %v2772_v58 = vld [vmem:[#allocation2 + $0x1f0] sm:$0xff] }
 0x1af   : > { %3509 = vst [vmem:[#allocation26_spill] sm:$0xff] %v2772_v58 }
 0x1b0   : > { %v1337_v16 = vadd.f32 %v1336_v9, %v1335_v13  ;;  %v1346_v13 = vsel %vm641_vm1, %v2772_v58, 0.0  ;;  %v2776_v9 = vld [vmem:[#allocation2 + $0x1f8] sm:$0xff] }
 0x1b1   : > { %3510 = vst [vmem:[#allocation27_spill] sm:$0xff] %v2776_v9 }
 0x1b2   : > { %v1339_v27 = vadd.f32 %v1338_v21, %v1337_v16 }
 0x1b4   : > { %v1341_v34 = vadd.f32 %v1340_v22, %v1339_v27  ;;  %v1348_v22 = vsel %vm641_vm1, %v2776_v9, 0.0 }
 0x1b6   : > { %v1343_v50 = vadd.f32 %v1342_v46, %v1341_v34 }
 0x1b8   : > { %v1345_v3 = vadd.f32 %v1344_v59, %v1343_v50 }
 0x1ba   : > { %v1347_v7 = vadd.f32 %v1346_v13, %v1345_v3 }
 0x1bc   : > { %v1349_v21 = vadd.f32 %v1348_v22, %v1347_v7 }
 0x1be   : > { %v1350_v16 = vrot.slane %v1349_v21, 4 }
 0x1c0   : > { %v1351_v27 = vadd.f32 %v1350_v16, %v1349_v21 }
 0x1c2   : > { %v1352_v30 = vrot.slane %v1351_v27, 2 }
 0x1c4   : > { %v1353_v34 = vadd.f32 %v1352_v30, %v1351_v27 }
 0x1c6   : > { %v1354_v46 = vrot.slane %v1353_v34, 1 }
 0x1c8   : > { %v1355_v0 = vadd.f32 %v1354_v46, %v1353_v34 }
 0x1ca   : > { %v2780_v40 = vmul.f32 0.001953125, %v1355_v0 }
 0x1cc   : > { %v1358_v50 = vsub.f32 %v2524_v35, %v2780_v40  ;;  %v1359_v59 = vsub.f32 %v2526_v36, %v2780_v40  ;;  %v1360_v3 = vsub.f32 %v2528_v37, %v2780_v40  ;;  %v1361_v7 = vsub.f32 %v2530_v38, %v2780_v40 }
 0x1cd   : > { %v1362_v13 = vsub.f32 %v2538_v42, %v2780_v40  ;;  %v1363_v0 = vsub.f32 %v2542_v45, %v2780_v40  ;;  %v1364_v27 = vsub.f32 %v2546_v48, %v2780_v40 }
 0x1ce   : > { %v1422_v30 = vmul.f32 %v1358_v50, %v1358_v50  ;;  %v1423_v22 = vmul.f32 %v1359_v59, %v1359_v59  ;;  %v1424_v21 = vmul.f32 %v1360_v3, %v1360_v3  ;;  %v1425_v16 = vmul.f32 %v1361_v7, %v1361_v7 }
 0x1cf   : > { %v1426_v34 = vmul.f32 %v1362_v13, %v1362_v13  ;;  %v1365_v50 = vsub.f32 %v2550_v51, %v2780_v40  ;;  %v1427_v59 = vmul.f32 %v1363_v0, %v1363_v0  ;;  %v1366_v7 = vsub.f32 %v2554_v54, %v2780_v40 }
 0x1d0   : > { %v1486_v46 = vsel %vm641_vm1, %v1422_v30, 0.0  ;;  %v1487_v37 = vsel %vm641_vm1, %v1423_v22, 0.0  ;;  %v1489_v38 = vsel %vm641_vm1, %v1424_v21, 0.0  ;;  %v1491_v3 = vsel %vm641_vm1, %v1425_v16, 0.0 }
 0x1d1   : > { %v1488_v36 = vadd.f32 %v1487_v37, %v1486_v46  ;;  %v1428_v45 = vmul.f32 %v1364_v27, %v1364_v27  ;;  %v1493_v13 = vsel %vm641_vm1, %v1426_v34, 0.0  ;;  %v1367_v30 = vsub.f32 %v2558_v57, %v2780_v40 }
 0x1d2   : > { %v1429_v22 = vmul.f32 %v1365_v50, %v1365_v50  ;;  %v1495_v37 = vsel %vm641_vm1, %v1427_v59, 0.0  ;;  %v1368_v0 = vsub.f32 %v2562_v60, %v2780_v40  ;;  %v1430_v46 = vmul.f32 %v1366_v7, %v1366_v7 }
 0x1d3   : > { %v1490_v42 = vadd.f32 %v1489_v38, %v1488_v36  ;;  %v1497_v36 = vsel %vm641_vm1, %v1428_v45, 0.0  ;;  %v1369_v16 = vsub.f32 %v2566_v63, %v2780_v40  ;;  %v1431_v27 = vmul.f32 %v1367_v30, %v1367_v30 }
 0x1d4   : > { %v1370_v50 = vsub.f32 %v2570_v2, %v2780_v40  ;;  %v1371_v7 = vsub.f32 %v2574_v5, %v2780_v40  ;;  %v1372_v30 = vsub.f32 %v2578_v8, %v2780_v40 }
 0x1d5   : > { %v1492_v48 = vadd.f32 %v1491_v3, %v1490_v42  ;;  %v1499_v42 = vsel %vm641_vm1, %v1429_v22, 0.0  ;;  %v1432_v3 = vmul.f32 %v1368_v0, %v1368_v0  ;;  %v1503_v45 = vsel %vm641_vm1, %v1431_v27, 0.0 }
 0x1d6   : > { %v1373_v0 = vsub.f32 %v2582_v11, %v2780_v40 }
 0x1d7   : > { %v1494_v21 = vadd.f32 %v1493_v13, %v1492_v48  ;;  %v1501_v48 = vsel %vm641_vm1, %v1430_v46, 0.0  ;;  %v1433_v13 = vmul.f32 %v1369_v16, %v1369_v16  ;;  %v1505_v22 = vsel %vm641_vm1, %v1432_v3, 0.0 }
 0x1d8   : > { %v1374_v16 = vsub.f32 %v2586_v14, %v2780_v40 }
 0x1d9   : > { %v1496_v38 = vadd.f32 %v1495_v37, %v1494_v21  ;;  %v1434_v21 = vmul.f32 %v1370_v50, %v1370_v50  ;;  %v1507_v46 = vsel %vm641_vm1, %v1433_v13, 0.0  ;;  %v1375_v50 = vsub.f32 %v2590_v17, %v2780_v40 }
 0x1db   : > { %v1498_v34 = vadd.f32 %v1497_v36, %v1496_v38  ;;  %v1435_v38 = vmul.f32 %v1371_v7, %v1371_v7  ;;  %v1509_v27 = vsel %vm641_vm1, %v1434_v21, 0.0  ;;  %v1376_v7 = vsub.f32 %v2594_v20, %v2780_v40 }
 0x1dd   : > { %v1500_v59 = vadd.f32 %v1499_v42, %v1498_v34  ;;  %v1436_v34 = vmul.f32 %v1372_v30, %v1372_v30  ;;  %v1511_v3 = vsel %vm641_vm1, %v1435_v38, 0.0  ;;  %v1377_v30 = vsub.f32 %v2598_v23, %v2780_v40 }
 0x1df   : > { %v1502_v37 = vadd.f32 %v1501_v48, %v1500_v59  ;;  %v1437_v59 = vmul.f32 %v1373_v0, %v1373_v0  ;;  %v1513_v13 = vsel %vm641_vm1, %v1436_v34, 0.0  ;;  %v1378_v0 = vsub.f32 %v2602_v26, %v2780_v40 }
 0x1e1   : > { %v1504_v36 = vadd.f32 %v1503_v45, %v1502_v37  ;;  %v1438_v37 = vmul.f32 %v1374_v16, %v1374_v16  ;;  %v1515_v21 = vsel %vm641_vm1, %v1437_v59, 0.0  ;;  %v1379_v16 = vsub.f32 %v2606_v29, %v2780_v40 }
 0x1e3   : > { %v1506_v42 = vadd.f32 %v1505_v22, %v1504_v36  ;;  %v1439_v36 = vmul.f32 %v1375_v50, %v1375_v50  ;;  %v1517_v38 = vsel %vm641_vm1, %v1438_v37, 0.0  ;;  %v1380_v50 = vsub.f32 %v2610_v32, %v2780_v40 }
 0x1e5   : > { %v1508_v48 = vadd.f32 %v1507_v46, %v1506_v42  ;;  %v1440_v42 = vmul.f32 %v1376_v7, %v1376_v7  ;;  %v1519_v34 = vsel %vm641_vm1, %v1439_v36, 0.0  ;;  %v1381_v7 = vsub.f32 %v2614_v39, %v2780_v40 }
 0x1e7   : > { %v1510_v45 = vadd.f32 %v1509_v27, %v1508_v48  ;;  %v1441_v48 = vmul.f32 %v1377_v30, %v1377_v30  ;;  %v1521_v59 = vsel %vm641_vm1, %v1440_v42, 0.0  ;;  %v1382_v30 = vsub.f32 %v2618_v43, %v2780_v40 }
 0x1e9   : > { %v1512_v22 = vadd.f32 %v1511_v3, %v1510_v45  ;;  %v1442_v45 = vmul.f32 %v1378_v0, %v1378_v0  ;;  %v1523_v37 = vsel %vm641_vm1, %v1441_v48, 0.0  ;;  %v1383_v0 = vsub.f32 %v2622_v47, %v2780_v40 }
 0x1eb   : > { %v1514_v46 = vadd.f32 %v1513_v13, %v1512_v22  ;;  %v1443_v22 = vmul.f32 %v1379_v16, %v1379_v16  ;;  %v1525_v36 = vsel %vm641_vm1, %v1442_v45, 0.0  ;;  %v1384_v16 = vsub.f32 %v2626_v52, %v2780_v40 }
 0x1ed   : > { %v1516_v27 = vadd.f32 %v1515_v21, %v1514_v46  ;;  %v1444_v46 = vmul.f32 %v1380_v50, %v1380_v50  ;;  %v1527_v42 = vsel %vm641_vm1, %v1443_v22, 0.0  ;;  %v1385_v50 = vsub.f32 %v2630_v56, %v2780_v40 }
 0x1ef   : > { %v1518_v3 = vadd.f32 %v1517_v38, %v1516_v27  ;;  %v1445_v27 = vmul.f32 %v1381_v7, %v1381_v7  ;;  %v1529_v48 = vsel %vm641_vm1, %v1444_v46, 0.0  ;;  %v1386_v7 = vsub.f32 %v2634_v61, %v2780_v40 }
 0x1f1   : > { %v1520_v13 = vadd.f32 %v1519_v34, %v1518_v3  ;;  %v1446_v3 = vmul.f32 %v1382_v30, %v1382_v30  ;;  %v1531_v45 = vsel %vm641_vm1, %v1445_v27, 0.0  ;;  %v1387_v30 = vsub.f32 %v2638_v1, %v2780_v40 }
 0x1f3   : > { %v1522_v21 = vadd.f32 %v1521_v59, %v1520_v13  ;;  %v1447_v13 = vmul.f32 %v1383_v0, %v1383_v0  ;;  %v1533_v22 = vsel %vm641_vm1, %v1446_v3, 0.0  ;;  %v1388_v0 = vsub.f32 %v2642_v6, %v2780_v40 }
 0x1f5   : > { %v1524_v38 = vadd.f32 %v1523_v37, %v1522_v21  ;;  %v1448_v21 = vmul.f32 %v1384_v16, %v1384_v16  ;;  %v1535_v46 = vsel %vm641_vm1, %v1447_v13, 0.0  ;;  %v1389_v16 = vsub.f32 %v2646_v10, %v2780_v40 }
 0x1f7   : > { %v1526_v34 = vadd.f32 %v1525_v36, %v1524_v38  ;;  %v1449_v38 = vmul.f32 %v1385_v50, %v1385_v50  ;;  %v1537_v27 = vsel %vm641_vm1, %v1448_v21, 0.0  ;;  %v1390_v50 = vsub.f32 %v2650_v15, %v2780_v40 }
 0x1f9   : > { %v1528_v59 = vadd.f32 %v1527_v42, %v1526_v34  ;;  %v1450_v34 = vmul.f32 %v1386_v7, %v1386_v7  ;;  %v1539_v3 = vsel %vm641_vm1, %v1449_v38, 0.0  ;;  %v1391_v7 = vsub.f32 %v2654_v19, %v2780_v40 }
 0x1fb   : > { %v1530_v37 = vadd.f32 %v1529_v48, %v1528_v59  ;;  %v1451_v59 = vmul.f32 %v1387_v30, %v1387_v30  ;;  %v1541_v13 = vsel %vm641_vm1, %v1450_v34, 0.0  ;;  %v1392_v30 = vsub.f32 %v2658_v24, %v2780_v40 }
 0x1fd   : > { %v1532_v36 = vadd.f32 %v1531_v45, %v1530_v37  ;;  %v1452_v37 = vmul.f32 %v1388_v0, %v1388_v0  ;;  %v1543_v21 = vsel %vm641_vm1, %v1451_v59, 0.0  ;;  %v1393_v0 = vsub.f32 %v2662_v28, %v2780_v40 }
 0x1ff   : > { %v1534_v42 = vadd.f32 %v1533_v22, %v1532_v36  ;;  %v1453_v36 = vmul.f32 %v1389_v16, %v1389_v16  ;;  %v1545_v38 = vsel %vm641_vm1, %v1452_v37, 0.0  ;;  %v1394_v16 = vsub.f32 %v2666_v33, %v2780_v40 }
 0x201   : > { %v1536_v48 = vadd.f32 %v1535_v46, %v1534_v42  ;;  %v1454_v42 = vmul.f32 %v1390_v50, %v1390_v50  ;;  %v1547_v34 = vsel %vm641_vm1, %v1453_v36, 0.0  ;;  %v1395_v50 = vsub.f32 %v2670_v41, %v2780_v40 }
 0x203   : > { %v1538_v45 = vadd.f32 %v1537_v27, %v1536_v48  ;;  %v1455_v48 = vmul.f32 %v1391_v7, %v1391_v7  ;;  %v1549_v59 = vsel %vm641_vm1, %v1454_v42, 0.0  ;;  %v1396_v7 = vsub.f32 %v2674_v49, %v2780_v40 }
 0x205   : > { %v1540_v22 = vadd.f32 %v1539_v3, %v1538_v45  ;;  %v1456_v45 = vmul.f32 %v1392_v30, %v1392_v30  ;;  %v1551_v37 = vsel %vm641_vm1, %v1455_v48, 0.0  ;;  %v1397_v30 = vsub.f32 %v2678_v55, %v2780_v40 }
 0x207   : > { %v1542_v46 = vadd.f32 %v1541_v13, %v1540_v22  ;;  %v1457_v22 = vmul.f32 %v1393_v0, %v1393_v0  ;;  %v1553_v36 = vsel %vm641_vm1, %v1456_v45, 0.0  ;;  %v1398_v0 = vsub.f32 %v2682_v62, %v2780_v40 }
 0x209   : > { %v1544_v27 = vadd.f32 %v1543_v21, %v1542_v46  ;;  %v1458_v46 = vmul.f32 %v1394_v16, %v1394_v16  ;;  %v1555_v42 = vsel %vm641_vm1, %v1457_v22, 0.0  ;;  %v1399_v16 = vsub.f32 %v2686_v4, %v2780_v40 }
 0x20b   : > { %v1546_v3 = vadd.f32 %v1545_v38, %v1544_v27  ;;  %v1459_v27 = vmul.f32 %v1395_v50, %v1395_v50  ;;  %v1557_v48 = vsel %vm641_vm1, %v1458_v46, 0.0  ;;  %v1400_v50 = vsub.f32 %v2690_v12, %v2780_v40 }
 0x20d   : > { %v1548_v13 = vadd.f32 %v1547_v34, %v1546_v3  ;;  %v1460_v3 = vmul.f32 %v1396_v7, %v1396_v7  ;;  %v1559_v45 = vsel %vm641_vm1, %v1459_v27, 0.0  ;;  %v1401_v7 = vsub.f32 %v2694_v18, %v2780_v40 }
 0x20f   : > { %v1550_v21 = vadd.f32 %v1549_v59, %v1548_v13  ;;  %v1461_v13 = vmul.f32 %v1397_v30, %v1397_v30  ;;  %v1561_v22 = vsel %vm641_vm1, %v1460_v3, 0.0  ;;  %v1402_v30 = vsub.f32 %v2698_v25, %v2780_v40 }
 0x211   : > { %v1552_v38 = vadd.f32 %v1551_v37, %v1550_v21  ;;  %v1462_v21 = vmul.f32 %v1398_v0, %v1398_v0  ;;  %v1563_v46 = vsel %vm641_vm1, %v1461_v13, 0.0  ;;  %v1403_v0 = vsub.f32 %v2702_v31, %v2780_v40 }
 0x213   : > { %v1554_v34 = vadd.f32 %v1553_v36, %v1552_v38  ;;  %v1463_v38 = vmul.f32 %v1399_v16, %v1399_v16  ;;  %v1565_v27 = vsel %vm641_vm1, %v1462_v21, 0.0  ;;  %v1404_v16 = vsub.f32 %v2706_v44, %v2780_v40 }
 0x215   : > { %v1556_v59 = vadd.f32 %v1555_v42, %v1554_v34  ;;  %v1464_v34 = vmul.f32 %v1400_v50, %v1400_v50  ;;  %v1567_v3 = vsel %vm641_vm1, %v1463_v38, 0.0  ;;  %v1405_v50 = vsub.f32 %v2710_v53, %v2780_v40 }
 0x216   : > { %v1468_v31 = vmul.f32 %v1404_v16, %v1404_v16 }
 0x217   : > { %v1558_v37 = vadd.f32 %v1557_v48, %v1556_v59  ;;  %v1465_v59 = vmul.f32 %v1401_v7, %v1401_v7  ;;  %v1569_v13 = vsel %vm641_vm1, %v1464_v34, 0.0  ;;  %v1469_v44 = vmul.f32 %v1405_v50, %v1405_v50 }
 0x219   : > { %v1560_v36 = vadd.f32 %v1559_v45, %v1558_v37  ;;  %v1466_v37 = vmul.f32 %v1402_v30, %v1402_v30  ;;  %v1571_v21 = vsel %vm641_vm1, %v1465_v59, 0.0  ;;  %v1577_v59 = vsel %vm641_vm1, %v1468_v31, 0.0 }
 0x21b   : > { %v1562_v42 = vadd.f32 %v1561_v22, %v1560_v36  ;;  %v1467_v36 = vmul.f32 %v1403_v0, %v1403_v0  ;;  %v1573_v38 = vsel %vm641_vm1, %v1466_v37, 0.0  ;;  %v1579_v37 = vsel %vm641_vm1, %v1469_v44, 0.0 }
 0x21d   : > { %v1564_v48 = vadd.f32 %v1563_v46, %v1562_v42  ;;  %v3511_v42 = vld [vmem:[#allocation12_spill] sm:$0xff]  ;;  %v1575_v34 = vsel %vm641_vm1, %v1467_v36, 0.0 }
 0x21e   : > { %v1406_v7 = vsub.f32 %v3511_v42, %v2780_v40 }
 0x21f   : > { %v1566_v45 = vadd.f32 %v1565_v27, %v1564_v48  ;;  %v3512_v48 = vld [vmem:[#allocation13_spill] sm:$0xff] }
 0x220   : > { %v1407_v30 = vsub.f32 %v3512_v48, %v2780_v40  ;;  %v1470_v53 = vmul.f32 %v1406_v7, %v1406_v7 }
 0x221   : > { %v1568_v22 = vadd.f32 %v1567_v3, %v1566_v45  ;;  %v3513_v45 = vld [vmem:[#allocation14_spill] sm:$0xff] }
 0x222   : > { %v1408_v0 = vsub.f32 %v3513_v45, %v2780_v40  ;;  %v1471_v42 = vmul.f32 %v1407_v30, %v1407_v30  ;;  %v1581_v36 = vsel %vm641_vm1, %v1470_v53, 0.0 }
 0x223   : > { %v1570_v46 = vadd.f32 %v1569_v13, %v1568_v22  ;;  %v3514_v22 = vld [vmem:[#allocation15_spill] sm:$0xff] }
 0x224   : > { %v1409_v16 = vsub.f32 %v3514_v22, %v2780_v40  ;;  %v1472_v48 = vmul.f32 %v1408_v0, %v1408_v0  ;;  %v1583_v31 = vsel %vm641_vm1, %v1471_v42, 0.0 }
 0x225   : > { %v1572_v27 = vadd.f32 %v1571_v21, %v1570_v46  ;;  %v3515_v46 = vld [vmem:[#allocation16_spill] sm:$0xff] }
 0x226   : > { %v1410_v50 = vsub.f32 %v3515_v46, %v2780_v40  ;;  %v1473_v45 = vmul.f32 %v1409_v16, %v1409_v16  ;;  %v1585_v44 = vsel %vm641_vm1, %v1472_v48, 0.0 }
 0x227   : > { %v1574_v3 = vadd.f32 %v1573_v38, %v1572_v27  ;;  %v3516_v27 = vld [vmem:[#allocation17_spill] sm:$0xff] }
 0x228   : > { %v1411_v7 = vsub.f32 %v3516_v27, %v2780_v40  ;;  %v1474_v22 = vmul.f32 %v1410_v50, %v1410_v50  ;;  %v1587_v53 = vsel %vm641_vm1, %v1473_v45, 0.0 }
 0x229   : > { %v1576_v13 = vadd.f32 %v1575_v34, %v1574_v3  ;;  %v3517_v3 = vld [vmem:[#allocation18_spill] sm:$0xff] }
 0x22a   : > { %v1412_v30 = vsub.f32 %v3517_v3, %v2780_v40  ;;  %v1475_v46 = vmul.f32 %v1411_v7, %v1411_v7  ;;  %v1589_v42 = vsel %vm641_vm1, %v1474_v22, 0.0 }
 0x22b   : > { %v1578_v21 = vadd.f32 %v1577_v59, %v1576_v13  ;;  %v3518_v13 = vld [vmem:[#allocation19_spill] sm:$0xff] }
 0x22c   : > { %v1413_v0 = vsub.f32 %v3518_v13, %v2780_v40  ;;  %v1476_v27 = vmul.f32 %v1412_v30, %v1412_v30  ;;  %v1591_v48 = vsel %vm641_vm1, %v1475_v46, 0.0 }
 0x22d   : > { %v1580_v38 = vadd.f32 %v1579_v37, %v1578_v21  ;;  %v3519_v21 = vld [vmem:[#allocation20_spill] sm:$0xff] }
 0x22e   : > { %v1414_v16 = vsub.f32 %v3519_v21, %v2780_v40  ;;  %v1477_v3 = vmul.f32 %v1413_v0, %v1413_v0  ;;  %v1593_v45 = vsel %vm641_vm1, %v1476_v27, 0.0 }
 0x22f   : > { %v1582_v34 = vadd.f32 %v1581_v36, %v1580_v38  ;;  %v3520_v38 = vld [vmem:[#allocation21_spill] sm:$0xff] }
 0x230   : > { %v1415_v50 = vsub.f32 %v3520_v38, %v2780_v40  ;;  %v1478_v13 = vmul.f32 %v1414_v16, %v1414_v16  ;;  %v1595_v22 = vsel %vm641_vm1, %v1477_v3, 0.0 }
 0x231   : > { %v1584_v59 = vadd.f32 %v1583_v31, %v1582_v34  ;;  %v3521_v34 = vld [vmem:[#allocation22_spill] sm:$0xff] }
 0x232   : > { %v1416_v7 = vsub.f32 %v3521_v34, %v2780_v40  ;;  %v1479_v21 = vmul.f32 %v1415_v50, %v1415_v50  ;;  %v1597_v46 = vsel %vm641_vm1, %v1478_v13, 0.0  ;;  %v1420_v50 = vsub.f32 %v2772_v58, %v2780_v40 }
 0x233   : > { %v1586_v37 = vadd.f32 %v1585_v44, %v1584_v59  ;;  %v3522_v59 = vld [vmem:[#allocation23_spill] sm:$0xff] }
 0x234   : > { %v1417_v30 = vsub.f32 %v3522_v59, %v2780_v40  ;;  %v1480_v38 = vmul.f32 %v1416_v7, %v1416_v7  ;;  %v1599_v27 = vsel %vm641_vm1, %v1479_v21, 0.0  ;;  %v1421_v7 = vsub.f32 %v2776_v9, %v2780_v40 }
 0x235   : > { %v1588_v36 = vadd.f32 %v1587_v53, %v1586_v37  ;;  %v3523_v37 = vld [vmem:[#allocation24_spill] sm:$0xff] }
 0x236   : > { %v1418_v0 = vsub.f32 %v3523_v37, %v2780_v40  ;;  %v1481_v34 = vmul.f32 %v1417_v30, %v1417_v30  ;;  %v1601_v3 = vsel %vm641_vm1, %v1480_v38, 0.0  ;;  %v1485_v21 = vmul.f32 %v1421_v7, %v1421_v7 }
 0x237   : > { %v1590_v31 = vadd.f32 %v1589_v42, %v1588_v36  ;;  %v3524_v36 = vld [vmem:[#allocation25_spill] sm:$0xff]  ;;  %v1628_v7 = vlaneseq }
 0x238   : > { %v1419_v16 = vsub.f32 %v3524_v36, %v2780_v40  ;;  %v1603_v13 = vsel %vm641_vm1, %v1481_v34, 0.0  ;;  %v1611_v38 = vsel %vm641_vm1, %v1485_v21, 0.0 }
 0x239   : > { %v1592_v44 = vadd.f32 %v1591_v48, %v1590_v31  ;;  %v1482_v31 = vmul.f32 %v1418_v0, %v1418_v0 }
 0x23b   : > { %v1594_v53 = vadd.f32 %v1593_v45, %v1592_v44  ;;  %v1483_v44 = vmul.f32 %v1419_v16, %v1419_v16  ;;  %v1605_v30 = vsel %vm641_vm1, %v1482_v31, 0.0 }
 0x23d   : > { %v1596_v42 = vadd.f32 %v1595_v22, %v1594_v53  ;;  %v1484_v53 = vmul.f32 %v1420_v50, %v1420_v50 }
 0x23f   : > { %v1598_v48 = vadd.f32 %v1597_v46, %v1596_v42  ;;  %v1607_v46 = vsel %vm641_vm1, %v1483_v44, 0.0  ;;  %v1609_v0 = vsel %vm641_vm1, %v1484_v53, 0.0 }
 0x241   : > { %v1600_v45 = vadd.f32 %v1599_v27, %v1598_v48 }
 0x243   : > { %v1602_v22 = vadd.f32 %v1601_v3, %v1600_v45 }
 0x245   : > { %v1604_v36 = vadd.f32 %v1603_v13, %v1602_v22  ;;  %v1629_v13 = vshrl.u32 %v1628_v7, 7 }
 0x247   : > { %v1606_v42 = vadd.f32 %v1605_v30, %v1604_v36  ;;  %v1620_v36 = vld [vmem:[%s3444_s2] sm:$0x1]  ;;  %v1630_v44 = vsub.s32 0, %v1629_v13 }
 0x249   : > { %v1608_v58 = vadd.f32 %v1607_v46, %v1606_v42  ;;  %v3525_v46 = vld [vmem:[#allocation3_spill] sm:$0xff] }
 0x24b   : > { %v1610_v27 = vadd.f32 %v1609_v0, %v1608_v58  ;;  %v1624_v58 = vld [vmem:[%s3445_s3] sm:$0x1]  ;;  %v3526_v0 = vld [vmem:[#allocation4_spill] sm:$0xff] }
 0x24d   : > { %v1612_v48 = vadd.f32 %v1611_v38, %v1610_v27  ;;  %v3527_v27 = vld [vmem:[#allocation5_spill] sm:$0xff] }
 0x24f   : > { %v1613_v9 = vrot.slane %v1612_v48, 4 }
 0x251   : > { %v1614_v16 = vadd.f32 %v1613_v9, %v1612_v48 }
 0x253   : > { %v1615_v37 = vrot.slane %v1614_v16, 2 }
 0x255   : > { %v1616_v34 = vadd.f32 %v1615_v37, %v1614_v16  ;;  %v3528_v16 = vld [vmem:[#allocation6_spill] sm:$0xff] }
 0x257   : > { %v1617_v3 = vrot.slane %v1616_v34, 1 }
 0x259   : > { %v1618_v50 = vadd.f32 %v1617_v3, %v1616_v34  ;;  %v3529_v3 = vld [vmem:[#allocation7_spill] sm:$0xff] }
 0x25b   : > { %v1619_v45 = vmul.f32 0.001953125, %v1618_v50  ;;  %v3530_v50 = vld [vmem:[#allocation8_spill] sm:$0xff] }
 0x25d   : > { %v1621_v31 = vadd.f32 1e-05, %v1619_v45 }
 0x25f   : > { %2180 = vrsqrt.f32 %v1621_v31 }
 0x26c   : > { %v2181_v22 = vpop.eup %2180 }
 0x26d   : > { %v1623_v53 = vmul.f32 %v2181_v22, %v1620_v36 }
 0x26f   : > { %v1625_v9 = vmul.f32 %v1623_v53, %v2780_v40  ;;  %v2981_v37 = vrot.slane %v1623_v53, %v1630_v44 }
 0x271   : > { %v1626_v30 = vsub.f32 %v1624_v58, %v1625_v9  ;;  %v1633_v21 = vmul.f32 %v2981_v37, %v2524_v35  ;;  %v1634_v42 = vmul.f32 %v2981_v37, %v3525_v46  ;;  %v1635_v38 = vmul.f32 %v2981_v37, %v3526_v0 }
 0x272   : > { %v1636_v48 = vmul.f32 %v2981_v37, %v3527_v27  ;;  %v1637_v34 = vmul.f32 %v2981_v37, %v3528_v16  ;;  %v1638_v40 = vmul.f32 %v2981_v37, %v3529_v3  ;;  %v1639_v45 = vmul.f32 %v2981_v37, %v3530_v50 }
 0x273   : > { %v2997_v31 = vrot.slane %v1626_v30, %v1630_v44  ;;  %v1640_v35 = vmul.f32 %v2981_v37, %v2550_v51  ;;  %v1641_v7 = vmul.f32 %v2981_v37, %v2554_v54  ;;  %v1642_v13 = vmul.f32 %v2981_v37, %v2558_v57 }
 0x274   : > { %v1643_v36 = vmul.f32 %v2981_v37, %v2562_v60  ;;  %v1644_v22 = vmul.f32 %v2981_v37, %v2566_v63  ;;  %v1645_v53 = vmul.f32 %v2981_v37, %v2570_v2  ;;  %v1646_v44 = vmul.f32 %v2981_v37, %v2574_v5 }
 0x275   : > { %v1703_v51 = vadd.f32 %v2997_v31, %v1633_v21  ;;  %v1704_v58 = vadd.f32 %v2997_v31, %v1634_v42  ;;  %v1705_v54 = vadd.f32 %v2997_v31, %v1635_v38  ;;  %v1706_v57 = vadd.f32 %v2997_v31, %v1636_v48 }
 0x276   : > { %v1707_v9 = vadd.f32 %v2997_v31, %v1637_v34  ;;  %v1708_v60 = vadd.f32 %v2997_v31, %v1638_v40  ;;  %v1709_v63 = vadd.f32 %v2997_v31, %v1639_v45  ;;  %v1710_v30 = vadd.f32 %v2997_v31, %v1640_v35 }
 0x277   : > { %1767 = vst.msk [vmem:[%s3446_s4] sm:$0xff] %vm641_vm1, %v1703_v51  ;;  %1768 = vst.msk [vmem:[%s3446_s4 + $0x8] sm:$0xff] %vm641_vm1, %v1704_v58  ;;  %v1711_v2 = vadd.f32 %v2997_v31, %v1641_v7  ;;  %v1712_v5 = vadd.f32 %v2997_v31, %v1642_v13  ;;  %v1713_v21 = vadd.f32 %v2997_v31, %v1643_v36 }
 0x278   : > { %1769 = vst.msk [vmem:[%s3446_s4 + $0x10] sm:$0xff] %vm641_vm1, %v1705_v54  ;;  %1770 = vst.msk [vmem:[%s3446_s4 + $0x18] sm:$0xff] %vm641_vm1, %v1706_v57  ;;  %v1714_v46 = vadd.f32 %v2997_v31, %v1644_v22  ;;  %v1715_v42 = vadd.f32 %v2997_v31, %v1645_v53  ;;  %v1716_v0 = vadd.f32 %v2997_v31, %v1646_v44 }
 0x279   : > { %1771 = vst.msk [vmem:[%s3446_s4 + $0x20] sm:$0xff] %vm641_vm1, %v1707_v9  ;;  %1772 = vst.msk [vmem:[%s3446_s4 + $0x28] sm:$0xff] %vm641_vm1, %v1708_v60  ;;  %v1647_v38 = vmul.f32 %v2981_v37, %v2578_v8  ;;  %v1648_v27 = vmul.f32 %v2981_v37, %v2582_v11  ;;  %v1649_v8 = vmul.f32 %v2981_v37, %v2586_v14 }
 0x27a   : > { %1773 = vst.msk [vmem:[%s3446_s4 + $0x30] sm:$0xff] %vm641_vm1, %v1709_v63  ;;  %1774 = vst.msk [vmem:[%s3446_s4 + $0x38] sm:$0xff] %vm641_vm1, %v1710_v30  ;;  %v1650_v11 = vmul.f32 %v2981_v37, %v2590_v17  ;;  %v1651_v48 = vmul.f32 %v2981_v37, %v2594_v20  ;;  %v1652_v16 = vmul.f32 %v2981_v37, %v2598_v23 }
 0x27b   : > { %1775 = vst.msk [vmem:[%s3446_s4 + $0x40] sm:$0xff] %vm641_vm1, %v1711_v2  ;;  %1776 = vst.msk [vmem:[%s3446_s4 + $0x48] sm:$0xff] %vm641_vm1, %v1712_v5  ;;  %v1717_v14 = vadd.f32 %v2997_v31, %v1647_v38  ;;  %v1718_v17 = vadd.f32 %v2997_v31, %v1648_v27  ;;  %v1653_v20 = vmul.f32 %v2981_v37, %v2602_v26 }
 0x27c   : > { %1777 = vst.msk [vmem:[%s3446_s4 + $0x50] sm:$0xff] %vm641_vm1, %v1713_v21  ;;  %1778 = vst.msk [vmem:[%s3446_s4 + $0x58] sm:$0xff] %vm641_vm1, %v1714_v46  ;;  %v1654_v23 = vmul.f32 %v2981_v37, %v2606_v29  ;;  %v1719_v34 = vadd.f32 %v2997_v31, %v1649_v8  ;;  %v1720_v3 = vadd.f32 %v2997_v31, %v1650_v11 }
 0x27d   : > { %1779 = vst.msk [vmem:[%s3446_s4 + $0x60] sm:$0xff] %vm641_vm1, %v1715_v42  ;;  %1780 = vst.msk [vmem:[%s3446_s4 + $0x68] sm:$0xff] %vm641_vm1, %v1716_v0  ;;  %v1721_v40 = vadd.f32 %v2997_v31, %v1651_v48  ;;  %v1722_v50 = vadd.f32 %v2997_v31, %v1652_v16  ;;  %v1723_v26 = vadd.f32 %v2997_v31, %v1653_v20  ;;  %v3531_v42 = vld [vmem:[#allocation9_spill] sm:$0xff]  ;;  %v3532_v48 = vld [vmem:[#allocation10_spill] sm:$0xff] }
 0x27e   : > { %1781 = vst.msk [vmem:[%s3446_s4 + $0x70] sm:$0xff] %vm641_vm1, %v1717_v14  ;;  %1782 = vst.msk [vmem:[%s3446_s4 + $0x78] sm:$0xff] %vm641_vm1, %v1718_v17  ;;  %v1724_v29 = vadd.f32 %v2997_v31, %v1654_v23  ;;  %v1655_v45 = vmul.f32 %v2981_v37, %v2610_v32  ;;  %v1656_v35 = vmul.f32 %v2981_v37, %v2614_v39  ;;  %v3533_v14 = vld [vmem:[#allocation11_spill] sm:$0xff]  ;;  %v3534_v20 = vld [vmem:[#allocation12_spill] sm:$0xff] }
 0x27f   : > { %1783 = vst.msk [vmem:[%s3446_s4 + $0x80] sm:$0xff] %vm641_vm1, %v1719_v34  ;;  %1784 = vst.msk [vmem:[%s3446_s4 + $0x88] sm:$0xff] %vm641_vm1, %v1720_v3  ;;  %v1657_v32 = vmul.f32 %v2981_v37, %v2618_v43  ;;  %v1658_v39 = vmul.f32 %v2981_v37, %v2622_v47  ;;  %v1659_v7 = vmul.f32 %v2981_v37, %v2626_v52  ;;  %v3535_v34 = vld [vmem:[#allocation13_spill] sm:$0xff] }
 0x280   : > { %1785 = vst.msk [vmem:[%s3446_s4 + $0x90] sm:$0xff] %vm641_vm1, %v1721_v40  ;;  %1786 = vst.msk [vmem:[%s3446_s4 + $0x98] sm:$0xff] %vm641_vm1, %v1722_v50  ;;  %v1660_v13 = vmul.f32 %v2981_v37, %v2630_v56  ;;  %v1725_v43 = vadd.f32 %v2997_v31, %v1655_v45  ;;  %v1726_v47 = vadd.f32 %v2997_v31, %v1656_v35  ;;  %v3536_v40 = vld [vmem:[#allocation14_spill] sm:$0xff] }
 0x281   : > { %1787 = vst.msk [vmem:[%s3446_s4 + $0xa0] sm:$0xff] %vm641_vm1, %v1723_v26  ;;  %1788 = vst.msk [vmem:[%s3446_s4 + $0xa8] sm:$0xff] %vm641_vm1, %v1724_v29  ;;  %v1661_v52 = vmul.f32 %v2981_v37, %v2634_v61  ;;  %v1662_v56 = vmul.f32 %v2981_v37, %v2638_v1  ;;  %v1727_v36 = vadd.f32 %v2997_v31, %v1657_v32  ;;  %v3537_v26 = vld [vmem:[#allocation15_spill] sm:$0xff]  ;;  %v3538_v32 = vld [vmem:[#allocation16_spill] sm:$0xff] }
 0x282   : > { %v1728_v22 = vadd.f32 %v2997_v31, %v1658_v39  ;;  %v1729_v53 = vadd.f32 %v2997_v31, %v1659_v7  ;;  %v1730_v44 = vadd.f32 %v2997_v31, %v1660_v13  ;;  %1789 = vst.msk [vmem:[%s3446_s4 + $0xb0] sm:$0xff] %vm641_vm1, %v1725_v43  ;;  %1790 = vst.msk [vmem:[%s3446_s4 + $0xb8] sm:$0xff] %vm641_vm1, %v1726_v47  ;;  %v3539_v7 = vld [vmem:[#allocation17_spill] sm:$0xff] }
 0x283   : > { %v1731_v61 = vadd.f32 %v2997_v31, %v1661_v52  ;;  %v1732_v1 = vadd.f32 %v2997_v31, %v1662_v56  ;;  %v1663_v51 = vmul.f32 %v2981_v37, %v2642_v6  ;;  %v1664_v58 = vmul.f32 %v2981_v37, %v2646_v10  ;;  %1791 = vst.msk [vmem:[%s3446_s4 + $0xc0] sm:$0xff] %vm641_vm1, %v1727_v36 }
 0x284   : > { %1792 = vst.msk [vmem:[%s3446_s4 + $0xc8] sm:$0xff] %vm641_vm1, %v1728_v22  ;;  %1793 = vst.msk [vmem:[%s3446_s4 + $0xd0] sm:$0xff] %vm641_vm1, %v1729_v53  ;;  %v1665_v6 = vmul.f32 %v2981_v37, %v2650_v15  ;;  %v1666_v10 = vmul.f32 %v2981_v37, %v2654_v19  ;;  %v1667_v54 = vmul.f32 %v2981_v37, %v2658_v24  ;;  %v3540_v53 = vld [vmem:[#allocation18_spill] sm:$0xff] }
 0x285   : > { %1794 = vst.msk [vmem:[%s3446_s4 + $0xd8] sm:$0xff] %vm641_vm1, %v1730_v44  ;;  %v1668_v57 = vmul.f32 %v2981_v37, %v2662_v28  ;;  %1795 = vst.msk [vmem:[%s3446_s4 + $0xe0] sm:$0xff] %vm641_vm1, %v1731_v61  ;;  %v1733_v15 = vadd.f32 %v2997_v31, %v1663_v51  ;;  %v1734_v19 = vadd.f32 %v2997_v31, %v1664_v58  ;;  %v3541_v61 = vld [vmem:[#allocation19_spill] sm:$0xff]  ;;  %v3542_v51 = vld [vmem:[#allocation20_spill] sm:$0xff] }
 0x286   : > { %1796 = vst.msk [vmem:[%s3446_s4 + $0xe8] sm:$0xff] %vm641_vm1, %v1732_v1  ;;  %v1669_v24 = vmul.f32 %v2981_v37, %v2666_v33  ;;  %v1670_v28 = vmul.f32 %v2981_v37, %v2670_v41  ;;  %v1735_v9 = vadd.f32 %v2997_v31, %v1665_v6  ;;  %v1736_v60 = vadd.f32 %v2997_v31, %v1666_v10  ;;  %v3543_v6 = vld [vmem:[#allocation21_spill] sm:$0xff] }
 0x287   : > { %v1737_v63 = vadd.f32 %v2997_v31, %v1667_v54  ;;  %v1738_v30 = vadd.f32 %v2997_v31, %v1668_v57  ;;  %1797 = vst.msk [vmem:[%s3446_s4 + $0xf0] sm:$0xff] %vm641_vm1, %v1733_v15  ;;  %1798 = vst.msk [vmem:[%s3446_s4 + $0xf8] sm:$0xff] %vm641_vm1, %v1734_v19  ;;  %v1671_v2 = vmul.f32 %v2981_v37, %v2674_v49  ;;  %v3544_v54 = vld [vmem:[#allocation22_spill] sm:$0xff] }
 0x288   : > { %v1739_v33 = vadd.f32 %v2997_v31, %v1669_v24  ;;  %v1740_v41 = vadd.f32 %v2997_v31, %v1670_v28  ;;  %v1672_v5 = vmul.f32 %v2981_v37, %v2678_v55  ;;  %1799 = vst.msk [vmem:[%s3446_s4 + $0x100] sm:$0xff] %vm641_vm1, %v1735_v9  ;;  %1800 = vst.msk [vmem:[%s3446_s4 + $0x108] sm:$0xff] %vm641_vm1, %v1736_v60  ;;  %v3545_v28 = vld [vmem:[#allocation24_spill] sm:$0xff]  ;;  %v3546_v60 = vld [vmem:[#allocation25_spill] sm:$0xff] }
 0x289   : > { %1801 = vst.msk [vmem:[%s3446_s4 + $0x110] sm:$0xff] %vm641_vm1, %v1737_v63  ;;  %1802 = vst.msk [vmem:[%s3446_s4 + $0x118] sm:$0xff] %vm641_vm1, %v1738_v30  ;;  %v1673_v49 = vmul.f32 %v2981_v37, %v2682_v62  ;;  %v1674_v55 = vmul.f32 %v2981_v37, %v2686_v4  ;;  %v1675_v21 = vmul.f32 %v2981_v37, %v2690_v12 }
 0x28a   : > { %v1676_v46 = vmul.f32 %v2981_v37, %v2694_v18  ;;  %1803 = vst.msk [vmem:[%s3446_s4 + $0x120] sm:$0xff] %vm641_vm1, %v1739_v33  ;;  %1804 = vst.msk [vmem:[%s3446_s4 + $0x128] sm:$0xff] %vm641_vm1, %v1740_v41  ;;  %v1741_v62 = vadd.f32 %v2997_v31, %v1671_v2  ;;  %v1742_v4 = vadd.f32 %v2997_v31, %v1672_v5 }
 0x28b   : > { %v1677_v12 = vmul.f32 %v2981_v37, %v2698_v25  ;;  %v1678_v18 = vmul.f32 %v2981_v37, %v3531_v42  ;;  %v1743_v0 = vadd.f32 %v2997_v31, %v1673_v49  ;;  %v1744_v38 = vadd.f32 %v2997_v31, %v1674_v55  ;;  %v3547_v49 = vld [vmem:[#allocation26_spill] sm:$0xff] }
 0x28c   : > { %v1745_v27 = vadd.f32 %v2997_v31, %v1675_v21  ;;  %v1746_v8 = vadd.f32 %v2997_v31, %v1676_v46  ;;  %1805 = vst.msk [vmem:[%s3446_s4 + $0x130] sm:$0xff] %vm641_vm1, %v1741_v62  ;;  %1806 = vst.msk [vmem:[%s3446_s4 + $0x138] sm:$0xff] %vm641_vm1, %v1742_v4  ;;  %v1679_v16 = vmul.f32 %v2981_v37, %v3532_v48  ;;  %v3548_v21 = vld [vmem:[#allocation27_spill] sm:$0xff] }
 0x28d   : > { %v1747_v25 = vadd.f32 %v2997_v31, %v1677_v12  ;;  %v1748_v11 = vadd.f32 %v2997_v31, %v1678_v18  ;;  %v1680_v17 = vmul.f32 %v2981_v37, %v3533_v14  ;;  %1807 = vst.msk [vmem:[%s3446_s4 + $0x140] sm:$0xff] %vm641_vm1, %v1743_v0  ;;  %1808 = vst.msk [vmem:[%s3446_s4 + $0x148] sm:$0xff] %vm641_vm1, %v1744_v38 }
 0x28e   : > { %1809 = vst.msk [vmem:[%s3446_s4 + $0x150] sm:$0xff] %vm641_vm1, %v1745_v27  ;;  %1810 = vst.msk [vmem:[%s3446_s4 + $0x158] sm:$0xff] %vm641_vm1, %v1746_v8  ;;  %v1681_v23 = vmul.f32 %v2981_v37, %v3534_v20  ;;  %v1682_v3 = vmul.f32 %v2981_v37, %v3535_v34  ;;  %v1683_v50 = vmul.f32 %v2981_v37, %v3536_v40 }
 0x28f   : > { %v1684_v29 = vmul.f32 %v2981_v37, %v3537_v26  ;;  %1811 = vst.msk [vmem:[%s3446_s4 + $0x160] sm:$0xff] %vm641_vm1, %v1747_v25  ;;  %1812 = vst.msk [vmem:[%s3446_s4 + $0x168] sm:$0xff] %vm641_vm1, %v1748_v11  ;;  %v1749_v45 = vadd.f32 %v2997_v31, %v1679_v16  ;;  %v1750_v35 = vadd.f32 %v2997_v31, %v1680_v17 }
 0x290   : > { %v1685_v39 = vmul.f32 %v2981_v37, %v3538_v32  ;;  %v1686_v13 = vmul.f32 %v2981_v37, %v3539_v7  ;;  %v1751_v43 = vadd.f32 %v2997_v31, %v1681_v23  ;;  %v1752_v47 = vadd.f32 %v2997_v31, %v1682_v3 }
 0x291   : > { %v1753_v52 = vadd.f32 %v2997_v31, %v1683_v50  ;;  %v1754_v56 = vadd.f32 %v2997_v31, %v1684_v29  ;;  %1813 = vst.msk [vmem:[%s3446_s4 + $0x170] sm:$0xff] %vm641_vm1, %v1749_v45  ;;  %1814 = vst.msk [vmem:[%s3446_s4 + $0x178] sm:$0xff] %vm641_vm1, %v1750_v35  ;;  %v1687_v44 = vmul.f32 %v2981_v37, %v3540_v53 }
 0x292   : > { %v1755_v36 = vadd.f32 %v2997_v31, %v1685_v39  ;;  %v1756_v22 = vadd.f32 %v2997_v31, %v1686_v13  ;;  %v1688_v1 = vmul.f32 %v2981_v37, %v3541_v61  ;;  %1815 = vst.msk [vmem:[%s3446_s4 + $0x180] sm:$0xff] %vm641_vm1, %v1751_v43  ;;  %1816 = vst.msk [vmem:[%s3446_s4 + $0x188] sm:$0xff] %vm641_vm1, %v1752_v47 }
 0x293   : > { %1817 = vst.msk [vmem:[%s3446_s4 + $0x190] sm:$0xff] %vm641_vm1, %v1753_v52  ;;  %1818 = vst.msk [vmem:[%s3446_s4 + $0x198] sm:$0xff] %vm641_vm1, %v1754_v56  ;;  %v1689_v58 = vmul.f32 %v2981_v37, %v3542_v51  ;;  %v1690_v10 = vmul.f32 %v2981_v37, %v3543_v6  ;;  %v1691_v57 = vmul.f32 %v2981_v37, %v3544_v54 }
 0x294   : > { %v1692_v15 = vmul.f32 %v2981_v37, %v3522_v59  ;;  %1819 = vst.msk [vmem:[%s3446_s4 + $0x1a0] sm:$0xff] %vm641_vm1, %v1755_v36  ;;  %1820 = vst.msk [vmem:[%s3446_s4 + $0x1a8] sm:$0xff] %vm641_vm1, %v1756_v22  ;;  %v1757_v19 = vadd.f32 %v2997_v31, %v1687_v44  ;;  %v1758_v24 = vadd.f32 %v2997_v31, %v1688_v1 }
 0x295   : > { %v1693_v9 = vmul.f32 %v2981_v37, %v3545_v28  ;;  %v1694_v59 = vmul.f32 %v2981_v37, %v3546_v60  ;;  %v1759_v63 = vadd.f32 %v2997_v31, %v1689_v58  ;;  %v1760_v30 = vadd.f32 %v2997_v31, %v1690_v10 }
 0x296   : > { %v1761_v33 = vadd.f32 %v2997_v31, %v1691_v57  ;;  %v1762_v41 = vadd.f32 %v2997_v31, %v1692_v15  ;;  %1821 = vst.msk [vmem:[%s3446_s4 + $0x1b0] sm:$0xff] %vm641_vm1, %v1757_v19  ;;  %1822 = vst.msk [vmem:[%s3446_s4 + $0x1b8] sm:$0xff] %vm641_vm1, %v1758_v24  ;;  %v1695_v55 = vmul.f32 %v2981_v37, %v3547_v49 }
 0x297   : > { %v1763_v2 = vadd.f32 %v2997_v31, %v1693_v9  ;;  %v1764_v5 = vadd.f32 %v2997_v31, %v1694_v59  ;;  %v1696_v46 = vmul.f32 %v2981_v37, %v3548_v21  ;;  %1823 = vst.msk [vmem:[%s3446_s4 + $0x1c0] sm:$0xff] %vm641_vm1, %v1759_v63  ;;  %1824 = vst.msk [vmem:[%s3446_s4 + $0x1c8] sm:$0xff] %vm641_vm1, %v1760_v30 }
 0x298   : > { %1825 = vst.msk [vmem:[%s3446_s4 + $0x1d0] sm:$0xff] %vm641_vm1, %v1761_v33  ;;  %1826 = vst.msk [vmem:[%s3446_s4 + $0x1d8] sm:$0xff] %vm641_vm1, %v1762_v41  ;;  %v1765_v37 = vadd.f32 %v2997_v31, %v1695_v55 }
 0x299   : > { %1827 = vst.msk [vmem:[%s3446_s4 + $0x1e0] sm:$0xff] %vm641_vm1, %v1763_v2  ;;  %1828 = vst.msk [vmem:[%s3446_s4 + $0x1e8] sm:$0xff] %vm641_vm1, %v1764_v5  ;;  %v1766_v62 = vadd.f32 %v2997_v31, %v1696_v46 }
 0x29a   : > { %1829 = vst.msk [vmem:[%s3446_s4 + $0x1f0] sm:$0xff] %vm641_vm1, %v1765_v37 }
 0x29b   : > { %1830 = vst.msk [vmem:[%s3446_s4 + $0x1f8] sm:$0xff] %vm641_vm1, %v1766_v62 }
 0x29c PF: > { %s14_s17 = sadd.s32 1, %s2204_s17   ;;  %s3549_s15 = smov %s2200_s16 }
 0x29d   : > { %p11_p7 = scmp.ge.s32.totalorder %s14_s17, 11   ;;  %s3550_s16 = smov %s3552_s18 }
 0x29f   :  { %13 = sbr.rel (!%p11_p7) target bundleno = 2 (0x2), region = 83 }

// kernel: forward.10
= control target key start
LH: loop header
LB: loop body
LE: loop exit
PB: predicated region body
PF: predicated region fallthrough
CT: control target
= control target key end

     0   :  { %s1001_s15 = smov 0   ;;  %s1003_s16 = smov 0   ;;  %s1291_s0 = inlined_call_operand.vmem [shape: bf16[9,128,32], index: 0, kind: input, shape index: {}]   ;;  %s1292_s1 = inlined_call_operand.vmem [shape: bf16[9,32,64], index: 1, kind: input, shape index: {}]   ;;  %s1293_s2 = inlined_call_operand.vmem [shape: f32[1,64], index: 2, kind: input, shape index: {}]   ;;  %s1294_s3 = inlined_call_operand.vmem [shape: f32[1,64], index: 3, kind: input, shape index: {}]   ;;  %s1295_s4 = inlined_call_operand.vmem [shape: f32[128,64], index: 4, kind: output, shape index: {}]  }
   0x1   :  { %s1005_s17 = smov 0  }
   0x2 LB: > { %s23_s18 = sadd.s32 1, %s969_s16  ;;  %p850_p0 = scmp.ge.s32.totalorder %s973_s17, 1  ;;  %s973_s17 = sphi %s1005_s17, %s14_s17   ;;  %s969_s16 = sphi %s1003_s16, %s1297_s16   ;;  %s965_s15 = sphi %s1001_s15, %s1296_s15  }
   0x3   : > { %p24_p1 = scmp.ge.s32.totalorder %s23_s18, 9  ;;  %p205_p2 = scmp.lt.s32.totalorder %s973_s17, 10 }
   0x5   : > { %s1299_s18 = smov (%p24_p1, %s23_s18), 0  ;;  %p206_p3 = pnand %p850_p0, %p205_p2 }
   0x6   : > { %p244_p4 = scmp.lt.s32.totalorder (!%p206_p3), %s965_s15, 8  ;;  %p855_p5 = scmp.ne.s32.totalorder (!%p206_p3), %s965_s15, 0 }
   0x7   : > { %209 = sbr.rel (%p206_p3) target bundleno = 378 (0x17a), region = 36 }
   0xc   : > { %s245_s19 = scalar_select %p244_p4, %s965_s15, 8 }
   0xd   : > { %271 = sbr.rel (%p855_p5) target bundleno = 27 (0x1b), region = 40 }
   0xe   : > { %s878_s20 = sshll.u32 %s245_s19, 6  ;;  %s879_s21 = sshll.u32 %s245_s19, 4 }
   0xf   : > { %s1026_s24 = scalar_lea.vmem %s1291_s0, %s878_s20  ;;  %s256_s27 = scalar_lea.vmem %s1292_s1, %s879_s21 }
  0x12   : > { %vm272_vm0 = vcmask 523264   ;;  %v975_v0 = vmov 0.0  }
  0x13   : > { %273 = vst.msk [vmem:[#allocation2] sm:$0xff] %vm272_vm0, %v975_v0  ;;  %274 = vst.msk [vmem:[#allocation2 + $0x8] sm:$0xff] %vm272_vm0, %v975_v0 }
  0x14   : > { %275 = vst.msk [vmem:[#allocation2 + $0x10] sm:$0xff] %vm272_vm0, %v975_v0  ;;  %276 = vst.msk [vmem:[#allocation2 + $0x18] sm:$0xff] %vm272_vm0, %v975_v0 }
  0x15   : > { %277 = vst.msk [vmem:[#allocation2 + $0x20] sm:$0xff] %vm272_vm0, %v975_v0  ;;  %278 = vst.msk [vmem:[#allocation2 + $0x28] sm:$0xff] %vm272_vm0, %v975_v0 }
  0x16   : > { %279 = vst.msk [vmem:[#allocation2 + $0x30] sm:$0xff] %vm272_vm0, %v975_v0  ;;  %280 = vst.msk [vmem:[#allocation2 + $0x38] sm:$0xff] %vm272_vm0, %v975_v0 }
  0x17   : > { %281 = vst.msk [vmem:[#allocation2 + $0x40] sm:$0xff] %vm272_vm0, %v975_v0  ;;  %282 = vst.msk [vmem:[#allocation2 + $0x48] sm:$0xff] %vm272_vm0, %v975_v0 }
  0x18   : > { %283 = vst.msk [vmem:[#allocation2 + $0x50] sm:$0xff] %vm272_vm0, %v975_v0  ;;  %284 = vst.msk [vmem:[#allocation2 + $0x58] sm:$0xff] %vm272_vm0, %v975_v0 }
  0x19   : > { %285 = vst.msk [vmem:[#allocation2 + $0x60] sm:$0xff] %vm272_vm0, %v975_v0  ;;  %286 = vst.msk [vmem:[#allocation2 + $0x68] sm:$0xff] %vm272_vm0, %v975_v0 }
  0x1a   : > { %287 = vst.msk [vmem:[#allocation2 + $0x70] sm:$0xff] %vm272_vm0, %v975_v0  ;;  %288 = vst.msk [vmem:[#allocation2 + $0x78] sm:$0xff] %vm272_vm0, %v975_v0 }
  0x1b PF: > { %v939_v1 = vld [vmem:[%s256_s27 + $0x8] sm:$0xff]   ;;  %v940_v2 = vld [vmem:[%s256_s27] sm:$0xff]   ;;  %vm377_vm1 = vcmask 261120   ;;  %v945_v7 = vld [vmem:[%s1026_s24 + $0x10] sm:$0xff]   ;;  %vm515_vm2 = vcmask 523264   ;;  %p874_p6 = scmp.ne.s32.totalorder %s965_s15, 8 }
  0x1c   : > { %890 = vmatprep.subr.bf16.mxu0 %v939_v1  ;;  %910 = vmatprep.subr.bf16.mxu1 %v939_v1  ;;  %v941_v3 = vld [vmem:[%s1026_s24] sm:$0xff]   ;;  %v943_v5 = vld [vmem:[%s1026_s24 + $0x8] sm:$0xff]   ;;  %v946_v8 = vld [vmem:[%s1026_s24 + $0x30] sm:$0xff]  }
  0x1d   : > { %891 = vmatpush3.bf16.msra.mxu0 %v939_v1  ;;  %912 = vmatpush3.bf16.msra.mxu1 %v939_v1  ;;  %v942_v4 = vld [vmem:[%s1026_s24 + $0x20] sm:$0xff]   ;;  %v944_v6 = vld [vmem:[%s1026_s24 + $0x28] sm:$0xff]   ;;  %v947_v9 = vld [vmem:[%s1026_s24 + $0x18] sm:$0xff]  }
  0x1e   : > { %892 = vmatprep.subr.bf16.mxu0 %v940_v2  ;;  %911 = vmatprep.subr.bf16.mxu1 %v940_v2  ;;  %v948_v10 = vld [vmem:[%s1026_s24 + $0x38] sm:$0xff]   ;;  %v291_v11 = vld [vmem:[#allocation2 + $0x10] sm:$0xff]  ;;  %v289_v15 = vld [vmem:[#allocation2] sm:$0xff] }
  0x1f   : > { %894 = vmatprep.mubr.msk.bf16.mxu0 %vm377_vm1, %v941_v3  ;;  %902 = vmatprep.mubr.msk.bf16.mxu1 %vm377_vm1, %v942_v4  ;;  %v299_v12 = vld [vmem:[#allocation2 + $0x50] sm:$0xff]  ;;  %v297_v16 = vld [vmem:[#allocation2 + $0x40] sm:$0xff]  ;;  %v292_v21 = vld [vmem:[#allocation2 + $0x18] sm:$0xff] }
  0x20   : > { %v300_v22 = vld [vmem:[#allocation2 + $0x58] sm:$0xff]  ;;  %v290_v27 = vld [vmem:[#allocation2 + $0x8] sm:$0xff]  ;;  %v295_v33 = vld [vmem:[#allocation2 + $0x30] sm:$0xff] }
  0x21   : > { %893 = vmatpush3.bf16.msra.mxu0 %v940_v2  ;;  %913 = vmatpush3.bf16.msra.mxu1 %v940_v2  ;;  %v298_v28 = vld [vmem:[#allocation2 + $0x48] sm:$0xff]  ;;  %v303_v34 = vld [vmem:[#allocation2 + $0x70] sm:$0xff]  ;;  %v293_v39 = vld [vmem:[#allocation2 + $0x20] sm:$0xff] }
  0x22   : > { %v301_v40 = vld [vmem:[#allocation2 + $0x60] sm:$0xff]  ;;  %v296_v45 = vld [vmem:[#allocation2 + $0x38] sm:$0xff]  ;;  %v294_v51 = vld [vmem:[#allocation2 + $0x28] sm:$0xff] }
  0x23   : > { %v304_v46 = vld [vmem:[#allocation2 + $0x78] sm:$0xff]  ;;  %v302_v52 = vld [vmem:[#allocation2 + $0x68] sm:$0xff] }
  0x24   : > { %895 = vmatmul.mubr.msk.bf16.vlgmr.msra.gmra.mxu0 %vm377_vm1, %v943_v5  ;;  %903 = vmatmul.mubr.msk.bf16.vlgmr.msra.gmra.mxu1 %vm377_vm1, %v944_v6 }
  0x25   : > { %898 = vmatprep.mubr.msk.bf16.mxu0 %vm377_vm1, %v945_v7  ;;  %906 = vmatprep.mubr.msk.bf16.mxu1 %vm377_vm1, %v946_v8 }
  0x2c   : > { %899 = vmatmul.mubr.msk.bf16.gmra.mxu0 %vm377_vm1, %v947_v9  ;;  %907 = vmatmul.mubr.msk.bf16.gmra.mxu1 %vm377_vm1, %v948_v10 }
  0xe4   : > { %v896_v13 = vpop.f32.mrf.mxu0  ;;  %v904_v14 = vpop.f32.mrf.mxu1 }
  0xe5   : > { %v501_v17 = vadd.f32 %v896_v13, %v291_v11  ;;  %v509_v18 = vadd.f32 %v904_v14, %v299_v12 }
  0xe6   : > { %v436_v19 = vpop.f32.mrf.mxu0  ;;  %v468_v20 = vpop.f32.mrf.mxu1 }
  0xe7   : > { %518 = vst.msk [vmem:[#allocation2 + $0x10] sm:$0xff] %vm515_vm2, %v501_v17  ;;  %526 = vst.msk [vmem:[#allocation2 + $0x50] sm:$0xff] %vm515_vm2, %v509_v18  ;;  %v499_v23 = vadd.f32 %v436_v19, %v289_v15  ;;  %v507_v24 = vadd.f32 %v468_v20, %v297_v16 }
  0xe8   : > { %v897_v25 = vpop.f32.mrf.mxu0  ;;  %v905_v26 = vpop.f32.mrf.mxu1 }
  0xe9   : > { %516 = vst.msk [vmem:[#allocation2] sm:$0xff] %vm515_vm2, %v499_v23  ;;  %524 = vst.msk [vmem:[#allocation2 + $0x40] sm:$0xff] %vm515_vm2, %v507_v24  ;;  %v502_v29 = vadd.f32 %v897_v25, %v292_v21  ;;  %v510_v30 = vadd.f32 %v905_v26, %v300_v22 }
  0xea   : > { %v439_v31 = vpop.f32.mrf.mxu0  ;;  %v471_v32 = vpop.f32.mrf.mxu1 }
  0xeb   : > { %519 = vst.msk [vmem:[#allocation2 + $0x18] sm:$0xff] %vm515_vm2, %v502_v29  ;;  %527 = vst.msk [vmem:[#allocation2 + $0x58] sm:$0xff] %vm515_vm2, %v510_v30  ;;  %v500_v35 = vadd.f32 %v439_v31, %v290_v27  ;;  %v508_v36 = vadd.f32 %v471_v32, %v298_v28 }
  0xec   : > { %v900_v37 = vpop.f32.mrf.mxu0  ;;  %v908_v38 = vpop.f32.mrf.mxu1 }
  0xed   : > { %517 = vst.msk [vmem:[#allocation2 + $0x8] sm:$0xff] %vm515_vm2, %v500_v35  ;;  %525 = vst.msk [vmem:[#allocation2 + $0x48] sm:$0xff] %vm515_vm2, %v508_v36  ;;  %v505_v41 = vadd.f32 %v900_v37, %v295_v33  ;;  %v513_v42 = vadd.f32 %v908_v38, %v303_v34 }
  0xee   : > { %v452_v43 = vpop.f32.mrf.mxu0  ;;  %v484_v44 = vpop.f32.mrf.mxu1 }
  0xef   : > { %522 = vst.msk [vmem:[#allocation2 + $0x30] sm:$0xff] %vm515_vm2, %v505_v41  ;;  %530 = vst.msk [vmem:[#allocation2 + $0x70] sm:$0xff] %vm515_vm2, %v513_v42  ;;  %v503_v47 = vadd.f32 %v452_v43, %v293_v39  ;;  %v511_v48 = vadd.f32 %v484_v44, %v301_v40 }
  0xf0   : > { %v901_v49 = vpop.f32.mrf.mxu0  ;;  %v909_v50 = vpop.f32.mrf.mxu1 }
  0xf1   : > { %520 = vst.msk [vmem:[#allocation2 + $0x20] sm:$0xff] %vm515_vm2, %v503_v47  ;;  %528 = vst.msk [vmem:[#allocation2 + $0x60] sm:$0xff] %vm515_vm2, %v511_v48  ;;  %v506_v53 = vadd.f32 %v901_v49, %v296_v45  ;;  %v514_v54 = vadd.f32 %v909_v50, %v304_v46  ;;  %535 = sbr.rel (%p874_p6) target bundleno = 378 (0x17a), region = 44 }
  0xf2   : > { %v455_v55 = vpop.f32.mrf.mxu0  ;;  %v487_v56 = vpop.f32.mrf.mxu1 }
  0xf3   : > { %523 = vst.msk [vmem:[#allocation2 + $0x38] sm:$0xff] %vm515_vm2, %v506_v53  ;;  %531 = vst.msk [vmem:[#allocation2 + $0x78] sm:$0xff] %vm515_vm2, %v514_v54  ;;  %v504_v57 = vadd.f32 %v455_v55, %v294_v51  ;;  %v512_v58 = vadd.f32 %v487_v56, %v302_v52 }
  0xf5   : > { %521 = vst.msk [vmem:[#allocation2 + $0x28] sm:$0xff] %vm515_vm2, %v504_v57  ;;  %529 = vst.msk [vmem:[#allocation2 + $0x68] sm:$0xff] %vm515_vm2, %v512_v58 }
  0xf6   : > { %v1081_v59 = vld [vmem:[#allocation2] sm:$0xff]  ;;  %v1083_v60 = vld [vmem:[#allocation2 + $0x8] sm:$0xff]  ;;  %v1085_v61 = vld [vmem:[#allocation2 + $0x10] sm:$0xff] }
  0xf7   : > { %v1087_v62 = vld [vmem:[#allocation2 + $0x18] sm:$0xff]  ;;  %v552_v63 = vsel %vm515_vm2, %v1081_v59, 0.0  ;;  %v553_v0 = vsel %vm515_vm2, %v1083_v60, 0.0  ;;  %v555_v1 = vsel %vm515_vm2, %v1085_v61, 0.0  ;;  %v1103_v8 = vld [vmem:[#allocation2 + $0x30] sm:$0xff]  ;;  %v1111_v14 = vld [vmem:[#allocation2 + $0x40] sm:$0xff] }
  0xf8   : > { %v1095_v2 = vld [vmem:[#allocation2 + $0x20] sm:$0xff]  ;;  %v554_v3 = vadd.f32 %v553_v0, %v552_v63  ;;  %v557_v4 = vsel %vm515_vm2, %v1087_v62, 0.0  ;;  %v563_v13 = vsel %vm515_vm2, %v1103_v8, 0.0  ;;  %v1115_v17 = vld [vmem:[#allocation2 + $0x48] sm:$0xff]  ;;  %v567_v19 = vsel %vm515_vm2, %v1111_v14, 0.0  ;;  %v1119_v20 = vld [vmem:[#allocation2 + $0x50] sm:$0xff] }
  0xf9   : > { %v559_v7 = vsel %vm515_vm2, %v1095_v2, 0.0  ;;  %v569_v22 = vsel %vm515_vm2, %v1115_v17, 0.0  ;;  %v1123_v23 = vld [vmem:[#allocation2 + $0x58] sm:$0xff]  ;;  %v571_v25 = vsel %vm515_vm2, %v1119_v20, 0.0  ;;  %v1127_v26 = vld [vmem:[#allocation2 + $0x60] sm:$0xff]  ;;  %v1135_v32 = vld [vmem:[#allocation2 + $0x70] sm:$0xff] }
  0xfa   : > { %v556_v6 = vadd.f32 %v555_v1, %v554_v3  ;;  %v1107_v11 = vld [vmem:[#allocation2 + $0x38] sm:$0xff]  ;;  %v573_v28 = vsel %vm515_vm2, %v1123_v23, 0.0  ;;  %v575_v31 = vsel %vm515_vm2, %v1127_v26, 0.0  ;;  %v579_v37 = vsel %vm515_vm2, %v1135_v32, 0.0 }
  0xfb   : > { %v565_v16 = vsel %vm515_vm2, %v1107_v11, 0.0  ;;  %v1139_v35 = vld [vmem:[#allocation2 + $0x78] sm:$0xff] }
  0xfc   : > { %v1099_v5 = vld [vmem:[#allocation2 + $0x28] sm:$0xff]  ;;  %v558_v9 = vadd.f32 %v557_v4, %v556_v6  ;;  %v581_v39 = vsel %vm515_vm2, %v1139_v35, 0.0 }
  0xfd   : > { %v561_v10 = vsel %vm515_vm2, %v1099_v5, 0.0  ;;  %v1131_v29 = vld [vmem:[#allocation2 + $0x68] sm:$0xff] }
  0xfe   : > { %v560_v12 = vadd.f32 %v559_v7, %v558_v9  ;;  %v577_v34 = vsel %vm515_vm2, %v1131_v29, 0.0 }
 0x100   : > { %v562_v15 = vadd.f32 %v561_v10, %v560_v12 }
 0x102   : > { %v564_v18 = vadd.f32 %v563_v13, %v562_v15 }
 0x104   : > { %v566_v21 = vadd.f32 %v565_v16, %v564_v18 }
 0x106   : > { %v568_v24 = vadd.f32 %v567_v19, %v566_v21 }
 0x108   : > { %v570_v27 = vadd.f32 %v569_v22, %v568_v24 }
 0x10a   : > { %v572_v30 = vadd.f32 %v571_v25, %v570_v27 }
 0x10c   : > { %v574_v33 = vadd.f32 %v573_v28, %v572_v30 }
 0x10e   : > { %v576_v36 = vadd.f32 %v575_v31, %v574_v33 }
 0x110   : > { %v578_v38 = vadd.f32 %v577_v34, %v576_v36 }
 0x112   : > { %v580_v40 = vadd.f32 %v579_v37, %v578_v38 }
 0x114   : > { %v582_v41 = vadd.f32 %v581_v39, %v580_v40 }
 0x116   : > { %v583_v42 = vrot.slane %v582_v41, 4 }
 0x118   : > { %v584_v43 = vadd.f32 %v583_v42, %v582_v41 }
 0x11a   : > { %v585_v44 = vrot.slane %v584_v43, 2 }
 0x11c   : > { %v586_v45 = vadd.f32 %v585_v44, %v584_v43 }
 0x11e   : > { %v587_v46 = vrot.slane %v586_v45, 1 }
 0x120   : > { %v588_v47 = vadd.f32 %v587_v46, %v586_v45 }
 0x122   : > { %v1145_v48 = vmul.f32 0.0078125, %v588_v47 }
 0x124   : > { %v591_v49 = vsub.f32 %v1081_v59, %v1145_v48  ;;  %v592_v50 = vsub.f32 %v1083_v60, %v1145_v48  ;;  %v593_v51 = vsub.f32 %v1085_v61, %v1145_v48  ;;  %v594_v52 = vsub.f32 %v1087_v62, %v1145_v48 }
 0x125   : > { %v595_v53 = vsub.f32 %v1095_v2, %v1145_v48  ;;  %v596_v57 = vsub.f32 %v1099_v5, %v1145_v48  ;;  %v597_v63 = vsub.f32 %v1103_v8, %v1145_v48  ;;  %v598_v7 = vsub.f32 %v1107_v11, %v1145_v48 }
 0x126   : > { %v607_v54 = vmul.f32 %v591_v49, %v591_v49  ;;  %v608_v55 = vmul.f32 %v592_v50, %v592_v50  ;;  %v609_v56 = vmul.f32 %v593_v51, %v593_v51  ;;  %v610_v58 = vmul.f32 %v594_v52, %v594_v52 }
 0x127   : > { %v611_v0 = vmul.f32 %v595_v53, %v595_v53  ;;  %v612_v9 = vmul.f32 %v596_v57, %v596_v57  ;;  %v599_v13 = vsub.f32 %v1111_v14, %v1145_v48  ;;  %v613_v15 = vmul.f32 %v597_v63, %v597_v63 }
 0x128   : > { %v623_v1 = vsel %vm515_vm2, %v607_v54, 0.0  ;;  %v624_v3 = vsel %vm515_vm2, %v608_v55, 0.0  ;;  %v626_v4 = vsel %vm515_vm2, %v609_v56, 0.0  ;;  %v628_v10 = vsel %vm515_vm2, %v610_v58, 0.0 }
 0x129   : > { %v625_v6 = vadd.f32 %v624_v3, %v623_v1  ;;  %v630_v16 = vsel %vm515_vm2, %v611_v0, 0.0  ;;  %v600_v19 = vsub.f32 %v1115_v17, %v1145_v48  ;;  %v614_v21 = vmul.f32 %v598_v7, %v598_v7 }
 0x12a   : > { %v632_v22 = vsel %vm515_vm2, %v612_v9, 0.0  ;;  %v601_v25 = vsub.f32 %v1119_v20, %v1145_v48  ;;  %v615_v27 = vmul.f32 %v599_v13, %v599_v13  ;;  %v634_v28 = vsel %vm515_vm2, %v613_v15, 0.0 }
 0x12b   : > { %v627_v12 = vadd.f32 %v626_v4, %v625_v6  ;;  %v602_v31 = vsub.f32 %v1123_v23, %v1145_v48  ;;  %v616_v33 = vmul.f32 %v600_v19, %v600_v19  ;;  %v636_v34 = vsel %vm515_vm2, %v614_v21, 0.0 }
 0x12c   : > { %v603_v37 = vsub.f32 %v1127_v26, %v1145_v48  ;;  %v617_v38 = vmul.f32 %v601_v25, %v601_v25  ;;  %v638_v39 = vsel %vm515_vm2, %v615_v27, 0.0  ;;  %v604_v41 = vsub.f32 %v1131_v29, %v1145_v48 }
 0x12d   : > { %v629_v18 = vadd.f32 %v628_v10, %v627_v12  ;;  %v618_v42 = vmul.f32 %v602_v31, %v602_v31  ;;  %v640_v43 = vsel %vm515_vm2, %v616_v33, 0.0  ;;  %v605_v45 = vsub.f32 %v1135_v32, %v1145_v48 }
 0x12e   : > { %v619_v46 = vmul.f32 %v603_v37, %v603_v37  ;;  %v642_v47 = vsel %vm515_vm2, %v617_v38, 0.0  ;;  %v606_v50 = vsub.f32 %v1139_v35, %v1145_v48  ;;  %v620_v51 = vmul.f32 %v604_v41, %v604_v41 }
 0x12f   : > { %v631_v24 = vadd.f32 %v630_v16, %v629_v18  ;;  %v644_v52 = vsel %vm515_vm2, %v618_v42, 0.0  ;;  %v621_v54 = vmul.f32 %v605_v45, %v605_v45  ;;  %v669_v19 = vlaneseq }
 0x130   : > { %v646_v55 = vsel %vm515_vm2, %v619_v46, 0.0  ;;  %v622_v57 = vmul.f32 %v606_v50, %v606_v50  ;;  %v648_v58 = vsel %vm515_vm2, %v620_v51, 0.0 }
 0x131   : > { %v633_v30 = vadd.f32 %v632_v22, %v631_v24  ;;  %v650_v0 = vsel %vm515_vm2, %v621_v54, 0.0  ;;  %v670_v21 = vshrl.u32 %v669_v19, 7  ;;  %v661_v22 = vld [vmem:[%s1293_s2] sm:$0x1] }
 0x132   : > { %v652_v3 = vsel %vm515_vm2, %v622_v57, 0.0 }
 0x133   : > { %v635_v36 = vadd.f32 %v634_v28, %v633_v30  ;;  %v671_v24 = vsub.s32 0, %v670_v21  ;;  %v665_v28 = vld [vmem:[%s1294_s3] sm:$0x1] }
 0x135   : > { %v637_v40 = vadd.f32 %v636_v34, %v635_v36 }
 0x137   : > { %v639_v44 = vadd.f32 %v638_v39, %v637_v40 }
 0x139   : > { %v641_v49 = vadd.f32 %v640_v43, %v639_v44 }
 0x13b   : > { %v643_v53 = vadd.f32 %v642_v47, %v641_v49 }
 0x13d   : > { %v645_v56 = vadd.f32 %v644_v52, %v643_v53 }
 0x13f   : > { %v647_v63 = vadd.f32 %v646_v55, %v645_v56 }
 0x141   : > { %v649_v1 = vadd.f32 %v648_v58, %v647_v63 }
 0x143   : > { %v651_v4 = vadd.f32 %v650_v0, %v649_v1 }
 0x145   : > { %v653_v6 = vadd.f32 %v652_v3, %v651_v4 }
 0x147   : > { %v654_v7 = vrot.slane %v653_v6, 4 }
 0x149   : > { %v655_v9 = vadd.f32 %v654_v7, %v653_v6 }
 0x14b   : > { %v656_v10 = vrot.slane %v655_v9, 2 }
 0x14d   : > { %v657_v12 = vadd.f32 %v656_v10, %v655_v9 }
 0x14f   : > { %v658_v13 = vrot.slane %v657_v12, 1 }
 0x151   : > { %v659_v15 = vadd.f32 %v658_v13, %v657_v12 }
 0x153   : > { %v660_v16 = vmul.f32 0.0078125, %v659_v15 }
 0x155   : > { %v662_v18 = vadd.f32 1e-05, %v660_v16 }
 0x157   : > { %949 = vrsqrt.f32 %v662_v18 }
 0x164   : > { %v950_v25 = vpop.eup %949 }
 0x165   : > { %v664_v27 = vmul.f32 %v950_v25, %v661_v22 }
 0x167   : > { %v666_v30 = vmul.f32 %v664_v27, %v1145_v48  ;;  %v672_v31 = vrot.slane %v664_v27, %v671_v24 }
 0x169   : > { %v667_v33 = vsub.f32 %v665_v28, %v666_v30  ;;  %v674_v34 = vmul.f32 %v672_v31, %v1081_v59  ;;  %v675_v36 = vmul.f32 %v672_v31, %v1083_v60  ;;  %v676_v37 = vmul.f32 %v672_v31, %v1085_v61 }
 0x16a   : > { %v677_v38 = vmul.f32 %v672_v31, %v1087_v62  ;;  %v678_v39 = vmul.f32 %v672_v31, %v1095_v2  ;;  %v679_v40 = vmul.f32 %v672_v31, %v1099_v5  ;;  %v680_v41 = vmul.f32 %v672_v31, %v1103_v8 }
 0x16b   : > { %v694_v42 = vrot.slane %v667_v33, %v671_v24  ;;  %v681_v43 = vmul.f32 %v672_v31, %v1107_v11  ;;  %v682_v48 = vmul.f32 %v672_v31, %v1111_v14  ;;  %v683_v44 = vmul.f32 %v672_v31, %v1115_v17 }
 0x16c   : > { %v684_v59 = vmul.f32 %v672_v31, %v1119_v20  ;;  %v685_v60 = vmul.f32 %v672_v31, %v1123_v23  ;;  %v686_v61 = vmul.f32 %v672_v31, %v1127_v26  ;;  %v687_v62 = vmul.f32 %v672_v31, %v1131_v29 }
 0x16d   : > { %v696_v2 = vadd.f32 %v694_v42, %v674_v34  ;;  %v697_v45 = vadd.f32 %v694_v42, %v675_v36  ;;  %v698_v5 = vadd.f32 %v694_v42, %v676_v37  ;;  %v699_v46 = vadd.f32 %v694_v42, %v677_v38 }
 0x16e   : > { %v700_v8 = vadd.f32 %v694_v42, %v678_v39  ;;  %v701_v47 = vadd.f32 %v694_v42, %v679_v40  ;;  %v702_v49 = vadd.f32 %v694_v42, %v680_v41  ;;  %v703_v11 = vadd.f32 %v694_v42, %v681_v43 }
 0x16f   : > { %v712_v50 = vmax.f32 %v696_v2, 0.0  ;;  %v713_v14 = vmax.f32 %v697_v45, 0.0  ;;  %v714_v51 = vmax.f32 %v698_v5, 0.0  ;;  %v715_v17 = vmax.f32 %v699_v46, 0.0 }
 0x170   : > { %v716_v52 = vmax.f32 %v700_v8, 0.0  ;;  %v717_v20 = vmax.f32 %v701_v47, 0.0  ;;  %v718_v53 = vmax.f32 %v702_v49, 0.0  ;;  %v719_v23 = vmax.f32 %v703_v11, 0.0 }
 0x171   : > { %728 = vst.msk [vmem:[%s1295_s4] sm:$0xff] %vm515_vm2, %v712_v50  ;;  %729 = vst.msk [vmem:[%s1295_s4 + $0x8] sm:$0xff] %vm515_vm2, %v713_v14  ;;  %v704_v26 = vadd.f32 %v694_v42, %v682_v48  ;;  %v705_v29 = vadd.f32 %v694_v42, %v683_v44  ;;  %v706_v54 = vadd.f32 %v694_v42, %v684_v59 }
 0x172   : > { %730 = vst.msk [vmem:[%s1295_s4 + $0x10] sm:$0xff] %vm515_vm2, %v714_v51  ;;  %731 = vst.msk [vmem:[%s1295_s4 + $0x18] sm:$0xff] %vm515_vm2, %v715_v17  ;;  %v707_v55 = vadd.f32 %v694_v42, %v685_v60  ;;  %v708_v56 = vadd.f32 %v694_v42, %v686_v61  ;;  %v709_v57 = vadd.f32 %v694_v42, %v687_v62 }
 0x173   : > { %732 = vst.msk [vmem:[%s1295_s4 + $0x20] sm:$0xff] %vm515_vm2, %v716_v52  ;;  %733 = vst.msk [vmem:[%s1295_s4 + $0x28] sm:$0xff] %vm515_vm2, %v717_v20  ;;  %v688_v58 = vmul.f32 %v672_v31, %v1135_v32  ;;  %v689_v63 = vmul.f32 %v672_v31, %v1139_v35  ;;  %v720_v0 = vmax.f32 %v704_v26, 0.0  ;;  %v721_v1 = vmax.f32 %v705_v29, 0.0 }
 0x174   : > { %734 = vst.msk [vmem:[%s1295_s4 + $0x30] sm:$0xff] %vm515_vm2, %v718_v53  ;;  %735 = vst.msk [vmem:[%s1295_s4 + $0x38] sm:$0xff] %vm515_vm2, %v719_v23  ;;  %v722_v3 = vmax.f32 %v706_v54, 0.0  ;;  %v723_v4 = vmax.f32 %v707_v55, 0.0  ;;  %v724_v6 = vmax.f32 %v708_v56, 0.0  ;;  %v725_v7 = vmax.f32 %v709_v57, 0.0 }
 0x175   : > { %v710_v9 = vadd.f32 %v694_v42, %v688_v58  ;;  %v711_v10 = vadd.f32 %v694_v42, %v689_v63  ;;  %736 = vst.msk [vmem:[%s1295_s4 + $0x40] sm:$0xff] %vm515_vm2, %v720_v0  ;;  %737 = vst.msk [vmem:[%s1295_s4 + $0x48] sm:$0xff] %vm515_vm2, %v721_v1 }
 0x176   : > { %738 = vst.msk [vmem:[%s1295_s4 + $0x50] sm:$0xff] %vm515_vm2, %v722_v3  ;;  %739 = vst.msk [vmem:[%s1295_s4 + $0x58] sm:$0xff] %vm515_vm2, %v723_v4 }
 0x177   : > { %740 = vst.msk [vmem:[%s1295_s4 + $0x60] sm:$0xff] %vm515_vm2, %v724_v6  ;;  %741 = vst.msk [vmem:[%s1295_s4 + $0x68] sm:$0xff] %vm515_vm2, %v725_v7  ;;  %v726_v32 = vmax.f32 %v710_v9, 0.0  ;;  %v727_v35 = vmax.f32 %v711_v10, 0.0 }
 0x179   : > { %742 = vst.msk [vmem:[%s1295_s4 + $0x70] sm:$0xff] %vm515_vm2, %v726_v32  ;;  %743 = vst.msk [vmem:[%s1295_s4 + $0x78] sm:$0xff] %vm515_vm2, %v727_v35 }
 0x17a PF: > { %s14_s17 = sadd.s32 1, %s973_s17   ;;  %s1296_s15 = smov %s969_s16 }
 0x17b   : > { %p11_p7 = scmp.ge.s32.totalorder %s14_s17, 11   ;;  %s1297_s16 = smov %s1299_s18 }
 0x17d   :  { %13 = sbr.rel (!%p11_p7) target bundleno = 2 (0x2), region = 83 }

// kernel: forward.11
= control target key start
LH: loop header
LB: loop body
LE: loop exit
PB: predicated region body
PF: predicated region fallthrough
CT: control target
= control target key end

     0   :  { %s1014_s15 = smov 0   ;;  %s1016_s16 = smov 0   ;;  %s1310_s0 = inlined_call_operand.vmem [shape: bf16[9,128,64], index: 0, kind: input, shape index: {}]   ;;  %s1311_s1 = inlined_call_operand.vmem [shape: bf16[9,64,64], index: 1, kind: input, shape index: {}]   ;;  %s1312_s2 = inlined_call_operand.vmem [shape: f32[1,64], index: 2, kind: input, shape index: {}]   ;;  %s1313_s3 = inlined_call_operand.vmem [shape: f32[1,64], index: 3, kind: input, shape index: {}]   ;;  %s1314_s4 = inlined_call_operand.vmem [shape: f32[128,64], index: 4, kind: output, shape index: {}]  }
   0x1   :  { %s1018_s17 = smov 0  }
   0x2 LB: > { %s23_s18 = sadd.s32 1, %s982_s16  ;;  %p849_p0 = scmp.ge.s32.totalorder %s986_s17, 1  ;;  %s986_s17 = sphi %s1018_s17, %s14_s17   ;;  %s982_s16 = sphi %s1016_s16, %s1316_s16   ;;  %s978_s15 = sphi %s1014_s15, %s1315_s15  }
   0x3   : > { %p24_p1 = scmp.ge.s32.totalorder %s23_s18, 9  ;;  %p205_p2 = scmp.lt.s32.totalorder %s986_s17, 10 }
   0x5   : > { %s1318_s18 = smov (%p24_p1, %s23_s18), 0  ;;  %p206_p3 = pnand %p849_p0, %p205_p2 }
   0x6   : > { %p244_p4 = scmp.lt.s32.totalorder (!%p206_p3), %s978_s15, 8  ;;  %p854_p5 = scmp.ne.s32.totalorder (!%p206_p3), %s978_s15, 0 }
   0x7   : > { %209 = sbr.rel (%p206_p3) target bundleno = 383 (0x17f), region = 36 }
   0xc   : > { %s245_s19 = scalar_select %p244_p4, %s978_s15, 8 }
   0xd   : > { %271 = sbr.rel (%p854_p5) target bundleno = 27 (0x1b), region = 40 }
   0xe   : > { %s879_s20 = sshll.u32 %s245_s19, 6  ;;  %s880_s21 = sshll.u32 %s245_s19, 5 }
   0xf   : > { %s1039_s24 = scalar_lea.vmem %s1310_s0, %s879_s20  ;;  %s1044_s27 = scalar_lea.vmem %s1311_s1, %s880_s21 }
  0x12   : > { %vm272_vm0 = vcmask 523264   ;;  %v988_v0 = vmov 0.0  }
  0x13   : > { %273 = vst.msk [vmem:[#allocation2] sm:$0xff] %vm272_vm0, %v988_v0  ;;  %274 = vst.msk [vmem:[#allocation2 + $0x8] sm:$0xff] %vm272_vm0, %v988_v0 }
  0x14   : > { %275 = vst.msk [vmem:[#allocation2 + $0x10] sm:$0xff] %vm272_vm0, %v988_v0  ;;  %276 = vst.msk [vmem:[#allocation2 + $0x18] sm:$0xff] %vm272_vm0, %v988_v0 }
  0x15   : > { %277 = vst.msk [vmem:[#allocation2 + $0x20] sm:$0xff] %vm272_vm0, %v988_v0  ;;  %278 = vst.msk [vmem:[#allocation2 + $0x28] sm:$0xff] %vm272_vm0, %v988_v0 }
  0x16   : > { %279 = vst.msk [vmem:[#allocation2 + $0x30] sm:$0xff] %vm272_vm0, %v988_v0  ;;  %280 = vst.msk [vmem:[#allocation2 + $0x38] sm:$0xff] %vm272_vm0, %v988_v0 }
  0x17   : > { %281 = vst.msk [vmem:[#allocation2 + $0x40] sm:$0xff] %vm272_vm0, %v988_v0  ;;  %282 = vst.msk [vmem:[#allocation2 + $0x48] sm:$0xff] %vm272_vm0, %v988_v0 }
  0x18   : > { %283 = vst.msk [vmem:[#allocation2 + $0x50] sm:$0xff] %vm272_vm0, %v988_v0  ;;  %284 = vst.msk [vmem:[#allocation2 + $0x58] sm:$0xff] %vm272_vm0, %v988_v0 }
  0x19   : > { %285 = vst.msk [vmem:[#allocation2 + $0x60] sm:$0xff] %vm272_vm0, %v988_v0  ;;  %286 = vst.msk [vmem:[#allocation2 + $0x68] sm:$0xff] %vm272_vm0, %v988_v0 }
  0x1a   : > { %287 = vst.msk [vmem:[#allocation2 + $0x70] sm:$0xff] %vm272_vm0, %v988_v0  ;;  %288 = vst.msk [vmem:[#allocation2 + $0x78] sm:$0xff] %vm272_vm0, %v988_v0 }
  0x1b PF: > { %v950_v1 = vld [vmem:[%s1044_s27 + $0x18] sm:$0xff]   ;;  %v951_v2 = vld [vmem:[%s1044_s27 + $0x10] sm:$0xff]   ;;  %v952_v3 = vld [vmem:[%s1044_s27 + $0x8] sm:$0xff]   ;;  %vm393_vm1 = vcmask 523264   ;;  %p875_p6 = scmp.ne.s32.totalorder %s978_s15, 8 }
  0x1c   : > { %893 = vmatprep.subr.bf16.mxu0 %v950_v1  ;;  %917 = vmatprep.subr.bf16.mxu1 %v950_v1  ;;  %v954_v4 = vld [vmem:[%s1039_s24] sm:$0xff]   ;;  %v956_v7 = vld [vmem:[%s1039_s24 + $0x8] sm:$0xff]   ;;  %v958_v9 = vld [vmem:[%s1039_s24 + $0x10] sm:$0xff]  }
  0x1d   : > { %894 = vmatpush3.bf16.msra.mxu0 %v950_v1  ;;  %921 = vmatpush3.bf16.msra.mxu1 %v950_v1  ;;  %v955_v5 = vld [vmem:[%s1039_s24 + $0x20] sm:$0xff]   ;;  %v957_v8 = vld [vmem:[%s1039_s24 + $0x28] sm:$0xff]   ;;  %v959_v10 = vld [vmem:[%s1039_s24 + $0x30] sm:$0xff]  }
  0x1e   : > { %895 = vmatprep.subr.bf16.mxu0 %v951_v2  ;;  %918 = vmatprep.subr.bf16.mxu1 %v951_v2  ;;  %v953_v6 = vld [vmem:[%s1044_s27] sm:$0xff]   ;;  %v960_v11 = vld [vmem:[%s1039_s24 + $0x18] sm:$0xff]   ;;  %v291_v13 = vld [vmem:[#allocation2 + $0x10] sm:$0xff] }
  0x1f   : > { %901 = vmatprep.mubr.msk.bf16.mxu0 %vm393_vm1, %v954_v4  ;;  %909 = vmatprep.mubr.msk.bf16.mxu1 %vm393_vm1, %v955_v5  ;;  %v961_v12 = vld [vmem:[%s1039_s24 + $0x38] sm:$0xff]   ;;  %v299_v14 = vld [vmem:[#allocation2 + $0x50] sm:$0xff]  ;;  %v289_v17 = vld [vmem:[#allocation2] sm:$0xff] }
  0x20   : > { %v297_v18 = vld [vmem:[#allocation2 + $0x40] sm:$0xff]  ;;  %v292_v23 = vld [vmem:[#allocation2 + $0x18] sm:$0xff]  ;;  %v290_v29 = vld [vmem:[#allocation2 + $0x8] sm:$0xff] }
  0x21   : > { %896 = vmatpush3.bf16.msra.mxu0 %v951_v2  ;;  %922 = vmatpush3.bf16.msra.mxu1 %v951_v2  ;;  %v300_v24 = vld [vmem:[#allocation2 + $0x58] sm:$0xff]  ;;  %v298_v30 = vld [vmem:[#allocation2 + $0x48] sm:$0xff]  ;;  %v295_v35 = vld [vmem:[#allocation2 + $0x30] sm:$0xff] }
  0x22   : > { %897 = vmatprep.subr.bf16.mxu0 %v952_v3  ;;  %919 = vmatprep.subr.bf16.mxu1 %v952_v3  ;;  %v303_v36 = vld [vmem:[#allocation2 + $0x70] sm:$0xff]  ;;  %v293_v41 = vld [vmem:[#allocation2 + $0x20] sm:$0xff]  ;;  %v296_v47 = vld [vmem:[#allocation2 + $0x38] sm:$0xff] }
  0x23   : > { %v301_v42 = vld [vmem:[#allocation2 + $0x60] sm:$0xff]  ;;  %v304_v48 = vld [vmem:[#allocation2 + $0x78] sm:$0xff]  ;;  %v294_v53 = vld [vmem:[#allocation2 + $0x28] sm:$0xff] }
  0x24   : > { %v302_v54 = vld [vmem:[#allocation2 + $0x68] sm:$0xff] }
  0x25   : > { %898 = vmatpush3.bf16.msra.mxu0 %v952_v3  ;;  %923 = vmatpush3.bf16.msra.mxu1 %v952_v3 }
  0x26   : > { %899 = vmatprep.subr.bf16.mxu0 %v953_v6  ;;  %920 = vmatprep.subr.bf16.mxu1 %v953_v6 }
  0x29   : > { %900 = vmatpush3.bf16.msra.mxu0 %v953_v6  ;;  %924 = vmatpush3.bf16.msra.mxu1 %v953_v6 }
  0x2c   : > { %902 = vmatmul.mubr.msk.bf16.vlgmr.msra.gmra.mxu0 %vm393_vm1, %v956_v7  ;;  %910 = vmatmul.mubr.msk.bf16.vlgmr.msra.gmra.mxu1 %vm393_vm1, %v957_v8 }
  0x2d   : > { %905 = vmatprep.mubr.msk.bf16.mxu0 %vm393_vm1, %v958_v9  ;;  %913 = vmatprep.mubr.msk.bf16.mxu1 %vm393_vm1, %v959_v10 }
  0x34   : > { %906 = vmatmul.mubr.msk.bf16.gmra.mxu0 %vm393_vm1, %v960_v11  ;;  %914 = vmatmul.mubr.msk.bf16.gmra.mxu1 %vm393_vm1, %v961_v12 }
  0xec   : > { %v903_v15 = vpop.f32.mrf.mxu0  ;;  %v911_v16 = vpop.f32.mrf.mxu1 }
  0xed   : > { %v517_v19 = vadd.f32 %v903_v15, %v291_v13  ;;  %v525_v20 = vadd.f32 %v911_v16, %v299_v14 }
  0xee   : > { %v452_v21 = vpop.f32.mrf.mxu0  ;;  %v484_v22 = vpop.f32.mrf.mxu1 }
  0xef   : > { %533 = vst.msk [vmem:[#allocation2 + $0x10] sm:$0xff] %vm393_vm1, %v517_v19  ;;  %541 = vst.msk [vmem:[#allocation2 + $0x50] sm:$0xff] %vm393_vm1, %v525_v20  ;;  %v515_v25 = vadd.f32 %v452_v21, %v289_v17  ;;  %v523_v26 = vadd.f32 %v484_v22, %v297_v18 }
  0xf0   : > { %v904_v27 = vpop.f32.mrf.mxu0  ;;  %v912_v28 = vpop.f32.mrf.mxu1 }
  0xf1   : > { %531 = vst.msk [vmem:[#allocation2] sm:$0xff] %vm393_vm1, %v515_v25  ;;  %539 = vst.msk [vmem:[#allocation2 + $0x40] sm:$0xff] %vm393_vm1, %v523_v26  ;;  %v518_v31 = vadd.f32 %v904_v27, %v292_v23  ;;  %v526_v32 = vadd.f32 %v912_v28, %v300_v24 }
  0xf2   : > { %v455_v33 = vpop.f32.mrf.mxu0  ;;  %v487_v34 = vpop.f32.mrf.mxu1 }
  0xf3   : > { %534 = vst.msk [vmem:[#allocation2 + $0x18] sm:$0xff] %vm393_vm1, %v518_v31  ;;  %542 = vst.msk [vmem:[#allocation2 + $0x58] sm:$0xff] %vm393_vm1, %v526_v32  ;;  %v516_v37 = vadd.f32 %v455_v33, %v290_v29  ;;  %v524_v38 = vadd.f32 %v487_v34, %v298_v30 }
  0xf4   : > { %v907_v39 = vpop.f32.mrf.mxu0  ;;  %v915_v40 = vpop.f32.mrf.mxu1 }
  0xf5   : > { %532 = vst.msk [vmem:[#allocation2 + $0x8] sm:$0xff] %vm393_vm1, %v516_v37  ;;  %540 = vst.msk [vmem:[#allocation2 + $0x48] sm:$0xff] %vm393_vm1, %v524_v38  ;;  %v521_v43 = vadd.f32 %v907_v39, %v295_v35  ;;  %v529_v44 = vadd.f32 %v915_v40, %v303_v36 }
  0xf6   : > { %v468_v45 = vpop.f32.mrf.mxu0  ;;  %v500_v46 = vpop.f32.mrf.mxu1 }
  0xf7   : > { %537 = vst.msk [vmem:[#allocation2 + $0x30] sm:$0xff] %vm393_vm1, %v521_v43  ;;  %545 = vst.msk [vmem:[#allocation2 + $0x70] sm:$0xff] %vm393_vm1, %v529_v44  ;;  %v519_v49 = vadd.f32 %v468_v45, %v293_v41  ;;  %v527_v50 = vadd.f32 %v500_v46, %v301_v42 }
  0xf8   : > { %v908_v51 = vpop.f32.mrf.mxu0  ;;  %v916_v52 = vpop.f32.mrf.mxu1 }
  0xf9   : > { %535 = vst.msk [vmem:[#allocation2 + $0x20] sm:$0xff] %vm393_vm1, %v519_v49  ;;  %543 = vst.msk [vmem:[#allocation2 + $0x60] sm:$0xff] %vm393_vm1, %v527_v50  ;;  %v522_v55 = vadd.f32 %v908_v51, %v296_v47  ;;  %v530_v56 = vadd.f32 %v916_v52, %v304_v48  ;;  %550 = sbr.rel (%p875_p6) target bundleno = 383 (0x17f), region = 44 }
  0xfa   : > { %v471_v57 = vpop.f32.mrf.mxu0  ;;  %v503_v58 = vpop.f32.mrf.mxu1 }
  0xfb   : > { %538 = vst.msk [vmem:[#allocation2 + $0x38] sm:$0xff] %vm393_vm1, %v522_v55  ;;  %546 = vst.msk [vmem:[#allocation2 + $0x78] sm:$0xff] %vm393_vm1, %v530_v56  ;;  %v520_v59 = vadd.f32 %v471_v57, %v294_v53  ;;  %v528_v60 = vadd.f32 %v503_v58, %v302_v54 }
  0xfd   : > { %536 = vst.msk [vmem:[#allocation2 + $0x28] sm:$0xff] %vm393_vm1, %v520_v59  ;;  %544 = vst.msk [vmem:[#allocation2 + $0x68] sm:$0xff] %vm393_vm1, %v528_v60 }
  0xfe   : > { %v1100_v61 = vld [vmem:[#allocation2] sm:$0xff]  ;;  %v1102_v62 = vld [vmem:[#allocation2 + $0x8] sm:$0xff]  ;;  %v1104_v63 = vld [vmem:[#allocation2 + $0x10] sm:$0xff] }
  0xff   : > { %v1106_v0 = vld [vmem:[#allocation2 + $0x18] sm:$0xff]  ;;  %v567_v1 = vsel %vm393_vm1, %v1100_v61, 0.0  ;;  %v568_v2 = vsel %vm393_vm1, %v1102_v62, 0.0  ;;  %v570_v3 = vsel %vm393_vm1, %v1104_v63, 0.0  ;;  %v1122_v10 = vld [vmem:[#allocation2 + $0x30] sm:$0xff]  ;;  %v1130_v16 = vld [vmem:[#allocation2 + $0x40] sm:$0xff] }
 0x100   : > { %v1114_v4 = vld [vmem:[#allocation2 + $0x20] sm:$0xff]  ;;  %v569_v5 = vadd.f32 %v568_v2, %v567_v1  ;;  %v572_v6 = vsel %vm393_vm1, %v1106_v0, 0.0  ;;  %v578_v15 = vsel %vm393_vm1, %v1122_v10, 0.0  ;;  %v1134_v19 = vld [vmem:[#allocation2 + $0x48] sm:$0xff]  ;;  %v582_v21 = vsel %vm393_vm1, %v1130_v16, 0.0  ;;  %v1138_v22 = vld [vmem:[#allocation2 + $0x50] sm:$0xff] }
 0x101   : > { %v574_v9 = vsel %vm393_vm1, %v1114_v4, 0.0  ;;  %v584_v24 = vsel %vm393_vm1, %v1134_v19, 0.0  ;;  %v1142_v25 = vld [vmem:[#allocation2 + $0x58] sm:$0xff]  ;;  %v586_v27 = vsel %vm393_vm1, %v1138_v22, 0.0  ;;  %v1146_v28 = vld [vmem:[#allocation2 + $0x60] sm:$0xff]  ;;  %v1154_v34 = vld [vmem:[#allocation2 + $0x70] sm:$0xff] }
 0x102   : > { %v571_v8 = vadd.f32 %v570_v3, %v569_v5  ;;  %v1126_v13 = vld [vmem:[#allocation2 + $0x38] sm:$0xff]  ;;  %v588_v30 = vsel %vm393_vm1, %v1142_v25, 0.0  ;;  %v590_v33 = vsel %vm393_vm1, %v1146_v28, 0.0  ;;  %v594_v39 = vsel %vm393_vm1, %v1154_v34, 0.0 }
 0x103   : > { %v580_v18 = vsel %vm393_vm1, %v1126_v13, 0.0  ;;  %v1158_v37 = vld [vmem:[#allocation2 + $0x78] sm:$0xff] }
 0x104   : > { %v1118_v7 = vld [vmem:[#allocation2 + $0x28] sm:$0xff]  ;;  %v573_v11 = vadd.f32 %v572_v6, %v571_v8  ;;  %v596_v41 = vsel %vm393_vm1, %v1158_v37, 0.0 }
 0x105   : > { %v576_v12 = vsel %vm393_vm1, %v1118_v7, 0.0  ;;  %v1150_v31 = vld [vmem:[#allocation2 + $0x68] sm:$0xff] }
 0x106   : > { %v575_v14 = vadd.f32 %v574_v9, %v573_v11  ;;  %v592_v36 = vsel %vm393_vm1, %v1150_v31, 0.0 }
 0x108   : > { %v577_v17 = vadd.f32 %v576_v12, %v575_v14 }
 0x10a   : > { %v579_v20 = vadd.f32 %v578_v15, %v577_v17 }
 0x10c   : > { %v581_v23 = vadd.f32 %v580_v18, %v579_v20 }
 0x10e   : > { %v583_v26 = vadd.f32 %v582_v21, %v581_v23 }
 0x110   : > { %v585_v29 = vadd.f32 %v584_v24, %v583_v26 }
 0x112   : > { %v587_v32 = vadd.f32 %v586_v27, %v585_v29 }
 0x114   : > { %v589_v35 = vadd.f32 %v588_v30, %v587_v32 }
 0x116   : > { %v591_v38 = vadd.f32 %v590_v33, %v589_v35 }
 0x118   : > { %v593_v40 = vadd.f32 %v592_v36, %v591_v38 }
 0x11a   : > { %v595_v42 = vadd.f32 %v594_v39, %v593_v40 }
 0x11c   : > { %v597_v43 = vadd.f32 %v596_v41, %v595_v42 }
 0x11e   : > { %v598_v44 = vrot.slane %v597_v43, 4 }
 0x120   : > { %v599_v45 = vadd.f32 %v598_v44, %v597_v43 }
 0x122   : > { %v600_v46 = vrot.slane %v599_v45, 2 }
 0x124   : > { %v601_v47 = vadd.f32 %v600_v46, %v599_v45 }
 0x126   : > { %v602_v48 = vrot.slane %v601_v47, 1 }
 0x128   : > { %v603_v49 = vadd.f32 %v602_v48, %v601_v47 }
 0x12a   : > { %v1164_v50 = vmul.f32 0.0078125, %v603_v49 }
 0x12c   : > { %v606_v51 = vsub.f32 %v1100_v61, %v1164_v50  ;;  %v607_v52 = vsub.f32 %v1102_v62, %v1164_v50  ;;  %v608_v53 = vsub.f32 %v1104_v63, %v1164_v50  ;;  %v609_v54 = vsub.f32 %v1106_v0, %v1164_v50 }
 0x12d   : > { %v610_v55 = vsub.f32 %v1114_v4, %v1164_v50  ;;  %v611_v59 = vsub.f32 %v1118_v7, %v1164_v50  ;;  %v612_v1 = vsub.f32 %v1122_v10, %v1164_v50  ;;  %v613_v9 = vsub.f32 %v1126_v13, %v1164_v50 }
 0x12e   : > { %v622_v56 = vmul.f32 %v606_v51, %v606_v51  ;;  %v623_v57 = vmul.f32 %v607_v52, %v607_v52  ;;  %v624_v58 = vmul.f32 %v608_v53, %v608_v53  ;;  %v625_v60 = vmul.f32 %v609_v54, %v609_v54 }
 0x12f   : > { %v626_v2 = vmul.f32 %v610_v55, %v610_v55  ;;  %v627_v11 = vmul.f32 %v611_v59, %v611_v59  ;;  %v614_v15 = vsub.f32 %v1130_v16, %v1164_v50  ;;  %v628_v17 = vmul.f32 %v612_v1, %v612_v1 }
 0x130   : > { %v638_v3 = vsel %vm393_vm1, %v622_v56, 0.0  ;;  %v639_v5 = vsel %vm393_vm1, %v623_v57, 0.0  ;;  %v641_v6 = vsel %vm393_vm1, %v624_v58, 0.0  ;;  %v643_v12 = vsel %vm393_vm1, %v625_v60, 0.0 }
 0x131   : > { %v640_v8 = vadd.f32 %v639_v5, %v638_v3  ;;  %v645_v18 = vsel %vm393_vm1, %v626_v2, 0.0  ;;  %v615_v21 = vsub.f32 %v1134_v19, %v1164_v50  ;;  %v629_v23 = vmul.f32 %v613_v9, %v613_v9 }
 0x132   : > { %v647_v24 = vsel %vm393_vm1, %v627_v11, 0.0  ;;  %v616_v27 = vsub.f32 %v1138_v22, %v1164_v50  ;;  %v630_v29 = vmul.f32 %v614_v15, %v614_v15  ;;  %v649_v30 = vsel %vm393_vm1, %v628_v17, 0.0 }
 0x133   : > { %v642_v14 = vadd.f32 %v641_v6, %v640_v8  ;;  %v617_v33 = vsub.f32 %v1142_v25, %v1164_v50  ;;  %v631_v35 = vmul.f32 %v615_v21, %v615_v21  ;;  %v651_v36 = vsel %vm393_vm1, %v629_v23, 0.0 }
 0x134   : > { %v618_v39 = vsub.f32 %v1146_v28, %v1164_v50  ;;  %v632_v40 = vmul.f32 %v616_v27, %v616_v27  ;;  %v653_v41 = vsel %vm393_vm1, %v630_v29, 0.0  ;;  %v619_v43 = vsub.f32 %v1150_v31, %v1164_v50 }
 0x135   : > { %v644_v20 = vadd.f32 %v643_v12, %v642_v14  ;;  %v633_v44 = vmul.f32 %v617_v33, %v617_v33  ;;  %v655_v45 = vsel %vm393_vm1, %v631_v35, 0.0  ;;  %v620_v47 = vsub.f32 %v1154_v34, %v1164_v50 }
 0x136   : > { %v634_v48 = vmul.f32 %v618_v39, %v618_v39  ;;  %v657_v49 = vsel %vm393_vm1, %v632_v40, 0.0  ;;  %v621_v52 = vsub.f32 %v1158_v37, %v1164_v50  ;;  %v635_v53 = vmul.f32 %v619_v43, %v619_v43 }
 0x137   : > { %v646_v26 = vadd.f32 %v645_v18, %v644_v20  ;;  %v659_v54 = vsel %vm393_vm1, %v633_v44, 0.0  ;;  %v636_v56 = vmul.f32 %v620_v47, %v620_v47  ;;  %v684_v21 = vlaneseq }
 0x138   : > { %v661_v57 = vsel %vm393_vm1, %v634_v48, 0.0  ;;  %v637_v59 = vmul.f32 %v621_v52, %v621_v52  ;;  %v663_v60 = vsel %vm393_vm1, %v635_v53, 0.0 }
 0x139   : > { %v648_v32 = vadd.f32 %v647_v24, %v646_v26  ;;  %v665_v2 = vsel %vm393_vm1, %v636_v56, 0.0  ;;  %v685_v23 = vshrl.u32 %v684_v21, 7  ;;  %v676_v24 = vld [vmem:[%s1312_s2] sm:$0x1] }
 0x13a   : > { %v667_v5 = vsel %vm393_vm1, %v637_v59, 0.0 }
 0x13b   : > { %v650_v38 = vadd.f32 %v649_v30, %v648_v32  ;;  %v686_v26 = vsub.s32 0, %v685_v23  ;;  %v680_v30 = vld [vmem:[%s1313_s3] sm:$0x1] }
 0x13d   : > { %v652_v42 = vadd.f32 %v651_v36, %v650_v38 }
 0x13f   : > { %v654_v46 = vadd.f32 %v653_v41, %v652_v42 }
 0x141   : > { %v656_v51 = vadd.f32 %v655_v45, %v654_v46 }
 0x143   : > { %v658_v55 = vadd.f32 %v657_v49, %v656_v51 }
 0x145   : > { %v660_v58 = vadd.f32 %v659_v54, %v658_v55 }
 0x147   : > { %v662_v1 = vadd.f32 %v661_v57, %v660_v58 }
 0x149   : > { %v664_v3 = vadd.f32 %v663_v60, %v662_v1 }
 0x14b   : > { %v666_v6 = vadd.f32 %v665_v2, %v664_v3 }
 0x14d   : > { %v668_v8 = vadd.f32 %v667_v5, %v666_v6 }
 0x14f   : > { %v669_v9 = vrot.slane %v668_v8, 4 }
 0x151   : > { %v670_v11 = vadd.f32 %v669_v9, %v668_v8 }
 0x153   : > { %v671_v12 = vrot.slane %v670_v11, 2 }
 0x155   : > { %v672_v14 = vadd.f32 %v671_v12, %v670_v11 }
 0x157   : > { %v673_v15 = vrot.slane %v672_v14, 1 }
 0x159   : > { %v674_v17 = vadd.f32 %v673_v15, %v672_v14 }
 0x15b   : > { %v675_v18 = vmul.f32 0.0078125, %v674_v17 }
 0x15d   : > { %v677_v20 = vadd.f32 1e-05, %v675_v18 }
 0x15f   : > { %962 = vrsqrt.f32 %v677_v20 }
 0x16c   : > { %v963_v27 = vpop.eup %962 }
 0x16d   : > { %v679_v29 = vmul.f32 %v963_v27, %v676_v24 }
 0x16f   : > { %v681_v32 = vmul.f32 %v679_v29, %v1164_v50  ;;  %v687_v33 = vrot.slane %v679_v29, %v686_v26 }
 0x171   : > { %v682_v35 = vsub.f32 %v680_v30, %v681_v32  ;;  %v689_v36 = vmul.f32 %v687_v33, %v1100_v61  ;;  %v690_v38 = vmul.f32 %v687_v33, %v1102_v62  ;;  %v691_v39 = vmul.f32 %v687_v33, %v1104_v63 }
 0x172   : > { %v692_v40 = vmul.f32 %v687_v33, %v1106_v0  ;;  %v693_v41 = vmul.f32 %v687_v33, %v1114_v4  ;;  %v694_v42 = vmul.f32 %v687_v33, %v1118_v7  ;;  %v695_v43 = vmul.f32 %v687_v33, %v1122_v10 }
 0x173   : > { %v709_v44 = vrot.slane %v682_v35, %v686_v26  ;;  %v696_v45 = vmul.f32 %v687_v33, %v1126_v13  ;;  %v697_v50 = vmul.f32 %v687_v33, %v1130_v16  ;;  %v698_v46 = vmul.f32 %v687_v33, %v1134_v19 }
 0x174   : > { %v699_v61 = vmul.f32 %v687_v33, %v1138_v22  ;;  %v700_v62 = vmul.f32 %v687_v33, %v1142_v25  ;;  %v701_v63 = vmul.f32 %v687_v33, %v1146_v28  ;;  %v702_v0 = vmul.f32 %v687_v33, %v1150_v31 }
 0x175   : > { %v711_v4 = vadd.f32 %v709_v44, %v689_v36  ;;  %v712_v47 = vadd.f32 %v709_v44, %v690_v38  ;;  %v713_v7 = vadd.f32 %v709_v44, %v691_v39  ;;  %v714_v48 = vadd.f32 %v709_v44, %v692_v40 }
 0x176   : > { %v715_v10 = vadd.f32 %v709_v44, %v693_v41  ;;  %v716_v49 = vadd.f32 %v709_v44, %v694_v42  ;;  %v717_v51 = vadd.f32 %v709_v44, %v695_v43  ;;  %v718_v13 = vadd.f32 %v709_v44, %v696_v45 }
 0x177   : > { %727 = vst.msk [vmem:[%s1314_s4] sm:$0xff] %vm393_vm1, %v711_v4  ;;  %728 = vst.msk [vmem:[%s1314_s4 + $0x8] sm:$0xff] %vm393_vm1, %v712_v47  ;;  %v719_v16 = vadd.f32 %v709_v44, %v697_v50  ;;  %v720_v19 = vadd.f32 %v709_v44, %v698_v46  ;;  %v721_v22 = vadd.f32 %v709_v44, %v699_v61 }
 0x178   : > { %729 = vst.msk [vmem:[%s1314_s4 + $0x10] sm:$0xff] %vm393_vm1, %v713_v7  ;;  %730 = vst.msk [vmem:[%s1314_s4 + $0x18] sm:$0xff] %vm393_vm1, %v714_v48  ;;  %v722_v25 = vadd.f32 %v709_v44, %v700_v62  ;;  %v723_v28 = vadd.f32 %v709_v44, %v701_v63  ;;  %v724_v31 = vadd.f32 %v709_v44, %v702_v0 }
 0x179   : > { %731 = vst.msk [vmem:[%s1314_s4 + $0x20] sm:$0xff] %vm393_vm1, %v715_v10  ;;  %732 = vst.msk [vmem:[%s1314_s4 + $0x28] sm:$0xff] %vm393_vm1, %v716_v49  ;;  %v703_v52 = vmul.f32 %v687_v33, %v1154_v34  ;;  %v704_v53 = vmul.f32 %v687_v33, %v1158_v37 }
 0x17a   : > { %733 = vst.msk [vmem:[%s1314_s4 + $0x30] sm:$0xff] %vm393_vm1, %v717_v51  ;;  %734 = vst.msk [vmem:[%s1314_s4 + $0x38] sm:$0xff] %vm393_vm1, %v718_v13 }
 0x17b   : > { %735 = vst.msk [vmem:[%s1314_s4 + $0x40] sm:$0xff] %vm393_vm1, %v719_v16  ;;  %736 = vst.msk [vmem:[%s1314_s4 + $0x48] sm:$0xff] %vm393_vm1, %v720_v19  ;;  %v725_v34 = vadd.f32 %v709_v44, %v703_v52  ;;  %v726_v37 = vadd.f32 %v709_v44, %v704_v53 }
 0x17c   : > { %737 = vst.msk [vmem:[%s1314_s4 + $0x50] sm:$0xff] %vm393_vm1, %v721_v22  ;;  %738 = vst.msk [vmem:[%s1314_s4 + $0x58] sm:$0xff] %vm393_vm1, %v722_v25 }
 0x17d   : > { %739 = vst.msk [vmem:[%s1314_s4 + $0x60] sm:$0xff] %vm393_vm1, %v723_v28  ;;  %740 = vst.msk [vmem:[%s1314_s4 + $0x68] sm:$0xff] %vm393_vm1, %v724_v31 }
 0x17e   : > { %741 = vst.msk [vmem:[%s1314_s4 + $0x70] sm:$0xff] %vm393_vm1, %v725_v34  ;;  %742 = vst.msk [vmem:[%s1314_s4 + $0x78] sm:$0xff] %vm393_vm1, %v726_v37 }
 0x17f PF: > { %s14_s17 = sadd.s32 1, %s986_s17   ;;  %s1315_s15 = smov %s982_s16 }
 0x180   : > { %p11_p7 = scmp.ge.s32.totalorder %s14_s17, 11   ;;  %s1316_s16 = smov %s1318_s18 }
 0x182   :  { %13 = sbr.rel (!%p11_p7) target bundleno = 2 (0x2), region = 83 }

// kernel: forward.12
= control target key start
LH: loop header
LB: loop body
LE: loop exit
PB: predicated region body
PF: predicated region fallthrough
CT: control target
= control target key end

     0   :  { %vm22_vm0 = vcmask 523264   ;;  %v546_v1 = vmov 0.0   ;;  %vm127_vm1 = vcmask 261120   ;;  %s843_s1 = inlined_call_operand.vmem [shape: bf16[1,32,64], index: 1, kind: input, shape index: {}]   ;;  %s844_s0 = inlined_call_operand.vmem [shape: bf16[1,128,32], index: 0, kind: input, shape index: {}]   ;;  %s845_s2 = inlined_call_operand.vmem [shape: f32[1,64], index: 2, kind: input, shape index: {}]   ;;  %s846_s3 = inlined_call_operand.vmem [shape: f32[1,64], index: 3, kind: input, shape index: {}]   ;;  %s847_s4 = inlined_call_operand.vmem [shape: f32[128,64], index: 4, kind: output, shape index: {}]  }
   0x1   :  { %v534_v0 = vld [vmem:[%s843_s1 + $0x8] sm:$0xff]   ;;  %25 = vst.msk [vmem:[#allocation2 + $0x10] sm:$0xff] %vm22_vm0, %v546_v1  ;;  %23 = vst.msk [vmem:[#allocation2] sm:$0xff] %vm22_vm0, %v546_v1  ;;  %v535_v2 = vld [vmem:[%s843_s1] sm:$0xff]  }
   0x2   :  { %24 = vst.msk [vmem:[#allocation2 + $0x8] sm:$0xff] %vm22_vm0, %v546_v1  ;;  %26 = vst.msk [vmem:[#allocation2 + $0x18] sm:$0xff] %vm22_vm0, %v546_v1  ;;  %509 = vmatprep.subr.bf16.mxu0 %v534_v0  ;;  %v536_v3 = vld [vmem:[%s844_s0] sm:$0xff]   ;;  %529 = vmatprep.subr.bf16.mxu1 %v534_v0  ;;  %v537_v4 = vld [vmem:[%s844_s0 + $0x8] sm:$0xff]  }
   0x3   :  { %27 = vst.msk [vmem:[#allocation2 + $0x20] sm:$0xff] %vm22_vm0, %v546_v1  ;;  %28 = vst.msk [vmem:[#allocation2 + $0x28] sm:$0xff] %vm22_vm0, %v546_v1  ;;  %510 = vmatpush3.bf16.msra.mxu0 %v534_v0  ;;  %531 = vmatpush3.bf16.msra.mxu1 %v534_v0  ;;  %v538_v5 = vld [vmem:[%s844_s0 + $0x10] sm:$0xff]   ;;  %v540_v6 = vld [vmem:[%s844_s0 + $0x20] sm:$0xff]  }
   0x4   :  { %29 = vst.msk [vmem:[#allocation2 + $0x30] sm:$0xff] %vm22_vm0, %v546_v1  ;;  %30 = vst.msk [vmem:[#allocation2 + $0x38] sm:$0xff] %vm22_vm0, %v546_v1  ;;  %511 = vmatprep.subr.bf16.mxu0 %v535_v2  ;;  %513 = vmatprep.mubr.msk.bf16.mxu0 %vm127_vm1, %v536_v3  ;;  %v541_v7 = vld [vmem:[%s844_s0 + $0x28] sm:$0xff]   ;;  %v542_v8 = vld [vmem:[%s844_s0 + $0x30] sm:$0xff]  }
   0x5   :  { %31 = vst.msk [vmem:[#allocation2 + $0x40] sm:$0xff] %vm22_vm0, %v546_v1  ;;  %32 = vst.msk [vmem:[#allocation2 + $0x48] sm:$0xff] %vm22_vm0, %v546_v1  ;;  %530 = vmatprep.subr.bf16.mxu1 %v535_v2  ;;  %521 = vmatprep.mubr.msk.bf16.mxu1 %vm127_vm1, %v540_v6  ;;  %v539_v9 = vld [vmem:[%s844_s0 + $0x18] sm:$0xff]  }
   0x6   :  { %33 = vst.msk [vmem:[#allocation2 + $0x50] sm:$0xff] %vm22_vm0, %v546_v1  ;;  %34 = vst.msk [vmem:[#allocation2 + $0x58] sm:$0xff] %vm22_vm0, %v546_v1  ;;  %v543_v10 = vld [vmem:[%s844_s0 + $0x38] sm:$0xff]  }
   0x7   :  { %35 = vst.msk [vmem:[#allocation2 + $0x60] sm:$0xff] %vm22_vm0, %v546_v1  ;;  %36 = vst.msk [vmem:[#allocation2 + $0x68] sm:$0xff] %vm22_vm0, %v546_v1  ;;  %512 = vmatpush3.bf16.msra.mxu0 %v535_v2  ;;  %532 = vmatpush3.bf16.msra.mxu1 %v535_v2 }
   0x8   :  { %37 = vst.msk [vmem:[#allocation2 + $0x70] sm:$0xff] %vm22_vm0, %v546_v1  ;;  %38 = vst.msk [vmem:[#allocation2 + $0x78] sm:$0xff] %vm22_vm0, %v546_v1  ;;  %v41_v11 = vld [vmem:[#allocation2 + $0x10] sm:$0xff]  ;;  %v39_v14 = vld [vmem:[#allocation2] sm:$0xff] }
   0x9   :  { %v42_v20 = vld [vmem:[#allocation2 + $0x18] sm:$0xff]  ;;  %v40_v26 = vld [vmem:[#allocation2 + $0x8] sm:$0xff] }
   0xa   :  { %514 = vmatmul.mubr.msk.bf16.vlgmr.msra.gmra.mxu0 %vm127_vm1, %v537_v4  ;;  %522 = vmatmul.mubr.msk.bf16.vlgmr.msra.gmra.mxu1 %vm127_vm1, %v541_v7  ;;  %v43_v38 = vld [vmem:[#allocation2 + $0x20] sm:$0xff]  ;;  %v44_v50 = vld [vmem:[#allocation2 + $0x28] sm:$0xff] }
   0xb   :  { %517 = vmatprep.mubr.msk.bf16.mxu0 %vm127_vm1, %v538_v5  ;;  %525 = vmatprep.mubr.msk.bf16.mxu1 %vm127_vm1, %v542_v8  ;;  %v45_v32 = vld [vmem:[#allocation2 + $0x30] sm:$0xff]  ;;  %v46_v44 = vld [vmem:[#allocation2 + $0x38] sm:$0xff] }
   0xc   :  { %v47_v16 = vld [vmem:[#allocation2 + $0x40] sm:$0xff]  ;;  %v48_v28 = vld [vmem:[#allocation2 + $0x48] sm:$0xff] }
   0xd   :  { %v49_v12 = vld [vmem:[#allocation2 + $0x50] sm:$0xff]  ;;  %v50_v22 = vld [vmem:[#allocation2 + $0x58] sm:$0xff] }
   0xe   :  { %v51_v40 = vld [vmem:[#allocation2 + $0x60] sm:$0xff]  ;;  %v52_v52 = vld [vmem:[#allocation2 + $0x68] sm:$0xff] }
   0xf   :  { %v53_v34 = vld [vmem:[#allocation2 + $0x70] sm:$0xff]  ;;  %v54_v46 = vld [vmem:[#allocation2 + $0x78] sm:$0xff] }
  0x12   :  { %518 = vmatmul.mubr.msk.bf16.gmra.mxu0 %vm127_vm1, %v539_v9  ;;  %526 = vmatmul.mubr.msk.bf16.gmra.mxu1 %vm127_vm1, %v543_v10 }
  0xca   :  { %v515_v13 = vpop.f32.mrf.mxu0  ;;  %v523_v15 = vpop.f32.mrf.mxu1 }
  0xcb   :  { %v251_v17 = vadd.f32 %v515_v13, %v41_v11  ;;  %v259_v18 = vadd.f32 %v523_v15, %v49_v12 }
  0xcc   :  { %v186_v19 = vpop.f32.mrf.mxu0  ;;  %v218_v21 = vpop.f32.mrf.mxu1 }
  0xcd   :  { %268 = vst.msk [vmem:[#allocation2 + $0x10] sm:$0xff] %vm22_vm0, %v251_v17  ;;  %v249_v23 = vadd.f32 %v186_v19, %v39_v14  ;;  %276 = vst.msk [vmem:[#allocation2 + $0x50] sm:$0xff] %vm22_vm0, %v259_v18  ;;  %v257_v24 = vadd.f32 %v218_v21, %v47_v16 }
  0xce   :  { %v516_v25 = vpop.f32.mrf.mxu0  ;;  %v524_v27 = vpop.f32.mrf.mxu1 }
  0xcf   :  { %266 = vst.msk [vmem:[#allocation2] sm:$0xff] %vm22_vm0, %v249_v23  ;;  %v252_v29 = vadd.f32 %v516_v25, %v42_v20  ;;  %274 = vst.msk [vmem:[#allocation2 + $0x40] sm:$0xff] %vm22_vm0, %v257_v24  ;;  %v260_v30 = vadd.f32 %v524_v27, %v50_v22 }
  0xd0   :  { %v189_v31 = vpop.f32.mrf.mxu0  ;;  %v221_v33 = vpop.f32.mrf.mxu1 }
  0xd1   :  { %269 = vst.msk [vmem:[#allocation2 + $0x18] sm:$0xff] %vm22_vm0, %v252_v29  ;;  %v250_v35 = vadd.f32 %v189_v31, %v40_v26  ;;  %277 = vst.msk [vmem:[#allocation2 + $0x58] sm:$0xff] %vm22_vm0, %v260_v30  ;;  %v258_v36 = vadd.f32 %v221_v33, %v48_v28 }
  0xd2   :  { %v519_v37 = vpop.f32.mrf.mxu0  ;;  %v527_v39 = vpop.f32.mrf.mxu1 }
  0xd3   :  { %267 = vst.msk [vmem:[#allocation2 + $0x8] sm:$0xff] %vm22_vm0, %v250_v35  ;;  %v255_v41 = vadd.f32 %v519_v37, %v45_v32  ;;  %275 = vst.msk [vmem:[#allocation2 + $0x48] sm:$0xff] %vm22_vm0, %v258_v36  ;;  %v263_v42 = vadd.f32 %v527_v39, %v53_v34 }
  0xd4   :  { %v202_v43 = vpop.f32.mrf.mxu0  ;;  %v234_v45 = vpop.f32.mrf.mxu1  ;;  %v642_v60 = vld [vmem:[#allocation2 + $0x10] sm:$0xff] }
  0xd5   :  { %272 = vst.msk [vmem:[#allocation2 + $0x30] sm:$0xff] %vm22_vm0, %v255_v41  ;;  %v253_v47 = vadd.f32 %v202_v43, %v43_v38  ;;  %280 = vst.msk [vmem:[#allocation2 + $0x70] sm:$0xff] %vm22_vm0, %v263_v42  ;;  %v261_v48 = vadd.f32 %v234_v45, %v51_v40  ;;  %v304_v2 = vsel %vm22_vm0, %v642_v60, 0.0  ;;  %v680_v21 = vld [vmem:[#allocation2 + $0x50] sm:$0xff] }
  0xd6   :  { %v520_v49 = vpop.f32.mrf.mxu0  ;;  %v528_v51 = vpop.f32.mrf.mxu1  ;;  %v638_v55 = vld [vmem:[#allocation2] sm:$0xff]  ;;  %v320_v26 = vsel %vm22_vm0, %v680_v21, 0.0 }
  0xd7   :  { %270 = vst.msk [vmem:[#allocation2 + $0x20] sm:$0xff] %vm22_vm0, %v253_v47  ;;  %v256_v53 = vadd.f32 %v520_v49, %v46_v44  ;;  %278 = vst.msk [vmem:[#allocation2 + $0x60] sm:$0xff] %vm22_vm0, %v261_v48  ;;  %v264_v54 = vadd.f32 %v528_v51, %v54_v46  ;;  %v301_v62 = vsel %vm22_vm0, %v638_v55, 0.0  ;;  %v672_v15 = vld [vmem:[#allocation2 + $0x40] sm:$0xff] }
  0xd8   :  { %v205_v56 = vpop.f32.mrf.mxu0  ;;  %v237_v57 = vpop.f32.mrf.mxu1  ;;  %v652_v0 = vld [vmem:[#allocation2 + $0x18] sm:$0xff]  ;;  %v316_v20 = vsel %vm22_vm0, %v672_v15, 0.0 }
  0xd9   :  { %273 = vst.msk [vmem:[#allocation2 + $0x38] sm:$0xff] %vm22_vm0, %v256_v53  ;;  %v254_v58 = vadd.f32 %v205_v56, %v44_v50  ;;  %281 = vst.msk [vmem:[#allocation2 + $0x78] sm:$0xff] %vm22_vm0, %v264_v54  ;;  %v262_v59 = vadd.f32 %v237_v57, %v52_v52  ;;  %v306_v5 = vsel %vm22_vm0, %v652_v0, 0.0  ;;  %v684_v24 = vld [vmem:[#allocation2 + $0x58] sm:$0xff] }
  0xda   :  { %v644_v61 = vld [vmem:[#allocation2 + $0x8] sm:$0xff]  ;;  %v322_v29 = vsel %vm22_vm0, %v684_v24, 0.0 }
  0xdb   :  { %v302_v63 = vsel %vm22_vm0, %v644_v61, 0.0  ;;  %271 = vst.msk [vmem:[#allocation2 + $0x28] sm:$0xff] %vm22_vm0, %v254_v58  ;;  %279 = vst.msk [vmem:[#allocation2 + $0x68] sm:$0xff] %vm22_vm0, %v262_v59  ;;  %v676_v18 = vld [vmem:[#allocation2 + $0x48] sm:$0xff] }
  0xdc   :  { %v303_v1 = vadd.f32 %v302_v63, %v301_v62  ;;  %v662_v8 = vld [vmem:[#allocation2 + $0x30] sm:$0xff]  ;;  %v318_v23 = vsel %vm22_vm0, %v676_v18, 0.0 }
  0xdd   :  { %v312_v14 = vsel %vm22_vm0, %v662_v8, 0.0  ;;  %v696_v33 = vld [vmem:[#allocation2 + $0x70] sm:$0xff] }
  0xde   :  { %v305_v3 = vadd.f32 %v304_v2, %v303_v1  ;;  %v656_v4 = vld [vmem:[#allocation2 + $0x20] sm:$0xff]  ;;  %v328_v38 = vsel %vm22_vm0, %v696_v33, 0.0 }
  0xdf   :  { %v308_v7 = vsel %vm22_vm0, %v656_v4, 0.0  ;;  %v688_v28 = vld [vmem:[#allocation2 + $0x60] sm:$0xff] }
  0xe0   :  { %v307_v6 = vadd.f32 %v306_v5, %v305_v3  ;;  %v668_v12 = vld [vmem:[#allocation2 + $0x38] sm:$0xff]  ;;  %v324_v32 = vsel %vm22_vm0, %v688_v28, 0.0 }
  0xe1   :  { %v314_v17 = vsel %vm22_vm0, %v668_v12, 0.0  ;;  %v700_v36 = vld [vmem:[#allocation2 + $0x78] sm:$0xff] }
  0xe2   :  { %v309_v9 = vadd.f32 %v308_v7, %v307_v6  ;;  %v664_v10 = vld [vmem:[#allocation2 + $0x28] sm:$0xff]  ;;  %v330_v40 = vsel %vm22_vm0, %v700_v36, 0.0 }
  0xe3   :  { %v310_v11 = vsel %vm22_vm0, %v664_v10, 0.0  ;;  %v692_v31 = vld [vmem:[#allocation2 + $0x68] sm:$0xff] }
  0xe4   :  { %v311_v13 = vadd.f32 %v310_v11, %v309_v9  ;;  %v326_v35 = vsel %vm22_vm0, %v692_v31, 0.0 }
  0xe6   :  { %v313_v16 = vadd.f32 %v312_v14, %v311_v13 }
  0xe8   :  { %v315_v19 = vadd.f32 %v314_v17, %v313_v16 }
  0xea   :  { %v317_v22 = vadd.f32 %v316_v20, %v315_v19 }
  0xec   :  { %v319_v25 = vadd.f32 %v318_v23, %v317_v22 }
  0xee   :  { %v321_v27 = vadd.f32 %v320_v26, %v319_v25 }
  0xf0   :  { %v323_v30 = vadd.f32 %v322_v29, %v321_v27 }
  0xf2   :  { %v325_v34 = vadd.f32 %v324_v32, %v323_v30 }
  0xf4   :  { %v327_v37 = vadd.f32 %v326_v35, %v325_v34 }
  0xf6   :  { %v329_v39 = vadd.f32 %v328_v38, %v327_v37 }
  0xf8   :  { %v331_v41 = vadd.f32 %v330_v40, %v329_v39 }
  0xfa   :  { %v332_v42 = vrot.slane %v331_v41, 4 }
  0xfc   :  { %v333_v43 = vadd.f32 %v332_v42, %v331_v41 }
  0xfe   :  { %v334_v44 = vrot.slane %v333_v43, 2 }
 0x100   :  { %v335_v45 = vadd.f32 %v334_v44, %v333_v43 }
 0x102   :  { %v336_v46 = vrot.slane %v335_v45, 1 }
 0x104   :  { %v337_v47 = vadd.f32 %v336_v46, %v335_v45 }
 0x106   :  { %v706_v48 = vmul.f32 0.0078125, %v337_v47 }
 0x108   :  { %v340_v49 = vsub.f32 %v638_v55, %v706_v48  ;;  %v341_v50 = vsub.f32 %v644_v61, %v706_v48  ;;  %v342_v51 = vsub.f32 %v642_v60, %v706_v48  ;;  %v343_v52 = vsub.f32 %v652_v0, %v706_v48 }
 0x109   :  { %v344_v56 = vsub.f32 %v656_v4, %v706_v48  ;;  %v345_v58 = vsub.f32 %v664_v10, %v706_v48  ;;  %v346_v2 = vsub.f32 %v662_v8, %v706_v48  ;;  %v347_v7 = vsub.f32 %v668_v12, %v706_v48 }
 0x10a   :  { %v356_v53 = vmul.f32 %v340_v49, %v340_v49  ;;  %v357_v54 = vmul.f32 %v341_v50, %v341_v50  ;;  %v358_v57 = vmul.f32 %v342_v51, %v342_v51  ;;  %v359_v59 = vmul.f32 %v343_v52, %v343_v52 }
 0x10b   :  { %v360_v3 = vmul.f32 %v344_v56, %v344_v56  ;;  %v361_v9 = vmul.f32 %v345_v58, %v345_v58  ;;  %v348_v14 = vsub.f32 %v672_v15, %v706_v48  ;;  %v362_v16 = vmul.f32 %v346_v2, %v346_v2 }
 0x10c   :  { %v372_v62 = vsel %vm22_vm0, %v356_v53, 0.0  ;;  %v373_v63 = vsel %vm22_vm0, %v357_v54, 0.0  ;;  %v375_v5 = vsel %vm22_vm0, %v358_v57, 0.0  ;;  %v377_v11 = vsel %vm22_vm0, %v359_v59, 0.0 }
 0x10d   :  { %v374_v1 = vadd.f32 %v373_v63, %v372_v62  ;;  %v379_v17 = vsel %vm22_vm0, %v360_v3, 0.0  ;;  %v349_v20 = vsub.f32 %v676_v18, %v706_v48  ;;  %v363_v22 = vmul.f32 %v347_v7, %v347_v7 }
 0x10e   :  { %v381_v23 = vsel %vm22_vm0, %v361_v9, 0.0  ;;  %v350_v26 = vsub.f32 %v680_v21, %v706_v48  ;;  %v364_v27 = vmul.f32 %v348_v14, %v348_v14  ;;  %v383_v29 = vsel %vm22_vm0, %v362_v16, 0.0 }
 0x10f   :  { %v376_v6 = vadd.f32 %v375_v5, %v374_v1  ;;  %v351_v32 = vsub.f32 %v684_v24, %v706_v48  ;;  %v365_v34 = vmul.f32 %v349_v20, %v349_v20  ;;  %v385_v35 = vsel %vm22_vm0, %v363_v22, 0.0  ;;  %v410_v22 = vld [vmem:[%s845_s2] sm:$0x1] }
 0x110   :  { %v352_v38 = vsub.f32 %v688_v28, %v706_v48  ;;  %v366_v39 = vmul.f32 %v350_v26, %v350_v26  ;;  %v387_v40 = vsel %vm22_vm0, %v364_v27, 0.0  ;;  %v353_v42 = vsub.f32 %v692_v31, %v706_v48  ;;  %v414_v27 = vld [vmem:[%s846_s3] sm:$0x1] }
 0x111   :  { %v378_v13 = vadd.f32 %v377_v11, %v376_v6  ;;  %v367_v43 = vmul.f32 %v351_v32, %v351_v32  ;;  %v389_v44 = vsel %vm22_vm0, %v365_v34, 0.0  ;;  %v354_v46 = vsub.f32 %v696_v33, %v706_v48 }
 0x112   :  { %v368_v47 = vmul.f32 %v352_v38, %v352_v38  ;;  %v391_v49 = vsel %vm22_vm0, %v366_v39, 0.0  ;;  %v355_v51 = vsub.f32 %v700_v36, %v706_v48  ;;  %v369_v52 = vmul.f32 %v353_v42, %v353_v42 }
 0x113   :  { %v380_v19 = vadd.f32 %v379_v17, %v378_v13  ;;  %v393_v53 = vsel %vm22_vm0, %v367_v43, 0.0  ;;  %v370_v56 = vmul.f32 %v354_v46, %v354_v46 }
 0x114   :  { %v395_v57 = vsel %vm22_vm0, %v368_v47, 0.0  ;;  %v371_v59 = vmul.f32 %v355_v51, %v355_v51  ;;  %v397_v62 = vsel %vm22_vm0, %v369_v52, 0.0 }
 0x115   :  { %v382_v25 = vadd.f32 %v381_v23, %v380_v19  ;;  %v399_v1 = vsel %vm22_vm0, %v370_v56, 0.0  ;;  %v418_v19 = vlaneseq }
 0x116   :  { %v401_v3 = vsel %vm22_vm0, %v371_v59, 0.0 }
 0x117   :  { %v384_v30 = vadd.f32 %v383_v29, %v382_v25  ;;  %v419_v20 = vshrl.u32 %v418_v19, 7 }
 0x119   :  { %v386_v37 = vadd.f32 %v385_v35, %v384_v30  ;;  %v420_v23 = vsub.s32 0, %v419_v20 }
 0x11b   :  { %v388_v41 = vadd.f32 %v387_v40, %v386_v37 }
 0x11d   :  { %v390_v45 = vadd.f32 %v389_v44, %v388_v41 }
 0x11f   :  { %v392_v50 = vadd.f32 %v391_v49, %v390_v45 }
 0x121   :  { %v394_v54 = vadd.f32 %v393_v53, %v392_v50 }
 0x123   :  { %v396_v58 = vadd.f32 %v395_v57, %v394_v54 }
 0x125   :  { %v398_v63 = vadd.f32 %v397_v62, %v396_v58 }
 0x127   :  { %v400_v2 = vadd.f32 %v399_v1, %v398_v63 }
 0x129   :  { %v402_v5 = vadd.f32 %v401_v3, %v400_v2 }
 0x12b   :  { %v403_v6 = vrot.slane %v402_v5, 4 }
 0x12d   :  { %v404_v7 = vadd.f32 %v403_v6, %v402_v5 }
 0x12f   :  { %v405_v9 = vrot.slane %v404_v7, 2 }
 0x131   :  { %v406_v11 = vadd.f32 %v405_v9, %v404_v7 }
 0x133   :  { %v407_v13 = vrot.slane %v406_v11, 1 }
 0x135   :  { %v408_v14 = vadd.f32 %v407_v13, %v406_v11 }
 0x137   :  { %v409_v16 = vmul.f32 0.0078125, %v408_v14 }
 0x139   :  { %v411_v17 = vadd.f32 1e-05, %v409_v16 }
 0x13b   :  { %544 = vrsqrt.f32 %v411_v17 }
 0x148   :  { %v545_v25 = vpop.eup %544 }
 0x149   :  { %v413_v26 = vmul.f32 %v545_v25, %v410_v22 }
 0x14b   :  { %v415_v29 = vmul.f32 %v413_v26, %v706_v48  ;;  %v421_v30 = vrot.slane %v413_v26, %v420_v23 }
 0x14d   :  { %v416_v32 = vsub.f32 %v414_v27, %v415_v29  ;;  %v423_v34 = vmul.f32 %v421_v30, %v638_v55  ;;  %v424_v35 = vmul.f32 %v421_v30, %v644_v61  ;;  %v425_v37 = vmul.f32 %v421_v30, %v642_v60 }
 0x14e   :  { %v426_v38 = vmul.f32 %v421_v30, %v652_v0  ;;  %v427_v39 = vmul.f32 %v421_v30, %v656_v4  ;;  %v428_v40 = vmul.f32 %v421_v30, %v664_v10  ;;  %v429_v41 = vmul.f32 %v421_v30, %v662_v8 }
 0x14f   :  { %v430_v42 = vmul.f32 %v421_v30, %v668_v12  ;;  %v431_v48 = vmul.f32 %v421_v30, %v672_v15  ;;  %v432_v43 = vmul.f32 %v421_v30, %v676_v18  ;;  %v433_v55 = vmul.f32 %v421_v30, %v680_v21 }
 0x150   :  { %v434_v61 = vmul.f32 %v421_v30, %v684_v24  ;;  %v443_v44 = vrot.slane %v416_v32, %v420_v23  ;;  %v435_v60 = vmul.f32 %v421_v30, %v688_v28  ;;  %v436_v0 = vmul.f32 %v421_v30, %v692_v31 }
 0x151   :  { %v437_v4 = vmul.f32 %v421_v30, %v696_v33  ;;  %v438_v10 = vmul.f32 %v421_v30, %v700_v36 }
 0x152   :  { %v445_v8 = vadd.f32 %v443_v44, %v423_v34  ;;  %v446_v45 = vadd.f32 %v443_v44, %v424_v35  ;;  %v447_v12 = vadd.f32 %v443_v44, %v425_v37  ;;  %v448_v46 = vadd.f32 %v443_v44, %v426_v38 }
 0x153   :  { %v449_v15 = vadd.f32 %v443_v44, %v427_v39  ;;  %v450_v47 = vadd.f32 %v443_v44, %v428_v40  ;;  %v451_v18 = vadd.f32 %v443_v44, %v429_v41  ;;  %v452_v49 = vadd.f32 %v443_v44, %v430_v42 }
 0x154   :  { %v453_v21 = vadd.f32 %v443_v44, %v431_v48  ;;  %v454_v50 = vadd.f32 %v443_v44, %v432_v43  ;;  %v455_v24 = vadd.f32 %v443_v44, %v433_v55  ;;  %v456_v51 = vadd.f32 %v443_v44, %v434_v61  ;;  %461 = vst.msk [vmem:[%s847_s4] sm:$0xff] %vm22_vm0, %v445_v8 }
 0x155   :  { %462 = vst.msk [vmem:[%s847_s4 + $0x8] sm:$0xff] %vm22_vm0, %v446_v45  ;;  %463 = vst.msk [vmem:[%s847_s4 + $0x10] sm:$0xff] %vm22_vm0, %v447_v12  ;;  %v457_v28 = vadd.f32 %v443_v44, %v435_v60  ;;  %v458_v31 = vadd.f32 %v443_v44, %v436_v0  ;;  %v459_v33 = vadd.f32 %v443_v44, %v437_v4 }
 0x156   :  { %464 = vst.msk [vmem:[%s847_s4 + $0x18] sm:$0xff] %vm22_vm0, %v448_v46  ;;  %v460_v36 = vadd.f32 %v443_v44, %v438_v10  ;;  %465 = vst.msk [vmem:[%s847_s4 + $0x20] sm:$0xff] %vm22_vm0, %v449_v15 }
 0x157   :  { %466 = vst.msk [vmem:[%s847_s4 + $0x28] sm:$0xff] %vm22_vm0, %v450_v47  ;;  %467 = vst.msk [vmem:[%s847_s4 + $0x30] sm:$0xff] %vm22_vm0, %v451_v18 }
 0x158   :  { %468 = vst.msk [vmem:[%s847_s4 + $0x38] sm:$0xff] %vm22_vm0, %v452_v49  ;;  %469 = vst.msk [vmem:[%s847_s4 + $0x40] sm:$0xff] %vm22_vm0, %v453_v21 }
 0x159   :  { %470 = vst.msk [vmem:[%s847_s4 + $0x48] sm:$0xff] %vm22_vm0, %v454_v50  ;;  %471 = vst.msk [vmem:[%s847_s4 + $0x50] sm:$0xff] %vm22_vm0, %v455_v24 }
 0x15a   :  { %472 = vst.msk [vmem:[%s847_s4 + $0x58] sm:$0xff] %vm22_vm0, %v456_v51  ;;  %473 = vst.msk [vmem:[%s847_s4 + $0x60] sm:$0xff] %vm22_vm0, %v457_v28 }
 0x15b   :  { %474 = vst.msk [vmem:[%s847_s4 + $0x68] sm:$0xff] %vm22_vm0, %v458_v31  ;;  %475 = vst.msk [vmem:[%s847_s4 + $0x70] sm:$0xff] %vm22_vm0, %v459_v33 }
 0x15c   :  { %476 = vst.msk [vmem:[%s847_s4 + $0x78] sm:$0xff] %vm22_vm0, %v460_v36 }

// kernel: forward.13
= control target key start
LH: loop header
LB: loop body
LE: loop exit
PB: predicated region body
PF: predicated region fallthrough
CT: control target
= control target key end

     0   :  { %8 = vsyncpa [#allocation4], 0  ;;  %s1026_s0 = inlined_call_operand.vmem [shape: f32[2,64,64], index: 0, kind: input, shape index: {}]   ;;  %s1027_s1 = inlined_call_operand.vmem [shape: f32[2,64,64], index: 1, kind: input, shape index: {}]   ;;  %s1028_s2 = inlined_call_operand.vmem [shape: f32[3], index: 2, kind: input, shape index: {}]   ;;  %s1029_s3 = inlined_call_operand.hbm [shape: f32[2,64,64], index: 3, kind: output, shape index: {}]  }
   0x1   :  { %9 = vsyncpa [#allocation3], 0 }
   0x2   :  { %11 = vsyncpa [#allocation3 + $0x1], 0  ;;  %s757_s12 = smov 0   ;;  %s759_s13 = smov 0  }
   0x3   :  { %s761_s14 = smov 0   ;;  %s763_s15 = smov 0  }
   0x4 LB: > { %s778_s16 = sadd.s32 4294967295, %s729_s15   ;;  %s541_s17 = sadd.s32 4294967294, %s729_s15   ;;  %s729_s15 = sphi %s763_s15, %s1036_s15   ;;  %s725_s14 = sphi %s761_s14, %s1035_s14   ;;  %s721_s13 = sphi %s759_s13, %s1034_s13   ;;  %s717_s12 = sphi %s757_s12, %s1033_s12  }
   0x5   : > { %s782_s18 = sadd.s32 1, %s729_s15   ;;  %s97_s19 = sadd.s32 1, %s725_s14 }
   0x6   : > { %s94_s20 = ssub.s32 %s729_s15, %s782_s18  ;;  %p107_p0 = scmp.ne.s32.totalorder %s725_s14, %s721_s13 }
   0x7   : > { %p95_p1 = scmp.eq.s32.totalorder %s94_s20, 0  ;;  %p108_p2 = scmp.eq.s32.totalorder %s778_s16, 1 }
   0x8   : > { %p113_p3 = scmp.ne.s32.totalorder %s721_s13, %s717_s12  ;;  %p114_p4 = scmp.eq.s32.totalorder %s541_s17, 1 }
   0x9   : > { %s793_s21 = scalar_select %p95_p1, %s725_s14, %s97_s19  }
   0xa   : > { %p795_p5 = por %p108_p2, %p107_p0  ;;  %p799_p6 = por %p114_p4, %p113_p3 }
   0xb   : > { %p542_p7 = scmp.ge.s32.totalorder %s729_s15, 1  ;;  %p121_p8 = scmp.lt.s32.totalorder %s729_s15, 3 }
   0xc   : > { %p606_p9 = scmp.eq.s32.totalorder %s778_s16, 0  ;;  %s134_s27 = sshll.u32 %s1028_s2, 4  ;;  %s135_s27 = int_to_ptr.vmem [resolvable:$true] %s134_s27 }
   0xd   : > { %p806_p10 = pnand %p542_p7, %p121_p8  ;;  %s650_s28 = scalar_lea.vmem %s135_s27, 16 }
   0xe   : > { %p651_p13 = scmp.ne.s32.totalorder %s135_s27, %s650_s28  ;;  %p658_p3 = scmp.lt.s32.totalorder %s135_s27, %s135_s27 }
   0xf   : > { %p598_p11 = pneg %p806_p10  ;;  %p659_p4 = scmp.lt.s32.totalorder %s650_s28, %s650_s28 }
  0x11   : > { %p599_p12 = pnand %p606_p9, %p598_p11  ;;  %p660_p7 = por %p659_p4, %p658_p3 }
  0x13   : > { %p652_p0 = pneg %p599_p12 }
  0x15   : > { %p653_p1 = pnand %p652_p0, %p651_p13 }
  0x17   : > { %p654_p2 = pneg %p653_p1 }
  0x19   : > { %p661_p8 = pnand %p660_p7, %p654_p2 }
  0x1b   : > { %664 = shalt.err (!%p661_p8)
}
  0x1c   : > { %s731_s29 = smov [#allocation2]   ;;  %163 = sbr.rel (%p806_p10) target bundleno = 339 (0x153), region = 32 }
  0x1d   : > { %601 = dma.vmem_to_smem (!%p599_p12), %s135_s27, 16, %s731_s29, [#allocation4]  }
  0x21   : > { %708 = dma.done.wait (%p606_p9), [#allocation4], 16  }
  0x22   : > { %710 = vsyncadd (%p606_p9), [#allocation4], 4294967280 }
  0x23   : > { %169 = sfence }
  0x24   : > { %v243_v0 = vlaneseq  ;;  %s263_s30 = sld [smem:[#allocation2]]  ;;  %v732_v1 = vmov 0.0   ;;  %vm733_vm0 = vmmov 0   ;;  %p193_p9 = scmp.lt.s32.totalorder %s778_s16, 1  ;;  %vm219_vm10 = vcmask 523264  }
  0x25   : > { %573 = vmatprep.subr.mxu0 %v732_v1  ;;  %s553_s4 = sld [smem:[#allocation2 + $0x1]]  ;;  %589 = vmatprep.mubr.msk.f32.mxu0 %vm733_vm0, %v732_v1  ;;  %s190_s11 = sand.u32 1, %s721_s13  }
  0x26   : > { %v825_v2 = vshrl.u32 %v243_v0, 7  ;;  %v827_v3 = vand.u32 127, %v243_v0  ;;  %s554_s5 = sld [smem:[#allocation2 + $0x2]]  ;;  %s547_s24 = sshll.u32 %s190_s11, 6 }
  0x27   : > { %s862_s6 = scalar_select %p193_p9, %s778_s16, 1 }
  0x28   : > { %v251_v4 = vadd.s32 56, %v825_v2  ;;  %v831_v5 = vadd.s32 4294967295, %v827_v3  ;;  %v834_v6 = vadd.s32 1, %v827_v3  ;;  %v250_v7 = vadd.s32 48, %v825_v2  ;;  %s563_s25 = sshll.u32 %s778_s16, 10  ;;  %s192_s26 = scalar_lea.vmem [#allocation5], %s547_s24 }
  0x29   : > { %v249_v8 = vadd.s32 40, %v825_v2  ;;  %v248_v9 = vadd.s32 32, %v825_v2  ;;  %v247_v10 = vadd.s32 24, %v825_v2  ;;  %v246_v11 = vadd.s32 16, %v825_v2  ;;  %s561_s7 = sshll.u32 %s862_s6, 6  ;;  %s455_s27 = sshll.u32 %s192_s26, 4  ;;  %s974_s27 = int_to_ptr.vmem [resolvable:$true] %s455_s27 }
  0x2a   : > { %vm262_vm1 = vcmp.eq.s32.totalorder %v251_v4, %v831_v5  ;;  %v843_v12 = vstv %s263_s30  ;;  %vm280_vm2 = vcmp.eq.s32.totalorder %v251_v4, %v827_v3  ;;  %vm307_vm3 = vcmp.eq.s32.totalorder %v251_v4, %v834_v6  ;;  %s894_s10 = scalar_lea.vmem %s1026_s0, %s561_s7  ;;  %s202_s20 = scalar_lea.vmem %s1027_s1, %s561_s7 }
  0x2b   : > { %v272_v13 = vsel %vm262_vm1, %v843_v12, 0.0  ;;  %v848_v14 = vstv %s553_s4  ;;  %vm261_vm4 = vcmp.eq.s32.totalorder %v250_v7, %v831_v5  ;;  %vm279_vm5 = vcmp.eq.s32.totalorder %v250_v7, %v827_v3  ;;  %v909_v45 = vld [vmem:[%s894_s10] sm:$0xff]  ;;  %v912_v46 = vld [vmem:[%s894_s10 + $0x8] sm:$0xff]  ;;  %v919_v51 = vld [vmem:[%s894_s10 + $0x10] sm:$0xff]  ;;  %s972_s30 = scalar_lea.hbm %s1029_s3, %s563_s25  ;;  %s986_s16 = scalar_lea.sflag [#allocation3], %s190_s11 }
  0x2c   : > { %v290_v15 = vsel %vm280_vm2, %v848_v14, 0.0  ;;  %v853_v16 = vstv %s554_s5  ;;  %v271_v17 = vsel %vm261_vm4, %v843_v12, 0.0  ;;  %v289_v18 = vsel %vm279_vm5, %v848_v14, 0.0  ;;  %v932_v55 = vld [vmem:[%s894_s10 + $0x18] sm:$0xff]  ;;  %v207_v61 = vld [vmem:[%s894_s10 + $0x20] sm:$0xff]  ;;  %v208_v4 = vld [vmem:[%s894_s10 + $0x28] sm:$0xff] }
  0x2d   : > { %v298_v19 = vadd.f32 %v290_v15, %v272_v13  ;;  %v317_v20 = vsel %vm307_vm3, %v853_v16, 0.0  ;;  %v297_v21 = vadd.f32 %v289_v18, %v271_v17  ;;  %vm306_vm6 = vcmp.eq.s32.totalorder %v250_v7, %v834_v6  ;;  %v209_v7 = vld [vmem:[%s894_s10 + $0x30] sm:$0xff]  ;;  %s665_s4 = scalar_lea.vmem %s974_s27, 1024  ;;  %s734_s5 = smov [#allocation5]  }
  0x2e   : > { %v316_v22 = vsel %vm306_vm6, %v853_v16, 0.0  ;;  %vm260_vm7 = vcmp.eq.s32.totalorder %v249_v8, %v831_v5  ;;  %vm278_vm8 = vcmp.eq.s32.totalorder %v249_v8, %v827_v3  ;;  %vm305_vm9 = vcmp.eq.s32.totalorder %v249_v8, %v834_v6  ;;  %p666_p10 = scmp.ne.s32.totalorder %s974_s27, %s665_s4  ;;  %s669_s6 = sshll.u32 %s734_s5, 4  ;;  %s670_s6 = int_to_ptr.vmem [resolvable:$false] %s669_s6 }
  0x2f   : > { %v325_v23 = vadd.f32 %v317_v20, %v298_v19  ;;  %v324_v24 = vadd.f32 %v316_v22, %v297_v21  ;;  %v270_v25 = vsel %vm260_vm7, %v843_v12, 0.0  ;;  %v288_v26 = vsel %vm278_vm8, %v848_v14, 0.0  ;;  %s671_s7 = scalar_lea.vmem %s670_s6, 2048  ;;  %p672_p13 = scmp.lt.s32.totalorder %s974_s27, %s670_s6 }
  0x30   : > { %v296_v27 = vadd.f32 %v288_v26, %v270_v25  ;;  %v315_v28 = vsel %vm305_vm9, %v853_v16, 0.0  ;;  %vm259_vm11 = vcmp.eq.s32.totalorder %v248_v9, %v831_v5  ;;  %vm277_vm12 = vcmp.eq.s32.totalorder %v248_v9, %v827_v3  ;;  %p667_p11 = pnand %p666_p10, %p795_p5  ;;  %p673_p0 = scmp.lt.s32.totalorder %s671_s7, %s665_s4 }
  0x31   : > { %574 = vmatpush3.msra.mxu0 %v325_v23  ;;  %v269_v29 = vsel %vm259_vm11, %v843_v12, 0.0  ;;  %v287_v30 = vsel %vm277_vm12, %v848_v14, 0.0  ;;  %vm304_vm13 = vcmp.eq.s32.totalorder %v248_v9, %v834_v6  ;;  %vm258_vm14 = vcmp.eq.s32.totalorder %v247_v10, %v831_v5 }
  0x32   : > { %575 = vmatprep.subr.mxu0 %v732_v1  ;;  %v323_v31 = vadd.f32 %v315_v28, %v296_v27  ;;  %v295_v32 = vadd.f32 %v287_v30, %v269_v29  ;;  %v314_v33 = vsel %vm304_vm13, %v853_v16, 0.0  ;;  %v268_v34 = vsel %vm258_vm14, %v843_v12, 0.0  ;;  %p668_p12 = pneg %p667_p11  ;;  %p674_p1 = por %p673_p0, %p672_p13 }
  0x33   : > { %576 = vmatpush3.msra.mxu0 %v324_v24  ;;  %vm276_vm15 = vcmp.eq.s32.totalorder %v247_v10, %v827_v3  ;;  %vm303_vm0 = vcmp.eq.s32.totalorder %v247_v10, %v834_v6  ;;  %vm257_vm1 = vcmp.eq.s32.totalorder %v246_v11, %v831_v5  ;;  %vm275_vm2 = vcmp.eq.s32.totalorder %v246_v11, %v827_v3  ;;  %v210_v10 = vld [vmem:[%s894_s10 + $0x38] sm:$0xff] }
  0x34   : > { %577 = vmatprep.subr.mxu0 %v732_v1  ;;  %v322_v35 = vadd.f32 %v314_v33, %v295_v32  ;;  %v286_v36 = vsel %vm276_vm15, %v848_v14, 0.0  ;;  %v313_v37 = vsel %vm303_vm0, %v853_v16, 0.0  ;;  %v267_v38 = vsel %vm257_vm1, %v843_v12, 0.0  ;;  %v211_v32 = vld [vmem:[%s202_s20] sm:$0xff]  ;;  %v212_v33 = vld [vmem:[%s202_s20 + $0x8] sm:$0xff]  ;;  %p675_p2 = pnand %p674_p1, %p668_p12 }
  0x35   : > { %578 = vmatpush3.msra.mxu0 %v323_v31  ;;  %v294_v39 = vadd.f32 %v286_v36, %v268_v34  ;;  %v285_v40 = vsel %vm275_vm2, %v848_v14, 0.0  ;;  %vm302_vm3 = vcmp.eq.s32.totalorder %v246_v11, %v834_v6  ;;  %v245_v41 = vadd.s32 8, %v825_v2  ;;  %v213_v34 = vld [vmem:[%s202_s20 + $0x10] sm:$0xff]  ;;  %v215_v36 = vld [vmem:[%s202_s20 + $0x20] sm:$0xff] }
  0x36   : > { %579 = vmatprep.subr.mxu0 %v732_v1  ;;  %v293_v42 = vadd.f32 %v285_v40, %v267_v38  ;;  %v312_v43 = vsel %vm302_vm3, %v853_v16, 0.0  ;;  %vm255_vm4 = vcmp.eq.s32.totalorder %v825_v2, %v831_v5  ;;  %vm273_vm5 = vcmp.eq.s32.totalorder %v825_v2, %v827_v3  ;;  %v217_v38 = vld [vmem:[%s202_s20 + $0x30] sm:$0xff] }
  0x37   : > { %580 = vmatpush3.msra.mxu0 %v322_v35  ;;  %v321_v44 = vadd.f32 %v313_v37, %v294_v39  ;;  %vm256_vm6 = vcmp.eq.s32.totalorder %v245_v41, %v831_v5  ;;  %vm274_vm7 = vcmp.eq.s32.totalorder %v245_v41, %v827_v3  ;;  %vm301_vm8 = vcmp.eq.s32.totalorder %v245_v41, %v834_v6  ;;  %v214_v35 = vld [vmem:[%s202_s20 + $0x18] sm:$0xff]  ;;  %v216_v37 = vld [vmem:[%s202_s20 + $0x28] sm:$0xff] }
  0x38   : > { %581 = vmatprep.subr.mxu0 %v732_v1  ;;  %v320_v47 = vadd.f32 %v312_v43, %v293_v42  ;;  %v266_v48 = vsel %vm256_vm6, %v843_v12, 0.0  ;;  %v284_v49 = vsel %vm274_vm7, %v848_v14, 0.0  ;;  %v311_v50 = vsel %vm301_vm8, %v853_v16, 0.0  ;;  %v218_v39 = vld [vmem:[%s202_s20 + $0x38] sm:$0xff] }
  0x39   : > { %582 = vmatpush3.msra.mxu0 %v321_v44  ;;  %v292_v52 = vadd.f32 %v284_v49, %v266_v48  ;;  %v265_v53 = vsel %vm255_vm4, %v843_v12, 0.0  ;;  %v283_v54 = vsel %vm273_vm5, %v848_v14, 0.0  ;;  %vm300_vm9 = vcmp.eq.s32.totalorder %v825_v2, %v834_v6 }
  0x3a   : > { %583 = vmatprep.subr.mxu0 %v732_v1  ;;  %v291_v56 = vadd.f32 %v283_v54, %v265_v53  ;;  %v310_v57 = vsel %vm300_vm9, %v853_v16, 0.0  ;;  %v220_v58 = vsel %vm219_vm10, %v909_v45, 0.0  ;;  %v221_v59 = vsel %vm219_vm10, %v912_v46, 0.0 }
  0x3b   : > { %584 = vmatpush3.msra.mxu0 %v320_v47  ;;  %v319_v60 = vadd.f32 %v311_v50, %v292_v52  ;;  %v222_v62 = vadd.f32 %v221_v59, %v220_v58  ;;  %v223_v63 = vsel %vm219_vm10, %v919_v51, 0.0  ;;  %v225_v3 = vsel %vm219_vm10, %v932_v55, 0.0 }
  0x3c   : > { %585 = vmatprep.subr.mxu0 %v732_v1  ;;  %v318_v0 = vadd.f32 %v310_v57, %v291_v56  ;;  %v227_v6 = vsel %vm219_vm10, %v207_v61, 0.0  ;;  %v229_v9 = vsel %vm219_vm10, %v208_v4, 0.0  ;;  %v231_v12 = vsel %vm219_vm10, %v209_v7, 0.0 }
  0x3d   : > { %586 = vmatpush3.msra.mxu0 %v319_v60  ;;  %v224_v5 = vadd.f32 %v223_v63, %v222_v62  ;;  %v233_v14 = vsel %vm219_vm10, %v210_v10, 0.0  ;;  %v407_v29 = vsub.s32 0, %v825_v2 }
  0x3e   : > { %587 = vmatprep.subr.mxu0 %v732_v1 }
  0x3f   : > { %588 = vmatpush3.msra.mxu0 %v318_v0  ;;  %v226_v8 = vadd.f32 %v225_v3, %v224_v5 }
  0x41   : > { %v228_v11 = vadd.f32 %v227_v6, %v226_v8 }
  0x43   : > { %v230_v13 = vadd.f32 %v229_v9, %v228_v11 }
  0x45   : > { %v232_v15 = vadd.f32 %v231_v12, %v230_v13 }
  0x47   : > { %v234_v16 = vadd.f32 %v233_v14, %v232_v15 }
  0x49   : > { %v235_v17 = vrot.slane %v234_v16, 4 }
  0x4b   : > { %v236_v18 = vadd.f32 %v235_v17, %v234_v16 }
  0x4d   : > { %v237_v1 = vrot.slane %v236_v18, 2 }
  0x4f   : > { %v238_v19 = vadd.f32 %v237_v1, %v236_v18 }
  0x51   : > { %v239_v20 = vrot.slane %v238_v19, 1 }
  0x53   : > { %v240_v21 = vadd.f32 %v239_v20, %v238_v19 }
  0x55   : > { %v242_v22 = vmul.f32 0.015625, %v240_v21 }
  0x57   : > { %590 = vmatmul.mubr.msk.f32.vlgmr.msra.gmra.mxu0 %vm219_vm10, %v242_v22 }
 0x117   : > { %v395_v23 = vpop.f32.mrf.mxu0 }
 0x118   : > { %v399_v24 = vsub.f32 0.0, %v395_v23 }
 0x119   : > { %v591_v25 = vpop.f32.mrf.mxu0 }
 0x11a   : > { %v400_v26 = vmul.f32 1.442695, %v399_v24 }
 0x11c   : > { %646 = vpow2.f32 %v400_v26 }
 0x129   : > { %v647_v27 = vpop.eup %646 }
 0x12a   : > { %v402_v28 = vadd.f32 1.0, %v647_v27 }
 0x12c   : > { %648 = vrcp.f32 %v402_v28 }
 0x139   : > { %v649_v30 = vpop.eup %648 }
 0x13a   : > { %v408_v31 = vrot.slane %v649_v30, %v407_v29 }
 0x13c   : > { %v409_v2 = vmul.f32 %v408_v31, %v909_v45  ;;  %v410_v40 = vmul.f32 %v408_v31, %v912_v46  ;;  %v411_v41 = vmul.f32 %v408_v31, %v919_v51  ;;  %v412_v42 = vmul.f32 %v408_v31, %v932_v55 }
 0x13d   : > { %v413_v43 = vmul.f32 %v408_v31, %v207_v61  ;;  %v414_v44 = vmul.f32 %v408_v31, %v208_v4  ;;  %v415_v47 = vmul.f32 %v408_v31, %v209_v7  ;;  %v416_v48 = vmul.f32 %v408_v31, %v210_v10 }
 0x13e   : > { %v417_v49 = vadd.f32 %v409_v2, %v211_v32  ;;  %v418_v50 = vadd.f32 %v410_v40, %v212_v33  ;;  %v419_v52 = vadd.f32 %v411_v41, %v213_v34  ;;  %v420_v53 = vadd.f32 %v412_v42, %v214_v35 }
 0x13f   : > { %v421_v54 = vadd.f32 %v413_v43, %v215_v36  ;;  %v422_v56 = vadd.f32 %v414_v44, %v216_v37  ;;  %v423_v45 = vadd.f32 %v415_v47, %v217_v38  ;;  %v424_v57 = vadd.f32 %v416_v48, %v218_v39 }
 0x140   : > { %v425_v46 = vmax.f32 %v417_v49, 0.0  ;;  %v426_v58 = vmax.f32 %v418_v50, 0.0  ;;  %v427_v51 = vmax.f32 %v419_v52, 0.0  ;;  %v428_v55 = vmax.f32 %v420_v53, 0.0 }
 0x141   : > { %v429_v59 = vmax.f32 %v421_v54, 0.0  ;;  %v430_v60 = vmax.f32 %v422_v56, 0.0  ;;  %v431_v61 = vmax.f32 %v423_v45, 0.0  ;;  %v432_v62 = vmax.f32 %v424_v57, 0.0 }
 0x142   : > { %433 = vst.msk [vmem:[%s192_s26] sm:$0xff] %vm219_vm10, %v425_v46  ;;  %434 = vst.msk [vmem:[%s192_s26 + $0x8] sm:$0xff] %vm219_vm10, %v426_v58 }
 0x143   : > { %435 = vst.msk [vmem:[%s192_s26 + $0x10] sm:$0xff] %vm219_vm10, %v427_v51  ;;  %436 = vst.msk [vmem:[%s192_s26 + $0x18] sm:$0xff] %vm219_vm10, %v428_v55 }
 0x144   : > { %437 = vst.msk [vmem:[%s192_s26 + $0x20] sm:$0xff] %vm219_vm10, %v429_v59  ;;  %438 = vst.msk [vmem:[%s192_s26 + $0x28] sm:$0xff] %vm219_vm10, %v430_v60 }
 0x145   : > { %439 = vst.msk [vmem:[%s192_s26 + $0x30] sm:$0xff] %vm219_vm10, %v431_v61  ;;  %440 = vst.msk [vmem:[%s192_s26 + $0x38] sm:$0xff] %vm219_vm10, %v432_v62 }
 0x146   : > { %678 = shalt.err (!%p675_p2)
}
 0x147   : > { %s679_s8 = scalar_lea.hbm %s972_s30, 1024  ;;  %s683_s11 = scalar_lea.hbm %s1029_s3, 2048 }
 0x148   : > { %p680_p3 = scmp.ne.s32.totalorder %s972_s30, %s679_s8  ;;  %p684_p8 = scmp.lt.s32.totalorder %s972_s30, %s1029_s3 }
 0x149   : > { %p685_p9 = scmp.lt.s32.totalorder %s683_s11, %s679_s8 }
 0x14a   : > { %p681_p4 = pnand %p680_p3, %p795_p5 }
 0x14b   : > { %p686_p10 = por %p685_p9, %p684_p8 }
 0x14c   : > { %p682_p7 = pneg %p681_p4 }
 0x14e   : > { %p687_p11 = pnand %p686_p10, %p682_p7 }
 0x150   : > { %690 = shalt.err (!%p687_p11)
}
 0x151   : > { %s735_s20 = smov 128   ;;  %s736_s24 = smov 8  }
 0x152   : > { %596 = dma.vmem_to_hbm [thread:$0]  (%p795_p5), %s974_s27, 1024, %s972_s30, %s986_s16, %s735_s20, %s735_s20, %s736_s24  }
 0x153 PF: > { %p608_p12 = scmp.ge.s32.totalorder %s729_s15, 2  ;;  %s470_s25 = sand.u32 1, %s717_s12  }
 0x154   : > { %s471_s26 = scalar_lea.sflag [#allocation3], %s470_s25 }
 0x155   : > { %p603_p13 = pnand %p608_p12, %p799_p6 }
 0x157   : > { %p604_p0 = pneg %p603_p13 }
 0x159   : > { %712 = dma.done.wait (%p604_p0), %s471_s26, 1024  }
 0x15a   : > { %714 = vsyncadd (%p604_p0), %s471_s26, 4294966272  ;;  %p14_p1 = scmp.ge.s32.totalorder %s782_s18, 4   ;;  %s1033_s12 = smov %s721_s13 }
 0x15b   : > { %s1034_s13 = smov %s725_s14  ;;  %s1035_s14 = smov %s793_s21 }
 0x15c   : > { %s1036_s15 = smov %s782_s18  ;;  %16 = sbr.rel (!%p14_p1) target bundleno = 4 (0x4), region = 75 }
 0x161   :  { %476 = vsyncpa [#allocation3], 1 }
 0x162   :  { %478 = vsyncpa [#allocation3 + $0x1], 1 }
 0x163   :  { %479 = vsyncpa [#allocation4], 1 }
 0x164   :  { %481 = vsyncpa [#allocation4 + $0x1], 1 }

</bundles_post_ra>
